<compile_context>
chip_gen: v7x
topology: tpu7x:2x2x1
jax: 0.10.0
libtpu: 0.0.40
codegen_flags: <defaults>
</compile_context>

<pallas_src>
import functools

import jax
import jax.numpy as jnp
from jax.experimental import pallas as pl
from jax.experimental.pallas import tpu as pltpu

F32 = jnp.float32
BF16 = jnp.bfloat16


# --------------------------------------------------------------------------
# Fused ARFFE kernel (one batch element per grid step)
# --------------------------------------------------------------------------

def _arffe_kernel(x_ref, xres_ref, wconv_ref, bns_ref, bnb_ref, wcc_ref,
                  ccs_ref, ccb_ref, w1_ref, w2_ref, o_ref,
                  colbuf_ref, im2col_ref, cat_ref, *, rates, H, W, C):
    """Refs (per grid step, one batch sample):
      x_ref     : (1, Hp, Wp, C) bf16  zero-padded NHWC input, Hp = H + 2*max(rates)
      xres_ref  : (1, H, W, C)   f32   exact un-padded input (residual add)
      wconv_ref : (R, 9*C, C)    bf16  per-rate 3x3 taps flattened to (K, Cout)
      bns/bnb   : (R, 1, C)      f32   folded BN scale/bias of the rate convs
      wcc_ref   : (R*C, C)       bf16  1x1 channel_change weight (concat-K major)
      ccs/ccb   : (1, C)         f32   folded BN of the channel_change conv
      w1_ref    : (C//16, C)     f32   SE fc1 (lane-dense; contract over dim 1)
      w2_ref    : (C//16, C)     f32   SE fc2 (x @ W form)
      o_ref     : (1, H, W, C)   f32   res * se_scale + x
    Scratch (VMEM):
      colbuf_ref: (3, Hp*W, C)   bf16  column(W)-shifted slabs, one per kj
      im2col_ref: (H*W, 9*C)     bf16  per-rate im2col for the wide-K conv matmul
      cat_ref   : (H*W, R*C)     bf16  BN+ReLU'd rate outputs (fused concat)
    """
    pad = max(rates)
    M = H * W
    HpW = (H + 2 * pad) * W

    # kj = 1 (center-column) slab: identical for every rate -> extract once.
    colbuf_ref[1] = x_ref[0, :, pad:pad + W, :].reshape(HpW, C)

    for r_idx, rate in enumerate(rates):
        # Column-shifted slabs for kj = 0 / 2 (the only strided compactions).
        colbuf_ref[0] = x_ref[0, :, pad - rate:pad - rate + W, :].reshape(HpW, C)
        colbuf_ref[2] = x_ref[0, :, pad + rate:pad + rate + W, :].reshape(HpW, C)

        # Fill the (M, 9C) im2col scratch: each tap is a contiguous H-slice of
        # its column slab; the store targets a lane-aligned 128-lane block.
        for ki in range(3):
            r0 = (pad + (ki - 1) * rate) * W
            for kj in range(3):
                tap = ki * 3 + kj
                im2col_ref[:, tap * C:(tap + 1) * C] = colbuf_ref[kj, r0:r0 + M, :]

        # One wide-K MXU matmul per rate (bf16 in, f32 accumulate), then the
        # ARFFEBlock BN + ReLU epilogue straight into the concat scratch.
        acc = jnp.dot(im2col_ref[...], wconv_ref[r_idx],
                      preferred_element_type=F32)                    # (M, C) f32
        out_r = jnp.maximum(acc * bns_ref[r_idx] + bnb_ref[r_idx], 0.0)
        cat_ref[:, r_idx * C:(r_idx + 1) * C] = out_r.astype(BF16)

    # concat + 1x1 channel_change fused as one (M, R*C) x (R*C, C) matmul.
    res = jnp.dot(cat_ref[...], wcc_ref[...], preferred_element_type=F32)
    res = jnp.maximum(res * ccs_ref[...] + ccb_ref[...], 0.0)        # (M, C) f32

    # Squeeze-and-Excite: avgpool -> FC1 -> ReLU -> FC2 -> sigmoid (all f32).
    pooled = jnp.mean(res, axis=0, keepdims=True)                    # (1, C)
    h = jax.lax.dot_general(pooled, w1_ref[...],
                            dimension_numbers=(((1,), (1,)), ((), ())),
                            preferred_element_type=F32)              # (1, C//16)
    h = jnp.maximum(h, 0.0)
    s = jax.nn.sigmoid(jnp.dot(h, w2_ref[...], preferred_element_type=F32))

    # SE scale + residual add with the exact f32 input.
    x_res = xres_ref[0].reshape(M, C)
    o_ref[...] = (res * s + x_res).reshape(1, H, W, C)


# --------------------------------------------------------------------------
# Wrapper: layout plumbing + one-time weight repacking + pallas_call
# --------------------------------------------------------------------------

def arffe_forward(params, x_nchw, rates):
    """ARFFE forward. x is NCHW (PyTorch layout); returns NCHW."""
    rates = tuple(int(r) for r in rates)
    N, C, H, W = x_nchw.shape
    R = len(rates)
    Cr = C // 16
    pad = max(rates)
    Hp, Wp = H + 2 * pad, W + 2 * pad
    M = H * W

    # NCHW -> NHWC; keep an exact f32 copy for the residual, pad + cast the
    # conv input to bf16 once (halves the dominant HBM->VMEM DMA).
    x = jnp.transpose(x_nchw.astype(F32), (0, 2, 3, 1))               # (N,H,W,C) f32
    x_pad = jnp.pad(x, ((0, 0), (pad, pad), (pad, pad), (0, 0))).astype(BF16)

    # One-time weight repacking.
    # OIHW -> (kh, kw, cin, cout) -> flattened (9*C, C) so K index = tap*C + cin.
    wconv = jnp.stack(
        [jnp.transpose(w, (2, 3, 1, 0)).reshape(9 * C, C)
         for w in params["conv_w"]], axis=0).astype(BF16)             # (R, 9C, C)
    bns = jnp.stack([s for s, _ in params["conv_bn"]], 0).reshape(R, 1, C).astype(F32)
    bnb = jnp.stack([b for _, b in params["conv_bn"]], 0).reshape(R, 1, C).astype(F32)
    # channel_change weight (C, R*C, 1, 1) -> (R*C, C): rows ordered rate-major.
    wcc = jnp.transpose(params["cc_w"][:, :, 0, 0], (1, 0)).astype(BF16)   # (R*C, C)
    ccs, ccb = params["cc_bn"]
    w1 = params["se_w1"].astype(F32)                                  # (Cr, C) lane-dense
    w2 = jnp.transpose(params["se_w2"], (1, 0)).astype(F32)           # (Cr, C)

    flops = N * (R * 2 * M * 9 * C * C + 2 * M * R * C * C + 4 * C * Cr)
    bytes_accessed = (x_pad.size * 2 + x.size * 4
                      + wconv.size * 2 + wcc.size * 2
                      + (bns.size + bnb.size + 2 * C + w1.size + w2.size) * 4
                      + N * M * C * 4)

    out = pl.pallas_call(
        functools.partial(_arffe_kernel, rates=rates, H=H, W=W, C=C),
        out_shape=jax.ShapeDtypeStruct((N, H, W, C), F32),
        grid=(N,),
        in_specs=[
            pl.BlockSpec((1, Hp, Wp, C), lambda n: (n, 0, 0, 0)),   # padded bf16 input
            pl.BlockSpec((1, H, W, C), lambda n: (n, 0, 0, 0)),     # f32 residual input
            pl.BlockSpec((R, 9 * C, C), lambda n: (0, 0, 0)),       # conv weights
            pl.BlockSpec((R, 1, C), lambda n: (0, 0, 0)),           # conv BN scale
            pl.BlockSpec((R, 1, C), lambda n: (0, 0, 0)),           # conv BN bias
            pl.BlockSpec((R * C, C), lambda n: (0, 0)),             # cc weight
            pl.BlockSpec((1, C), lambda n: (0, 0)),                 # cc BN scale
            pl.BlockSpec((1, C), lambda n: (0, 0)),                 # cc BN bias
            pl.BlockSpec((Cr, C), lambda n: (0, 0)),                # SE fc1
            pl.BlockSpec((Cr, C), lambda n: (0, 0)),                # SE fc2
        ],
        out_specs=pl.BlockSpec((1, H, W, C), lambda n: (n, 0, 0, 0)),
        scratch_shapes=[
            pltpu.VMEM((3, Hp * W, C), BF16),       # column-shifted slabs
            pltpu.VMEM((M, 9 * C), BF16),           # per-rate im2col (wide-K LHS)
            pltpu.VMEM((M, R * C), BF16),           # fused concat buffer
        ],
        compiler_params=pltpu.CompilerParams(
            dimension_semantics=("parallel",)),     # batch split across TCs (v7x)
        cost_estimate=pl.CostEstimate(
            flops=flops, transcendentals=N * C, bytes_accessed=bytes_accessed),
    )(x_pad, x, wconv, bns, bnb, wcc,
      ccs.reshape(1, C).astype(F32), ccb.reshape(1, C).astype(F32), w1, w2)

    return jnp.transpose(out, (0, 3, 1, 2))         # back to NCHW


# --------------------------------------------------------------------------
# Parameter construction (deterministic) + pure-JAX reference
# --------------------------------------------------------------------------

def _fold_bn(key, c, eps=1e-5):
    k1, k2, k3, k4 = jax.random.split(key, 4)
    gamma = 1.0 + 0.1 * jax.random.normal(k1, (c,), F32)
    beta = 0.1 * jax.random.normal(k2, (c,), F32)
    running_mean = 0.1 * jax.random.normal(k3, (c,), F32)
    running_var = 1.0 + 0.1 * jax.random.uniform(k4, (c,), F32)
    scale = gamma * jax.lax.rsqrt(running_var + eps)
    bias = beta - running_mean * scale
    return scale, bias


def make_arffe_params(key, channel, rates):
    c, R = channel, len(rates)
    keys = jax.random.split(key, 2 * R + 4)
    it = iter(keys)
    conv_w, conv_bn = [], []
    for _ in range(R):
        conv_w.append(jax.random.normal(next(it), (c, c, 3, 3), F32)
                      * (2.0 / (9 * c)) ** 0.5)
        conv_bn.append(_fold_bn(next(it), c))
    cc_w = jax.random.normal(next(it), (c, R * c, 1, 1), F32) * (2.0 / (R * c)) ** 0.5
    cc_bn = _fold_bn(next(it), c)
    se_w1 = jax.random.normal(next(it), (c // 16, c), F32) * (2.0 / c) ** 0.5
    se_w2 = jax.random.normal(next(it), (c, c // 16), F32) * (2.0 / (c // 16)) ** 0.5
    return {"conv_w": conv_w, "conv_bn": conv_bn,
            "cc_w": cc_w, "cc_bn": cc_bn, "se_w1": se_w1, "se_w2": se_w2}


def arffe_reference(params, x_nchw, rates):
    """Pure-JAX f32 reference of the PyTorch ARFFE forward (inference BN)."""
    x = x_nchw.astype(F32)
    hp = jax.lax.Precision.HIGHEST
    outs = []
    for r_idx, rate in enumerate(rates):
        y = jax.lax.conv_general_dilated(
            x, params["conv_w"][r_idx], window_strides=(1, 1),
            padding=((rate, rate), (rate, rate)), rhs_dilation=(rate, rate),
            dimension_numbers=("NCHW", "OIHW", "NCHW"), precision=hp)
        s, b = params["conv_bn"][r_idx]
        outs.append(jnp.maximum(y * s[None, :, None, None]
                                + b[None, :, None, None], 0.0))
    res = jnp.concatenate(outs, axis=1)
    res = jax.lax.conv_general_dilated(
        res, params["cc_w"], (1, 1), ((0, 0), (0, 0)),
        dimension_numbers=("NCHW", "OIHW", "NCHW"), precision=hp)
    s, b = params["cc_bn"]
    res = jnp.maximum(res * s[None, :, None, None] + b[None, :, None, None], 0.0)
    pooled = jnp.mean(res, axis=(2, 3))                              # (N, C)
    h = jnp.maximum(jnp.dot(pooled, params["se_w1"].T, precision=hp), 0.0)
    se = jax.nn.sigmoid(jnp.dot(h, params["se_w2"].T, precision=hp))
    return res * se[:, :, None, None] + x


# --------------------------------------------------------------------------
# Harness
# --------------------------------------------------------------------------

if __name__ == "__main__":
    rates = (1, 3, 5)               # as used by the shufflenet (channel = 128)
    N, C, H, W = 2, 128, 16, 16
    pkey, xkey = jax.random.split(jax.random.PRNGKey(0))
    params = make_arffe_params(pkey, C, rates)
    x = jax.random.normal(xkey, (N, C, H, W), F32)

    fwd = jax.jit(lambda p, xx: arffe_forward(p, xx, rates))
    out = jax.block_until_ready(fwd(params, x))

    assert out.shape == (N, C, H, W)
    assert bool(jnp.all(jnp.isfinite(out)))

    ref = arffe_reference(params, x, rates)
    max_err = float(jnp.max(jnp.abs(out - ref)))
    mean_err = float(jnp.mean(jnp.abs(out - ref)))
    assert max_err < 1.5e-1 and mean_err < 2e-2, (max_err, mean_err)
    print("KERNEL_OK")
</pallas_src>

<mosaic_0001>
module attributes {stable_mosaic.version = 11 : i64} {
  func.func @_arffe_kernel(%arg0: i32, %arg1: memref<1x26x26x128xbf16, #tpu.memory_space<vmem>>, %arg2: memref<1x16x16x128xf32, #tpu.memory_space<vmem>>, %arg3: memref<3x1152x128xbf16, #tpu.memory_space<vmem>>, %arg4: memref<3x1x128xf32, #tpu.memory_space<vmem>>, %arg5: memref<3x1x128xf32, #tpu.memory_space<vmem>>, %arg6: memref<384x128xbf16, #tpu.memory_space<vmem>>, %arg7: memref<1x128xf32, #tpu.memory_space<vmem>>, %arg8: memref<1x128xf32, #tpu.memory_space<vmem>>, %arg9: memref<8x128xf32, #tpu.memory_space<vmem>>, %arg10: memref<8x128xf32, #tpu.memory_space<vmem>>, %arg11: memref<1x16x16x128xf32, #tpu.memory_space<vmem>>, %arg12: memref<3x416x128xbf16, #tpu.memory_space<vmem>>, %arg13: memref<256x1152xbf16, #tpu.memory_space<vmem>>, %arg14: memref<256x384xbf16, #tpu.memory_space<vmem>>) attributes {dimension_semantics = [#tpu.dimension_semantics<parallel>], iteration_bounds = array<i64: 2>, scalar_prefetch = 0 : i64, scratch_operands = 3 : i64, tpu.core_type = #tpu.core_type<tc>, window_params = [{transform_indices = @transform_0, window_bounds = array<i64: 1, 26, 26, 128>}, {transform_indices = @transform_1, window_bounds = array<i64: 1, 16, 16, 128>}, {pipeline_mode = #tpu.pipeline_mode<synchronous>, transform_indices = @transform_2, window_bounds = array<i64: 3, 1152, 128>}, {pipeline_mode = #tpu.pipeline_mode<synchronous>, transform_indices = @transform_3, window_bounds = array<i64: 3, 1, 128>}, {pipeline_mode = #tpu.pipeline_mode<synchronous>, transform_indices = @transform_4, window_bounds = array<i64: 3, 1, 128>}, {pipeline_mode = #tpu.pipeline_mode<synchronous>, transform_indices = @transform_5, window_bounds = array<i64: 384, 128>}, {pipeline_mode = #tpu.pipeline_mode<synchronous>, transform_indices = @transform_6, window_bounds = array<i64: 1, 128>}, {pipeline_mode = #tpu.pipeline_mode<synchronous>, transform_indices = @transform_7, window_bounds = array<i64: 1, 128>}, {pipeline_mode = #tpu.pipeline_mode<synchronous>, transform_indices = @transform_8, window_bounds = array<i64: 8, 128>}, {pipeline_mode = #tpu.pipeline_mode<synchronous>, transform_indices = @transform_9, window_bounds = array<i64: 8, 128>}, {transform_indices = @transform_10, window_bounds = array<i64: 1, 16, 16, 128>}]} {
    %c0 = arith.constant 0 : index
    %c0_0 = arith.constant 0 : index
    %c5 = arith.constant 5 : index
    %c0_1 = arith.constant 0 : index
    %0 = vector.load %arg1[%c0, %c0_0, %c5, %c0_1] : memref<1x26x26x128xbf16, #tpu.memory_space<vmem>>, vector<1x26x16x128xbf16>
    %1 = vector.shape_cast %0 : vector<1x26x16x128xbf16> to vector<26x16x128xbf16>
    %2 = vector.shape_cast %1 : vector<26x16x128xbf16> to vector<416x128xbf16>
    %c1 = arith.constant 1 : index
    %c0_2 = arith.constant 0 : index
    %c0_3 = arith.constant 0 : index
    %3 = vector.load %arg12[%c1, %c0_2, %c0_3] : memref<3x416x128xbf16, #tpu.memory_space<vmem>>, vector<1x416x128xbf16>
    %4 = vector.shape_cast %3 : vector<1x416x128xbf16> to vector<416x128xbf16>
    %5 = vector.shape_cast %2 : vector<416x128xbf16> to vector<1x416x128xbf16>
    tpu.vector_store %arg12[%c1, %c0_2, %c0_3], %5 {strides = array<i32>} : memref<3x416x128xbf16, #tpu.memory_space<vmem>>, vector<1x416x128xbf16>,
    %c0_4 = arith.constant 0 : index
    %c0_5 = arith.constant 0 : index
    %c4 = arith.constant 4 : index
    %c0_6 = arith.constant 0 : index
    %6 = vector.load %arg1[%c0_4, %c0_5, %c4, %c0_6] : memref<1x26x26x128xbf16, #tpu.memory_space<vmem>>, vector<1x26x16x128xbf16>
    %7 = vector.shape_cast %6 : vector<1x26x16x128xbf16> to vector<26x16x128xbf16>
    %8 = vector.shape_cast %7 : vector<26x16x128xbf16> to vector<416x128xbf16>
    %c0_7 = arith.constant 0 : index
    %c0_8 = arith.constant 0 : index
    %c0_9 = arith.constant 0 : index
    %9 = vector.load %arg12[%c0_7, %c0_8, %c0_9] : memref<3x416x128xbf16, #tpu.memory_space<vmem>>, vector<1x416x128xbf16>
    %10 = vector.shape_cast %9 : vector<1x416x128xbf16> to vector<416x128xbf16>
    %11 = vector.shape_cast %8 : vector<416x128xbf16> to vector<1x416x128xbf16>
    tpu.vector_store %arg12[%c0_7, %c0_8, %c0_9], %11 {strides = array<i32>} : memref<3x416x128xbf16, #tpu.memory_space<vmem>>, vector<1x416x128xbf16>,
    %c0_10 = arith.constant 0 : index
    %c0_11 = arith.constant 0 : index
    %c6 = arith.constant 6 : index
    %c0_12 = arith.constant 0 : index
    %12 = vector.load %arg1[%c0_10, %c0_11, %c6, %c0_12] : memref<1x26x26x128xbf16, #tpu.memory_space<vmem>>, vector<1x26x16x128xbf16>
    %13 = vector.shape_cast %12 : vector<1x26x16x128xbf16> to vector<26x16x128xbf16>
    %14 = vector.shape_cast %13 : vector<26x16x128xbf16> to vector<416x128xbf16>
    %c2 = arith.constant 2 : index
    %c0_13 = arith.constant 0 : index
    %c0_14 = arith.constant 0 : index
    %15 = vector.load %arg12[%c2, %c0_13, %c0_14] : memref<3x416x128xbf16, #tpu.memory_space<vmem>>, vector<1x416x128xbf16>
    %16 = vector.shape_cast %15 : vector<1x416x128xbf16> to vector<416x128xbf16>
    %17 = vector.shape_cast %14 : vector<416x128xbf16> to vector<1x416x128xbf16>
    tpu.vector_store %arg12[%c2, %c0_13, %c0_14], %17 {strides = array<i32>} : memref<3x416x128xbf16, #tpu.memory_space<vmem>>, vector<1x416x128xbf16>,
    %c0_15 = arith.constant 0 : index
    %c64 = arith.constant 64 : index
    %c0_16 = arith.constant 0 : index
    %18 = vector.load %arg12[%c0_15, %c64, %c0_16] : memref<3x416x128xbf16, #tpu.memory_space<vmem>>, vector<1x256x128xbf16>
    %19 = vector.shape_cast %18 : vector<1x256x128xbf16> to vector<256x128xbf16>
    %c0_17 = arith.constant 0 : index
    %c0_18 = arith.constant 0 : index
    %20 = vector.load %arg13[%c0_17, %c0_18] : memref<256x1152xbf16, #tpu.memory_space<vmem>>, vector<256x128xbf16>
    tpu.vector_store %arg13[%c0_17, %c0_18], %19 {strides = array<i32>} : memref<256x1152xbf16, #tpu.memory_space<vmem>>, vector<256x128xbf16>,
    %c1_19 = arith.constant 1 : index
    %c64_20 = arith.constant 64 : index
    %c0_21 = arith.constant 0 : index
    %21 = vector.load %arg12[%c1_19, %c64_20, %c0_21] : memref<3x416x128xbf16, #tpu.memory_space<vmem>>, vector<1x256x128xbf16>
    %22 = vector.shape_cast %21 : vector<1x256x128xbf16> to vector<256x128xbf16>
    %c0_22 = arith.constant 0 : index
    %c128 = arith.constant 128 : index
    %23 = vector.load %arg13[%c0_22, %c128] : memref<256x1152xbf16, #tpu.memory_space<vmem>>, vector<256x128xbf16>
    tpu.vector_store %arg13[%c0_22, %c128], %22 {strides = array<i32>} : memref<256x1152xbf16, #tpu.memory_space<vmem>>, vector<256x128xbf16>,
    %c2_23 = arith.constant 2 : index
    %c64_24 = arith.constant 64 : index
    %c0_25 = arith.constant 0 : index
    %24 = vector.load %arg12[%c2_23, %c64_24, %c0_25] : memref<3x416x128xbf16, #tpu.memory_space<vmem>>, vector<1x256x128xbf16>
    %25 = vector.shape_cast %24 : vector<1x256x128xbf16> to vector<256x128xbf16>
    %c0_26 = arith.constant 0 : index
    %c256 = arith.constant 256 : index
    %26 = vector.load %arg13[%c0_26, %c256] : memref<256x1152xbf16, #tpu.memory_space<vmem>>, vector<256x128xbf16>
    tpu.vector_store %arg13[%c0_26, %c256], %25 {strides = array<i32>} : memref<256x1152xbf16, #tpu.memory_space<vmem>>, vector<256x128xbf16>,
    %c0_27 = arith.constant 0 : index
    %c80 = arith.constant 80 : index
    %c0_28 = arith.constant 0 : index
    %27 = vector.load %arg12[%c0_27, %c80, %c0_28] : memref<3x416x128xbf16, #tpu.memory_space<vmem>>, vector<1x256x128xbf16>
    %28 = vector.shape_cast %27 : vector<1x256x128xbf16> to vector<256x128xbf16>
    %c0_29 = arith.constant 0 : index
    %c384 = arith.constant 384 : index
    %29 = vector.load %arg13[%c0_29, %c384] : memref<256x1152xbf16, #tpu.memory_space<vmem>>, vector<256x128xbf16>
    tpu.vector_store %arg13[%c0_29, %c384], %28 {strides = array<i32>} : memref<256x1152xbf16, #tpu.memory_space<vmem>>, vector<256x128xbf16>,
    %c1_30 = arith.constant 1 : index
    %c80_31 = arith.constant 80 : index
    %c0_32 = arith.constant 0 : index
    %30 = vector.load %arg12[%c1_30, %c80_31, %c0_32] : memref<3x416x128xbf16, #tpu.memory_space<vmem>>, vector<1x256x128xbf16>
    %31 = vector.shape_cast %30 : vector<1x256x128xbf16> to vector<256x128xbf16>
    %c0_33 = arith.constant 0 : index
    %c512 = arith.constant 512 : index
    %32 = vector.load %arg13[%c0_33, %c512] : memref<256x1152xbf16, #tpu.memory_space<vmem>>, vector<256x128xbf16>
    tpu.vector_store %arg13[%c0_33, %c512], %31 {strides = array<i32>} : memref<256x1152xbf16, #tpu.memory_space<vmem>>, vector<256x128xbf16>,
    %c2_34 = arith.constant 2 : index
    %c80_35 = arith.constant 80 : index
    %c0_36 = arith.constant 0 : index
    %33 = vector.load %arg12[%c2_34, %c80_35, %c0_36] : memref<3x416x128xbf16, #tpu.memory_space<vmem>>, vector<1x256x128xbf16>
    %34 = vector.shape_cast %33 : vector<1x256x128xbf16> to vector<256x128xbf16>
    %c0_37 = arith.constant 0 : index
    %c640 = arith.constant 640 : index
    %35 = vector.load %arg13[%c0_37, %c640] : memref<256x1152xbf16, #tpu.memory_space<vmem>>, vector<256x128xbf16>
    tpu.vector_store %arg13[%c0_37, %c640], %34 {strides = array<i32>} : memref<256x1152xbf16, #tpu.memory_space<vmem>>, vector<256x128xbf16>,
    %c0_38 = arith.constant 0 : index
    %c96 = arith.constant 96 : index
    %c0_39 = arith.constant 0 : index
    %36 = vector.load %arg12[%c0_38, %c96, %c0_39] : memref<3x416x128xbf16, #tpu.memory_space<vmem>>, vector<1x256x128xbf16>
    %37 = vector.shape_cast %36 : vector<1x256x128xbf16> to vector<256x128xbf16>
    %c0_40 = arith.constant 0 : index
    %c768 = arith.constant 768 : index
    %38 = vector.load %arg13[%c0_40, %c768] : memref<256x1152xbf16, #tpu.memory_space<vmem>>, vector<256x128xbf16>
    tpu.vector_store %arg13[%c0_40, %c768], %37 {strides = array<i32>} : memref<256x1152xbf16, #tpu.memory_space<vmem>>, vector<256x128xbf16>,
    %c1_41 = arith.constant 1 : index
    %c96_42 = arith.constant 96 : index
    %c0_43 = arith.constant 0 : index
    %39 = vector.load %arg12[%c1_41, %c96_42, %c0_43] : memref<3x416x128xbf16, #tpu.memory_space<vmem>>, vector<1x256x128xbf16>
    %40 = vector.shape_cast %39 : vector<1x256x128xbf16> to vector<256x128xbf16>
    %c0_44 = arith.constant 0 : index
    %c896 = arith.constant 896 : index
    %41 = vector.load %arg13[%c0_44, %c896] : memref<256x1152xbf16, #tpu.memory_space<vmem>>, vector<256x128xbf16>
    tpu.vector_store %arg13[%c0_44, %c896], %40 {strides = array<i32>} : memref<256x1152xbf16, #tpu.memory_space<vmem>>, vector<256x128xbf16>,
    %c2_45 = arith.constant 2 : index
    %c96_46 = arith.constant 96 : index
    %c0_47 = arith.constant 0 : index
    %42 = vector.load %arg12[%c2_45, %c96_46, %c0_47] : memref<3x416x128xbf16, #tpu.memory_space<vmem>>, vector<1x256x128xbf16>
    %43 = vector.shape_cast %42 : vector<1x256x128xbf16> to vector<256x128xbf16>
    %c0_48 = arith.constant 0 : index
    %c1024 = arith.constant 1024 : index
    %44 = vector.load %arg13[%c0_48, %c1024] : memref<256x1152xbf16, #tpu.memory_space<vmem>>, vector<256x128xbf16>
    tpu.vector_store %arg13[%c0_48, %c1024], %43 {strides = array<i32>} : memref<256x1152xbf16, #tpu.memory_space<vmem>>, vector<256x128xbf16>,
    %c0_49 = arith.constant 0 : index
    %c0_50 = arith.constant 0 : index
    %45 = vector.load %arg13[%c0_49, %c0_50] : memref<256x1152xbf16, #tpu.memory_space<vmem>>, vector<256x1152xbf16>
    %c0_51 = arith.constant 0 : index
    %c0_52 = arith.constant 0 : index
    %c0_53 = arith.constant 0 : index
    %46 = vector.load %arg3[%c0_51, %c0_52, %c0_53] : memref<3x1152x128xbf16, #tpu.memory_space<vmem>>, vector<1x1152x128xbf16>
    %47 = vector.shape_cast %46 : vector<1x1152x128xbf16> to vector<1152x128xbf16>
    %cst = arith.constant dense<0.000000e+00> : vector<256x128xf32>
    %48 = tpu.matmul %45, %47, %cst {dimension_numbers = #tpu.dot_dimension_numbers<[1], [0], [0], [1], [0, 0, 1, 1], [], []>} : vector<256x1152xbf16>, vector<1152x128xbf16>, vector<256x128xf32> -> vector<256x128xf32>
    %c0_54 = arith.constant 0 : index
    %c0_55 = arith.constant 0 : index
    %c0_56 = arith.constant 0 : index
    %49 = vector.load %arg4[%c0_54, %c0_55, %c0_56] : memref<3x1x128xf32, #tpu.memory_space<vmem>>, vector<1x1x128xf32>
    %50 = vector.shape_cast %49 : vector<1x1x128xf32> to vector<1x128xf32>
    %51 = vector.broadcast %50 : vector<1x128xf32> to vector<256x128xf32>
    %52 = arith.mulf %48, %51 : vector<256x128xf32>
    %c0_57 = arith.constant 0 : index
    %c0_58 = arith.constant 0 : index
    %c0_59 = arith.constant 0 : index
    %53 = vector.load %arg5[%c0_57, %c0_58, %c0_59] : memref<3x1x128xf32, #tpu.memory_space<vmem>>, vector<1x1x128xf32>
    %54 = vector.shape_cast %53 : vector<1x1x128xf32> to vector<1x128xf32>
    %55 = vector.broadcast %54 : vector<1x128xf32> to vector<256x128xf32>
    %56 = arith.addf %52, %55 : vector<256x128xf32>
    %cst_60 = arith.constant 0.000000e+00 : f32
    %57 = vector.broadcast %cst_60 : f32 to vector<256x128xf32>
    %58 = arith.maximumf %56, %57 : vector<256x128xf32>
    %59 = arith.truncf %58 : vector<256x128xf32> to vector<256x128xbf16>
    %c0_61 = arith.constant 0 : index
    %c0_62 = arith.constant 0 : index
    %60 = vector.load %arg14[%c0_61, %c0_62] : memref<256x384xbf16, #tpu.memory_space<vmem>>, vector<256x128xbf16>
    tpu.vector_store %arg14[%c0_61, %c0_62], %59 {strides = array<i32>} : memref<256x384xbf16, #tpu.memory_space<vmem>>, vector<256x128xbf16>,
    %c0_63 = arith.constant 0 : index
    %c0_64 = arith.constant 0 : index
    %c2_65 = arith.constant 2 : index
    %c0_66 = arith.constant 0 : index
    %61 = vector.load %arg1[%c0_63, %c0_64, %c2_65, %c0_66] : memref<1x26x26x128xbf16, #tpu.memory_space<vmem>>, vector<1x26x16x128xbf16>
    %62 = vector.shape_cast %61 : vector<1x26x16x128xbf16> to vector<26x16x128xbf16>
    %63 = vector.shape_cast %62 : vector<26x16x128xbf16> to vector<416x128xbf16>
    %c0_67 = arith.constant 0 : index
    %c0_68 = arith.constant 0 : index
    %c0_69 = arith.constant 0 : index
    %64 = vector.load %arg12[%c0_67, %c0_68, %c0_69] : memref<3x416x128xbf16, #tpu.memory_space<vmem>>, vector<1x416x128xbf16>
    %65 = vector.shape_cast %64 : vector<1x416x128xbf16> to vector<416x128xbf16>
    %66 = vector.shape_cast %63 : vector<416x128xbf16> to vector<1x416x128xbf16>
    tpu.vector_store %arg12[%c0_67, %c0_68, %c0_69], %66 {strides = array<i32>} : memref<3x416x128xbf16, #tpu.memory_space<vmem>>, vector<1x416x128xbf16>,
    %c0_70 = arith.constant 0 : index
    %c0_71 = arith.constant 0 : index
    %c8 = arith.constant 8 : index
    %c0_72 = arith.constant 0 : index
    %67 = vector.load %arg1[%c0_70, %c0_71, %c8, %c0_72] : memref<1x26x26x128xbf16, #tpu.memory_space<vmem>>, vector<1x26x16x128xbf16>
    %68 = vector.shape_cast %67 : vector<1x26x16x128xbf16> to vector<26x16x128xbf16>
    %69 = vector.shape_cast %68 : vector<26x16x128xbf16> to vector<416x128xbf16>
    %c2_73 = arith.constant 2 : index
    %c0_74 = arith.constant 0 : index
    %c0_75 = arith.constant 0 : index
    %70 = vector.load %arg12[%c2_73, %c0_74, %c0_75] : memref<3x416x128xbf16, #tpu.memory_space<vmem>>, vector<1x416x128xbf16>
    %71 = vector.shape_cast %70 : vector<1x416x128xbf16> to vector<416x128xbf16>
    %72 = vector.shape_cast %69 : vector<416x128xbf16> to vector<1x416x128xbf16>
    tpu.vector_store %arg12[%c2_73, %c0_74, %c0_75], %72 {strides = array<i32>} : memref<3x416x128xbf16, #tpu.memory_space<vmem>>, vector<1x416x128xbf16>,
    %c0_76 = arith.constant 0 : index
    %c32 = arith.constant 32 : index
    %c0_77 = arith.constant 0 : index
    %73 = vector.load %arg12[%c0_76, %c32, %c0_77] : memref<3x416x128xbf16, #tpu.memory_space<vmem>>, vector<1x256x128xbf16>
    %74 = vector.shape_cast %73 : vector<1x256x128xbf16> to vector<256x128xbf16>
    %c0_78 = arith.constant 0 : index
    %c0_79 = arith.constant 0 : index
    %75 = vector.load %arg13[%c0_78, %c0_79] : memref<256x1152xbf16, #tpu.memory_space<vmem>>, vector<256x128xbf16>
    tpu.vector_store %arg13[%c0_78, %c0_79], %74 {strides = array<i32>} : memref<256x1152xbf16, #tpu.memory_space<vmem>>, vector<256x128xbf16>,
    %c1_80 = arith.constant 1 : index
    %c32_81 = arith.constant 32 : index
    %c0_82 = arith.constant 0 : index
    %76 = vector.load %arg12[%c1_80, %c32_81, %c0_82] : memref<3x416x128xbf16, #tpu.memory_space<vmem>>, vector<1x256x128xbf16>
    %77 = vector.shape_cast %76 : vector<1x256x128xbf16> to vector<256x128xbf16>
    %c0_83 = arith.constant 0 : index
    %c128_84 = arith.constant 128 : index
    %78 = vector.load %arg13[%c0_83, %c128_84] : memref<256x1152xbf16, #tpu.memory_space<vmem>>, vector<256x128xbf16>
    tpu.vector_store %arg13[%c0_83, %c128_84], %77 {strides = array<i32>} : memref<256x1152xbf16, #tpu.memory_space<vmem>>, vector<256x128xbf16>,
    %c2_85 = arith.constant 2 : index
    %c32_86 = arith.constant 32 : index
    %c0_87 = arith.constant 0 : index
    %79 = vector.load %arg12[%c2_85, %c32_86, %c0_87] : memref<3x416x128xbf16, #tpu.memory_space<vmem>>, vector<1x256x128xbf16>
    %80 = vector.shape_cast %79 : vector<1x256x128xbf16> to vector<256x128xbf16>
    %c0_88 = arith.constant 0 : index
    %c256_89 = arith.constant 256 : index
    %81 = vector.load %arg13[%c0_88, %c256_89] : memref<256x1152xbf16, #tpu.memory_space<vmem>>, vector<256x128xbf16>
    tpu.vector_store %arg13[%c0_88, %c256_89], %80 {strides = array<i32>} : memref<256x1152xbf16, #tpu.memory_space<vmem>>, vector<256x128xbf16>,
    %c0_90 = arith.constant 0 : index
    %c80_91 = arith.constant 80 : index
    %c0_92 = arith.constant 0 : index
    %82 = vector.load %arg12[%c0_90, %c80_91, %c0_92] : memref<3x416x128xbf16, #tpu.memory_space<vmem>>, vector<1x256x128xbf16>
    %83 = vector.shape_cast %82 : vector<1x256x128xbf16> to vector<256x128xbf16>
    %c0_93 = arith.constant 0 : index
    %c384_94 = arith.constant 384 : index
    %84 = vector.load %arg13[%c0_93, %c384_94] : memref<256x1152xbf16, #tpu.memory_space<vmem>>, vector<256x128xbf16>
    tpu.vector_store %arg13[%c0_93, %c384_94], %83 {strides = array<i32>} : memref<256x1152xbf16, #tpu.memory_space<vmem>>, vector<256x128xbf16>,
    %c1_95 = arith.constant 1 : index
    %c80_96 = arith.constant 80 : index
    %c0_97 = arith.constant 0 : index
    %85 = vector.load %arg12[%c1_95, %c80_96, %c0_97] : memref<3x416x128xbf16, #tpu.memory_space<vmem>>, vector<1x256x128xbf16>
    %86 = vector.shape_cast %85 : vector<1x256x128xbf16> to vector<256x128xbf16>
    %c0_98 = arith.constant 0 : index
    %c512_99 = arith.constant 512 : index
    %87 = vector.load %arg13[%c0_98, %c512_99] : memref<256x1152xbf16, #tpu.memory_space<vmem>>, vector<256x128xbf16>
    tpu.vector_store %arg13[%c0_98, %c512_99], %86 {strides = array<i32>} : memref<256x1152xbf16, #tpu.memory_space<vmem>>, vector<256x128xbf16>,
    %c2_100 = arith.constant 2 : index
    %c80_101 = arith.constant 80 : index
    %c0_102 = arith.constant 0 : index
    %88 = vector.load %arg12[%c2_100, %c80_101, %c0_102] : memref<3x416x128xbf16, #tpu.memory_space<vmem>>, vector<1x256x128xbf16>
    %89 = vector.shape_cast %88 : vector<1x256x128xbf16> to vector<256x128xbf16>
    %c0_103 = arith.constant 0 : index
    %c640_104 = arith.constant 640 : index
    %90 = vector.load %arg13[%c0_103, %c640_104] : memref<256x1152xbf16, #tpu.memory_space<vmem>>, vector<256x128xbf16>
    tpu.vector_store %arg13[%c0_103, %c640_104], %89 {strides = array<i32>} : memref<256x1152xbf16, #tpu.memory_space<vmem>>, vector<256x128xbf16>,
    %c0_105 = arith.constant 0 : index
    %c128_106 = arith.constant 128 : index
    %c0_107 = arith.constant 0 : index
    %91 = vector.load %arg12[%c0_105, %c128_106, %c0_107] : memref<3x416x128xbf16, #tpu.memory_space<vmem>>, vector<1x256x128xbf16>
    %92 = vector.shape_cast %91 : vector<1x256x128xbf16> to vector<256x128xbf16>
    %c0_108 = arith.constant 0 : index
    %c768_109 = arith.constant 768 : index
    %93 = vector.load %arg13[%c0_108, %c768_109] : memref<256x1152xbf16, #tpu.memory_space<vmem>>, vector<256x128xbf16>
    tpu.vector_store %arg13[%c0_108, %c768_109], %92 {strides = array<i32>} : memref<256x1152xbf16, #tpu.memory_space<vmem>>, vector<256x128xbf16>,
    %c1_110 = arith.constant 1 : index
    %c128_111 = arith.constant 128 : index
    %c0_112 = arith.constant 0 : index
    %94 = vector.load %arg12[%c1_110, %c128_111, %c0_112] : memref<3x416x128xbf16, #tpu.memory_space<vmem>>, vector<1x256x128xbf16>
    %95 = vector.shape_cast %94 : vector<1x256x128xbf16> to vector<256x128xbf16>
    %c0_113 = arith.constant 0 : index
    %c896_114 = arith.constant 896 : index
    %96 = vector.load %arg13[%c0_113, %c896_114] : memref<256x1152xbf16, #tpu.memory_space<vmem>>, vector<256x128xbf16>
    tpu.vector_store %arg13[%c0_113, %c896_114], %95 {strides = array<i32>} : memref<256x1152xbf16, #tpu.memory_space<vmem>>, vector<256x128xbf16>,
    %c2_115 = arith.constant 2 : index
    %c128_116 = arith.constant 128 : index
    %c0_117 = arith.constant 0 : index
    %97 = vector.load %arg12[%c2_115, %c128_116, %c0_117] : memref<3x416x128xbf16, #tpu.memory_space<vmem>>, vector<1x256x128xbf16>
    %98 = vector.shape_cast %97 : vector<1x256x128xbf16> to vector<256x128xbf16>
    %c0_118 = arith.constant 0 : index
    %c1024_119 = arith.constant 1024 : index
    %99 = vector.load %arg13[%c0_118, %c1024_119] : memref<256x1152xbf16, #tpu.memory_space<vmem>>, vector<256x128xbf16>
    tpu.vector_store %arg13[%c0_118, %c1024_119], %98 {strides = array<i32>} : memref<256x1152xbf16, #tpu.memory_space<vmem>>, vector<256x128xbf16>,
    %c0_120 = arith.constant 0 : index
    %c0_121 = arith.constant 0 : index
    %100 = vector.load %arg13[%c0_120, %c0_121] : memref<256x1152xbf16, #tpu.memory_space<vmem>>, vector<256x1152xbf16>
    %c1_122 = arith.constant 1 : index
    %c0_123 = arith.constant 0 : index
    %c0_124 = arith.constant 0 : index
    %101 = vector.load %arg3[%c1_122, %c0_123, %c0_124] : memref<3x1152x128xbf16, #tpu.memory_space<vmem>>, vector<1x1152x128xbf16>
    %102 = vector.shape_cast %101 : vector<1x1152x128xbf16> to vector<1152x128xbf16>
    %cst_125 = arith.constant dense<0.000000e+00> : vector<256x128xf32>
    %103 = tpu.matmul %100, %102, %cst_125 {dimension_numbers = #tpu.dot_dimension_numbers<[1], [0], [0], [1], [0, 0, 1, 1], [], []>} : vector<256x1152xbf16>, vector<1152x128xbf16>, vector<256x128xf32> -> vector<256x128xf32>
    %c1_126 = arith.constant 1 : index
    %c0_127 = arith.constant 0 : index
    %c0_128 = arith.constant 0 : index
    %104 = vector.load %arg4[%c1_126, %c0_127, %c0_128] : memref<3x1x128xf32, #tpu.memory_space<vmem>>, vector<1x1x128xf32>
    %105 = vector.shape_cast %104 : vector<1x1x128xf32> to vector<1x128xf32>
    %106 = vector.broadcast %105 : vector<1x128xf32> to vector<256x128xf32>
    %107 = arith.mulf %103, %106 : vector<256x128xf32>
    %c1_129 = arith.constant 1 : index
    %c0_130 = arith.constant 0 : index
    %c0_131 = arith.constant 0 : index
    %108 = vector.load %arg5[%c1_129, %c0_130, %c0_131] : memref<3x1x128xf32, #tpu.memory_space<vmem>>, vector<1x1x128xf32>
    %109 = vector.shape_cast %108 : vector<1x1x128xf32> to vector<1x128xf32>
    %110 = vector.broadcast %109 : vector<1x128xf32> to vector<256x128xf32>
    %111 = arith.addf %107, %110 : vector<256x128xf32>
    %cst_132 = arith.constant 0.000000e+00 : f32
    %112 = vector.broadcast %cst_132 : f32 to vector<256x128xf32>
    %113 = arith.maximumf %111, %112 : vector<256x128xf32>
    %114 = arith.truncf %113 : vector<256x128xf32> to vector<256x128xbf16>
    %c0_133 = arith.constant 0 : index
    %c128_134 = arith.constant 128 : index
    %115 = vector.load %arg14[%c0_133, %c128_134] : memref<256x384xbf16, #tpu.memory_space<vmem>>, vector<256x128xbf16>
    tpu.vector_store %arg14[%c0_133, %c128_134], %114 {strides = array<i32>} : memref<256x384xbf16, #tpu.memory_space<vmem>>, vector<256x128xbf16>,
    %c0_135 = arith.constant 0 : index
    %c0_136 = arith.constant 0 : index
    %c0_137 = arith.constant 0 : index
    %c0_138 = arith.constant 0 : index
    %116 = vector.load %arg1[%c0_135, %c0_136, %c0_137, %c0_138] : memref<1x26x26x128xbf16, #tpu.memory_space<vmem>>, vector<1x26x16x128xbf16>
    %117 = vector.shape_cast %116 : vector<1x26x16x128xbf16> to vector<26x16x128xbf16>
    %118 = vector.shape_cast %117 : vector<26x16x128xbf16> to vector<416x128xbf16>
    %c0_139 = arith.constant 0 : index
    %c0_140 = arith.constant 0 : index
    %c0_141 = arith.constant 0 : index
    %119 = vector.load %arg12[%c0_139, %c0_140, %c0_141] : memref<3x416x128xbf16, #tpu.memory_space<vmem>>, vector<1x416x128xbf16>
    %120 = vector.shape_cast %119 : vector<1x416x128xbf16> to vector<416x128xbf16>
    %121 = vector.shape_cast %118 : vector<416x128xbf16> to vector<1x416x128xbf16>
    tpu.vector_store %arg12[%c0_139, %c0_140, %c0_141], %121 {strides = array<i32>} : memref<3x416x128xbf16, #tpu.memory_space<vmem>>, vector<1x416x128xbf16>,
    %c0_142 = arith.constant 0 : index
    %c0_143 = arith.constant 0 : index
    %c10 = arith.constant 10 : index
    %c0_144 = arith.constant 0 : index
    %122 = vector.load %arg1[%c0_142, %c0_143, %c10, %c0_144] : memref<1x26x26x128xbf16, #tpu.memory_space<vmem>>, vector<1x26x16x128xbf16>
    %123 = vector.shape_cast %122 : vector<1x26x16x128xbf16> to vector<26x16x128xbf16>
    %124 = vector.shape_cast %123 : vector<26x16x128xbf16> to vector<416x128xbf16>
    %c2_145 = arith.constant 2 : index
    %c0_146 = arith.constant 0 : index
    %c0_147 = arith.constant 0 : index
    %125 = vector.load %arg12[%c2_145, %c0_146, %c0_147] : memref<3x416x128xbf16, #tpu.memory_space<vmem>>, vector<1x416x128xbf16>
    %126 = vector.shape_cast %125 : vector<1x416x128xbf16> to vector<416x128xbf16>
    %127 = vector.shape_cast %124 : vector<416x128xbf16> to vector<1x416x128xbf16>
    tpu.vector_store %arg12[%c2_145, %c0_146, %c0_147], %127 {strides = array<i32>} : memref<3x416x128xbf16, #tpu.memory_space<vmem>>, vector<1x416x128xbf16>,
    %c0_148 = arith.constant 0 : index
    %c0_149 = arith.constant 0 : index
    %c0_150 = arith.constant 0 : index
    %128 = vector.load %arg12[%c0_148, %c0_149, %c0_150] : memref<3x416x128xbf16, #tpu.memory_space<vmem>>, vector<1x256x128xbf16>
    %129 = vector.shape_cast %128 : vector<1x256x128xbf16> to vector<256x128xbf16>
    %c0_151 = arith.constant 0 : index
    %c0_152 = arith.constant 0 : index
    %130 = vector.load %arg13[%c0_151, %c0_152] : memref<256x1152xbf16, #tpu.memory_space<vmem>>, vector<256x128xbf16>
    tpu.vector_store %arg13[%c0_151, %c0_152], %129 {strides = array<i32>} : memref<256x1152xbf16, #tpu.memory_space<vmem>>, vector<256x128xbf16>,
    %c1_153 = arith.constant 1 : index
    %c0_154 = arith.constant 0 : index
    %c0_155 = arith.constant 0 : index
    %131 = vector.load %arg12[%c1_153, %c0_154, %c0_155] : memref<3x416x128xbf16, #tpu.memory_space<vmem>>, vector<1x256x128xbf16>
    %132 = vector.shape_cast %131 : vector<1x256x128xbf16> to vector<256x128xbf16>
    %c0_156 = arith.constant 0 : index
    %c128_157 = arith.constant 128 : index
    %133 = vector.load %arg13[%c0_156, %c128_157] : memref<256x1152xbf16, #tpu.memory_space<vmem>>, vector<256x128xbf16>
    tpu.vector_store %arg13[%c0_156, %c128_157], %132 {strides = array<i32>} : memref<256x1152xbf16, #tpu.memory_space<vmem>>, vector<256x128xbf16>,
    %c2_158 = arith.constant 2 : index
    %c0_159 = arith.constant 0 : index
    %c0_160 = arith.constant 0 : index
    %134 = vector.load %arg12[%c2_158, %c0_159, %c0_160] : memref<3x416x128xbf16, #tpu.memory_space<vmem>>, vector<1x256x128xbf16>
    %135 = vector.shape_cast %134 : vector<1x256x128xbf16> to vector<256x128xbf16>
    %c0_161 = arith.constant 0 : index
    %c256_162 = arith.constant 256 : index
    %136 = vector.load %arg13[%c0_161, %c256_162] : memref<256x1152xbf16, #tpu.memory_space<vmem>>, vector<256x128xbf16>
    tpu.vector_store %arg13[%c0_161, %c256_162], %135 {strides = array<i32>} : memref<256x1152xbf16, #tpu.memory_space<vmem>>, vector<256x128xbf16>,
    %c0_163 = arith.constant 0 : index
    %c80_164 = arith.constant 80 : index
    %c0_165 = arith.constant 0 : index
    %137 = vector.load %arg12[%c0_163, %c80_164, %c0_165] : memref<3x416x128xbf16, #tpu.memory_space<vmem>>, vector<1x256x128xbf16>
    %138 = vector.shape_cast %137 : vector<1x256x128xbf16> to vector<256x128xbf16>
    %c0_166 = arith.constant 0 : index
    %c384_167 = arith.constant 384 : index
    %139 = vector.load %arg13[%c0_166, %c384_167] : memref<256x1152xbf16, #tpu.memory_space<vmem>>, vector<256x128xbf16>
    tpu.vector_store %arg13[%c0_166, %c384_167], %138 {strides = array<i32>} : memref<256x1152xbf16, #tpu.memory_space<vmem>>, vector<256x128xbf16>,
    %c1_168 = arith.constant 1 : index
    %c80_169 = arith.constant 80 : index
    %c0_170 = arith.constant 0 : index
    %140 = vector.load %arg12[%c1_168, %c80_169, %c0_170] : memref<3x416x128xbf16, #tpu.memory_space<vmem>>, vector<1x256x128xbf16>
    %141 = vector.shape_cast %140 : vector<1x256x128xbf16> to vector<256x128xbf16>
    %c0_171 = arith.constant 0 : index
    %c512_172 = arith.constant 512 : index
    %142 = vector.load %arg13[%c0_171, %c512_172] : memref<256x1152xbf16, #tpu.memory_space<vmem>>, vector<256x128xbf16>
    tpu.vector_store %arg13[%c0_171, %c512_172], %141 {strides = array<i32>} : memref<256x1152xbf16, #tpu.memory_space<vmem>>, vector<256x128xbf16>,
    %c2_173 = arith.constant 2 : index
    %c80_174 = arith.constant 80 : index
    %c0_175 = arith.constant 0 : index
    %143 = vector.load %arg12[%c2_173, %c80_174, %c0_175] : memref<3x416x128xbf16, #tpu.memory_space<vmem>>, vector<1x256x128xbf16>
    %144 = vector.shape_cast %143 : vector<1x256x128xbf16> to vector<256x128xbf16>
    %c0_176 = arith.constant 0 : index
    %c640_177 = arith.constant 640 : index
    %145 = vector.load %arg13[%c0_176, %c640_177] : memref<256x1152xbf16, #tpu.memory_space<vmem>>, vector<256x128xbf16>
    tpu.vector_store %arg13[%c0_176, %c640_177], %144 {strides = array<i32>} : memref<256x1152xbf16, #tpu.memory_space<vmem>>, vector<256x128xbf16>,
    %c0_178 = arith.constant 0 : index
    %c160 = arith.constant 160 : index
    %c0_179 = arith.constant 0 : index
    %146 = vector.load %arg12[%c0_178, %c160, %c0_179] : memref<3x416x128xbf16, #tpu.memory_space<vmem>>, vector<1x256x128xbf16>
    %147 = vector.shape_cast %146 : vector<1x256x128xbf16> to vector<256x128xbf16>
    %c0_180 = arith.constant 0 : index
    %c768_181 = arith.constant 768 : index
    %148 = vector.load %arg13[%c0_180, %c768_181] : memref<256x1152xbf16, #tpu.memory_space<vmem>>, vector<256x128xbf16>
    tpu.vector_store %arg13[%c0_180, %c768_181], %147 {strides = array<i32>} : memref<256x1152xbf16, #tpu.memory_space<vmem>>, vector<256x128xbf16>,
    %c1_182 = arith.constant 1 : index
    %c160_183 = arith.constant 160 : index
    %c0_184 = arith.constant 0 : index
    %149 = vector.load %arg12[%c1_182, %c160_183, %c0_184] : memref<3x416x128xbf16, #tpu.memory_space<vmem>>, vector<1x256x128xbf16>
    %150 = vector.shape_cast %149 : vector<1x256x128xbf16> to vector<256x128xbf16>
    %c0_185 = arith.constant 0 : index
    %c896_186 = arith.constant 896 : index
    %151 = vector.load %arg13[%c0_185, %c896_186] : memref<256x1152xbf16, #tpu.memory_space<vmem>>, vector<256x128xbf16>
    tpu.vector_store %arg13[%c0_185, %c896_186], %150 {strides = array<i32>} : memref<256x1152xbf16, #tpu.memory_space<vmem>>, vector<256x128xbf16>,
    %c2_187 = arith.constant 2 : index
    %c160_188 = arith.constant 160 : index
    %c0_189 = arith.constant 0 : index
    %152 = vector.load %arg12[%c2_187, %c160_188, %c0_189] : memref<3x416x128xbf16, #tpu.memory_space<vmem>>, vector<1x256x128xbf16>
    %153 = vector.shape_cast %152 : vector<1x256x128xbf16> to vector<256x128xbf16>
    %c0_190 = arith.constant 0 : index
    %c1024_191 = arith.constant 1024 : index
    %154 = vector.load %arg13[%c0_190, %c1024_191] : memref<256x1152xbf16, #tpu.memory_space<vmem>>, vector<256x128xbf16>
    tpu.vector_store %arg13[%c0_190, %c1024_191], %153 {strides = array<i32>} : memref<256x1152xbf16, #tpu.memory_space<vmem>>, vector<256x128xbf16>,
    %c0_192 = arith.constant 0 : index
    %c0_193 = arith.constant 0 : index
    %155 = vector.load %arg13[%c0_192, %c0_193] : memref<256x1152xbf16, #tpu.memory_space<vmem>>, vector<256x1152xbf16>
    %c2_194 = arith.constant 2 : index
    %c0_195 = arith.constant 0 : index
    %c0_196 = arith.constant 0 : index
    %156 = vector.load %arg3[%c2_194, %c0_195, %c0_196] : memref<3x1152x128xbf16, #tpu.memory_space<vmem>>, vector<1x1152x128xbf16>
    %157 = vector.shape_cast %156 : vector<1x1152x128xbf16> to vector<1152x128xbf16>
    %cst_197 = arith.constant dense<0.000000e+00> : vector<256x128xf32>
    %158 = tpu.matmul %155, %157, %cst_197 {dimension_numbers = #tpu.dot_dimension_numbers<[1], [0], [0], [1], [0, 0, 1, 1], [], []>} : vector<256x1152xbf16>, vector<1152x128xbf16>, vector<256x128xf32> -> vector<256x128xf32>
    %c2_198 = arith.constant 2 : index
    %c0_199 = arith.constant 0 : index
    %c0_200 = arith.constant 0 : index
    %159 = vector.load %arg4[%c2_198, %c0_199, %c0_200] : memref<3x1x128xf32, #tpu.memory_space<vmem>>, vector<1x1x128xf32>
    %160 = vector.shape_cast %159 : vector<1x1x128xf32> to vector<1x128xf32>
    %161 = vector.broadcast %160 : vector<1x128xf32> to vector<256x128xf32>
    %162 = arith.mulf %158, %161 : vector<256x128xf32>
    %c2_201 = arith.constant 2 : index
    %c0_202 = arith.constant 0 : index
    %c0_203 = arith.constant 0 : index
    %163 = vector.load %arg5[%c2_201, %c0_202, %c0_203] : memref<3x1x128xf32, #tpu.memory_space<vmem>>, vector<1x1x128xf32>
    %164 = vector.shape_cast %163 : vector<1x1x128xf32> to vector<1x128xf32>
    %165 = vector.broadcast %164 : vector<1x128xf32> to vector<256x128xf32>
    %166 = arith.addf %162, %165 : vector<256x128xf32>
    %cst_204 = arith.constant 0.000000e+00 : f32
    %167 = vector.broadcast %cst_204 : f32 to vector<256x128xf32>
    %168 = arith.maximumf %166, %167 : vector<256x128xf32>
    %169 = arith.truncf %168 : vector<256x128xf32> to vector<256x128xbf16>
    %c0_205 = arith.constant 0 : index
    %c256_206 = arith.constant 256 : index
    %170 = vector.load %arg14[%c0_205, %c256_206] : memref<256x384xbf16, #tpu.memory_space<vmem>>, vector<256x128xbf16>
    tpu.vector_store %arg14[%c0_205, %c256_206], %169 {strides = array<i32>} : memref<256x384xbf16, #tpu.memory_space<vmem>>, vector<256x128xbf16>,
    %c0_207 = arith.constant 0 : index
    %c0_208 = arith.constant 0 : index
    %171 = vector.load %arg14[%c0_207, %c0_208] : memref<256x384xbf16, #tpu.memory_space<vmem>>, vector<256x384xbf16>
    %c0_209 = arith.constant 0 : index
    %c0_210 = arith.constant 0 : index
    %172 = vector.load %arg6[%c0_209, %c0_210] : memref<384x128xbf16, #tpu.memory_space<vmem>>, vector<384x128xbf16>
    %cst_211 = arith.constant dense<0.000000e+00> : vector<256x128xf32>
    %173 = tpu.matmul %171, %172, %cst_211 {dimension_numbers = #tpu.dot_dimension_numbers<[1], [0], [0], [1], [0, 0, 1, 1], [], []>} : vector<256x384xbf16>, vector<384x128xbf16>, vector<256x128xf32> -> vector<256x128xf32>
    %c0_212 = arith.constant 0 : index
    %c0_213 = arith.constant 0 : index
    %174 = vector.load %arg7[%c0_212, %c0_213] : memref<1x128xf32, #tpu.memory_space<vmem>>, vector<1x128xf32>
    %175 = vector.broadcast %174 : vector<1x128xf32> to vector<256x128xf32>
    %176 = arith.mulf %173, %175 : vector<256x128xf32>
    %c0_214 = arith.constant 0 : index
    %c0_215 = arith.constant 0 : index
    %177 = vector.load %arg8[%c0_214, %c0_215] : memref<1x128xf32, #tpu.memory_space<vmem>>, vector<1x128xf32>
    %178 = vector.broadcast %177 : vector<1x128xf32> to vector<256x128xf32>
    %179 = arith.addf %176, %178 : vector<256x128xf32>
    %cst_216 = arith.constant 0.000000e+00 : f32
    %180 = vector.broadcast %cst_216 : f32 to vector<256x128xf32>
    %181 = arith.maximumf %179, %180 : vector<256x128xf32>
    %cst_217 = arith.constant dense<0.000000e+00> : vector<128xf32>
    %182 = vector.multi_reduction <add>, %181, %cst_217 [0] : vector<256x128xf32> to vector<128xf32>
    %183 = vector.shape_cast %182 : vector<128xf32> to vector<1x128xf32>
    %cst_218 = arith.constant 2.560000e+02 : f32
    %184 = vector.broadcast %cst_218 : f32 to vector<1x128xf32>
    %185 = arith.divf %183, %184 : vector<1x128xf32>
    %c0_219 = arith.constant 0 : index
    %c0_220 = arith.constant 0 : index
    %186 = vector.load %arg9[%c0_219, %c0_220] : memref<8x128xf32, #tpu.memory_space<vmem>>, vector<8x128xf32>
    %cst_221 = arith.constant dense<0.000000e+00> : vector<1x8xf32>
    %187 = tpu.matmul %185, %186, %cst_221 {dimension_numbers = #tpu.dot_dimension_numbers<[1], [1], [0], [0], [0, 0, 1, 0], [], []>} : vector<1x128xf32>, vector<8x128xf32>, vector<1x8xf32> -> vector<1x8xf32>
    %cst_222 = arith.constant 0.000000e+00 : f32
    %188 = vector.broadcast %cst_222 : f32 to vector<1x8xf32>
    %189 = arith.maximumf %187, %188 : vector<1x8xf32>
    %c0_223 = arith.constant 0 : index
    %c0_224 = arith.constant 0 : index
    %190 = vector.load %arg10[%c0_223, %c0_224] : memref<8x128xf32, #tpu.memory_space<vmem>>, vector<8x128xf32>
    %cst_225 = arith.constant dense<0.000000e+00> : vector<1x128xf32>
    %191 = tpu.matmul %189, %190, %cst_225 {dimension_numbers = #tpu.dot_dimension_numbers<[1], [0], [0], [1], [0, 0, 1, 1], [], []>} : vector<1x8xf32>, vector<8x128xf32>, vector<1x128xf32> -> vector<1x128xf32>
    %192 = arith.negf %191 : vector<1x128xf32>
    %193 = math.exp %192 : vector<1x128xf32>
    %cst_226 = arith.constant 1.000000e+00 : f32
    %194 = vector.broadcast %cst_226 : f32 to vector<1x128xf32>
    %195 = arith.addf %194, %193 : vector<1x128xf32>
    %196 = arith.divf %194, %195 : vector<1x128xf32>
    %c0_227 = arith.constant 0 : index
    %c0_228 = arith.constant 0 : index
    %c0_229 = arith.constant 0 : index
    %c0_230 = arith.constant 0 : index
    %197 = vector.load %arg2[%c0_227, %c0_228, %c0_229, %c0_230] : memref<1x16x16x128xf32, #tpu.memory_space<vmem>>, vector<1x16x16x128xf32>
    %198 = vector.shape_cast %197 : vector<1x16x16x128xf32> to vector<16x16x128xf32>
    %199 = vector.shape_cast %198 : vector<16x16x128xf32> to vector<256x128xf32>
    %200 = vector.broadcast %196 : vector<1x128xf32> to vector<256x128xf32>
    %201 = arith.mulf %181, %200 : vector<256x128xf32>
    %202 = arith.addf %201, %199 : vector<256x128xf32>
    %203 = vector.shape_cast %202 : vector<256x128xf32> to vector<1x16x16x128xf32>
    %c0_231 = arith.constant 0 : index
    %c0_232 = arith.constant 0 : index
    %c0_233 = arith.constant 0 : index
    %c0_234 = arith.constant 0 : index
    %204 = vector.load %arg11[%c0_231, %c0_232, %c0_233, %c0_234] : memref<1x16x16x128xf32, #tpu.memory_space<vmem>>, vector<1x16x16x128xf32>
    tpu.vector_store %arg11[%c0_231, %c0_232, %c0_233, %c0_234], %203 {strides = array<i32>} : memref<1x16x16x128xf32, #tpu.memory_space<vmem>>, vector<1x16x16x128xf32>,
    return
  }
  func.func @transform_0(%arg0: i32) -> (i32, i32, i32, i32) {
    %c0_i32 = arith.constant 0 : i32
    %c0_i32_0 = arith.constant 0 : i32
    %c0_i32_1 = arith.constant 0 : i32
    %c0_i32_2 = arith.constant 0 : i32
    return %arg0, %c0_i32, %c0_i32_0, %c0_i32_1 : i32, i32, i32, i32
  }
  func.func @transform_1(%arg0: i32) -> (i32, i32, i32, i32) {
    %c0_i32 = arith.constant 0 : i32
    %c0_i32_0 = arith.constant 0 : i32
    %c0_i32_1 = arith.constant 0 : i32
    %c0_i32_2 = arith.constant 0 : i32
    return %arg0, %c0_i32, %c0_i32_0, %c0_i32_1 : i32, i32, i32, i32
  }
  func.func @transform_2(%arg0: i32) -> (i32, i32, i32) {
    %c0_i32 = arith.constant 0 : i32
    %c0_i32_0 = arith.constant 0 : i32
    %c0_i32_1 = arith.constant 0 : i32
    %c0_i32_2 = arith.constant 0 : i32
    return %c0_i32, %c0_i32_0, %c0_i32_1 : i32, i32, i32
  }
  func.func @transform_3(%arg0: i32) -> (i32, i32, i32) {
    %c0_i32 = arith.constant 0 : i32
    %c0_i32_0 = arith.constant 0 : i32
    %c0_i32_1 = arith.constant 0 : i32
    %c0_i32_2 = arith.constant 0 : i32
    return %c0_i32, %c0_i32_0, %c0_i32_1 : i32, i32, i32
  }
  func.func @transform_4(%arg0: i32) -> (i32, i32, i32) {
    %c0_i32 = arith.constant 0 : i32
    %c0_i32_0 = arith.constant 0 : i32
    %c0_i32_1 = arith.constant 0 : i32
    %c0_i32_2 = arith.constant 0 : i32
    return %c0_i32, %c0_i32_0, %c0_i32_1 : i32, i32, i32
  }
  func.func @transform_5(%arg0: i32) -> (i32, i32) {
    %c0_i32 = arith.constant 0 : i32
    %c0_i32_0 = arith.constant 0 : i32
    %c0_i32_1 = arith.constant 0 : i32
    return %c0_i32, %c0_i32_0 : i32, i32
  }
  func.func @transform_6(%arg0: i32) -> (i32, i32) {
    %c0_i32 = arith.constant 0 : i32
    %c0_i32_0 = arith.constant 0 : i32
    %c0_i32_1 = arith.constant 0 : i32
    return %c0_i32, %c0_i32_0 : i32, i32
  }
  func.func @transform_7(%arg0: i32) -> (i32, i32) {
    %c0_i32 = arith.constant 0 : i32
    %c0_i32_0 = arith.constant 0 : i32
    %c0_i32_1 = arith.constant 0 : i32
    return %c0_i32, %c0_i32_0 : i32, i32
  }
  func.func @transform_8(%arg0: i32) -> (i32, i32) {
    %c0_i32 = arith.constant 0 : i32
    %c0_i32_0 = arith.constant 0 : i32
    %c0_i32_1 = arith.constant 0 : i32
    return %c0_i32, %c0_i32_0 : i32, i32
  }
  func.func @transform_9(%arg0: i32) -> (i32, i32) {
    %c0_i32 = arith.constant 0 : i32
    %c0_i32_0 = arith.constant 0 : i32
    %c0_i32_1 = arith.constant 0 : i32
    return %c0_i32, %c0_i32_0 : i32, i32
  }
  func.func @transform_10(%arg0: i32) -> (i32, i32, i32, i32) {
    %c0_i32 = arith.constant 0 : i32
    %c0_i32_0 = arith.constant 0 : i32
    %c0_i32_1 = arith.constant 0 : i32
    %c0_i32_2 = arith.constant 0 : i32
    return %arg0, %c0_i32, %c0_i32_0, %c0_i32_1 : i32, i32, i32, i32
  }
}

</mosaic_0001>

<bundles_post_ra>
// kernel: _lambda_.1
= control target key start
LH: loop header
LB: loop body
LE: loop exit
PB: predicated region body
PF: predicated region fallthrough
CT: control target
= control target key end

     0   :  { %15 = vsyncpa [#allocation6], 0  ;;  %s18035_s0 = inlined_call_operand.vmem [shape: bf16[2,26,26,128], index: 0, kind: input, shape index: {}]   ;;  %s18036_s1 = inlined_call_operand.vmem [shape: f32[2,16,16,128], index: 1, kind: input, shape index: {}]   ;;  %s18037_s2 = inlined_call_operand.vmem [shape: bf16[3,1152,128], index: 2, kind: input, shape index: {}]   ;;  %s18038_s3 = inlined_call_operand.vmem [shape: f32[3,1,128], index: 3, kind: input, shape index: {}]   ;;  %s18039_s4 = inlined_call_operand.vmem [shape: f32[3,1,128], index: 4, kind: input, shape index: {}]   ;;  %s18040_s5 = inlined_call_operand.vmem [shape: bf16[384,128], index: 5, kind: input, shape index: {}]   ;;  %s18041_s6 = inlined_call_operand.vmem [shape: f32[1,128], index: 6, kind: input, shape index: {}]   ;;  %s18042_s7 = inlined_call_operand.vmem [shape: f32[1,128], index: 7, kind: input, shape index: {}]   ;;  %s18043_s8 = inlined_call_operand.vmem [shape: f32[8,128], index: 8, kind: input, shape index: {}]   ;;  %s18044_s9 = inlined_call_operand.vmem [shape: f32[8,128], index: 9, kind: input, shape index: {}]   ;;  %s18045_s10 = inlined_call_operand.hbm [shape: f32[2,16,16,128], index: 10, kind: output, shape index: {}]  }
   0x1   :  { %17 = vsyncpa [#allocation6 + $0x1], 0  ;;  %s13687_s13 = smov 0   ;;  %s13689_s14 = smov 0  }
   0x2   :  { %s13691_s15 = smov 0   ;;  %s13693_s16 = smov 0  }
   0x3 LB: > { %s13708_s17 = sadd.s32 4294967295, %s13625_s16   ;;  %s10624_s18 = sadd.s32 4294967294, %s13625_s16   ;;  %s13625_s16 = sphi %s13693_s16, %s18510_s16   ;;  %s13621_s15 = sphi %s13691_s15, %s18509_s15   ;;  %s13617_s14 = sphi %s13689_s14, %s18508_s14   ;;  %s13613_s13 = sphi %s13687_s13, %s18507_s13  }
   0x4   : > { %s13712_s19 = sadd.s32 1, %s13625_s16   ;;  %s250_s20 = sadd.s32 1, %s13621_s15 }
   0x5   : > { %s247_s21 = ssub.s32 %s13625_s16, %s13712_s19  ;;  %p260_p0 = scmp.ne.s32.totalorder %s13621_s15, %s13617_s14 }
   0x6   : > { %p248_p1 = scmp.eq.s32.totalorder %s247_s21, 0  ;;  %p261_p2 = scmp.eq.s32.totalorder %s13708_s17, 1 }
   0x7   : > { %p266_p3 = scmp.ne.s32.totalorder %s13617_s14, %s13613_s13  ;;  %p267_p4 = scmp.eq.s32.totalorder %s10624_s18, 1 }
   0x8   : > { %s13723_s22 = scalar_select %p248_p1, %s13621_s15, %s250_s20  }
   0x9   : > { %p13725_p5 = por %p261_p2, %p260_p0  ;;  %p13729_p6 = por %p267_p4, %p266_p3 }
   0xa   : > { %18168 = sst [smem:[#allocation8_spill]] %s13723_s22  ;;  %p10627_p7 = scmp.ge.s32.totalorder %s13625_s16, 1 }
   0xb   : > { %p325_p8 = scmp.lt.s32.totalorder %s13625_s16, 3 }
   0xd   : > { %p326_p9 = pnand %p10627_p7, %p325_p8 }
   0xf   : > { %329 = sbr.rel (%p326_p9) target bundleno = 1912 (0x778), region = 60 }
  0x16   : > { %v13269_v0 = vld [vmem:[%s18037_s2 + $0x40] sm:$0xff]   ;;  %v13273_v4 = vld [vmem:[%s18037_s2 + $0x48] sm:$0xff]   ;;  %v13277_v8 = vld [vmem:[%s18037_s2 + $0x50] sm:$0xff]   ;;  %p368_p10 = scmp.lt.s32.totalorder %s13708_s17, 1  ;;  %vm1475_vm0 = vcmask 1041408   ;;  %vm1476_vm1 = vcmask 1045508  }
  0x17   : > { %v13270_v1 = vld [vmem:[%s18037_s2 + $0xc0] sm:$0xff]   ;;  %11467 = vmatprep.subr.bf16.mxu0 %v13269_v0  ;;  %v13274_v5 = vld [vmem:[%s18037_s2 + $0xc8] sm:$0xff]   ;;  %v13278_v9 = vld [vmem:[%s18037_s2 + $0xd0] sm:$0xff]   ;;  %vm1946_vm2 = vcmask 1040384   ;;  %vm1947_vm3 = vcmask 1044484   ;;  %v18173_v58 = vmov 0 }
  0x18   : > { %v13271_v2 = vld [vmem:[%s18037_s2] sm:$0xff]   ;;  %11579 = vmatprep.subr.bf16.mxu1 %v13270_v1  ;;  %v13275_v6 = vld [vmem:[%s18037_s2 + $0x8] sm:$0xff]   ;;  %v13279_v10 = vld [vmem:[%s18037_s2 + $0x10] sm:$0xff]   ;;  %s13803_s25 = scalar_select %p368_p10, %s13708_s17, 1  ;;  %vm457_vm4 = vsmask.f32 1280 }
  0x19   : > { %v13272_v3 = vld [vmem:[%s18037_s2 + $0x80] sm:$0xff]   ;;  %11468 = vmatpush3.bf16.msra.mxu0 %v13271_v2  ;;  %v13276_v7 = vld [vmem:[%s18037_s2 + $0x88] sm:$0xff]   ;;  %v13280_v11 = vld [vmem:[%s18037_s2 + $0x90] sm:$0xff]   ;;  %vm458_vm5 = vsmask.f32 5392  ;;  %vm4373_vm9 = vcmask 1042432  }
  0x1a   : > { %11580 = vmatpush3.bf16.msra.mxu1 %v13272_v3  ;;  %11469 = vmatprep.subr.bf16.mxu0 %v13273_v4  ;;  %v13281_v12 = vld [vmem:[%s18037_s2 + $0x58] sm:$0xff]   ;;  %v13285_v16 = vld [vmem:[%s18037_s2 + $0x60] sm:$0xff]   ;;  %v13289_v20 = vld [vmem:[%s18037_s2 + $0x68] sm:$0xff]   ;;  %s13225_s20 = smul.u32 416, %s13803_s25  ;;  %vm4374_vm10 = vcmask 1046532   ;;  %vm13628_vm12 = vmmov 0  }
  0x1b   : > { %11581 = vmatprep.subr.bf16.mxu1 %v13274_v5  ;;  %v13282_v13 = vld [vmem:[%s18037_s2 + $0xd8] sm:$0xff]   ;;  %v13286_v17 = vld [vmem:[%s18037_s2 + $0xe0] sm:$0xff]   ;;  %v13290_v21 = vld [vmem:[%s18037_s2 + $0xe8] sm:$0xff]   ;;  %vm10324_vm13 = vcmask 64512   ;;  %s11465_s11 = sshll.u32 %s13803_s25, 8  ;;  %s365_s25 = sand.u32 1, %s13617_s14  }
  0x1c   : > { %v13283_v14 = vld [vmem:[%s18037_s2 + $0x18] sm:$0xff]   ;;  %v13287_v18 = vld [vmem:[%s18037_s2 + $0x20] sm:$0xff]   ;;  %v13291_v22 = vld [vmem:[%s18037_s2 + $0x28] sm:$0xff]   ;;  %s13833_s21 = scalar_lea.vmem %s18035_s0, %s13225_s20  ;;  %s17781_s26 = scalar_lea.vmem %s18036_s1, %s11465_s11 }
  0x1d   : > { %11470 = vmatpush3.bf16.msra.mxu0 %v13275_v6  ;;  %v13284_v15 = vld [vmem:[%s18037_s2 + $0x98] sm:$0xff]   ;;  %v13288_v19 = vld [vmem:[%s18037_s2 + $0xa0] sm:$0xff]   ;;  %v13292_v23 = vld [vmem:[%s18037_s2 + $0xa8] sm:$0xff]   ;;  %s17830_s27 = sshll.u32 %s365_s25, 8  ;;  %s11466_s29 = sshll.u32 %s13708_s17, 12 }
  0x1e   : > { %11582 = vmatpush3.bf16.msra.mxu1 %v13276_v7  ;;  %11471 = vmatprep.subr.bf16.mxu0 %v13277_v8  ;;  %v13293_v24 = vld [vmem:[%s18037_s2 + $0x70] sm:$0xff]   ;;  %v13297_v28 = vld [vmem:[%s18037_s2 + $0x78] sm:$0xff]   ;;  %v391_v32 = vld [vmem:[%s13833_s21 + $0x40] sm:$0xc]  ;;  %s17919_s28 = scalar_lea.vmem [#allocation5], %s17830_s27  ;;  %s17970_s30 = scalar_lea.hbm %s18045_s10, %s11466_s29 }
  0x1f   : > { %11583 = vmatprep.subr.bf16.mxu1 %v13278_v9  ;;  %v13294_v25 = vld [vmem:[%s18037_s2 + $0xf0] sm:$0xff]   ;;  %v13298_v29 = vld [vmem:[%s18037_s2 + $0xf8] sm:$0xff]   ;;  %v392_v33 = vld [vmem:[%s13833_s21 + $0x44] sm:$0xf]  ;;  %v573_v35 = vshrl.u32 %v391_v32, 16  ;;  %v576_v36 = vshll.u32 %v391_v32, 16 }
  0x20   : > { %v13295_v26 = vld [vmem:[%s18037_s2 + $0x30] sm:$0xff]   ;;  %v13299_v30 = vld [vmem:[%s18037_s2 + $0x38] sm:$0xff]   ;;  %v393_v34 = vld [vmem:[%s13833_s21 + $0x48] sm:$0x7]  ;;  %v582_v37 = vshrl.u32 %v392_v33, 16  ;;  %v585_v38 = vshll.u32 %v392_v33, 16 }
  0x21   : > { %11472 = vmatpush3.bf16.msra.mxu0 %v13279_v10  ;;  %v13296_v27 = vld [vmem:[%s18037_s2 + $0xb0] sm:$0xff]   ;;  %v13300_v31 = vld [vmem:[%s18037_s2 + $0xb8] sm:$0xff]   ;;  %v592_v39 = vshrl.u32 %v393_v34, 16  ;;  %v595_v40 = vshll.u32 %v393_v34, 16  ;;  %v575_v42 = vrot.slane %v573_v35, 6  ;;  %v578_v43 = vrot.slane %v576_v36, 7  ;;  %vm13849_vm6 = vmor %vm1475_vm0, %vm1476_vm1 }
  0x22   : > { %11584 = vmatpush3.bf16.msra.mxu1 %v13280_v11  ;;  %11473 = vmatprep.subr.bf16.mxu0 %v13281_v12  ;;  %v1334_v41 = vld [vmem:[%s13833_s21 + $0x50] sm:$0xc]  ;;  %v1335_v44 = vld [vmem:[%s13833_s21 + $0x54] sm:$0xf]  ;;  %v1336_v45 = vld [vmem:[%s13833_s21 + $0x58] sm:$0x3] }
  0x23   : > { %11585 = vmatprep.subr.bf16.mxu1 %v13282_v13  ;;  %v584_v46 = vrot.slane %v582_v37, 6  ;;  %v587_v47 = vrot.slane %v585_v38, 7  ;;  %v594_v48 = vrot.slane %v592_v39, 6  ;;  %v597_v49 = vrot.slane %v595_v40, 7  ;;  %v1331_v51 = vld [vmem:[%s13833_s21 + $0x40] sm:$0xc]  ;;  %vm13860_vm7 = vmor %vm457_vm4, %vm458_vm5 }
  0x24   : > { %v579_v52 = vor.u32 %v578_v43, %v575_v42  ;;  %v10663_v53 = vrot.slane %v1334_v41, 10  ;;  %v1515_v54 = vrot.slane %v1335_v44, 6  ;;  %v1518_v55 = vrot.slane %v1336_v45, 6  ;;  %v1332_v56 = vld [vmem:[%s13833_s21 + $0x44] sm:$0xf]  ;;  %vm13874_vm8 = vmor %vm1946_vm2, %vm1947_vm3  ;;  %v13304_v43 = vld [vmem:[%s18037_s2 + $0x108] sm:$0xff]  }
  0x25   : > { %11474 = vmatpush3.bf16.msra.mxu0 %v13283_v14  ;;  %v13301_v57 = vld [vmem:[%s18037_s2 + $0x140] sm:$0xff]   ;;  %v18174_v58 = vsel %vm13860_vm7, 4294967295, %v18173_v58  ;;  %v588_v59 = vor.u32 %v587_v47, %v584_v46  ;;  %v598_v60 = vor.u32 %v597_v49, %v594_v48  ;;  %v1333_v61 = vld [vmem:[%s13833_s21 + $0x48] sm:$0x3]  ;;  %v10662_v62 = vrot.slane %v1331_v51, 10  ;;  %vm14847_vm11 = vmor %vm4373_vm9, %vm4374_vm10  ;;  %s10550_s22 = sshll.u32 %s17919_s28, 4  ;;  %s17974_s22 = int_to_ptr.vmem [resolvable:$true] %s10550_s22 }
  0x26   : > { %11586 = vmatpush3.bf16.msra.mxu1 %v13284_v15  ;;  %11475 = vmatprep.subr.bf16.mxu0 %v13285_v16  ;;  %18175 = vst [vmem:[#allocation9_spill] sm:$0xff] %v18174_v58  ;;  %v1508_v63 = vrot.slane %v1332_v56, 6  ;;  %v1802_v0 = vld [vmem:[%s13833_s21 + $0x40] sm:$0x8]  ;;  %v580_v1 = vrot.slane %v579_v52, 4  ;;  %v1516_v2 = vsel %vm13849_vm6, %v10663_v53, %v1515_v54  ;;  %v1517_v3 = vrot.slane %v1515_v54, 4 }
  0x27   : > { %11587 = vmatprep.subr.bf16.mxu1 %v13286_v17  ;;  %v1511_v4 = vrot.slane %v1333_v61, 6  ;;  %v1803_v5 = vld [vmem:[%s13833_s21 + $0x44] sm:$0xf]  ;;  %v590_v6 = vrot.slane %v588_v59, 4  ;;  %v1804_v9 = vld [vmem:[%s13833_s21 + $0x48] sm:$0x7] }
  0x28   : > { %v1509_v7 = vsel %vm13849_vm6, %v10662_v62, %v1508_v63  ;;  %v1510_v8 = vrot.slane %v1508_v63, 4  ;;  %v10714_v11 = vrot.slane %v1802_v0, 11  ;;  %v589_v12 = vsel %vm13860_vm7, %v580_v1, %v588_v59  ;;  %v13302_v16 = vld [vmem:[%s18037_s2 + $0x100] sm:$0xff]   ;;  %v1339_v37 = vld [vmem:[%s13833_s21 + $0x68] sm:$0x3]  ;;  %s17994_s17 = scalar_lea.sflag [#allocation6], %s365_s25 }
  0x29   : > { %11476 = vmatpush3.bf16.msra.mxu0 %v13287_v18  ;;  %v1519_v13 = vsel %vm13849_vm6, %v1517_v3, %v1518_v55  ;;  %v1979_v14 = vrot.slane %v1803_v5, 7  ;;  %v1982_v15 = vrot.slane %v1804_v9, 7  ;;  %v599_v17 = vsel %vm13860_vm7, %v590_v6, %v598_v60  ;;  %v1337_v32 = vld [vmem:[%s13833_s21 + $0x60] sm:$0xc]  ;;  %v1338_v36 = vld [vmem:[%s13833_s21 + $0x64] sm:$0xf] }
  0x2a   : > { %11588 = vmatpush3.bf16.msra.mxu1 %v13288_v19  ;;  %11477 = vmatprep.subr.bf16.mxu0 %v13289_v20  ;;  %v13887_v18 = vcombine.low %v1516_v2, %v1519_v13  ;;  %v1512_v19 = vsel %vm13849_vm6, %v1510_v8, %v1511_v4  ;;  %v394_v20 = vld [vmem:[%s13833_s21 + $0x50] sm:$0xc]  ;;  %v10664_v47 = vrot.slane %v1337_v32, 10  ;;  %v1806_v48 = vld [vmem:[%s13833_s21 + $0x54] sm:$0xf]  ;;  %v1522_v51 = vrot.slane %v1338_v36, 6 }
  0x2b   : > { %11589 = vmatprep.subr.bf16.mxu1 %v13290_v21  ;;  %v13892_v21 = vcombine.low %v589_v12, %v599_v17  ;;  %v1805_v42 = vld [vmem:[%s13833_s21 + $0x50] sm:$0x8]  ;;  %v1525_v52 = vrot.slane %v1339_v37, 6  ;;  %v1807_v53 = vld [vmem:[%s13833_s21 + $0x58] sm:$0x7]  ;;  %v1986_v59 = vrot.slane %v1806_v48, 7 }
  0x2c   : > { %3463 = vmatprep.mubr.bf16.mxu1 %v13887_v18  ;;  %v10715_v54 = vrot.slane %v1805_v42, 11  ;;  %v13305_v55 = vld [vmem:[%s18037_s2 + $0x150] sm:$0xff]   ;;  %v1989_v60 = vrot.slane %v1807_v53, 7  ;;  %v397_v61 = vld [vmem:[%s13833_s21 + $0x60] sm:$0xc]  ;;  %v1523_v0 = vsel %vm13849_vm6, %v10664_v47, %v1522_v51  ;;  %v1524_v1 = vrot.slane %v1522_v51, 4 }
  0x2d   : > { %11478 = vmatpush3.bf16.msra.mxu0 %v13291_v22  ;;  %18178 = vst [vmem:[#allocation10_spill] sm:$0xff] %v13892_v21  ;;  %v10688_v22 = vcombine.low %v1509_v7, %v1512_v19  ;;  %3302 = vmatprep.mubr.bf16.mxu0 %v13892_v21  ;;  %v398_v62 = vld [vmem:[%s13833_s21 + $0x64] sm:$0xf]  ;;  %v399_v2 = vld [vmem:[%s13833_s21 + $0x68] sm:$0x7]  ;;  %v629_v3 = vshrl.u32 %v397_v61, 16 }
  0x2e   : > { %11590 = vmatpush3.bf16.msra.mxu1 %v13292_v23  ;;  %11479 = vmatprep.subr.bf16.mxu0 %v13293_v24  ;;  %v1980_v23 = vsel %vm13874_vm8, %v10714_v11, %v1979_v14  ;;  %v1981_v24 = vrot.slane %v1979_v14, 4  ;;  %v13306_v4 = vld [vmem:[%s18037_s2 + $0x110] sm:$0xff]   ;;  %v1987_v6 = vsel %vm13874_vm8, %v10715_v54, %v1986_v59  ;;  %v1988_v7 = vrot.slane %v1986_v59, 4  ;;  %v13307_v11 = vld [vmem:[%s18037_s2 + $0x158] sm:$0xff]   ;;  %v1810_v32 = vld [vmem:[%s13833_s21 + $0x68] sm:$0x7] }
  0x2f   : > { %11591 = vmatprep.subr.bf16.mxu1 %v13294_v25  ;;  %v395_v25 = vld [vmem:[%s13833_s21 + $0x54] sm:$0xf]  ;;  %v632_v8 = vshll.u32 %v397_v61, 16  ;;  %v1340_v9 = vld [vmem:[%s13833_s21 + $0x70] sm:$0xc]  ;;  %v1526_v13 = vsel %vm13849_vm6, %v1524_v1, %v1525_v52  ;;  %v631_v14 = vrot.slane %v629_v3, 6 }
  0x30   : > { %v1983_v33 = vsel %vm13874_vm8, %v1981_v24, %v1982_v15  ;;  %v638_v15 = vshrl.u32 %v398_v62, 16  ;;  %v1342_v17 = vld [vmem:[%s13833_s21 + $0x78] sm:$0x3]  ;;  %v1808_v24 = vld [vmem:[%s13833_s21 + $0x60] sm:$0x8]  ;;  %v10665_v36 = vrot.slane %v1340_v9, 10 }
  0x31   : > { %11480 = vmatpush3.bf16.msra.mxu0 %v13295_v26  ;;  %v396_v26 = vld [vmem:[%s13833_s21 + $0x58] sm:$0x7]  ;;  %v10740_v38 = vcombine.low %v1980_v23, %v1983_v33  ;;  %v634_v23 = vrot.slane %v632_v8, 7  ;;  %v13310_v37 = vld [vmem:[%s18037_s2 + $0x180] sm:$0xff]   ;;  %v400_v51 = vld [vmem:[%s13833_s21 + $0x70] sm:$0xc] }
  0x32   : > { %11592 = vmatpush3.bf16.msra.mxu1 %v13296_v27  ;;  %11481 = vmatprep.subr.bf16.mxu0 %v13297_v28  ;;  %v13303_v27 = vld [vmem:[%s18037_s2 + $0x148] sm:$0xff]   ;;  %v601_v28 = vshrl.u32 %v394_v20, 16  ;;  %v620_v34 = vshrl.u32 %v396_v26, 16  ;;  %v623_v35 = vshll.u32 %v396_v26, 16  ;;  %v13308_v26 = vld [vmem:[%s18037_s2 + $0x118] sm:$0xff]   ;;  %v660_v61 = vshll.u32 %v400_v51, 16 }
  0x33   : > { %11593 = vmatprep.subr.bf16.mxu1 %v13298_v29  ;;  %v604_v29 = vshll.u32 %v394_v20, 16  ;;  %v13939_v20 = vcombine.low %v1523_v0, %v1526_v13  ;;  %v635_v33 = vor.u32 %v634_v23, %v631_v14  ;;  %v401_v52 = vld [vmem:[%s13833_s21 + $0x74] sm:$0xf]  ;;  %v1344_v3 = vld [vmem:[%s13833_s21 + $0x84] sm:$0xf]  ;;  %s13563_s11 = scalar_lea.vmem %s17974_s22, 4096 }
  0x34   : > { %v603_v39 = vrot.slane %v601_v28, 6  ;;  %v622_v45 = vrot.slane %v620_v34, 6  ;;  %v625_v46 = vrot.slane %v623_v35, 7  ;;  %v648_v34 = vshrl.u32 %v399_v2, 16  ;;  %v1811_v9 = vld [vmem:[%s13833_s21 + $0x70] sm:$0x8]  ;;  %p13564_p11 = scmp.ne.s32.totalorder %s17974_s22, %s13563_s11 }
  0x35   : > { %11482 = vmatpush3.bf16.msra.mxu0 %v13299_v30  ;;  %v610_v30 = vshrl.u32 %v395_v25, 16  ;;  %v606_v40 = vrot.slane %v604_v29, 7  ;;  %v651_v35 = vshll.u32 %v399_v2, 16  ;;  %v636_v42 = vrot.slane %v635_v33, 4  ;;  %s13629_s12 = smov [#allocation5]  }
  0x36   : > { %11594 = vmatpush3.bf16.msra.mxu1 %v13300_v31  ;;  %11691 = vmatprep.subr.bf16.mxu0 %v13301_v57  ;;  %v613_v31 = vshll.u32 %v395_v25, 16  ;;  %v626_v57 = vor.u32 %v625_v46, %v622_v45  ;;  %v1809_v25 = vld [vmem:[%s13833_s21 + $0x64] sm:$0xf]  ;;  %v666_v2 = vshrl.u32 %v401_v52, 16  ;;  %v669_v8 = vshll.u32 %v401_v52, 16  ;;  %p13565_p12 = pnand %p13564_p11, %p13725_p5  ;;  %s13567_s18 = sshll.u32 %s13629_s12, 4  ;;  %s13568_s18 = int_to_ptr.vmem [resolvable:$false] %s13567_s18 }
  0x37   : > { %v612_v41 = vrot.slane %v610_v30, 6  ;;  %v607_v49 = vor.u32 %v606_v40, %v603_v39  ;;  %v640_v30 = vrot.slane %v638_v15, 6  ;;  %v1532_v40 = vrot.slane %v1342_v17, 6  ;;  %v13311_v17 = vld [vmem:[%s18037_s2 + $0x160] sm:$0xff]   ;;  %p13570_p0 = scmp.lt.s32.totalorder %s17974_s22, %s13568_s18 }
  0x38   : > { %3303 = vmatmul.mubr.bf16.vlgmr.msra.gmra.mrb[0].mxu0 %v10688_v22  ;;  %v615_v44 = vrot.slane %v613_v31, 7  ;;  %v1990_v22 = vsel %vm13874_vm8, %v1988_v7, %v1989_v60  ;;  %v641_v31 = vshll.u32 %v398_v62, 16  ;;  %v1993_v45 = vrot.slane %v1809_v25, 7  ;;  %v402_v60 = vld [vmem:[%s13833_s21 + $0x78] sm:$0x7]  ;;  %p13566_p13 = pneg %p13565_p12 }
  0x39   : > { %11692 = vmatpush3.bf16.msra.mxu0 %v13302_v16  ;;  %3464 = vmatmul.mubr.bf16.vlgmr.msra.gmra.mrb[0].mxu1 %v10740_v38  ;;  %v608_v63 = vrot.slane %v607_v49, 4  ;;  %v1341_v16 = vld [vmem:[%s13833_s21 + $0x74] sm:$0xf]  ;;  %v13953_v29 = vcombine.low %v1987_v6, %v1990_v22  ;;  %v1996_v49 = vrot.slane %v1810_v32, 7  ;;  %v1343_v62 = vld [vmem:[%s13833_s21 + $0x80] sm:$0xc] }
  0x3a   : > { %11693 = vmatprep.subr.bf16.mxu0 %v13303_v27  ;;  %v616_v56 = vor.u32 %v615_v44, %v612_v41  ;;  %v13309_v27 = vld [vmem:[%s18037_s2 + $0x1c0] sm:$0xff]   ;;  %3471 = vmatprep.mubr.bf16.mxu1 %v13939_v20  ;;  %v643_v38 = vrot.slane %v641_v31, 7  ;;  %v1529_v39 = vrot.slane %v1341_v16, 6  ;;  %v10716_v41 = vrot.slane %v1808_v24, 11  ;;  %v1813_v16 = vld [vmem:[%s13833_s21 + $0x78] sm:$0x7] }
  0x3b   : > { %v653_v44 = vrot.slane %v651_v35, 7  ;;  %11803 = vmatprep.subr.bf16.mxu1 %v13309_v27  ;;  %v1995_v54 = vrot.slane %v1993_v45, 4  ;;  %v662_v7 = vrot.slane %v660_v61, 7  ;;  %v668_v13 = vrot.slane %v666_v2, 6  ;;  %v403_v25 = vld [vmem:[%s13833_s21 + $0x80] sm:$0xc] }
  0x3c   : > { %v618_v5 = vrot.slane %v616_v56, 4  ;;  %v617_v12 = vsel %vm13860_vm7, %v608_v63, %v616_v56  ;;  %v644_v46 = vor.u32 %v643_v38, %v640_v30  ;;  %v1530_v47 = vsel %vm13849_vm6, %v10665_v36, %v1529_v39  ;;  %11804 = vmatpush3.bf16.msra.mxu1 %v13310_v37  ;;  %v404_v37 = vld [vmem:[%s13833_s21 + $0x84] sm:$0xf]  ;;  %v1814_v2 = vld [vmem:[%s13833_s21 + $0x80] sm:$0x8] }
  0x3d   : > { %11694 = vmatpush3.bf16.msra.mxu0 %v13304_v43  ;;  %v650_v43 = vrot.slane %v648_v34, 6  ;;  %v1531_v48 = vrot.slane %v1529_v39, 4  ;;  %v1997_v0 = vsel %vm13874_vm8, %v1995_v54, %v1996_v49  ;;  %v676_v14 = vshrl.u32 %v402_v60, 16  ;;  %v1347_v49 = vld [vmem:[%s13833_s21 + $0x94] sm:$0xf] }
  0x3e   : > { %11695 = vmatprep.subr.bf16.mxu0 %v13305_v55  ;;  %v627_v19 = vsel %vm13860_vm7, %v618_v5, %v626_v57  ;;  %v657_v55 = vshrl.u32 %v400_v51, 16  ;;  %v645_v56 = vsel %vm13860_vm7, %v636_v42, %v644_v46  ;;  %v646_v57 = vrot.slane %v644_v46, 4  ;;  %v1348_v54 = vld [vmem:[%s13833_s21 + $0x98] sm:$0x3] }
  0x3f   : > { %v13951_v28 = vcombine.low %v617_v12, %v627_v19  ;;  %v654_v53 = vor.u32 %v653_v44, %v650_v43  ;;  %v1533_v59 = vsel %vm13849_vm6, %v1531_v48, %v1532_v40  ;;  %v679_v15 = vshll.u32 %v402_v60, 16  ;;  %v13313_v43 = vld [vmem:[%s18037_s2 + $0x1c8] sm:$0xff]   ;;  %v1346_v48 = vld [vmem:[%s13833_s21 + $0x90] sm:$0xc] }
  0x40   : > { %v13975_v63 = vcombine.low %v1530_v47, %v1533_v59  ;;  %v659_v1 = vrot.slane %v657_v55, 6  ;;  %v671_v22 = vrot.slane %v669_v8, 7  ;;  %v10666_v23 = vrot.slane %v1343_v62, 10  ;;  %11805 = vmatprep.subr.bf16.mxu1 %v13313_v43  ;;  %v13314_v60 = vld [vmem:[%s18037_s2 + $0x188] sm:$0xff]   ;;  %v1815_v8 = vld [vmem:[%s13833_s21 + $0x84] sm:$0xf] }
  0x41   : > { %18179 = vst [vmem:[#allocation11_spill] sm:$0xff] %v13951_v28  ;;  %11696 = vmatpush3.bf16.msra.mxu0 %v13306_v4  ;;  %3310 = vmatprep.mubr.bf16.mxu0 %v13951_v28  ;;  %v1345_v4 = vld [vmem:[%s13833_s21 + $0x88] sm:$0x3]  ;;  %v655_v5 = vsel %vm13860_vm7, %v646_v57, %v654_v53  ;;  %v1536_v24 = vrot.slane %v1344_v3, 6  ;;  %v678_v27 = vrot.slane %v676_v14, 6  ;;  %v681_v30 = vrot.slane %v679_v15, 7 }
  0x42   : > { %3472 = vmatmul.mubr.bf16.gmra.mrb[4].mxu1 %v13953_v29  ;;  %3311 = vmatmul.mubr.bf16.gmra.mrb[4].mxu0 %v13887_v18  ;;  %v1994_v18 = vsel %vm13874_vm8, %v10716_v41, %v1993_v45  ;;  %v13987_v12 = vcombine.low %v645_v56, %v655_v5  ;;  %v663_v19 = vor.u32 %v662_v7, %v659_v1  ;;  %v1539_v31 = vrot.slane %v1345_v4, 6  ;;  %v405_v41 = vld [vmem:[%s13833_s21 + $0x88] sm:$0x7] }
  0x43   : > { %11697 = vmatprep.subr.bf16.mxu0 %v13307_v11  ;;  %v13983_v6 = vcombine.low %v1994_v18, %v1997_v0  ;;  %v1812_v11 = vld [vmem:[%s13833_s21 + $0x74] sm:$0xf]  ;;  %3479 = vmatprep.mubr.bf16.mxu1 %v13975_v63  ;;  %v10717_v32 = vrot.slane %v1811_v9, 11  ;;  %v672_v34 = vor.u32 %v671_v22, %v668_v13  ;;  %v1537_v35 = vsel %vm13849_vm6, %v10666_v23, %v1536_v24  ;;  %v1816_v9 = vld [vmem:[%s13833_s21 + $0x88] sm:$0x7] }
  0x44   : > { %18180 = vst [vmem:[#allocation12_spill] sm:$0xff] %v13987_v12  ;;  %3318 = vmatprep.mubr.bf16.mxu0 %v13987_v12  ;;  %v664_v33 = vrot.slane %v663_v19, 4  ;;  %v1538_v36 = vrot.slane %v1536_v24, 4  ;;  %v682_v38 = vor.u32 %v681_v30, %v678_v27  ;;  %v2000_v39 = vrot.slane %v1812_v11, 7  ;;  %11806 = vmatpush3.bf16.msra.mxu1 %v13314_v60  ;;  %v13315_v24 = vld [vmem:[%s18037_s2 + $0x168] sm:$0xff]  }
  0x45   : > { %11698 = vmatpush3.bf16.msra.mxu0 %v13308_v26  ;;  %v13312_v26 = vld [vmem:[%s18037_s2 + $0x120] sm:$0xff]   ;;  %v2003_v40 = vrot.slane %v1813_v16, 7  ;;  %v685_v42 = vshrl.u32 %v403_v25, 16  ;;  %v674_v45 = vrot.slane %v672_v34, 4  ;;  %v688_v47 = vshll.u32 %v403_v25, 16 }
  0x46   : > { %11699 = vmatprep.subr.bf16.mxu0 %v13311_v17  ;;  %v673_v44 = vsel %vm13860_vm7, %v664_v33, %v672_v34  ;;  %v1540_v46 = vsel %vm13849_vm6, %v1538_v36, %v1539_v31  ;;  %v2001_v52 = vsel %vm13874_vm8, %v10717_v32, %v2000_v39  ;;  %v2002_v53 = vrot.slane %v2000_v39, 4  ;;  %v406_v16 = vld [vmem:[%s13833_s21 + $0x90] sm:$0xc]  ;;  %v407_v31 = vld [vmem:[%s13833_s21 + $0x94] sm:$0xf]  ;;  %v13316_v36 = vld [vmem:[%s18037_s2 + $0x128] sm:$0xff]  }
  0x47   : > { %v14014_v51 = vcombine.low %v1537_v35, %v1540_v46  ;;  %v687_v18 = vrot.slane %v685_v42, 6  ;;  %v683_v55 = vsel %vm13860_vm7, %v674_v45, %v682_v38  ;;  %v690_v56 = vrot.slane %v688_v47, 7  ;;  %v1349_v42 = vld [vmem:[%s13833_s21 + $0xa0] sm:$0xc]  ;;  %v1350_v47 = vld [vmem:[%s13833_s21 + $0xa4] sm:$0xf] }
  0x48   : > { %v694_v57 = vshrl.u32 %v404_v37, 16  ;;  %v697_v59 = vshll.u32 %v404_v37, 16  ;;  %v14024_v61 = vcombine.low %v673_v44, %v683_v55  ;;  %v2004_v62 = vsel %vm13874_vm8, %v2002_v53, %v2003_v40  ;;  %v408_v40 = vld [vmem:[%s13833_s21 + $0x98] sm:$0x7]  ;;  %v1818_v55 = vld [vmem:[%s13833_s21 + $0x94] sm:$0xf] }
  0x49   : > { %11700 = vmatpush3.bf16.msra.mxu0 %v13312_v26  ;;  %v704_v0 = vshrl.u32 %v405_v41, 16  ;;  %v707_v1 = vshll.u32 %v405_v41, 16  ;;  %v14030_v3 = vcombine.low %v2001_v52, %v2004_v62  ;;  %v691_v4 = vor.u32 %v690_v56, %v687_v18  ;;  %v1819_v62 = vld [vmem:[%s13833_s21 + $0x98] sm:$0x7] }
  0x4a   : > { %3480 = vmatmul.mubr.bf16.gmra.mrb[8].mxu1 %v13983_v6  ;;  %3319 = vmatmul.mubr.bf16.gmra.mrb[8].mxu0 %v13939_v20  ;;  %18181 = vst [vmem:[#allocation13_spill] sm:$0xff] %v14024_v61  ;;  %v696_v5 = vrot.slane %v694_v57, 6  ;;  %v699_v7 = vrot.slane %v697_v59, 7  ;;  %v10667_v14 = vrot.slane %v1346_v48, 10  ;;  %v1543_v15 = vrot.slane %v1347_v49, 6 }
  0x4b   : > { %3487 = vmatprep.mubr.bf16.mxu1 %v14014_v51  ;;  %3326 = vmatprep.mubr.bf16.mxu0 %v14024_v61  ;;  %v706_v11 = vrot.slane %v704_v0, 6  ;;  %v709_v13 = vrot.slane %v707_v1, 7  ;;  %v692_v17 = vrot.slane %v691_v4, 4  ;;  %v1546_v22 = vrot.slane %v1348_v54, 6  ;;  %v1351_v48 = vld [vmem:[%s13833_s21 + $0xa8] sm:$0x3] }
  0x4c   : > { %v700_v19 = vor.u32 %v699_v7, %v696_v5  ;;  %v10718_v23 = vrot.slane %v1814_v2, 11  ;;  %v1544_v26 = vsel %vm13849_vm6, %v10667_v14, %v1543_v15  ;;  %v1545_v27 = vrot.slane %v1543_v15, 4  ;;  %11701 = vmatprep.subr.bf16.mxu0 %v13315_v24  ;;  %v1817_v54 = vld [vmem:[%s13833_s21 + $0x90] sm:$0x8]  ;;  %v409_v7 = vld [vmem:[%s13833_s21 + $0xa0] sm:$0xc] }
  0x4d   : > { %v710_v25 = vor.u32 %v709_v13, %v706_v11  ;;  %v2007_v30 = vrot.slane %v1815_v8, 7  ;;  %v2010_v34 = vrot.slane %v1816_v9, 7  ;;  %v713_v35 = vshrl.u32 %v406_v16, 16  ;;  %11702 = vmatpush3.bf16.msra.mxu0 %v13316_v36  ;;  %v13317_v0 = vld [vmem:[%s18037_s2 + $0x1d0] sm:$0xff]   ;;  %v410_v15 = vld [vmem:[%s13833_s21 + $0xa4] sm:$0xf] }
  0x4e   : > { %v701_v32 = vsel %vm13860_vm7, %v692_v17, %v700_v19  ;;  %v702_v33 = vrot.slane %v700_v19, 4  ;;  %v1547_v37 = vsel %vm13849_vm6, %v1545_v27, %v1546_v22  ;;  %v716_v41 = vshll.u32 %v406_v16, 16  ;;  %v13318_v8 = vld [vmem:[%s18037_s2 + $0x190] sm:$0xff]   ;;  %11807 = vmatprep.subr.bf16.mxu1 %v13317_v0  ;;  %v1822_v0 = vld [vmem:[%s13833_s21 + $0xa8] sm:$0x7] }
  0x4f   : > { %v2008_v38 = vsel %vm13874_vm8, %v10718_v23, %v2007_v30  ;;  %v2009_v39 = vrot.slane %v2007_v30, 4  ;;  %v14057_v44 = vcombine.low %v1544_v26, %v1547_v37  ;;  %v715_v45 = vrot.slane %v713_v35, 6  ;;  %v411_v23 = vld [vmem:[%s13833_s21 + $0xa8] sm:$0x7]  ;;  %11808 = vmatpush3.bf16.msra.mxu1 %v13318_v8  ;;  %v13319_v30 = vld [vmem:[%s18037_s2 + $0x170] sm:$0xff]  }
  0x50   : > { %v711_v43 = vsel %vm13860_vm7, %v702_v33, %v710_v25  ;;  %v722_v46 = vshrl.u32 %v407_v31, 16  ;;  %v718_v53 = vrot.slane %v716_v41, 7  ;;  %v725_v18 = vshll.u32 %v407_v31, 16  ;;  %11703 = vmatprep.subr.bf16.mxu0 %v13319_v30  ;;  %v13322_v30 = vld [vmem:[%s18037_s2 + $0x198] sm:$0xff]  }
  0x51   : > { %v14061_v49 = vcombine.low %v701_v32, %v711_v43  ;;  %v2011_v52 = vsel %vm13874_vm8, %v2009_v39, %v2010_v34  ;;  %v732_v59 = vshrl.u32 %v408_v40, 16  ;;  %v735_v60 = vshll.u32 %v408_v40, 16  ;;  %v1352_v39 = vld [vmem:[%s13833_s21 + $0xb0] sm:$0xc] }
  0x52   : > { %3327 = vmatmul.mubr.bf16.gmra.mrb[12].mxu0 %v13975_v63  ;;  %3488 = vmatmul.mubr.bf16.gmra.mrb[12].mxu1 %v14030_v3  ;;  %v14068_v56 = vcombine.low %v2008_v38, %v2011_v52  ;;  %v724_v57 = vrot.slane %v722_v46, 6  ;;  %v719_v1 = vor.u32 %v718_v53, %v715_v45  ;;  %v727_v2 = vrot.slane %v725_v18, 7  ;;  %v1353_v45 = vld [vmem:[%s13833_s21 + $0xb4] sm:$0xf]  ;;  %v1354_v18 = vld [vmem:[%s13833_s21 + $0xb8] sm:$0x3] }
  0x53   : > { %18182 = vst [vmem:[#allocation14_spill] sm:$0xff] %v14061_v49  ;;  %3495 = vmatprep.mubr.bf16.mxu1 %v14057_v44  ;;  %3334 = vmatprep.mubr.bf16.mxu0 %v14061_v49  ;;  %v10668_v4 = vrot.slane %v1349_v42, 10  ;;  %v1550_v5 = vrot.slane %v1350_v47, 6  ;;  %v734_v9 = vrot.slane %v732_v59, 6  ;;  %v737_v11 = vrot.slane %v735_v60, 7  ;;  %v13320_v46 = vld [vmem:[%s18037_s2 + $0x130] sm:$0xff]  }
  0x54   : > { %v1553_v13 = vrot.slane %v1351_v48, 6  ;;  %v10719_v14 = vrot.slane %v1817_v54, 11  ;;  %v720_v16 = vrot.slane %v719_v1, 4  ;;  %v728_v17 = vor.u32 %v727_v2, %v724_v57  ;;  %v1820_v54 = vld [vmem:[%s13833_s21 + $0xa0] sm:$0x8]  ;;  %11704 = vmatpush3.bf16.msra.mxu0 %v13320_v46 }
  0x55   : > { %v1551_v19 = vsel %vm13849_vm6, %v10668_v4, %v1550_v5  ;;  %v1552_v22 = vrot.slane %v1550_v5, 4  ;;  %v738_v24 = vor.u32 %v737_v11, %v734_v9  ;;  %v2014_v25 = vrot.slane %v1818_v55, 7 }
  0x56   : > { %v2017_v26 = vrot.slane %v1819_v62, 7  ;;  %v741_v27 = vshrl.u32 %v409_v7, 16  ;;  %v729_v31 = vsel %vm13860_vm7, %v720_v16, %v728_v17  ;;  %v730_v32 = vrot.slane %v728_v17, 4  ;;  %v1821_v62 = vld [vmem:[%s13833_s21 + $0xa4] sm:$0xf] }
  0x57   : > { %v1554_v33 = vsel %vm13849_vm6, %v1552_v22, %v1553_v13  ;;  %v744_v34 = vshll.u32 %v409_v7, 16  ;;  %v2015_v36 = vsel %vm13874_vm8, %v10719_v14, %v2014_v25  ;;  %v2016_v37 = vrot.slane %v2014_v25, 4  ;;  %v412_v7 = vld [vmem:[%s13833_s21 + $0xb0] sm:$0xc]  ;;  %v413_v14 = vld [vmem:[%s13833_s21 + $0xb4] sm:$0xf] }
  0x58   : > { %v14092_v35 = vcombine.low %v1551_v19, %v1554_v33  ;;  %v743_v38 = vrot.slane %v741_v27, 6  ;;  %v739_v40 = vsel %vm13860_vm7, %v730_v32, %v738_v24  ;;  %v750_v42 = vshrl.u32 %v410_v15, 16 }
  0x59   : > { %v746_v41 = vrot.slane %v744_v34, 7  ;;  %v753_v43 = vshll.u32 %v410_v15, 16  ;;  %v14103_v47 = vcombine.low %v729_v31, %v739_v40  ;;  %v2018_v48 = vsel %vm13874_vm8, %v2016_v37, %v2017_v26  ;;  %v13321_v15 = vld [vmem:[%s18037_s2 + $0x1d8] sm:$0xff]  }
  0x5a   : > { %3335 = vmatmul.mubr.bf16.gmra.mrb[16].mxu0 %v14014_v51  ;;  %3496 = vmatmul.mubr.bf16.gmra.mrb[16].mxu1 %v14068_v56  ;;  %v760_v52 = vshrl.u32 %v411_v23, 16  ;;  %v763_v53 = vshll.u32 %v411_v23, 16  ;;  %v14110_v55 = vcombine.low %v2015_v36, %v2018_v48  ;;  %v752_v59 = vrot.slane %v750_v42, 6  ;;  %v414_v23 = vld [vmem:[%s13833_s21 + $0xb8] sm:$0x7] }
  0x5b   : > { %18183 = vst [vmem:[#allocation15_spill] sm:$0xff] %v14103_v47  ;;  %3503 = vmatprep.mubr.bf16.mxu1 %v14092_v35  ;;  %v747_v57 = vor.u32 %v746_v41, %v743_v38  ;;  %v755_v60 = vrot.slane %v753_v43, 7  ;;  %3342 = vmatprep.mubr.bf16.mxu0 %v14103_v47  ;;  %v10669_v4 = vrot.slane %v1352_v39, 10  ;;  %v1557_v5 = vrot.slane %v1353_v45, 6  ;;  %v1355_v36 = vld [vmem:[%s13833_s21 + $0xc0] sm:$0xc] }
  0x5c   : > { %v762_v1 = vrot.slane %v760_v52, 6  ;;  %v765_v2 = vrot.slane %v763_v53, 7  ;;  %v1560_v11 = vrot.slane %v1354_v18, 6  ;;  %v10720_v13 = vrot.slane %v1820_v54, 11  ;;  %11809 = vmatprep.subr.bf16.mxu1 %v13321_v15  ;;  %v1356_v41 = vld [vmem:[%s13833_s21 + $0xc4] sm:$0xf] }
  0x5d   : > { %v748_v8 = vrot.slane %v747_v57, 4  ;;  %v756_v9 = vor.u32 %v755_v60, %v752_v59  ;;  %v1558_v17 = vsel %vm13849_vm6, %v10669_v4, %v1557_v5  ;;  %v1559_v19 = vrot.slane %v1557_v5, 4  ;;  %v1357_v42 = vld [vmem:[%s13833_s21 + $0xc8] sm:$0x3]  ;;  %11810 = vmatpush3.bf16.msra.mxu1 %v13322_v30  ;;  %v1823_v52 = vld [vmem:[%s13833_s21 + $0xb0] sm:$0x8] }
  0x5e   : > { %v766_v16 = vor.u32 %v765_v2, %v762_v1  ;;  %v2021_v22 = vrot.slane %v1821_v62, 7  ;;  %v2024_v26 = vrot.slane %v1822_v0, 7  ;;  %v769_v27 = vshrl.u32 %v412_v7, 16  ;;  %v1824_v53 = vld [vmem:[%s13833_s21 + $0xb4] sm:$0xf]  ;;  %v13323_v62 = vld [vmem:[%s18037_s2 + $0x178] sm:$0xff]  }
  0x5f   : > { %v757_v24 = vsel %vm13860_vm7, %v748_v8, %v756_v9  ;;  %v758_v25 = vrot.slane %v756_v9, 4  ;;  %v1561_v31 = vsel %vm13849_vm6, %v1559_v19, %v1560_v11  ;;  %v772_v34 = vshll.u32 %v412_v7, 16  ;;  %v1825_v60 = vld [vmem:[%s13833_s21 + $0xb8] sm:$0x7]  ;;  %v415_v5 = vld [vmem:[%s13833_s21 + $0xc0] sm:$0xc]  ;;  %11705 = vmatprep.subr.bf16.mxu0 %v13323_v62 }
  0x60   : > { %v2022_v32 = vsel %vm13874_vm8, %v10720_v13, %v2021_v22  ;;  %v2023_v33 = vrot.slane %v2021_v22, 4  ;;  %v14137_v38 = vcombine.low %v1558_v17, %v1561_v31  ;;  %v771_v39 = vrot.slane %v769_v27, 6  ;;  %v13324_v7 = vld [vmem:[%s18037_s2 + $0x1e0] sm:$0xff]   ;;  %v417_v22 = vld [vmem:[%s13833_s21 + $0xc8] sm:$0x7]  ;;  %v13325_v27 = vld [vmem:[%s18037_s2 + $0x138] sm:$0xff]  }
  0x61   : > { %v767_v37 = vsel %vm13860_vm7, %v758_v25, %v766_v16  ;;  %v778_v40 = vshrl.u32 %v413_v14, 16  ;;  %v774_v46 = vrot.slane %v772_v34, 7  ;;  %v781_v48 = vshll.u32 %v413_v14, 16  ;;  %v416_v14 = vld [vmem:[%s13833_s21 + $0xc4] sm:$0xf]  ;;  %11811 = vmatprep.subr.bf16.mxu1 %v13324_v7  ;;  %11706 = vmatpush3.bf16.msra.mxu0 %v13325_v27 }
  0x62   : > { %3343 = vmatmul.mubr.bf16.gmra.mrb[20].mxu0 %v14057_v44  ;;  %3504 = vmatmul.mubr.bf16.gmra.mrb[20].mxu1 %v14110_v55  ;;  %v14141_v43 = vcombine.low %v757_v24, %v767_v37  ;;  %v2025_v45 = vsel %vm13874_vm8, %v2023_v33, %v2024_v26  ;;  %v788_v57 = vshrl.u32 %v414_v23, 16  ;;  %v791_v59 = vshll.u32 %v414_v23, 16  ;;  %v1826_v62 = vld [vmem:[%s13833_s21 + $0xc0] sm:$0x8]  ;;  %v1828_v7 = vld [vmem:[%s13833_s21 + $0xc8] sm:$0x7] }
  0x63   : > { %3511 = vmatprep.mubr.bf16.mxu1 %v14137_v38  ;;  %v14148_v18 = vcombine.low %v2022_v32, %v2025_v45  ;;  %v780_v54 = vrot.slane %v778_v40, 6  ;;  %v775_v0 = vor.u32 %v774_v46, %v771_v39  ;;  %v783_v1 = vrot.slane %v781_v48, 7  ;;  %v1358_v40 = vld [vmem:[%s13833_s21 + $0xd0] sm:$0xc]  ;;  %v1359_v48 = vld [vmem:[%s13833_s21 + $0xd4] sm:$0xf] }
  0x64   : > { %18184 = vst [vmem:[#allocation16_spill] sm:$0xff] %v14141_v43  ;;  %3350 = vmatprep.mubr.bf16.mxu0 %v14141_v43  ;;  %v10670_v2 = vrot.slane %v1355_v36, 10  ;;  %v1564_v4 = vrot.slane %v1356_v41, 6  ;;  %v790_v8 = vrot.slane %v788_v57, 6  ;;  %v793_v9 = vrot.slane %v791_v59, 7 }
  0x65   : > { %v1567_v11 = vrot.slane %v1357_v42, 6  ;;  %v10721_v13 = vrot.slane %v1823_v52, 11  ;;  %v776_v15 = vrot.slane %v775_v0, 4  ;;  %v784_v16 = vor.u32 %v783_v1, %v780_v54  ;;  %v13326_v52 = vld [vmem:[%s18037_s2 + $0x1a0] sm:$0xff]  }
  0x66   : > { %v1565_v17 = vsel %vm13849_vm6, %v10670_v2, %v1564_v4  ;;  %v1566_v19 = vrot.slane %v1564_v4, 4  ;;  %v794_v23 = vor.u32 %v793_v9, %v790_v8  ;;  %v2028_v24 = vrot.slane %v1824_v53, 7  ;;  %11812 = vmatpush3.bf16.msra.mxu1 %v13326_v52 }
  0x67   : > { %v2031_v25 = vrot.slane %v1825_v60, 7  ;;  %v797_v26 = vshrl.u32 %v415_v5, 16  ;;  %v785_v30 = vsel %vm13860_vm7, %v776_v15, %v784_v16  ;;  %v786_v31 = vrot.slane %v784_v16, 4  ;;  %v1360_v60 = vld [vmem:[%s13833_s21 + $0xd8] sm:$0x3] }
  0x68   : > { %v1568_v32 = vsel %vm13849_vm6, %v1566_v19, %v1567_v11  ;;  %v800_v33 = vshll.u32 %v415_v5, 16  ;;  %v2029_v36 = vsel %vm13874_vm8, %v10721_v13, %v2028_v24  ;;  %v2030_v37 = vrot.slane %v2028_v24, 4  ;;  %v1827_v5 = vld [vmem:[%s13833_s21 + $0xc4] sm:$0xf] }
  0x69   : > { %v14172_v34 = vcombine.low %v1565_v17, %v1568_v32  ;;  %v799_v39 = vrot.slane %v797_v26, 6  ;;  %v795_v41 = vsel %vm13860_vm7, %v786_v31, %v794_v23  ;;  %v806_v45 = vshrl.u32 %v416_v14, 16  ;;  %v13327_v23 = vld [vmem:[%s18037_s2 + $0x1e8] sm:$0xff]  }
  0x6a   : > { %3351 = vmatmul.mubr.bf16.gmra.mrb[24].mxu0 %v14092_v35  ;;  %3512 = vmatmul.mubr.bf16.gmra.mrb[24].mxu1 %v14148_v18  ;;  %v802_v42 = vrot.slane %v800_v33, 7  ;;  %v809_v46 = vshll.u32 %v416_v14, 16  ;;  %v14183_v53 = vcombine.low %v785_v30, %v795_v41  ;;  %v2032_v54 = vsel %vm13874_vm8, %v2030_v37, %v2031_v25  ;;  %v418_v14 = vld [vmem:[%s13833_s21 + $0xd0] sm:$0xc]  ;;  %v420_v30 = vld [vmem:[%s13833_s21 + $0xd8] sm:$0x7] }
  0x6b   : > { %3519 = vmatprep.mubr.bf16.mxu1 %v14172_v34  ;;  %v816_v57 = vshrl.u32 %v417_v22, 16  ;;  %v819_v59 = vshll.u32 %v417_v22, 16  ;;  %v14190_v0 = vcombine.low %v2029_v36, %v2032_v54  ;;  %v808_v2 = vrot.slane %v806_v45, 6  ;;  %v419_v22 = vld [vmem:[%s13833_s21 + $0xd4] sm:$0xf]  ;;  %11813 = vmatprep.subr.bf16.mxu1 %v13327_v23  ;;  %v13328_v37 = vld [vmem:[%s18037_s2 + $0x1a8] sm:$0xff]  }
  0x6c   : > { %18185 = vst [vmem:[#allocation17_spill] sm:$0xff] %v14183_v53  ;;  %v803_v1 = vor.u32 %v802_v42, %v799_v39  ;;  %v811_v4 = vrot.slane %v809_v46, 7  ;;  %3358 = vmatprep.mubr.bf16.mxu0 %v14183_v53  ;;  %v10671_v11 = vrot.slane %v1358_v40, 10  ;;  %v1571_v13 = vrot.slane %v1359_v48, 6  ;;  %v1361_v45 = vld [vmem:[%s13833_s21 + $0xe0] sm:$0xc]  ;;  %11814 = vmatpush3.bf16.msra.mxu1 %v13328_v37 }
  0x6d   : > { %v818_v8 = vrot.slane %v816_v57, 6  ;;  %v821_v9 = vrot.slane %v819_v59, 7  ;;  %v1574_v17 = vrot.slane %v1360_v60, 6  ;;  %v10722_v19 = vrot.slane %v1826_v62, 11  ;;  %v1362_v57 = vld [vmem:[%s13833_s21 + $0xe4] sm:$0xf] }
  0x6e   : > { %v804_v15 = vrot.slane %v803_v1, 4  ;;  %v812_v16 = vor.u32 %v811_v4, %v808_v2  ;;  %v1572_v25 = vsel %vm13849_vm6, %v10671_v11, %v1571_v13  ;;  %v1573_v26 = vrot.slane %v1571_v13, 4  ;;  %v1363_v59 = vld [vmem:[%s13833_s21 + $0xe8] sm:$0x3]  ;;  %v1829_v4 = vld [vmem:[%s13833_s21 + $0xd0] sm:$0x8] }
  0x6f   : > { %v822_v24 = vor.u32 %v821_v9, %v818_v8  ;;  %v2035_v27 = vrot.slane %v1827_v5, 7  ;;  %v2038_v33 = vrot.slane %v1828_v7, 7  ;;  %v825_v36 = vshrl.u32 %v418_v14, 16  ;;  %v1830_v5 = vld [vmem:[%s13833_s21 + $0xd4] sm:$0xf] }
  0x70   : > { %v813_v31 = vsel %vm13860_vm7, %v804_v15, %v812_v16  ;;  %v814_v32 = vrot.slane %v812_v16, 4  ;;  %v1575_v39 = vsel %vm13849_vm6, %v1573_v26, %v1574_v17  ;;  %v828_v42 = vshll.u32 %v418_v14, 16  ;;  %v1831_v13 = vld [vmem:[%s13833_s21 + $0xd8] sm:$0x7]  ;;  %v13329_v14 = vld [vmem:[%s18037_s2 + $0x1f0] sm:$0xff]  }
  0x71   : > { %v2036_v40 = vsel %vm13874_vm8, %v10722_v19, %v2035_v27  ;;  %v2037_v41 = vrot.slane %v2035_v27, 4  ;;  %v14217_v48 = vcombine.low %v1572_v25, %v1575_v39  ;;  %v827_v52 = vrot.slane %v825_v36, 6  ;;  %v13330_v23 = vld [vmem:[%s18037_s2 + $0x1b0] sm:$0xff]   ;;  %v423_v37 = vld [vmem:[%s13833_s21 + $0xe8] sm:$0x7]  ;;  %11815 = vmatprep.subr.bf16.mxu1 %v13329_v14  ;;  %v13332_v14 = vld [vmem:[%s18037_s2 + $0x1b8] sm:$0xff]  }
  0x72   : > { %3359 = vmatmul.mubr.bf16.gmra.mrb[28].mxu0 %v14137_v38  ;;  %3520 = vmatmul.mubr.bf16.gmra.mrb[28].mxu1 %v14190_v0  ;;  %v823_v46 = vsel %vm13860_vm7, %v814_v32, %v822_v24  ;;  %v834_v54 = vshrl.u32 %v419_v22, 16  ;;  %v830_v1 = vrot.slane %v828_v42, 7  ;;  %v837_v2 = vshll.u32 %v419_v22, 16  ;;  %v421_v22 = vld [vmem:[%s13833_s21 + $0xe0] sm:$0xc] }
  0x73   : > { %v14221_v60 = vcombine.low %v813_v31, %v823_v46  ;;  %v2039_v62 = vsel %vm13874_vm8, %v2037_v41, %v2038_v33  ;;  %3527 = vmatprep.mubr.bf16.mxu1 %v14217_v48  ;;  %v844_v9 = vshrl.u32 %v420_v30, 16  ;;  %v847_v11 = vshll.u32 %v420_v30, 16  ;;  %v422_v30 = vld [vmem:[%s13833_s21 + $0xe4] sm:$0xf]  ;;  %11816 = vmatpush3.bf16.msra.mxu1 %v13330_v23  ;;  %v1832_v23 = vld [vmem:[%s13833_s21 + $0xe0] sm:$0x8] }
  0x74   : > { %v14228_v7 = vcombine.low %v2036_v40, %v2039_v62  ;;  %v836_v8 = vrot.slane %v834_v54, 6  ;;  %v831_v15 = vor.u32 %v830_v1, %v827_v52  ;;  %v839_v16 = vrot.slane %v837_v2, 7 }
  0x75   : > { %18186 = vst [vmem:[#allocation18_spill] sm:$0xff] %v14221_v60  ;;  %3366 = vmatprep.mubr.bf16.mxu0 %v14221_v60  ;;  %v10672_v17 = vrot.slane %v1361_v45, 10  ;;  %v1578_v19 = vrot.slane %v1362_v57, 6  ;;  %v846_v24 = vrot.slane %v844_v9, 6  ;;  %v849_v25 = vrot.slane %v847_v11, 7  ;;  %v13331_v45 = vld [vmem:[%s18037_s2 + $0x1f8] sm:$0xff]  }
  0x76   : > { %18187 = vst [vmem:[#allocation19_spill] sm:$0xff] %v14228_v7  ;;  %v1581_v26 = vrot.slane %v1363_v59, 6  ;;  %v10723_v27 = vrot.slane %v1829_v4, 11  ;;  %v832_v31 = vrot.slane %v831_v15, 4  ;;  %v840_v32 = vor.u32 %v839_v16, %v836_v8  ;;  %v1364_v4 = vld [vmem:[%s13833_s21 + $0xf0] sm:$0xc]  ;;  %11817 = vmatprep.subr.bf16.mxu1 %v13331_v45 }
  0x77   : > { %v1579_v33 = vsel %vm13849_vm6, %v10672_v17, %v1578_v19  ;;  %v1580_v36 = vrot.slane %v1578_v19, 4  ;;  %v850_v39 = vor.u32 %v849_v25, %v846_v24  ;;  %v2042_v40 = vrot.slane %v1830_v5, 7  ;;  %11818 = vmatpush3.bf16.msra.mxu1 %v13332_v14 }
  0x78   : > { %v2045_v41 = vrot.slane %v1831_v13, 7  ;;  %v853_v42 = vshrl.u32 %v421_v22, 16  ;;  %v841_v46 = vsel %vm13860_vm7, %v832_v31, %v840_v32  ;;  %v842_v52 = vrot.slane %v840_v32, 4  ;;  %v1365_v13 = vld [vmem:[%s13833_s21 + $0xf4] sm:$0xf] }
  0x79   : > { %v1582_v54 = vsel %vm13849_vm6, %v1580_v36, %v1581_v26  ;;  %v856_v57 = vshll.u32 %v421_v22, 16  ;;  %v2043_v62 = vsel %vm13874_vm8, %v10723_v27, %v2042_v40  ;;  %v2044_v1 = vrot.slane %v2042_v40, 4  ;;  %v1366_v22 = vld [vmem:[%s13833_s21 + $0xf8] sm:$0x3]  ;;  %v1834_v31 = vld [vmem:[%s13833_s21 + $0xe8] sm:$0x7] }
  0x7a   : > { %3367 = vmatmul.mubr.bf16.gmra.mrb[32].mxu0 %v14172_v34  ;;  %3528 = vmatmul.mubr.bf16.gmra.mrb[32].mxu1 %v14228_v7  ;;  %v14252_v59 = vcombine.low %v1579_v33, %v1582_v54  ;;  %v855_v2 = vrot.slane %v853_v42, 6  ;;  %v851_v5 = vsel %vm13860_vm7, %v842_v52, %v850_v39  ;;  %v862_v9 = vshrl.u32 %v422_v30, 16  ;;  %v424_v40 = vld [vmem:[%s13833_s21 + $0xf0] sm:$0xc]  ;;  %v14282_v52 = vld [vmem:[%s18037_s2 + $0x200] sm:$0xff]  }
  0x7b   : > { %v858_v8 = vrot.slane %v856_v57, 7  ;;  %v865_v11 = vshll.u32 %v422_v30, 16  ;;  %v14263_v15 = vcombine.low %v841_v46, %v851_v5  ;;  %v2046_v16 = vsel %vm13874_vm8, %v2044_v1, %v2045_v41  ;;  %v1833_v30 = vld [vmem:[%s13833_s21 + $0xe4] sm:$0xf]  ;;  %v425_v46 = vld [vmem:[%s13833_s21 + $0xf4] sm:$0xf]  ;;  %13023 = vmatprep.subr.bf16.mxu0 %v14282_v52 }
  0x7c   : > { %3535 = vmatprep.mubr.bf16.mxu1 %v14252_v59  ;;  %v872_v17 = vshrl.u32 %v423_v37, 16  ;;  %v875_v19 = vshll.u32 %v423_v37, 16  ;;  %v14270_v24 = vcombine.low %v2043_v62, %v2046_v16  ;;  %v864_v26 = vrot.slane %v862_v9, 6 }
  0x7d   : > { %18188 = vst [vmem:[#allocation20_spill] sm:$0xff] %v14263_v15  ;;  %v859_v25 = vor.u32 %v858_v8, %v855_v2  ;;  %v867_v27 = vrot.slane %v865_v11, 7  ;;  %3374 = vmatprep.mubr.bf16.mxu0 %v14263_v15  ;;  %v10673_v36 = vrot.slane %v1364_v4, 10  ;;  %v1585_v39 = vrot.slane %v1365_v13, 6  ;;  %v426_v2 = vld [vmem:[%s13833_s21 + $0xf8] sm:$0x7] }
  0x7e   : > { %18189 = vst [vmem:[#allocation21_spill] sm:$0xff] %v14270_v24  ;;  %v874_v32 = vrot.slane %v872_v17, 6  ;;  %v877_v33 = vrot.slane %v875_v19, 7  ;;  %v1588_v42 = vrot.slane %v1366_v22, 6  ;;  %v10724_v45 = vrot.slane %v1832_v23, 11 }
  0x7f   : > { %v860_v37 = vrot.slane %v859_v25, 4  ;;  %v868_v41 = vor.u32 %v867_v27, %v864_v26  ;;  %v1586_v57 = vsel %vm13849_vm6, %v10673_v36, %v1585_v39  ;;  %v1587_v62 = vrot.slane %v1585_v39, 4  ;;  %v1367_v17 = vld [vmem:[%s13833_s21 + $0x100] sm:$0xc]  ;;  %v1368_v26 = vld [vmem:[%s13833_s21 + $0x104] sm:$0xf] }
  0x80   : > { %v878_v54 = vor.u32 %v877_v33, %v874_v32  ;;  %v2049_v1 = vrot.slane %v1833_v30, 7  ;;  %v2052_v8 = vrot.slane %v1834_v31, 7  ;;  %v881_v9 = vshrl.u32 %v424_v40, 16  ;;  %v1369_v27 = vld [vmem:[%s13833_s21 + $0x108] sm:$0x3] }
  0x81   : > { %v869_v4 = vsel %vm13860_vm7, %v860_v37, %v868_v41  ;;  %v870_v5 = vrot.slane %v868_v41, 4  ;;  %v1589_v11 = vsel %vm13849_vm6, %v1587_v62, %v1588_v42  ;;  %v884_v16 = vshll.u32 %v424_v40, 16  ;;  %v1835_v36 = vld [vmem:[%s13833_s21 + $0xf0] sm:$0x8]  ;;  %v1836_v39 = vld [vmem:[%s13833_s21 + $0xf4] sm:$0xf] }
  0x82   : > { %3375 = vmatmul.mubr.bf16.gmra.mrb[36].mxu0 %v14217_v48  ;;  %3536 = vmatmul.mubr.bf16.gmra.mrb[36].mxu1 %v14270_v24  ;;  %v2050_v13 = vsel %vm13874_vm8, %v10724_v45, %v2049_v1  ;;  %v2051_v14 = vrot.slane %v2049_v1, 4  ;;  %v14297_v22 = vcombine.low %v1586_v57, %v1589_v11  ;;  %v883_v23 = vrot.slane %v881_v9, 6  ;;  %v1837_v45 = vld [vmem:[%s13833_s21 + $0xf8] sm:$0x7]  ;;  %v428_v11 = vld [vmem:[%s13833_s21 + $0x104] sm:$0xf] }
  0x83   : > { %v879_v19 = vsel %vm13860_vm7, %v870_v5, %v878_v54  ;;  %v890_v25 = vshrl.u32 %v425_v46, 16  ;;  %v886_v32 = vrot.slane %v884_v16, 7  ;;  %v893_v33 = vshll.u32 %v425_v46, 16 }
  0x84   : > { %v14301_v30 = vcombine.low %v869_v4, %v879_v19  ;;  %v2053_v31 = vsel %vm13874_vm8, %v2051_v14, %v2052_v8  ;;  %3543 = vmatprep.mubr.bf16.mxu1 %v14297_v22  ;;  %v900_v41 = vshrl.u32 %v426_v2, 16  ;;  %v903_v42 = vshll.u32 %v426_v2, 16  ;;  %v427_v4 = vld [vmem:[%s13833_s21 + $0x100] sm:$0xc]  ;;  %v429_v19 = vld [vmem:[%s13833_s21 + $0x108] sm:$0x7] }
  0x85   : > { %v14308_v40 = vcombine.low %v2050_v13, %v2053_v31  ;;  %v892_v37 = vrot.slane %v890_v25, 6  ;;  %v887_v54 = vor.u32 %v886_v32, %v883_v23  ;;  %v895_v57 = vrot.slane %v893_v33, 7  ;;  %v13337_v31 = vld [vmem:[%s18037_s2 + $0x280] sm:$0xff]  }
  0x86   : > { %18190 = vst [vmem:[#allocation22_spill] sm:$0xff] %v14301_v30  ;;  %3382 = vmatprep.mubr.bf16.mxu0 %v14301_v30  ;;  %v10674_v62 = vrot.slane %v1367_v17, 10  ;;  %v1592_v1 = vrot.slane %v1368_v26, 6  ;;  %v902_v46 = vrot.slane %v900_v41, 6  ;;  %v905_v5 = vrot.slane %v903_v42, 7  ;;  %11939 = vmatprep.subr.bf16.mxu1 %v13337_v31 }
  0x87   : > { %18191 = vst [vmem:[#allocation23_spill] sm:$0xff] %v14308_v40  ;;  %v1595_v8 = vrot.slane %v1369_v27, 6  ;;  %v10725_v9 = vrot.slane %v1835_v36, 11  ;;  %v888_v13 = vrot.slane %v887_v54, 4  ;;  %v896_v2 = vor.u32 %v895_v57, %v892_v37 }
  0x88   : > { %v1593_v14 = vsel %vm13849_vm6, %v10674_v62, %v1592_v1  ;;  %v1594_v16 = vrot.slane %v1592_v1, 4  ;;  %v906_v17 = vor.u32 %v905_v5, %v902_v46  ;;  %v2056_v23 = vrot.slane %v1836_v39, 7 }
  0x89   : > { %v2059_v25 = vrot.slane %v1837_v45, 7  ;;  %v909_v26 = vshrl.u32 %v427_v4, 16  ;;  %v897_v27 = vsel %vm13860_vm7, %v888_v13, %v896_v2  ;;  %v898_v32 = vrot.slane %v896_v2, 4  ;;  %v1370_v45 = vld [vmem:[%s13833_s21 + $0x110] sm:$0xc] }
  0x8a   : > { %3383 = vmatmul.mubr.bf16.gmra.mrb[40].mxu0 %v14252_v59  ;;  %3544 = vmatmul.mubr.bf16.gmra.mrb[40].mxu1 %v14308_v40  ;;  %v1596_v33 = vsel %vm13849_vm6, %v1594_v16, %v1595_v8  ;;  %v912_v36 = vshll.u32 %v427_v4, 16  ;;  %v2057_v39 = vsel %vm13874_vm8, %v10725_v9, %v2056_v23  ;;  %v2058_v41 = vrot.slane %v2056_v23, 4  ;;  %v1371_v4 = vld [vmem:[%s13833_s21 + $0x114] sm:$0xf]  ;;  %v1372_v13 = vld [vmem:[%s13833_s21 + $0x118] sm:$0x3] }
  0x8b   : > { %v14326_v37 = vcombine.low %v1593_v14, %v1596_v33  ;;  %v911_v42 = vrot.slane %v909_v26, 6  ;;  %v907_v54 = vsel %vm13860_vm7, %v898_v32, %v906_v17  ;;  %v918_v62 = vshrl.u32 %v428_v11, 16  ;;  %v1838_v2 = vld [vmem:[%s13833_s21 + $0x100] sm:$0x8]  ;;  %v1840_v26 = vld [vmem:[%s13833_s21 + $0x108] sm:$0x7] }
  0x8c   : > { %v914_v57 = vrot.slane %v912_v36, 7  ;;  %v921_v1 = vshll.u32 %v428_v11, 16  ;;  %v14334_v46 = vcombine.low %v897_v27, %v907_v54  ;;  %v2060_v5 = vsel %vm13874_vm8, %v2058_v41, %v2059_v25  ;;  %v1839_v11 = vld [vmem:[%s13833_s21 + $0x104] sm:$0xf]  ;;  %v430_v33 = vld [vmem:[%s13833_s21 + $0x110] sm:$0xc] }
  0x8d   : > { %18192 = vst [vmem:[#allocation24_spill] sm:$0xff] %v14326_v37  ;;  %3551 = vmatprep.mubr.bf16.mxu1 %v14326_v37  ;;  %v928_v8 = vshrl.u32 %v429_v19, 16  ;;  %v931_v9 = vshll.u32 %v429_v19, 16  ;;  %v14341_v14 = vcombine.low %v2057_v39, %v2060_v5  ;;  %v920_v17 = vrot.slane %v918_v62, 6 }
  0x8e   : > { %18193 = vst [vmem:[#allocation25_spill] sm:$0xff] %v14334_v46  ;;  %v915_v16 = vor.u32 %v914_v57, %v911_v42  ;;  %v923_v23 = vrot.slane %v921_v1, 7  ;;  %3390 = vmatprep.mubr.bf16.mxu0 %v14334_v46  ;;  %v10675_v32 = vrot.slane %v1370_v45, 10  ;;  %v1599_v25 = vrot.slane %v1371_v4, 6  ;;  %v431_v42 = vld [vmem:[%s13833_s21 + $0x114] sm:$0xf] }
  0x8f   : > { %18194 = vst [vmem:[#allocation26_spill] sm:$0xff] %v14341_v14  ;;  %v930_v31 = vrot.slane %v928_v8, 6  ;;  %v933_v27 = vrot.slane %v931_v9, 7  ;;  %v1602_v39 = vrot.slane %v1372_v13, 6  ;;  %v10726_v41 = vrot.slane %v1838_v2, 11 }
  0x90   : > { %v916_v19 = vrot.slane %v915_v16, 4  ;;  %v924_v36 = vor.u32 %v923_v23, %v920_v17  ;;  %v1600_v57 = vsel %vm13849_vm6, %v10675_v32, %v1599_v25  ;;  %v1601_v62 = vrot.slane %v1599_v25, 4  ;;  %v432_v45 = vld [vmem:[%s13833_s21 + $0x118] sm:$0x7]  ;;  %v1373_v23 = vld [vmem:[%s13833_s21 + $0x120] sm:$0xc] }
  0x91   : > { %v934_v54 = vor.u32 %v933_v27, %v930_v31  ;;  %v2063_v1 = vrot.slane %v1839_v11, 7  ;;  %v2066_v8 = vrot.slane %v1840_v26, 7  ;;  %v937_v9 = vshrl.u32 %v430_v33, 16  ;;  %v1374_v32 = vld [vmem:[%s13833_s21 + $0x124] sm:$0xf] }
  0x92   : > { %3391 = vmatmul.mubr.bf16.gmra.mrb[44].mxu0 %v14297_v22  ;;  %3552 = vmatmul.mubr.bf16.gmra.mrb[44].mxu1 %v14341_v14  ;;  %v925_v4 = vsel %vm13860_vm7, %v916_v19, %v924_v36  ;;  %v926_v5 = vrot.slane %v924_v36, 4  ;;  %v1603_v13 = vsel %vm13849_vm6, %v1601_v62, %v1602_v39  ;;  %v940_v17 = vshll.u32 %v430_v33, 16  ;;  %v1375_v25 = vld [vmem:[%s13833_s21 + $0x128] sm:$0x3]  ;;  %v1841_v33 = vld [vmem:[%s13833_s21 + $0x110] sm:$0x8] }
  0x93   : > { %v2064_v2 = vsel %vm13874_vm8, %v10726_v41, %v2063_v1  ;;  %v2065_v16 = vrot.slane %v2063_v1, 4  ;;  %v14362_v31 = vcombine.low %v1600_v57, %v1603_v13  ;;  %v939_v27 = vrot.slane %v937_v9, 6  ;;  %v1842_v62 = vld [vmem:[%s13833_s21 + $0x114] sm:$0xf]  ;;  %v1843_v9 = vld [vmem:[%s13833_s21 + $0x118] sm:$0x7] }
  0x94   : > { %v935_v11 = vsel %vm13860_vm7, %v926_v5, %v934_v54  ;;  %v946_v26 = vshrl.u32 %v431_v42, 16  ;;  %v942_v39 = vrot.slane %v940_v17, 7  ;;  %v949_v41 = vshll.u32 %v431_v42, 16  ;;  %v433_v17 = vld [vmem:[%s13833_s21 + $0x120] sm:$0xc] }
  0x95   : > { %18195 = vst [vmem:[#allocation27_spill] sm:$0xff] %v14362_v31  ;;  %v14366_v19 = vcombine.low %v925_v4, %v935_v11  ;;  %v2067_v36 = vsel %vm13874_vm8, %v2065_v16, %v2066_v8  ;;  %3559 = vmatprep.mubr.bf16.mxu1 %v14362_v31  ;;  %v956_v1 = vshrl.u32 %v432_v45, 16  ;;  %v959_v5 = vshll.u32 %v432_v45, 16  ;;  %v434_v45 = vld [vmem:[%s13833_s21 + $0x124] sm:$0xf] }
  0x96   : > { %v14373_v54 = vcombine.low %v2064_v2, %v2067_v36  ;;  %v948_v57 = vrot.slane %v946_v26, 6  ;;  %v943_v4 = vor.u32 %v942_v39, %v939_v27  ;;  %v951_v13 = vrot.slane %v949_v41, 7 }
  0x97   : > { %18196 = vst [vmem:[#allocation28_spill] sm:$0xff] %v14366_v19  ;;  %3398 = vmatprep.mubr.bf16.mxu0 %v14366_v19  ;;  %v10676_v8 = vrot.slane %v1373_v23, 10  ;;  %v1606_v16 = vrot.slane %v1374_v32, 6  ;;  %v958_v42 = vrot.slane %v956_v1, 6  ;;  %v961_v2 = vrot.slane %v959_v5, 7 }
  0x98   : > { %18197 = vst [vmem:[#allocation29_spill] sm:$0xff] %v14373_v54  ;;  %v1609_v11 = vrot.slane %v1375_v25, 6  ;;  %v10727_v26 = vrot.slane %v1841_v33, 11  ;;  %v944_v36 = vrot.slane %v943_v4, 4  ;;  %v952_v21 = vor.u32 %v951_v13, %v948_v57  ;;  %v435_v23 = vld [vmem:[%s13833_s21 + $0x128] sm:$0x7] }
  0x99   : > { %v1607_v27 = vsel %vm13849_vm6, %v10676_v8, %v1606_v16  ;;  %v1608_v39 = vrot.slane %v1606_v16, 4  ;;  %v962_v32 = vor.u32 %v961_v2, %v958_v42  ;;  %v2070_v41 = vrot.slane %v1842_v62, 7  ;;  %v1376_v5 = vld [vmem:[%s13833_s21 + $0x130] sm:$0xc]  ;;  %v1377_v4 = vld [vmem:[%s13833_s21 + $0x134] sm:$0xf] }
  0x9a   : > { %3399 = vmatmul.mubr.bf16.gmra.mrb[48].mxu0 %v14326_v37  ;;  %3560 = vmatmul.mubr.bf16.gmra.mrb[48].mxu1 %v14373_v54  ;;  %v2073_v37 = vrot.slane %v1843_v9, 7  ;;  %v965_v54 = vshrl.u32 %v433_v17, 16  ;;  %v953_v25 = vsel %vm13860_vm7, %v944_v36, %v952_v21  ;;  %v954_v33 = vrot.slane %v952_v21, 4  ;;  %v1378_v16 = vld [vmem:[%s13833_s21 + $0x138] sm:$0x3] }
  0x9b   : > { %v1610_v1 = vsel %vm13849_vm6, %v1608_v39, %v1609_v11  ;;  %v968_v57 = vshll.u32 %v433_v17, 16  ;;  %v2071_v8 = vsel %vm13874_vm8, %v10727_v26, %v2070_v41  ;;  %v2072_v62 = vrot.slane %v2070_v41, 4  ;;  %v1844_v42 = vld [vmem:[%s13833_s21 + $0x120] sm:$0x8]  ;;  %v1845_v11 = vld [vmem:[%s13833_s21 + $0x124] sm:$0xf] }
  0x9c   : > { %v14390_v13 = vcombine.low %v1607_v27, %v1610_v1  ;;  %v967_v9 = vrot.slane %v965_v54, 6  ;;  %v963_v2 = vsel %vm13860_vm7, %v954_v33, %v962_v32  ;;  %v974_v36 = vshrl.u32 %v434_v45, 16  ;;  %v1846_v41 = vld [vmem:[%s13833_s21 + $0x128] sm:$0x7] }
  0x9d   : > { %v970_v21 = vrot.slane %v968_v57, 7  ;;  %v977_v19 = vshll.u32 %v434_v45, 16  ;;  %v14399_v17 = vcombine.low %v953_v25, %v963_v2  ;;  %v2074_v27 = vsel %vm13874_vm8, %v2072_v62, %v2073_v37 }
  0x9e   : > { %3567 = vmatprep.mubr.bf16.mxu1 %v14390_v13  ;;  %v984_v39 = vshrl.u32 %v435_v23, 16  ;;  %v987_v26 = vshll.u32 %v435_v23, 16  ;;  %v14405_v54 = vcombine.low %v2071_v8, %v2074_v27  ;;  %v976_v14 = vrot.slane %v974_v36, 6 }
  0x9f   : > { %18198 = vst [vmem:[#allocation30_spill] sm:$0xff] %v14399_v17  ;;  %v971_v1 = vor.u32 %v970_v21, %v967_v9  ;;  %v979_v32 = vrot.slane %v977_v19, 7  ;;  %3406 = vmatprep.mubr.bf16.mxu0 %v14399_v17  ;;  %v10677_v33 = vrot.slane %v1376_v5, 10  ;;  %v1613_v57 = vrot.slane %v1377_v4, 6  ;;  %v436_v9 = vld [vmem:[%s13833_s21 + $0x130] sm:$0xc] }
  0xa0   : > { %18199 = vst [vmem:[#allocation31_spill] sm:$0xff] %v14405_v54  ;;  %v986_v45 = vrot.slane %v984_v39, 6  ;;  %v989_v25 = vrot.slane %v987_v26, 7  ;;  %v1616_v62 = vrot.slane %v1378_v16, 6  ;;  %v10728_v8 = vrot.slane %v1844_v42, 11 }
  0xa1   : > { %v972_v37 = vrot.slane %v971_v1, 4  ;;  %v980_v23 = vor.u32 %v979_v32, %v976_v14  ;;  %v1614_v2 = vsel %vm13849_vm6, %v10677_v33, %v1613_v57  ;;  %v1615_v21 = vrot.slane %v1613_v57, 4  ;;  %v437_v5 = vld [vmem:[%s13833_s21 + $0x134] sm:$0xf]  ;;  %v438_v14 = vld [vmem:[%s13833_s21 + $0x138] sm:$0x7] }
  0xa2   : > { %3407 = vmatmul.mubr.bf16.gmra.mrb[52].mxu0 %v14362_v31  ;;  %3568 = vmatmul.mubr.bf16.gmra.mrb[52].mxu1 %v14405_v54  ;;  %v990_v19 = vor.u32 %v989_v25, %v986_v45  ;;  %v2077_v36 = vrot.slane %v1845_v11, 7  ;;  %v2080_v39 = vrot.slane %v1846_v41, 7  ;;  %v993_v16 = vshrl.u32 %v436_v9, 16  ;;  %v1379_v32 = vld [vmem:[%s13833_s21 + $0x140] sm:$0xc] }
  0xa3   : > { %v981_v4 = vsel %vm13860_vm7, %v972_v37, %v980_v23  ;;  %v982_v27 = vrot.slane %v980_v23, 4  ;;  %v1617_v42 = vsel %vm13849_vm6, %v1615_v21, %v1616_v62  ;;  %v996_v11 = vshll.u32 %v436_v9, 16  ;;  %v1380_v45 = vld [vmem:[%s13833_s21 + $0x144] sm:$0xf]  ;;  %v1381_v37 = vld [vmem:[%s13833_s21 + $0x148] sm:$0x3] }
  0xa4   : > { %v2078_v26 = vsel %vm13874_vm8, %v10728_v8, %v2077_v36  ;;  %v2079_v1 = vrot.slane %v2077_v36, 4  ;;  %v14425_v33 = vcombine.low %v1614_v2, %v1617_v42  ;;  %v995_v41 = vrot.slane %v993_v16, 6  ;;  %v1847_v23 = vld [vmem:[%s13833_s21 + $0x130] sm:$0x8]  ;;  %v1848_v36 = vld [vmem:[%s13833_s21 + $0x134] sm:$0xf] }
  0xa5   : > { %v991_v25 = vsel %vm13860_vm7, %v982_v27, %v990_v19  ;;  %v1002_v57 = vshrl.u32 %v437_v5, 16  ;;  %v998_v8 = vrot.slane %v996_v11, 7  ;;  %v1005_v21 = vshll.u32 %v437_v5, 16  ;;  %v1849_v9 = vld [vmem:[%s13833_s21 + $0x138] sm:$0x7] }
  0xa6   : > { %v14429_v54 = vcombine.low %v981_v4, %v991_v25  ;;  %v2081_v62 = vsel %vm13874_vm8, %v2079_v1, %v2080_v39  ;;  %3575 = vmatprep.mubr.bf16.mxu1 %v14425_v33  ;;  %v1012_v2 = vshrl.u32 %v438_v14, 16  ;;  %v1015_v27 = vshll.u32 %v438_v14, 16 }
  0xa7   : > { %v14436_v31 = vcombine.low %v2078_v26, %v2081_v62  ;;  %v1004_v19 = vrot.slane %v1002_v57, 6  ;;  %v999_v16 = vor.u32 %v998_v8, %v995_v41  ;;  %v1007_v42 = vrot.slane %v1005_v21, 7 }
  0xa8   : > { %18200 = vst [vmem:[#allocation32_spill] sm:$0xff] %v14429_v54  ;;  %3414 = vmatprep.mubr.bf16.mxu0 %v14429_v54  ;;  %v10678_v4 = vrot.slane %v1379_v32, 10  ;;  %v1620_v25 = vrot.slane %v1380_v45, 6  ;;  %v1014_v5 = vrot.slane %v1012_v2, 6  ;;  %v1017_v39 = vrot.slane %v1015_v27, 7  ;;  %v13340_v27 = vld [vmem:[%s18037_s2 + $0x288] sm:$0xff]  }
  0xa9   : > { %v1623_v1 = vrot.slane %v1381_v37, 6  ;;  %v10729_v11 = vrot.slane %v1847_v23, 11  ;;  %v1000_v17 = vrot.slane %v999_v16, 4  ;;  %v1008_v26 = vor.u32 %v1007_v42, %v1004_v19  ;;  %v13336_v16 = vld [vmem:[%s18037_s2 + $0x218] sm:$0xff]   ;;  %v13344_v42 = vld [vmem:[%s18037_s2 + $0x250] sm:$0xff]  }
  0xaa   : > { %3415 = vmatmul.mubr.bf16.gmra.mrb[56].mxu0 %v14390_v13  ;;  %3576 = vmatmul.mubr.bf16.gmra.mrb[56].mxu1 %v14436_v31  ;;  %v1621_v57 = vsel %vm13849_vm6, %v10678_v4, %v1620_v25  ;;  %v1622_v14 = vrot.slane %v1620_v25, 4  ;;  %v1018_v62 = vor.u32 %v1017_v39, %v1014_v5  ;;  %v2084_v54 = vrot.slane %v1848_v36, 7  ;;  %v13346_v4 = vld [vmem:[%s18037_s2 + $0x298] sm:$0xff]   ;;  %v13339_v25 = vld [vmem:[%s18037_s2 + $0x220] sm:$0xff]   ;;  %v13342_v39 = vld [vmem:[%s18037_s2 + $0x228] sm:$0xff]  }
  0xab   : > { %v2087_v41 = vrot.slane %v1849_v9, 7  ;;  %v1009_v32 = vsel %vm13860_vm7, %v1000_v17, %v1008_v26  ;;  %v1010_v45 = vrot.slane %v1008_v26, 4  ;;  %v13338_v9 = vld [vmem:[%s18037_s2 + $0x240] sm:$0xff]   ;;  %v13345_v26 = vld [vmem:[%s18037_s2 + $0x230] sm:$0xff]  }
  0xac   : > { %v1624_v8 = vsel %vm13849_vm6, %v1622_v14, %v1623_v1  ;;  %v2085_v37 = vsel %vm13874_vm8, %v10729_v11, %v2084_v54  ;;  %v2086_v23 = vrot.slane %v2084_v54, 4  ;;  %v13334_v54 = vld [vmem:[%s18037_s2 + $0x208] sm:$0xff]   ;;  %v13349_v5 = vld [vmem:[%s18037_s2 + $0x2a0] sm:$0xff]   ;;  %v13348_v14 = vld [vmem:[%s18037_s2 + $0x238] sm:$0xff]  }
  0xad   : > { %v14447_v21 = vcombine.low %v1621_v57, %v1624_v8  ;;  %v1019_v19 = vsel %vm13860_vm7, %v1010_v45, %v1018_v62  ;;  %v13350_v1 = vld [vmem:[%s18037_s2 + $0x260] sm:$0xff]   ;;  %v13351_v11 = vld [vmem:[%s18037_s2 + $0x2a8] sm:$0xff]   ;;  %v13353_v57 = vld [vmem:[%s18037_s2 + $0x2b0] sm:$0xff]  }
  0xae   : > { %v14453_v2 = vcombine.low %v1009_v32, %v1019_v19  ;;  %v2088_v17 = vsel %vm13874_vm8, %v2086_v23, %v2087_v41  ;;  %v13354_v62 = vld [vmem:[%s18037_s2 + $0x270] sm:$0xff]   ;;  %v13355_v41 = vld [vmem:[%s18037_s2 + $0x2b8] sm:$0xff]   ;;  %v440_v45 = vld [vmem:[%s13833_s21 + $0x144] sm:$0xf] }
  0xaf   : > { %3583 = vmatprep.mubr.bf16.mxu1 %v14447_v21  ;;  %v14458_v36 = vcombine.low %v2085_v37, %v2088_v17  ;;  %v13356_v32 = vld [vmem:[%s18037_s2 + $0x278] sm:$0xff]   ;;  %v441_v8 = vld [vmem:[%s13833_s21 + $0x148] sm:$0x7]  ;;  %v1030_v23 = vshrl.u32 %v440_v45, 16  ;;  %v1033_v19 = vshll.u32 %v440_v45, 16 }
  0xb0   : > { %18201 = vst [vmem:[#allocation33_spill] sm:$0xff] %v14453_v2  ;;  %3422 = vmatprep.mubr.bf16.mxu0 %v14453_v2  ;;  %v1043_v17 = vshll.u32 %v441_v8, 16 }
  0xb2   : > { %3423 = vmatmul.mubr.bf16.gmra.mrb[60].mxu0 %v14425_v33  ;;  %3584 = vmatmul.mubr.bf16.gmra.mrb[60].mxu1 %v14458_v36 }
  0xb3   : > { %3624 = vmatprep.mubr.bf16.mxu0 %v13953_v29  ;;  %3785 = vmatprep.mubr.bf16.mxu1 %v13987_v12  ;;  %v13335_v29 = vld [vmem:[%s18037_s2 + $0x210] sm:$0xff]  }
  0xba   : > { %3625 = vmatmul.mubr.bf16.vlgmr.msra.gmra.mrb[64].mxu0 %v13951_v28  ;;  %3786 = vmatmul.mubr.bf16.vlgmr.msra.gmra.mrb[64].mxu1 %v13939_v20  ;;  %v13341_v20 = vld [vmem:[%s18037_s2 + $0x248] sm:$0xff]  }
  0xbb   : > { %13024 = vmatpush3.bf16.msra.mxu0 %v14282_v52  ;;  %3632 = vmatprep.mubr.bf16.mxu0 %v13983_v6  ;;  %v13343_v52 = vld [vmem:[%s18037_s2 + $0x290] sm:$0xff]  }
  0xbc   : > { %3793 = vmatprep.mubr.bf16.mxu1 %v14024_v61  ;;  %13025 = vmatprep.subr.bf16.mxu0 %v13334_v54 }
  0xbd   : > { %11940 = vmatpush3.bf16.msra.mxu1 %v13338_v9 }
  0xbe   : > { %11941 = vmatprep.subr.bf16.mxu1 %v13340_v27  ;;  %v1032_v27 = vrot.slane %v1030_v23, 6 }
  0xbf   : > { %13026 = vmatpush3.bf16.msra.mxu0 %v13334_v54 }
  0xc0   : > { %13027 = vmatprep.subr.bf16.mxu0 %v13335_v29 }
  0xc1   : > { %11942 = vmatpush3.bf16.msra.mxu1 %v13341_v20  ;;  %v14571_v20 = vld [vmem:[%s13833_s21 + $0x144] sm:$0xf] }
  0xc2   : > { %3633 = vmatmul.mubr.bf16.gmra.mrb[68].mxu0 %v13987_v12  ;;  %3794 = vmatmul.mubr.bf16.gmra.mrb[68].mxu1 %v13975_v63  ;;  %v13347_v63 = vld [vmem:[%s18037_s2 + $0x258] sm:$0xff]  }
  0xc3   : > { %3640 = vmatprep.mubr.bf16.mxu0 %v14030_v3  ;;  %3801 = vmatprep.mubr.bf16.mxu1 %v14061_v49 }
  0xc4   : > { %13028 = vmatpush3.bf16.msra.mxu0 %v13335_v29  ;;  %11943 = vmatprep.subr.bf16.mxu1 %v13343_v52  ;;  %v1035_v29 = vrot.slane %v1033_v19, 7  ;;  %v442_v52 = vld [vmem:[%s13833_s21 + $0x150] sm:$0xc] }
  0xc5   : > { %13029 = vmatprep.subr.bf16.mxu0 %v13336_v16  ;;  %11944 = vmatpush3.bf16.msra.mxu1 %v13344_v42 }
  0xc6   : > { %11945 = vmatprep.subr.bf16.mxu1 %v13346_v4  ;;  %v14576_v4 = vld [vmem:[%s13833_s21 + $0x140] sm:$0x8] }
  0xc8   : > { %13030 = vmatpush3.bf16.msra.mxu0 %v13336_v16  ;;  %v443_v16 = vld [vmem:[%s13833_s21 + $0x154] sm:$0xf] }
  0xc9   : > { %13031 = vmatprep.subr.bf16.mxu0 %v13339_v25  ;;  %11946 = vmatpush3.bf16.msra.mxu1 %v13347_v63  ;;  %v18062_v63 = vrot.slane %v14571_v20, 7 }
  0xca   : > { %3641 = vmatmul.mubr.bf16.gmra.mrb[72].mxu0 %v14024_v61  ;;  %3802 = vmatmul.mubr.bf16.gmra.mrb[72].mxu1 %v14014_v51  ;;  %v13352_v51 = vld [vmem:[%s18037_s2 + $0x268] sm:$0xff]  }
  0xcb   : > { %3648 = vmatprep.mubr.bf16.mxu0 %v14068_v56  ;;  %3809 = vmatprep.mubr.bf16.mxu1 %v14103_v47 }
  0xcc   : > { %13032 = vmatpush3.bf16.msra.mxu0 %v13339_v25  ;;  %11947 = vmatprep.subr.bf16.mxu1 %v13349_v5  ;;  %v14579_v25 = vld [vmem:[%s13833_s21 + $0x148] sm:$0x7]  ;;  %v1049_v5 = vshrl.u32 %v442_v52, 16 }
  0xcd   : > { %13033 = vmatprep.subr.bf16.mxu0 %v13342_v39  ;;  %11948 = vmatpush3.bf16.msra.mxu1 %v13350_v1 }
  0xce   : > { %11949 = vmatprep.subr.bf16.mxu1 %v13351_v11  ;;  %v1052_v11 = vshll.u32 %v442_v52, 16 }
  0xd0   : > { %13034 = vmatpush3.bf16.msra.mxu0 %v13342_v39  ;;  %v13373_v39 = vld [vmem:[%s18037_s2 + $0x380] sm:$0xff]   ;;  %v1054_v45 = vrot.slane %v1052_v11, 7 }
  0xd1   : > { %13035 = vmatprep.subr.bf16.mxu0 %v13345_v26  ;;  %11950 = vmatpush3.bf16.msra.mxu1 %v13352_v51 }
  0xd2   : > { %3649 = vmatmul.mubr.bf16.gmra.mrb[76].mxu0 %v14061_v49  ;;  %3810 = vmatmul.mubr.bf16.gmra.mrb[76].mxu1 %v14057_v44  ;;  %v13357_v44 = vld [vmem:[%s18037_s2 + $0x300] sm:$0xff]   ;;  %v388_v49 = vld [vmem:[%s13833_s21 + $0x30] sm:$0xc] }
  0xd3   : > { %3656 = vmatprep.mubr.bf16.mxu0 %v14110_v55  ;;  %3817 = vmatprep.mubr.bf16.mxu1 %v14141_v43 }
  0xd4   : > { %13036 = vmatpush3.bf16.msra.mxu0 %v13345_v26  ;;  %11951 = vmatprep.subr.bf16.mxu1 %v13353_v57  ;;  %v1058_v26 = vshrl.u32 %v443_v16, 16  ;;  %v14595_v57 = vrot.slane %v1043_v17, 7  ;;  %v18202_v17 = vld [vmem:[#allocation26_spill] sm:$0xff] }
  0xd5   : > { %13037 = vmatprep.subr.bf16.mxu0 %v13348_v14  ;;  %11952 = vmatpush3.bf16.msra.mxu1 %v13354_v62  ;;  %v386_v62 = vld [vmem:[%s13833_s21 + $0x24] sm:$0xf] }
  0xd6   : > { %11953 = vmatprep.subr.bf16.mxu1 %v13355_v41  ;;  %v526_v41 = vshrl.u32 %v386_v62, 16 }
  0xd8   : > { %13038 = vmatpush3.bf16.msra.mxu0 %v13348_v14 }
  0xd9   : > { %11954 = vmatpush3.bf16.msra.mxu1 %v13356_v32  ;;  %12051 = vmatprep.subr.bf16.mxu0 %v13357_v44  ;;  %v444_v32 = vld [vmem:[%s13833_s21 + $0x158] sm:$0x7]  ;;  %v1051_v44 = vrot.slane %v1049_v5, 6  ;;  %v385_v5 = vld [vmem:[%s13833_s21 + $0x20] sm:$0xc] }
  0xda   : > { %3657 = vmatmul.mubr.bf16.gmra.mrb[80].mxu0 %v14103_v47  ;;  %3818 = vmatmul.mubr.bf16.gmra.mrb[80].mxu1 %v14092_v35  ;;  %v439_v35 = vld [vmem:[%s13833_s21 + $0x140] sm:$0xc]  ;;  %v1068_v23 = vshrl.u32 %v444_v32, 16  ;;  %v1071_v19 = vshll.u32 %v444_v32, 16 }
  0xdb   : > { %3664 = vmatprep.mubr.bf16.mxu0 %v14148_v18  ;;  %3825 = vmatprep.mubr.bf16.mxu1 %v14183_v53  ;;  %v1021_v37 = vshrl.u32 %v439_v35, 16 }
  0xdc   : > { %12163 = vmatprep.subr.bf16.mxu1 %v13373_v39  ;;  %v14618_v52 = vrot.slane %v1068_v23, 6  ;;  %v14623_v32 = vrot.slane %v1071_v19, 7 }
  0xdd   : > { %v1023_v54 = vrot.slane %v1021_v37, 6  ;;  %v14606_v37 = vld [vmem:[%s13833_s21 + $0x150] sm:$0xc] }
  0xe2   : > { %3665 = vmatmul.mubr.bf16.gmra.mrb[84].mxu0 %v14141_v43  ;;  %3826 = vmatmul.mubr.bf16.gmra.mrb[84].mxu1 %v14137_v38  ;;  %v1024_v38 = vshll.u32 %v439_v35, 16  ;;  %v1061_v35 = vshll.u32 %v443_v16, 16 }
  0xe3   : > { %3672 = vmatprep.mubr.bf16.mxu0 %v14190_v0  ;;  %3833 = vmatprep.mubr.bf16.mxu1 %v14221_v60 }
  0xe4   : > { %v1026_v9 = vrot.slane %v1024_v38, 7  ;;  %v14609_v38 = vld [vmem:[%s13833_s21 + $0x154] sm:$0xf] }
  0xe6   : > { %v1027_v42 = vor.u32 %v1026_v9, %v1023_v54  ;;  %v18203_v54 = vld [vmem:[#allocation28_spill] sm:$0xff] }
  0xe8   : > { %v14593_v51 = vrot.slane %v1027_v42, 4  ;;  %v387_v42 = vld [vmem:[%s13833_s21 + $0x28] sm:$0x7] }
  0xea   : > { %3673 = vmatmul.mubr.bf16.gmra.mrb[88].mxu0 %v14183_v53  ;;  %3834 = vmatmul.mubr.bf16.gmra.mrb[88].mxu1 %v14172_v34  ;;  %v1040_v34 = vshrl.u32 %v441_v8, 16  ;;  %v1060_v8 = vrot.slane %v1058_v26, 6  ;;  %v1055_v26 = vor.u32 %v1054_v45, %v1051_v44  ;;  %v18205_v53 = vld [vmem:[#allocation24_spill] sm:$0xff] }
  0xeb   : > { %3680 = vmatprep.mubr.bf16.mxu0 %v14228_v7  ;;  %3841 = vmatprep.mubr.bf16.mxu1 %v14263_v15 }
  0xec   : > { %v14589_v1 = vrot.slane %v1040_v34, 6  ;;  %v14614_v34 = vld [vmem:[%s13833_s21 + $0x158] sm:$0x3]  ;;  %v14635_v19 = vrot.slane %v1055_v26, 4 }
  0xf2   : > { %3681 = vmatmul.mubr.bf16.gmra.mrb[92].mxu0 %v14221_v60  ;;  %3842 = vmatmul.mubr.bf16.gmra.mrb[92].mxu1 %v14217_v48  ;;  %v14581_v48 = vor.u32 %v1035_v29, %v1032_v27  ;;  %v1063_v27 = vrot.slane %v1061_v35, 7 }
  0xf3   : > { %3688 = vmatprep.mubr.bf16.mxu0 %v14270_v24  ;;  %3849 = vmatprep.mubr.bf16.mxu1 %v14301_v30 }
  0xfa   : > { %3689 = vmatmul.mubr.bf16.gmra.mrb[96].mxu0 %v14263_v15  ;;  %3850 = vmatmul.mubr.bf16.gmra.mrb[96].mxu1 %v14252_v59  ;;  %v14601_v59 = vrot.slane %v18062_v63, 4  ;;  %v517_v15 = vshrl.u32 %v385_v5, 16 }
  0xfb   : > { %3696 = vmatprep.mubr.bf16.mxu0 %v14308_v40  ;;  %3857 = vmatprep.mubr.bf16.mxu1 %v14334_v46  ;;  %v14683_v40 = vld [vmem:[%s13833_s21 + $0x30] sm:$0xe] }
 0x102   : > { %3697 = vmatmul.mubr.bf16.gmra.mrb[100].mxu0 %v14301_v30  ;;  %3858 = vmatmul.mubr.bf16.gmra.mrb[100].mxu1 %v14297_v22  ;;  %v14627_v30 = vor.u32 %v1063_v27, %v1060_v8  ;;  %v18207_v8 = vld [vmem:[#allocation29_spill] sm:$0xff]  ;;  %v18208_v27 = vld [vmem:[#allocation30_spill] sm:$0xff] }
 0x103   : > { %3704 = vmatprep.mubr.bf16.mxu0 %v18202_v17  ;;  %3865 = vmatprep.mubr.bf16.mxu1 %v18203_v54  ;;  %v389_v17 = vld [vmem:[%s13833_s21 + $0x34] sm:$0xf] }
 0x10a   : > { %3705 = vmatmul.mubr.bf16.gmra.mrb[104].mxu0 %v14334_v46  ;;  %3866 = vmatmul.mubr.bf16.gmra.mrb[104].mxu1 %v18205_v53  ;;  %v536_v53 = vshrl.u32 %v387_v42, 16 }
 0x10b   : > { %v11483_v9 = vpop.f32.mrb[0].mxu0  ;;  %3712 = vmatprep.mubr.bf16.mxu0 %v18207_v8  ;;  %3873 = vmatprep.mubr.bf16.mxu1 %v18208_v27 }
 0x10c   : > { %v11484_v29 = vpop.f32.mrb[1].mxu0  ;;  %v11595_v39 = vpop.f32.mrb[0].mxu1 }
 0x10d   : > { %v11485_v22 = vadd.f32 %v11484_v29, %v11483_v9  ;;  %v11486_v11 = vpop.f32.mrb[2].mxu0  ;;  %v11596_v35 = vpop.f32.mrb[1].mxu1  ;;  %v520_v9 = vshll.u32 %v385_v5, 16  ;;  %v14631_v29 = vld [vmem:[%s13833_s21 + $0x20] sm:$0xe] }
 0x10e   : > { %v11487_v63 = vpop.f32.mrb[3].mxu0  ;;  %v11597_v23 = vadd.f32 %v11596_v35, %v11595_v39  ;;  %v11598_v14 = vpop.f32.mrb[2].mxu1  ;;  %v14640_v39 = vld [vmem:[%s13833_s21 + $0x24] sm:$0xf]  ;;  %v539_v35 = vshll.u32 %v387_v42, 16 }
 0x10f   : > { %v11488_v16 = vadd.f32 %v11487_v63, %v11486_v11  ;;  %v11599_v60 = vpop.f32.mrb[3].mxu1  ;;  %v519_v11 = vrot.slane %v517_v15, 6  ;;  %v522_v26 = vrot.slane %v520_v9, 7 }
 0x110   : > { %v14633_v44 = vadd.f32 %v11597_v23, %v11485_v22  ;;  %v11600_v45 = vadd.f32 %v11599_v60, %v11598_v14  ;;  %v18209_v22 = vrot.slane %v14609_v38, 6  ;;  %v529_v14 = vshll.u32 %v386_v62, 16 }
 0x112   : > { %18204 = vst [vmem:[#allocation34_spill] sm:$0xff] %v14633_v44  ;;  %v14642_v63 = vadd.f32 %v11600_v45, %v11488_v16  ;;  %v14649_v60 = vrot.slane %v18209_v22, 4  ;;  %v528_v16 = vrot.slane %v526_v41, 6  ;;  %v14654_v22 = vld [vmem:[%s13833_s21 + $0x28] sm:$0x1]  ;;  %v531_v41 = vrot.slane %v529_v14, 7  ;;  %3713 = vmatmul.mubr.bf16.gmra.mrb[108].mxu0 %v18203_v54 }
 0x113   : > { %v18210_v45 = vld [vmem:[#allocation27_spill] sm:$0xff] }
 0x114   : > { %18206 = vst [vmem:[#allocation24_spill] sm:$0xff] %v14642_v63  ;;  %3874 = vmatmul.mubr.bf16.gmra.mrb[108].mxu1 %v18210_v45 }
 0x115   : > { %v11601_v23 = vpop.f32.mrb[4].mxu1  ;;  %v11489_v63 = vpop.f32.mrb[4].mxu0 }
 0x116   : > { %v11602_v44 = vpop.f32.mrb[5].mxu1  ;;  %v11490_v5 = vpop.f32.mrb[5].mxu0 }
 0x117   : > { %v11603_v43 = vadd.f32 %v11602_v44, %v11601_v23  ;;  %v11604_v47 = vpop.f32.mrb[6].mxu1  ;;  %v11491_v62 = vadd.f32 %v11490_v5, %v11489_v63  ;;  %v11492_v15 = vpop.f32.mrb[6].mxu0  ;;  %v18212_v44 = vld [vmem:[#allocation31_spill] sm:$0xff]  ;;  %v18213_v23 = vld [vmem:[#allocation32_spill] sm:$0xff]  ;;  %v14664_v63 = vrot.slane %v536_v53, 6  ;;  %v14666_v5 = vrot.slane %v539_v35, 7 }
 0x118   : > { %v11605_v9 = vpop.f32.mrb[7].mxu1  ;;  %v11493_v42 = vpop.f32.mrb[7].mxu0  ;;  %3720 = vmatprep.mubr.bf16.mxu0 %v18212_v44  ;;  %3881 = vmatprep.mubr.bf16.mxu1 %v18213_v23  ;;  %v1046_v53 = vor.u32 %v14595_v57, %v14589_v1  ;;  %v523_v35 = vor.u32 %v522_v26, %v519_v11  ;;  %v1037_v57 = vsel %vm13860_vm7, %v14593_v51, %v14581_v48  ;;  %v14699_v26 = vld [vmem:[%s13833_s21 + $0x34] sm:$0xf] }
 0x119   : > { %v11606_v61 = vadd.f32 %v11605_v9, %v11604_v47  ;;  %v14659_v46 = vadd.f32 %v11603_v43, %v11491_v62  ;;  %v11494_v8 = vadd.f32 %v11493_v42, %v11492_v15  ;;  %v18215_v47 = vrot.slane %v14640_v39, 5  ;;  %v14676_v43 = vld [vmem:[%s13833_s21 + $0x38] sm:$0x7] }
 0x11a   : > { %v545_v15 = vshrl.u32 %v388_v49, 16  ;;  %v548_v9 = vshll.u32 %v388_v49, 16  ;;  %v554_v42 = vshrl.u32 %v389_v17, 16  ;;  %v564_v7 = vshrl.u32 %v14676_v43, 16  ;;  %3721 = vmatmul.mubr.bf16.gmra.mrb[112].mxu0 %v18208_v27 }
 0x11b   : > { %18211 = vst [vmem:[#allocation27_spill] sm:$0xff] %v14659_v46  ;;  %v14668_v12 = vadd.f32 %v11606_v61, %v11494_v8  ;;  %v14672_v14 = vrot.slane %v18215_v47, 4  ;;  %v557_v61 = vshll.u32 %v389_v17, 16  ;;  %v14680_v46 = vor.u32 %v531_v41, %v528_v16  ;;  %3728 = vmatprep.mubr.bf16.mxu0 %v14436_v31 }
 0x11c   : > { %3882 = vmatmul.mubr.bf16.gmra.mrb[112].mxu1 %v14390_v13  ;;  %v18216_v17 = vrot.slane %v14581_v48, 4  ;;  %v14696_v11 = vrot.slane %v523_v35, 4  ;;  %v547_v51 = vrot.slane %v545_v15, 6  ;;  %v556_v48 = vrot.slane %v554_v42, 6 }
 0x11d   : > { %18214 = vst [vmem:[#allocation35_spill] sm:$0xff] %v14668_v12  ;;  %v11607_v62 = vpop.f32.mrb[8].mxu1  ;;  %v11495_v8 = vpop.f32.mrb[8].mxu0  ;;  %3889 = vmatprep.mubr.bf16.mxu1 %v14453_v2  ;;  %v534_v13 = vrot.slane %v14680_v46, 4  ;;  %v14709_v35 = vrot.slane %v564_v7, 6 }
 0x11e   : > { %v11608_v54 = vpop.f32.mrb[9].mxu1  ;;  %v11496_v45 = vpop.f32.mrb[9].mxu0  ;;  %v14723_v7 = vld [vmem:[%s13833_s21 + $0x44] sm:$0xf] }
 0x11f   : > { %v11609_v12 = vadd.f32 %v11608_v54, %v11607_v62  ;;  %v11610_v47 = vpop.f32.mrb[10].mxu1  ;;  %v11497_v24 = vadd.f32 %v11496_v45, %v11495_v8  ;;  %v11498_v28 = vpop.f32.mrb[10].mxu0  ;;  %v1047_v54 = vsel %vm13860_vm7, %v18216_v17, %v1046_v53  ;;  %v559_v45 = vrot.slane %v557_v61, 7  ;;  %v14716_v8 = vld [vmem:[%s13833_s21 + $0x38] sm:$0x1] }
 0x120   : > { %v11611_v44 = vpop.f32.mrb[11].mxu1  ;;  %v11499_v1 = vpop.f32.mrb[11].mxu0  ;;  %v567_v62 = vshll.u32 %v14676_v43, 16  ;;  %v14718_v42 = vcombine.low %v1037_v57, %v1047_v54 }
 0x121   : > { %v11612_v49 = vadd.f32 %v11611_v44, %v11610_v47  ;;  %v14701_v16 = vadd.f32 %v11609_v12, %v11497_v24  ;;  %v11500_v41 = vadd.f32 %v11499_v1, %v11498_v28  ;;  %v550_v44 = vrot.slane %v548_v9, 7 }
 0x122   : > { %v18089_v28 = vrot.slane %v14699_v26, 5  ;;  %v1074_v24 = vor.u32 %v14623_v32, %v14618_v52  ;;  %18217 = vst [vmem:[#allocation36_spill] sm:$0xff] %v14718_v42  ;;  %v18218_v52 = vrot.slane %v14571_v20, 7  ;;  %v18219_v32 = vrot.slane %v14576_v4, 11  ;;  %3729 = vmatmul.mubr.bf16.gmra.mrb[116].mxu0 %v18213_v23 }
 0x123   : > { %v14707_v53 = vadd.f32 %v11612_v49, %v11500_v41  ;;  %v551_v43 = vor.u32 %v550_v44, %v547_v51  ;;  %v14720_v49 = vor.u32 %v559_v45, %v556_v48  ;;  %v18220_v44 = vrot.slane %v14579_v25, 7  ;;  %3736 = vmatprep.mubr.bf16.mxu0 %v14458_v36 }
 0x124   : > { %v2092_v57 = vsel %vm13874_vm8, %v18219_v32, %v18218_v52  ;;  %3890 = vmatmul.mubr.bf16.gmra.mrb[116].mxu1 %v14425_v33  ;;  %v1065_v20 = vsel %vm13860_vm7, %v14635_v19, %v14627_v30  ;;  %v18221_v4 = vrot.slane %v14627_v30, 4  ;;  %v14747_v33 = vld [vmem:[%s13833_s21 + $0x54] sm:$0xf]  ;;  %v18232_v30 = vrot.slane %v14640_v39, 5  ;;  %v13358_v39 = vld [vmem:[%s18037_s2 + $0x2c0] sm:$0xff]  }
 0x125   : > { %v11501_v15 = vpop.f32.mrb[12].mxu0  ;;  %v11613_v9 = vpop.f32.mrb[12].mxu1  ;;  %v2095_v48 = vsel %vm13874_vm8, %v14601_v59, %v18220_v44  ;;  %3897 = vmatprep.mubr.bf16.mxu1 %v14718_v42  ;;  %v14754_v19 = vrot.slane %v551_v43, 4  ;;  %v14783_v44 = vld [vmem:[%s13833_s21 + $0x50] sm:$0xe]  ;;  %v18223_v59 = vrot.slane %v14609_v38, 6 }
 0x126   : > { %v11502_v61 = vpop.f32.mrb[13].mxu0  ;;  %v11614_v47 = vpop.f32.mrb[13].mxu1  ;;  %v1075_v45 = vsel %vm13860_vm7, %v18221_v4, %v1074_v24  ;;  %v14757_v24 = vrot.slane %v567_v62, 7  ;;  %v542_v62 = vor.u32 %v14666_v5, %v14664_v63  ;;  %v14786_v4 = vld [vmem:[%s13833_s21 + $0x58] sm:$0x1]  ;;  %v18225_v43 = vrot.slane %v14614_v34, 6 }
 0x127   : > { %v11503_v1 = vadd.f32 %v11502_v61, %v11501_v15  ;;  %v11615_v17 = vadd.f32 %v11614_v47, %v11613_v9  ;;  %v11504_v41 = vpop.f32.mrb[14].mxu0  ;;  %v11616_v12 = vpop.f32.mrb[14].mxu1  ;;  %v14761_v61 = vrot.slane %v18089_v28, 4  ;;  %v18224_v28 = vrot.slane %v14606_v37, 10  ;;  %v14795_v5 = vld [vmem:[%s13833_s21 + $0x60] sm:$0xe] }
 0x128   : > { %v11505_v54 = vpop.f32.mrb[15].mxu0  ;;  %v11617_v51 = vpop.f32.mrb[15].mxu1 }
 0x129   : > { %v14749_v15 = vadd.f32 %v11615_v17, %v11503_v1  ;;  %v11506_v25 = vadd.f32 %v11505_v54, %v11504_v41  ;;  %v11618_v9 = vadd.f32 %v11617_v51, %v11616_v12  ;;  %v14764_v12 = vld [vmem:[%s13833_s21 + $0x40] sm:$0xe]  ;;  %v14771_v17 = vld [vmem:[%s13833_s21 + $0x64] sm:$0xf]  ;;  %v14776_v41 = vld [vmem:[%s13833_s21 + $0x48] sm:$0x1]  ;;  %v14778_v54 = vcombine.low %v2092_v57, %v2095_v48 }
 0x12a   : > { %v14780_v51 = vcombine.low %v1065_v20, %v1075_v45  ;;  %v1628_v63 = vsel %vm13849_vm6, %v18224_v28, %v18223_v59  ;;  %v18090_v1 = vrot.slane %v14771_v17, 5  ;;  %3737 = vmatmul.mubr.bf16.gmra.mrb[120].mxu0 %v14453_v2  ;;  %v1631_v28 = vsel %vm13849_vm6, %v14649_v60, %v18225_v43  ;;  %v15166_v2 = vld [vmem:[%s13833_s21 + $0xc0] sm:$0xe] }
 0x12b   : > { %v14766_v47 = vadd.f32 %v11618_v9, %v11506_v25  ;;  %v533_v59 = vsel %vm13860_vm7, %v14696_v11, %v14680_v46  ;;  %3744 = vmatprep.mubr.bf16.mxu0 %v14778_v54  ;;  %v18226_v60 = vrot.slane %v14723_v7, 5 }
 0x12c   : > { %18222 = vst [vmem:[#allocation37_spill] sm:$0xff] %v14780_v51  ;;  %3898 = vmatmul.mubr.bf16.gmra.mrb[120].mxu1 %v14447_v21 }
 0x12d   : > { %v11507_v52 = vpop.f32.mrb[16].mxu0  ;;  %v11619_v32 = vpop.f32.mrb[16].mxu1  ;;  %3905 = vmatprep.mubr.bf16.mxu1 %v14780_v51  ;;  %v14824_v46 = vrot.slane %v18226_v60, 4  ;;  %v18233_v51 = vrot.slane %v14631_v29, 9  ;;  %v561_v29 = vsel %vm13860_vm7, %v14754_v19, %v14720_v49  ;;  %v13379_v19 = vld [vmem:[%s18037_s2 + $0x388] sm:$0xff]  }
 0x12e   : > { %v11508_v25 = vpop.f32.mrb[17].mxu0  ;;  %v11620_v9 = vpop.f32.mrb[17].mxu1 }
 0x12f   : > { %v11509_v57 = vadd.f32 %v11508_v25, %v11507_v52  ;;  %v11621_v48 = vadd.f32 %v11620_v9, %v11619_v32  ;;  %v11510_v20 = vpop.f32.mrb[18].mxu0  ;;  %v11622_v45 = vpop.f32.mrb[18].mxu1  ;;  %v543_v52 = vsel %vm13860_vm7, %v534_v13, %v542_v62  ;;  %v14815_v32 = vld [vmem:[%s13833_s21 + $0x68] sm:$0x1]  ;;  %v18227_v13 = vrot.slane %v14747_v33, 5 }
 0x130   : > { %v11511_v38 = vpop.f32.mrb[19].mxu0  ;;  %v11623_v37 = vpop.f32.mrb[19].mxu1 }
 0x131   : > { %v14817_v21 = vadd.f32 %v11621_v48, %v11509_v57  ;;  %v11512_v34 = vadd.f32 %v11511_v38, %v11510_v20  ;;  %v11624_v25 = vadd.f32 %v11623_v37, %v11622_v45  ;;  %v14829_v43 = vrot.slane %v18227_v13, 4  ;;  %v14843_v37 = vld [vmem:[%s13833_s21 + $0x70] sm:$0xe] }
 0x132   : > { %v14837_v48 = vrot.slane %v18090_v1, 4  ;;  %v10705_v45 = vcombine.low %v1628_v63, %v1631_v28  ;;  %v14840_v38 = vcombine.low %v533_v59, %v543_v52  ;;  %v570_v20 = vor.u32 %v14757_v24, %v14709_v35  ;;  %v14857_v63 = vld [vmem:[%s13833_s21 + $0x78] sm:$0x1]  ;;  %3745 = vmatmul.mubr.bf16.gmra.mrb[124].mxu0 %v14718_v42 }
 0x133   : > { %v14832_v9 = vadd.f32 %v11624_v25, %v11512_v34  ;;  %v18229_v34 = vmov 0  ;;  %v14852_v25 = vld [vmem:[%s13833_s21 + $0x74] sm:$0xf]  ;;  %13039 = vmatprep.mubr.bf16.mxu0 %v13983_v6  ;;  %v4393_v35 = vsel %vm14847_vm11, %v18233_v51, %v18232_v30  ;;  %v18234_v24 = vrot.slane %v14654_v22, 5 }
 0x134   : > { %18228 = vst [vmem:[#allocation38_spill] sm:$0xff] %v14840_v38  ;;  %v18230_v34 = vsel %vm14847_vm11, 4294967295, %v18229_v34  ;;  %3906 = vmatmul.mubr.bf16.gmra.mrb[124].mxu1 %v10705_v45  ;;  %v18235_v22 = vrot.slane %v14720_v49, 4  ;;  %v4427_v30 = vrot.slane %v14852_v25, 5  ;;  %v13374_v49 = vld [vmem:[%s18037_s2 + $0x340] sm:$0xff]   ;;  %v18237_v51 = vrot.slane %v14699_v26, 5 }
 0x135   : > { %v11513_v60 = vpop.f32.mrb[20].mxu0  ;;  %v11625_v13 = vpop.f32.mrb[20].mxu1  ;;  %18231 = vst [vmem:[#allocation39_spill] sm:$0xff] %v18230_v34  ;;  %5963 = vmatprep.mubr.bf16.mxu1 %v14840_v38  ;;  %v18238_v6 = vrot.slane %v14683_v40, 9  ;;  %v15161_v38 = vld [vmem:[%s13833_s21 + $0xb8] sm:$0x1] }
 0x136   : > { %v11514_v57 = vpop.f32.mrb[21].mxu0  ;;  %v11626_v1 = vpop.f32.mrb[21].mxu1 }
 0x137   : > { %v11515_v28 = vadd.f32 %v11514_v57, %v11513_v60  ;;  %v11627_v59 = vadd.f32 %v11626_v1, %v11625_v13  ;;  %v11516_v52 = vpop.f32.mrb[22].mxu0  ;;  %v11628_v62 = vpop.f32.mrb[22].mxu1  ;;  %v4396_v1 = vsel %vm14847_vm11, %v14672_v14, %v18234_v24  ;;  %v571_v14 = vsel %vm13860_vm7, %v18235_v22, %v570_v20 }
 0x138   : > { %v11517_v11 = vpop.f32.mrb[23].mxu0  ;;  %v11629_v50 = vpop.f32.mrb[23].mxu1 }
 0x139   : > { %v14873_v57 = vadd.f32 %v11627_v59, %v11515_v28  ;;  %v11518_v45 = vadd.f32 %v11517_v11, %v11516_v52  ;;  %v11630_v60 = vadd.f32 %v11629_v50, %v11628_v62  ;;  %v10864_v11 = vcombine.low %v4393_v35, %v4396_v1  ;;  %v13359_v62 = vld [vmem:[%s18037_s2 + $0x308] sm:$0xff]  }
 0x13a   : > { %v14894_v59 = vcombine.low %v561_v29, %v571_v14  ;;  %v13360_v35 = vld [vmem:[%s18037_s2 + $0x2c8] sm:$0xff]   ;;  %13040 = vmatmul.mubr.bf16.vlgmr.msra.gmra.mrb[128].mxu0 %v14030_v3  ;;  %v13361_v29 = vld [vmem:[%s18037_s2 + $0x310] sm:$0xff]   ;;  %v4400_v3 = vsel %vm14847_vm11, %v18238_v6, %v18237_v51 }
 0x13b   : > { %v14889_v50 = vadd.f32 %v11630_v60, %v11518_v45  ;;  %12052 = vmatpush3.bf16.msra.mxu0 %v13358_v39  ;;  %13043 = vmatprep.mubr.bf16.mxu0 %v14068_v56  ;;  %v14923_v39 = vrot.slane %v4427_v30, 4  ;;  %v13380_v56 = vld [vmem:[%s18037_s2 + $0x348] sm:$0xff]   ;;  %v13362_v51 = vld [vmem:[%s18037_s2 + $0x2d0] sm:$0xff]  }
 0x13c   : > { %18236 = vst [vmem:[#allocation40_spill] sm:$0xff] %v14894_v59  ;;  %5964 = vmatmul.mubr.bf16.vlgmr.msra.gmra.mrb[128].mxu1 %v10864_v11  ;;  %v18239_v11 = vrot.slane %v14716_v8, 5  ;;  %12053 = vmatprep.subr.bf16.mxu0 %v13359_v62  ;;  %v13386_v62 = vld [vmem:[%s18037_s2 + $0x350] sm:$0xff]  }
 0x13d   : > { %v11519_v13 = vpop.f32.mrb[24].mxu0  ;;  %v11631_v28 = vpop.f32.mrb[24].mxu1  ;;  %5971 = vmatprep.mubr.bf16.mxu1 %v14894_v59  ;;  %12164 = vmatpush3.bf16.msra.mxu1 %v13374_v49 }
 0x13e   : > { %v11520_v20 = vpop.f32.mrb[25].mxu0  ;;  %v11632_v52 = vpop.f32.mrb[25].mxu1  ;;  %12165 = vmatprep.subr.bf16.mxu1 %v13379_v19  ;;  %v13391_v19 = vld [vmem:[%s18037_s2 + $0x398] sm:$0xff]  }
 0x13f   : > { %v11521_v24 = vadd.f32 %v11520_v20, %v11519_v13  ;;  %v11633_v1 = vadd.f32 %v11632_v52, %v11631_v28  ;;  %v11522_v45 = vpop.f32.mrb[26].mxu0  ;;  %v11634_v60 = vpop.f32.mrb[26].mxu1  ;;  %v4403_v13 = vsel %vm14847_vm11, %v14761_v61, %v18239_v11  ;;  %v14926_v28 = vld [vmem:[%s13833_s21 + $0x84] sm:$0xf]  ;;  %v13385_v20 = vld [vmem:[%s18037_s2 + $0x390] sm:$0xff]   ;;  %12054 = vmatpush3.bf16.msra.mxu0 %v13360_v35  ;;  %v13363_v52 = vld [vmem:[%s18037_s2 + $0x318] sm:$0xff]  }
 0x140   : > { %v11523_v22 = vpop.f32.mrb[27].mxu0  ;;  %v11635_v14 = vpop.f32.mrb[27].mxu1  ;;  %v10865_v61 = vcombine.low %v4400_v3, %v4403_v13  ;;  %12055 = vmatprep.subr.bf16.mxu0 %v13361_v29  ;;  %v18093_v49 = vrot.slane %v14926_v28, 5 }
 0x141   : > { %v14931_v40 = vadd.f32 %v11633_v1, %v11521_v24  ;;  %v11524_v26 = vadd.f32 %v11523_v22, %v11522_v45  ;;  %v11636_v6 = vadd.f32 %v11635_v14, %v11634_v60  ;;  %12166 = vmatpush3.bf16.msra.mxu1 %v13380_v56  ;;  %v18240_v60 = vrot.slane %v14723_v7, 5  ;;  %v13364_v14 = vld [vmem:[%s18037_s2 + $0x2d8] sm:$0xff]  }
 0x142   : > { %13044 = vmatmul.mubr.bf16.gmra.mrb[132].mxu0 %v14110_v55  ;;  %v18241_v22 = vrot.slane %v14764_v12, 9  ;;  %v18242_v55 = vld [vmem:[#allocation10_spill] sm:$0xff]  ;;  %v13365_v12 = vld [vmem:[%s18037_s2 + $0x320] sm:$0xff]   ;;  %12167 = vmatprep.subr.bf16.mxu1 %v13385_v20 }
 0x143   : > { %v14934_v8 = vadd.f32 %v11636_v6, %v11524_v26  ;;  %13047 = vmatprep.mubr.bf16.mxu0 %v14148_v18  ;;  %v18243_v26 = vrot.slane %v14776_v41, 5  ;;  %v14973_v6 = vld [vmem:[%s13833_s21 + $0x80] sm:$0xe]  ;;  %12056 = vmatpush3.bf16.msra.mxu0 %v13362_v51  ;;  %v13367_v51 = vld [vmem:[%s18037_s2 + $0x328] sm:$0xff]  }
 0x144   : > { %5972 = vmatmul.mubr.bf16.gmra.mrb[132].mxu1 %v10865_v61  ;;  %v4407_v29 = vsel %vm14847_vm11, %v18241_v22, %v18240_v60  ;;  %v13392_v61 = vld [vmem:[%s18037_s2 + $0x358] sm:$0xff]   ;;  %12057 = vmatprep.subr.bf16.mxu0 %v13363_v52  ;;  %v13394_v60 = vld [vmem:[%s18037_s2 + $0x3a0] sm:$0xff]  }
 0x145   : > { %v11525_v24 = vpop.f32.mrb[28].mxu0  ;;  %v11637_v1 = vpop.f32.mrb[28].mxu1  ;;  %5979 = vmatprep.mubr.bf16.mxu1 %v18242_v55  ;;  %v4410_v7 = vsel %vm14847_vm11, %v14824_v46, %v18243_v26  ;;  %12168 = vmatpush3.bf16.msra.mxu1 %v13386_v62  ;;  %v13396_v20 = vld [vmem:[%s18037_s2 + $0x360] sm:$0xff]   ;;  %v13398_v62 = vld [vmem:[%s18037_s2 + $0x3a8] sm:$0xff]   ;;  %v18263_v55 = vld [vmem:[#allocation31_spill] sm:$0xff] }
 0x146   : > { %v11526_v35 = vpop.f32.mrb[29].mxu0  ;;  %v11638_v45 = vpop.f32.mrb[29].mxu1  ;;  %v10866_v46 = vcombine.low %v4407_v29, %v4410_v7  ;;  %12169 = vmatprep.subr.bf16.mxu1 %v13391_v19  ;;  %v13368_v26 = vld [vmem:[%s18037_s2 + $0x2e8] sm:$0xff]  }
 0x147   : > { %v11527_v3 = vadd.f32 %v11526_v35, %v11525_v24  ;;  %v11639_v11 = vadd.f32 %v11638_v45, %v11637_v1  ;;  %v11528_v13 = vpop.f32.mrb[30].mxu0  ;;  %v11640_v56 = vpop.f32.mrb[30].mxu1  ;;  %v13366_v45 = vld [vmem:[%s18037_s2 + $0x2e0] sm:$0xff]   ;;  %12058 = vmatpush3.bf16.msra.mxu0 %v13364_v14  ;;  %v18245_v14 = vrot.slane %v14783_v44, 9  ;;  %v13369_v44 = vld [vmem:[%s18037_s2 + $0x330] sm:$0xff]  }
 0x148   : > { %v11529_v24 = vpop.f32.mrb[31].mxu0  ;;  %v11641_v18 = vpop.f32.mrb[31].mxu1  ;;  %12059 = vmatprep.subr.bf16.mxu0 %v13365_v12 }
 0x149   : > { %v14978_v1 = vadd.f32 %v11639_v11, %v11527_v3  ;;  %v11530_v41 = vadd.f32 %v11529_v24, %v11528_v13  ;;  %v11642_v35 = vadd.f32 %v11641_v18, %v11640_v56  ;;  %12170 = vmatpush3.bf16.msra.mxu1 %v13392_v61  ;;  %v18244_v13 = vrot.slane %v14747_v33, 5  ;;  %v18246_v18 = vld [vmem:[#allocation19_spill] sm:$0xff] }
 0x14a   : > { %13048 = vmatmul.mubr.bf16.gmra.mrb[136].mxu0 %v14190_v0  ;;  %v18247_v0 = vld [vmem:[#allocation11_spill] sm:$0xff]  ;;  %12171 = vmatprep.subr.bf16.mxu1 %v13394_v60 }
 0x14b   : > { %v14986_v22 = vadd.f32 %v11642_v35, %v11530_v41  ;;  %v4414_v56 = vsel %vm14847_vm11, %v18245_v14, %v18244_v13  ;;  %13051 = vmatprep.mubr.bf16.mxu0 %v18246_v18  ;;  %v18248_v41 = vrot.slane %v14786_v4, 5  ;;  %v15019_v35 = vld [vmem:[%s13833_s21 + $0x154] sm:$0xf]  ;;  %12060 = vmatpush3.bf16.msra.mxu0 %v13366_v45  ;;  %v13371_v45 = vld [vmem:[%s18037_s2 + $0x338] sm:$0xff]  }
 0x14c   : > { %5980 = vmatmul.mubr.bf16.gmra.mrb[136].mxu1 %v10866_v46  ;;  %v13399_v46 = vld [vmem:[%s18037_s2 + $0x368] sm:$0xff]   ;;  %12061 = vmatprep.subr.bf16.mxu0 %v13367_v51  ;;  %v13370_v13 = vld [vmem:[%s18037_s2 + $0x2f0] sm:$0xff]  }
 0x14d   : > { %v11531_v19 = vpop.f32.mrb[32].mxu0  ;;  %v11643_v29 = vpop.f32.mrb[32].mxu1  ;;  %5987 = vmatprep.mubr.bf16.mxu1 %v18247_v0  ;;  %v4417_v33 = vsel %vm14847_vm11, %v14829_v43, %v18248_v41  ;;  %12172 = vmatpush3.bf16.msra.mxu1 %v13396_v20  ;;  %v13401_v14 = vld [vmem:[%s18037_s2 + $0x3b0] sm:$0xff]   ;;  %v13403_v20 = vld [vmem:[%s18037_s2 + $0x3b8] sm:$0xff]   ;;  %v4243_v51 = vld [vmem:[%s13833_s21 + $0x88] sm:$0x1] }
 0x14e   : > { %v11532_v3 = vpop.f32.mrb[33].mxu0  ;;  %v11644_v11 = vpop.f32.mrb[33].mxu1  ;;  %v15026_v43 = vcombine.low %v4414_v56, %v4417_v33  ;;  %12173 = vmatprep.subr.bf16.mxu1 %v13398_v62  ;;  %v13402_v60 = vld [vmem:[%s18037_s2 + $0x370] sm:$0xff]   ;;  %v18249_v62 = vld [vmem:[#allocation21_spill] sm:$0xff]  ;;  %v18251_v41 = vld [vmem:[#allocation12_spill] sm:$0xff]  ;;  %v18252_v33 = vrot.slane %v14771_v17, 5 }
 0x14f   : > { %v11533_v7 = vadd.f32 %v11532_v3, %v11531_v19  ;;  %v11645_v12 = vadd.f32 %v11644_v11, %v11643_v29  ;;  %v11534_v24 = vpop.f32.mrb[34].mxu0  ;;  %v11646_v61 = vpop.f32.mrb[34].mxu1  ;;  %12062 = vmatpush3.bf16.msra.mxu0 %v13368_v26  ;;  %v13404_v17 = vld [vmem:[%s18037_s2 + $0x378] sm:$0xff]   ;;  %v4437_v25 = vrot.slane %v4243_v51, 5 }
 0x150   : > { %v11535_v19 = vpop.f32.mrb[35].mxu0  ;;  %v11647_v29 = vpop.f32.mrb[35].mxu1  ;;  %12063 = vmatprep.subr.bf16.mxu0 %v13369_v44  ;;  %v18253_v44 = vrot.slane %v14795_v5, 9 }
 0x151   : > { %v15024_v3 = vadd.f32 %v11645_v12, %v11533_v7  ;;  %v11536_v4 = vadd.f32 %v11535_v19, %v11534_v24  ;;  %v11648_v11 = vadd.f32 %v11647_v29, %v11646_v61  ;;  %12174 = vmatpush3.bf16.msra.mxu1 %v13399_v46  ;;  %v13372_v12 = vld [vmem:[%s18037_s2 + $0x2f8] sm:$0xff]   ;;  %v18250_v61 = vld [vmem:[#allocation23_spill] sm:$0xff]  ;;  %v18254_v19 = vrot.slane %v14815_v32, 5 }
 0x152   : > { %13052 = vmatmul.mubr.bf16.gmra.mrb[140].mxu0 %v18249_v62  ;;  %v4421_v46 = vsel %vm14847_vm11, %v18253_v44, %v18252_v33  ;;  %12175 = vmatprep.subr.bf16.mxu1 %v13401_v14  ;;  %v15084_v14 = vld [vmem:[%s13833_s21 + $0x94] sm:$0xf] }
 0x153   : > { %v15034_v18 = vadd.f32 %v11648_v11, %v11536_v4  ;;  %13055 = vmatprep.mubr.bf16.mxu0 %v18250_v61  ;;  %v4424_v29 = vsel %vm14847_vm11, %v14837_v48, %v18254_v19  ;;  %v13376_v4 = vld [vmem:[%s18037_s2 + $0x400] sm:$0xff]   ;;  %12064 = vmatpush3.bf16.msra.mxu0 %v13370_v13  ;;  %v15081_v13 = vld [vmem:[%s13833_s21 + $0x158] sm:$0x7]  ;;  %v4441_v51 = vrot.slane %v15084_v14, 5 }
 0x154   : > { %5988 = vmatmul.mubr.bf16.gmra.mrb[140].mxu1 %v15026_v43  ;;  %12065 = vmatprep.subr.bf16.mxu0 %v13371_v45  ;;  %v15072_v52 = vcombine.low %v4421_v46, %v4424_v29  ;;  %v15087_v45 = vld [vmem:[%s13833_s21 + $0x90] sm:$0xe]  ;;  %v18257_v29 = vrot.slane %v14857_v63, 5  ;;  %v18260_v63 = vrot.slane %v15019_v35, 7 }
 0x155   : > { %v11537_v56 = vpop.f32.mrb[36].mxu0  ;;  %v11649_v7 = vpop.f32.mrb[36].mxu1  ;;  %5995 = vmatprep.mubr.bf16.mxu1 %v18251_v41  ;;  %12176 = vmatpush3.bf16.msra.mxu1 %v13402_v60  ;;  %v18255_v60 = vld [vmem:[#allocation26_spill] sm:$0xff]  ;;  %v4443_v14 = vrot.slane %v4441_v51, 4 }
 0x156   : > { %v11538_v24 = vpop.f32.mrb[37].mxu0  ;;  %v11650_v26 = vpop.f32.mrb[37].mxu1  ;;  %12177 = vmatprep.subr.bf16.mxu1 %v13403_v20  ;;  %v18256_v20 = vrot.slane %v14843_v37, 9  ;;  %v4436_v37 = vrot.slane %v18093_v49, 4 }
 0x157   : > { %v11539_v5 = vadd.f32 %v11538_v24, %v11537_v56  ;;  %v11651_v11 = vadd.f32 %v11650_v26, %v11649_v7  ;;  %v11540_v62 = vpop.f32.mrb[38].mxu0  ;;  %v11652_v61 = vpop.f32.mrb[38].mxu1  ;;  %v15076_v56 = vld [vmem:[%s13833_s21 + $0x150] sm:$0x8]  ;;  %12066 = vmatpush3.bf16.msra.mxu0 %v13372_v12  ;;  %v4431_v12 = vsel %vm14847_vm11, %v14923_v39, %v18257_v29 }
 0x158   : > { %v11541_v32 = vpop.f32.mrb[39].mxu0  ;;  %v11653_v48 = vpop.f32.mrb[39].mxu1  ;;  %12275 = vmatprep.subr.bf16.mxu0 %v13376_v4  ;;  %v4428_v46 = vsel %vm14847_vm11, %v18256_v20, %v4427_v30  ;;  %v15103_v4 = vld [vmem:[%s13833_s21 + $0xa4] sm:$0xf]  ;;  %v10731_v30 = vrot.slane %v15076_v56, 11 }
 0x159   : > { %v15070_v33 = vadd.f32 %v11651_v11, %v11539_v5  ;;  %v11542_v44 = vadd.f32 %v11541_v32, %v11540_v62  ;;  %v11654_v19 = vadd.f32 %v11653_v48, %v11652_v61  ;;  %12178 = vmatpush3.bf16.msra.mxu1 %v13404_v17  ;;  %v18258_v11 = vld [vmem:[#allocation29_spill] sm:$0xff]  ;;  %v2100_v61 = vrot.slane %v18260_v63, 4 }
 0x15a   : > { %13056 = vmatmul.mubr.bf16.gmra.mrb[144].mxu0 %v18255_v60  ;;  %v18259_v62 = vld [vmem:[#allocation13_spill] sm:$0xff]  ;;  %v10845_v60 = vrot.slane %v15087_v45, 9  ;;  %v18096_v56 = vrot.slane %v15103_v4, 5 }
 0x15b   : > { %v15078_v7 = vadd.f32 %v11654_v19, %v11542_v44  ;;  %13059 = vmatprep.mubr.bf16.mxu0 %v18258_v11  ;;  %v2101_v19 = vrot.slane %v15081_v13, 7  ;;  %v4246_v11 = vld [vmem:[%s13833_s21 + $0x98] sm:$0x1]  ;;  %v15127_v13 = vld [vmem:[%s13833_s21 + $0xb4] sm:$0xf] }
 0x15c   : > { %5996 = vmatmul.mubr.bf16.gmra.mrb[144].mxu1 %v15072_v52  ;;  %v15130_v45 = vld [vmem:[%s13833_s21 + $0xc4] sm:$0xf] }
 0x15d   : > { %v11543_v24 = vpop.f32.mrb[40].mxu0  ;;  %v11655_v26 = vpop.f32.mrb[40].mxu1  ;;  %6003 = vmatprep.mubr.bf16.mxu1 %v18259_v62 }
 0x15e   : > { %v11544_v17 = vpop.f32.mrb[41].mxu0  ;;  %v11656_v5 = vpop.f32.mrb[41].mxu1 }
 0x15f   : > { %v11545_v39 = vadd.f32 %v11544_v17, %v11543_v24  ;;  %v11657_v32 = vadd.f32 %v11656_v5, %v11655_v26  ;;  %v11546_v48 = vpop.f32.mrb[42].mxu0  ;;  %v11658_v44 = vpop.f32.mrb[42].mxu1  ;;  %v15119_v26 = vcombine.low %v4428_v46, %v4431_v12  ;;  %v15122_v17 = vld [vmem:[%s13833_s21 + $0xa0] sm:$0xe]  ;;  %v18264_v46 = vld [vmem:[#allocation14_spill] sm:$0xff]  ;;  %v18265_v12 = vrot.slane %v14926_v28, 5 }
 0x160   : > { %v11547_v20 = vpop.f32.mrb[43].mxu0  ;;  %v11659_v29 = vpop.f32.mrb[43].mxu1 }
 0x161   : > { %v15117_v49 = vadd.f32 %v11657_v32, %v11545_v39  ;;  %v11548_v63 = vadd.f32 %v11547_v20, %v11546_v48  ;;  %v11660_v24 = vadd.f32 %v11659_v29, %v11658_v44  ;;  %v4444_v39 = vrot.slane %v4246_v11, 5  ;;  %v15145_v29 = vld [vmem:[%s13833_s21 + $0xa8] sm:$0x1]  ;;  %v15158_v11 = vld [vmem:[%s13833_s21 + $0xb0] sm:$0xe] }
 0x162   : > { %13060 = vmatmul.mubr.bf16.gmra.mrb[148].mxu0 %v18263_v55  ;;  %v18266_v44 = vrot.slane %v14973_v6, 9  ;;  %v4438_v20 = vsel %vm14847_vm11, %v4436_v37, %v4437_v25  ;;  %v15169_v6 = vld [vmem:[%s13833_s21 + $0xc8] sm:$0x1] }
 0x163   : > { %18261 = vst [vmem:[#allocation19_spill] sm:$0xff] %v15117_v49  ;;  %v15124_v5 = vadd.f32 %v11660_v24, %v11548_v63  ;;  %13063 = vmatprep.mubr.bf16.mxu0 %v14436_v31  ;;  %v15150_v31 = vrot.slane %v18096_v56, 4  ;;  %v15184_v49 = vld [vmem:[%s13833_s21 + $0xd0] sm:$0xe] }
 0x164   : > { %6004 = vmatmul.mubr.bf16.gmra.mrb[148].mxu1 %v15119_v26  ;;  %v4435_v55 = vsel %vm14847_vm11, %v18266_v44, %v18265_v12  ;;  %v15155_v12 = vld [vmem:[%s13833_s21 + $0xd4] sm:$0xf] }
 0x165   : > { %18262 = vst [vmem:[#allocation21_spill] sm:$0xff] %v15124_v5  ;;  %v11549_v32 = vpop.f32.mrb[44].mxu0  ;;  %v11661_v48 = vpop.f32.mrb[44].mxu1  ;;  %6011 = vmatprep.mubr.bf16.mxu1 %v18264_v46  ;;  %v15163_v42 = vcombine.low %v4435_v55, %v4438_v20  ;;  %v18269_v5 = vrot.slane %v15019_v35, 7  ;;  %v2102_v20 = vsel %vm13874_vm8, %v2100_v61, %v2101_v19  ;;  %v18270_v61 = vld [vmem:[#allocation15_spill] sm:$0xff] }
 0x166   : > { %v11550_v28 = vpop.f32.mrb[45].mxu0  ;;  %v11662_v63 = vpop.f32.mrb[45].mxu1 }
 0x167   : > { %v11551_v44 = vadd.f32 %v11550_v28, %v11549_v32  ;;  %v11663_v37 = vadd.f32 %v11662_v63, %v11661_v48  ;;  %v11552_v25 = vpop.f32.mrb[46].mxu0  ;;  %v11664_v59 = vpop.f32.mrb[46].mxu1  ;;  %v4451_v48 = vrot.slane %v15145_v29, 5  ;;  %v18104_v28 = vrot.slane %v15155_v12, 5  ;;  %v15205_v29 = vld [vmem:[%s13833_s21 + $0xd8] sm:$0x1] }
 0x168   : > { %v11553_v56 = vpop.f32.mrb[47].mxu0  ;;  %v11665_v58 = vpop.f32.mrb[47].mxu1  ;;  %v2099_v55 = vsel %vm13874_vm8, %v10731_v30, %v18269_v5 }
 0x169   : > { %v15171_v24 = vadd.f32 %v11663_v37, %v11551_v44  ;;  %v11554_v23 = vadd.f32 %v11553_v56, %v11552_v25  ;;  %v11666_v32 = vadd.f32 %v11665_v58, %v11664_v59  ;;  %v4442_v58 = vsel %vm14847_vm11, %v10845_v60, %v4441_v51  ;;  %v15213_v56 = vld [vmem:[%s13833_s21 + $0xe4] sm:$0xf] }
 0x16a   : > { %13064 = vmatmul.mubr.bf16.gmra.mrb[152].mxu0 %v14458_v36  ;;  %v18271_v36 = vrot.slane %v15127_v13, 5  ;;  %v18272_v60 = vrot.slane %v15130_v45, 5  ;;  %v10757_v59 = vcombine.low %v2099_v55, %v2102_v20  ;;  %v18276_v55 = vrot.slane %v15103_v4, 5  ;;  %v13377_v4 = vld [vmem:[%s18037_s2 + $0x3c0] sm:$0xff]  }
 0x16b   : > { %18267 = vst [vmem:[#allocation23_spill] sm:$0xff] %v15171_v24  ;;  %v15175_v63 = vadd.f32 %v11666_v32, %v11554_v23  ;;  %v4445_v23 = vsel %vm14847_vm11, %v4443_v14, %v4444_v39  ;;  %13067 = vmatprep.mubr.bf16.mxu0 %v14778_v54  ;;  %v15210_v54 = vrot.slane %v18104_v28, 4  ;;  %v18277_v20 = vrot.slane %v15122_v17, 9 }
 0x16c   : > { %6012 = vmatmul.mubr.bf16.gmra.mrb[152].mxu1 %v15163_v42  ;;  %v4457_v19 = vrot.slane %v18271_v36, 4  ;;  %v15201_v51 = vrot.slane %v18272_v60, 4  ;;  %v15215_v5 = vcombine.low %v4442_v58, %v4445_v23 }
 0x16d   : > { %18268 = vst [vmem:[#allocation26_spill] sm:$0xff] %v15175_v63  ;;  %v11555_v30 = vpop.f32.mrb[48].mxu0  ;;  %v11667_v10 = vpop.f32.mrb[48].mxu1  ;;  %6019 = vmatprep.mubr.bf16.mxu1 %v18270_v61  ;;  %v4449_v58 = vsel %vm14847_vm11, %v18277_v20, %v18276_v55 }
 0x16e   : > { %v11556_v14 = vpop.f32.mrb[49].mxu0  ;;  %v11668_v39 = vpop.f32.mrb[49].mxu1  ;;  %18273 = vst [vmem:[#allocation29_spill] sm:$0xff] %v15215_v5 }
 0x16f   : > { %v11557_v37 = vadd.f32 %v11556_v14, %v11555_v30  ;;  %v11669_v25 = vadd.f32 %v11668_v39, %v11667_v10  ;;  %v11558_v32 = vpop.f32.mrb[50].mxu0  ;;  %v11670_v36 = vpop.f32.mrb[50].mxu1  ;;  %v18275_v14 = vld [vmem:[#allocation16_spill] sm:$0xff]  ;;  %v15237_v39 = vld [vmem:[%s13833_s21 + $0xe0] sm:$0xe] }
 0x170   : > { %v11559_v60 = vpop.f32.mrb[51].mxu0  ;;  %v11671_v35 = vpop.f32.mrb[51].mxu1 }
 0x171   : > { %v15217_v63 = vadd.f32 %v11669_v25, %v11557_v37  ;;  %v11560_v44 = vadd.f32 %v11559_v60, %v11558_v32  ;;  %v11672_v24 = vadd.f32 %v11671_v35, %v11670_v36  ;;  %v13375_v35 = vld [vmem:[%s13833_s21 + $0x24] sm:$0xff]   ;;  %v15251_v60 = vld [vmem:[%s13833_s21 + $0xf4] sm:$0xf] }
 0x172   : > { %13068 = vmatmul.mubr.bf16.gmra.mrb[156].mxu0 %v10757_v59 }
 0x173   : > { %v15221_v10 = vadd.f32 %v11672_v24, %v11560_v44  ;;  %6124 = vmatprep.mubr.bf16.mxu0 %v15026_v43  ;;  %v4452_v24 = vsel %vm14847_vm11, %v15150_v31, %v4451_v48  ;;  %v13382_v31 = vld [vmem:[%s18037_s2 + $0x408] sm:$0xff]  }
 0x174   : > { %6020 = vmatmul.mubr.bf16.gmra.mrb[156].mxu1 %v15215_v5  ;;  %v15242_v36 = vcombine.low %v4449_v58, %v4452_v24  ;;  %v15248_v48 = vld [vmem:[%s13833_s21 + $0xe8] sm:$0x1]  ;;  %v15262_v24 = vld [vmem:[%s18037_s2 + $0x440] sm:$0xff]   ;;  %v13389_v58 = vld [vmem:[%s18037_s2 + $0x3d0] sm:$0xff]  }
 0x175   : > { %18274 = vst [vmem:[#allocation31_spill] sm:$0xff] %v15221_v10  ;;  %6027 = vmatprep.mubr.bf16.mxu1 %v18275_v14  ;;  %v11561_v23 = vpop.f32.mrb[52].mxu0  ;;  %v11673_v59 = vpop.f32.mrb[52].mxu1  ;;  %13071 = vmatprep.subr.bf16.mxu1 %v15262_v24 }
 0x176   : > { %v11562_v44 = vpop.f32.mrb[53].mxu0  ;;  %v11674_v43 = vpop.f32.mrb[53].mxu1 }
 0x177   : > { %v11563_v17 = vadd.f32 %v11562_v44, %v11561_v23  ;;  %v11675_v37 = vadd.f32 %v11674_v43, %v11673_v59  ;;  %v11564_v25 = vpop.f32.mrb[54].mxu0  ;;  %v11676_v32 = vpop.f32.mrb[54].mxu1  ;;  %v13383_v23 = vld [vmem:[%s18037_s2 + $0x3c8] sm:$0xff]   ;;  %v18280_v44 = vrot.slane %v15127_v13, 5  ;;  %v18281_v43 = vrot.slane %v15158_v11, 9  ;;  %v13388_v13 = vld [vmem:[%s18037_s2 + $0x410] sm:$0xff]  }
 0x178   : > { %v11565_v55 = vpop.f32.mrb[55].mxu0  ;;  %v11677_v20 = vpop.f32.mrb[55].mxu1 }
 0x179   : > { %v15253_v28 = vadd.f32 %v11675_v37, %v11563_v17  ;;  %v11566_v30 = vadd.f32 %v11565_v55, %v11564_v25  ;;  %v11678_v10 = vadd.f32 %v11677_v20, %v11676_v32  ;;  %v4456_v17 = vsel %vm14847_vm11, %v18281_v43, %v18280_v44  ;;  %v18282_v37 = vld [vmem:[#allocation17_spill] sm:$0xff] }
 0x17a   : > { %6125 = vmatmul.mubr.bf16.vlgmr.msra.gmra.mrb[160].mxu0 %v13375_v35  ;;  %v18283_v25 = vrot.slane %v15161_v38, 5  ;;  %v13378_v38 = vld [vmem:[%s13833_s21 + $0x34] sm:$0xff]  }
 0x17b   : > { %18278 = vst [vmem:[#allocation41_spill] sm:$0xff] %v15253_v28  ;;  %v15264_v59 = vadd.f32 %v11678_v10, %v11566_v30  ;;  %12276 = vmatpush3.bf16.msra.mxu0 %v13377_v4  ;;  %v18284_v30 = vrot.slane %v15213_v56, 5  ;;  %6132 = vmatprep.mubr.bf16.mxu0 %v15072_v52  ;;  %v13395_v52 = vld [vmem:[%s18037_s2 + $0x418] sm:$0xff]   ;;  %v15341_v28 = vld [vmem:[%s13833_s21 + $0x104] sm:$0xf] }
 0x17c   : > { %6028 = vmatmul.mubr.bf16.gmra.mrb[160].mxu1 %v15242_v36  ;;  %v4459_v32 = vsel %vm14847_vm11, %v4457_v19, %v18283_v25  ;;  %12277 = vmatprep.subr.bf16.mxu0 %v13382_v31 }
 0x17d   : > { %18279 = vst [vmem:[#allocation42_spill] sm:$0xff] %v15264_v59  ;;  %6035 = vmatprep.mubr.bf16.mxu1 %v18282_v37  ;;  %v15280_v10 = vrot.slane %v18284_v30, 4  ;;  %v11567_v4 = vpop.f32.mrb[56].mxu0  ;;  %v11679_v55 = vpop.f32.mrb[56].mxu1  ;;  %v15290_v35 = vcombine.low %v4456_v17, %v4459_v32  ;;  %v18288_v32 = vld [vmem:[#allocation18_spill] sm:$0xff] }
 0x17e   : > { %v11568_v20 = vpop.f32.mrb[57].mxu0  ;;  %v11680_v19 = vpop.f32.mrb[57].mxu1 }
 0x17f   : > { %v11569_v44 = vadd.f32 %v11568_v20, %v11567_v4  ;;  %v11681_v43 = vadd.f32 %v11680_v19, %v11679_v55  ;;  %v11570_v25 = vpop.f32.mrb[58].mxu0  ;;  %v11682_v30 = vpop.f32.mrb[58].mxu1  ;;  %18285 = vst [vmem:[#allocation43_spill] sm:$0xff] %v15290_v35  ;;  %12278 = vmatpush3.bf16.msra.mxu0 %v13383_v23  ;;  %v13397_v23 = vld [vmem:[%s18037_s2 + $0x3d8] sm:$0xff]   ;;  %v18289_v20 = vrot.slane %v15130_v45, 5  ;;  %v13406_v19 = vld [vmem:[%s18037_s2 + $0x420] sm:$0xff]  }
 0x180   : > { %v11571_v11 = vpop.f32.mrb[59].mxu0  ;;  %v11683_v59 = vpop.f32.mrb[59].mxu1  ;;  %12279 = vmatprep.subr.bf16.mxu0 %v13388_v13  ;;  %v18291_v13 = vrot.slane %v15169_v6, 5 }
 0x181   : > { %v15298_v31 = vadd.f32 %v11681_v43, %v11569_v44  ;;  %v11572_v4 = vadd.f32 %v11571_v11, %v11570_v25  ;;  %v11684_v55 = vadd.f32 %v11683_v59, %v11682_v30  ;;  %v18290_v11 = vrot.slane %v15166_v2, 9  ;;  %v13381_v44 = vld [vmem:[%s13833_s21 + $0x44] sm:$0xff]   ;;  %v15329_v30 = vld [vmem:[%s13833_s21 + $0xf8] sm:$0x1] }
 0x182   : > { %6133 = vmatmul.mubr.bf16.gmra.mrb[164].mxu0 %v13378_v38  ;;  %v4466_v38 = vsel %vm14847_vm11, %v15201_v51, %v18291_v13  ;;  %v13407_v51 = vld [vmem:[%s18037_s2 + $0x3e0] sm:$0xff]  }
 0x183   : > { %18286 = vst [vmem:[#allocation44_spill] sm:$0xff] %v15298_v31  ;;  %v15300_v17 = vadd.f32 %v11684_v55, %v11572_v4  ;;  %6140 = vmatprep.mubr.bf16.mxu0 %v15119_v26  ;;  %v4463_v59 = vsel %vm14847_vm11, %v18290_v11, %v18289_v20  ;;  %12280 = vmatpush3.bf16.msra.mxu0 %v13389_v58  ;;  %v15324_v26 = vld [vmem:[%s13833_s21 + $0xf0] sm:$0xe] }
 0x184   : > { %6036 = vmatmul.mubr.bf16.gmra.mrb[164].mxu1 %v15290_v35  ;;  %12281 = vmatprep.subr.bf16.mxu0 %v13395_v52  ;;  %v15326_v6 = vcombine.low %v4463_v59, %v4466_v38  ;;  %v15338_v38 = vld [vmem:[%s13833_s21 + $0x100] sm:$0xe] }
 0x185   : > { %18287 = vst [vmem:[#allocation45_spill] sm:$0xff] %v15300_v17  ;;  %6043 = vmatprep.mubr.bf16.mxu1 %v18288_v32  ;;  %v11573_v45 = vpop.f32.mrb[60].mxu0  ;;  %v11685_v43 = vpop.f32.mrb[60].mxu1 }
 0x186   : > { %v11574_v2 = vpop.f32.mrb[61].mxu0  ;;  %v11686_v25 = vpop.f32.mrb[61].mxu1 }
 0x187   : > { %v11575_v4 = vadd.f32 %v11574_v2, %v11573_v45  ;;  %v11687_v55 = vadd.f32 %v11686_v25, %v11685_v43  ;;  %v11576_v58 = vpop.f32.mrb[62].mxu0  ;;  %v11688_v20 = vpop.f32.mrb[62].mxu1  ;;  %12282 = vmatpush3.bf16.msra.mxu0 %v13397_v23  ;;  %v13410_v45 = vld [vmem:[%s18037_s2 + $0x428] sm:$0xff]   ;;  %v18293_v23 = vrot.slane %v15155_v12, 5  ;;  %v18294_v43 = vrot.slane %v15184_v49, 9 }
 0x188   : > { %v11577_v11 = vpop.f32.mrb[63].mxu0  ;;  %v11689_v13 = vpop.f32.mrb[63].mxu1  ;;  %12283 = vmatprep.subr.bf16.mxu0 %v13406_v19  ;;  %v18297_v19 = vrot.slane %v15205_v29, 5 }
 0x189   : > { %v15334_v52 = vadd.f32 %v11687_v55, %v11575_v4  ;;  %v11578_v17 = vadd.f32 %v11577_v11, %v11576_v58  ;;  %v11690_v31 = vadd.f32 %v11689_v13, %v11688_v20  ;;  %v4470_v2 = vsel %vm14847_vm11, %v18294_v43, %v18293_v23  ;;  %v18296_v4 = vld [vmem:[#allocation20_spill] sm:$0xff] }
 0x18a   : > { %6141 = vmatmul.mubr.bf16.gmra.mrb[168].mxu0 %v13381_v44  ;;  %v4473_v55 = vsel %vm14847_vm11, %v15210_v54, %v18297_v19  ;;  %v18298_v44 = vrot.slane %v15251_v60, 5  ;;  %v15374_v58 = vld [vmem:[%s13833_s21 + $0x54] sm:$0xff]  }
 0x18b   : > { %18292 = vst [vmem:[#allocation46_spill] sm:$0xff] %v15334_v52  ;;  %v15353_v25 = vadd.f32 %v11690_v31, %v11578_v17  ;;  %6148 = vmatprep.mubr.bf16.mxu0 %v15163_v42  ;;  %v13411_v31 = vld [vmem:[%s18037_s2 + $0x3e8] sm:$0xff]   ;;  %v13414_v17 = vld [vmem:[%s18037_s2 + $0x430] sm:$0xff]   ;;  %12284 = vmatpush3.bf16.msra.mxu0 %v13407_v51  ;;  %v15376_v13 = vcombine.low %v4470_v2, %v4473_v55 }
 0x18c   : > { %6044 = vmatmul.mubr.bf16.gmra.mrb[168].mxu1 %v15326_v6  ;;  %v15364_v12 = vrot.slane %v18298_v44, 4  ;;  %12285 = vmatprep.subr.bf16.mxu0 %v13410_v45  ;;  %v13415_v51 = vld [vmem:[%s18037_s2 + $0x3f0] sm:$0xff]   ;;  %v13418_v45 = vld [vmem:[%s18037_s2 + $0x438] sm:$0xff]   ;;  %v18299_v2 = vld [vmem:[#allocation34_spill] sm:$0xff] }
 0x18d   : > { %18295 = vst [vmem:[#allocation47_spill] sm:$0xff] %v15353_v25  ;;  %6051 = vmatprep.mubr.bf16.mxu1 %v18296_v4  ;;  %v11707_v29 = vpop.f32.mrb[64].mxu0  ;;  %v11819_v20 = vpop.f32.mrb[64].mxu1 }
 0x18e   : > { %v11708_v54 = vpop.f32.mrb[65].mxu0  ;;  %v11820_v11 = vpop.f32.mrb[65].mxu1 }
 0x18f   : > { %v11709_v19 = vadd.f32 %v11708_v54, %v11707_v29  ;;  %v11710_v44 = vpop.f32.mrb[66].mxu0  ;;  %v11821_v49 = vadd.f32 %v11820_v11, %v11819_v20  ;;  %v11822_v59 = vpop.f32.mrb[66].mxu1  ;;  %12286 = vmatpush3.bf16.msra.mxu0 %v13411_v31  ;;  %v18300_v31 = vrot.slane %v15213_v56, 5  ;;  %v18301_v29 = vrot.slane %v15237_v39, 9  ;;  %v13419_v54 = vld [vmem:[%s18037_s2 + $0x3f8] sm:$0xff]   ;;  %v13422_v39 = vld [vmem:[%s18037_s2 + $0x4c0] sm:$0xff]  }
 0x190   : > { %v11711_v25 = vpop.f32.mrb[67].mxu0  ;;  %v11823_v52 = vpop.f32.mrb[67].mxu1  ;;  %12287 = vmatprep.subr.bf16.mxu0 %v13414_v17  ;;  %v18302_v11 = vld [vmem:[#allocation24_spill] sm:$0xff]  ;;  %v15412_v17 = vld [vmem:[%s13833_s21 + $0x64] sm:$0xff]  }
 0x191   : > { %v3627_v55 = vadd.f32 %v11709_v19, %v18299_v2  ;;  %v11712_v23 = vadd.f32 %v11711_v25, %v11710_v44  ;;  %v11824_v43 = vadd.f32 %v11823_v52, %v11822_v59  ;;  %v4477_v20 = vsel %vm14847_vm11, %v18301_v29, %v18300_v31  ;;  %v18303_v25 = vld [vmem:[#allocation22_spill] sm:$0xff] }
 0x192   : > { %6149 = vmatmul.mubr.bf16.gmra.mrb[172].mxu0 %v15374_v58  ;;  %v18304_v52 = vrot.slane %v15248_v48, 5 }
 0x193   : > { %v3630_v19 = vadd.f32 %v11712_v23, %v18302_v11  ;;  %6156 = vmatprep.mubr.bf16.mxu0 %v15215_v5  ;;  %v15409_v59 = vadd.f32 %v11821_v49, %v3627_v55  ;;  %12288 = vmatpush3.bf16.msra.mxu0 %v13415_v51  ;;  %v18307_v51 = vld [vmem:[#allocation27_spill] sm:$0xff] }
 0x194   : > { %6052 = vmatmul.mubr.bf16.gmra.mrb[172].mxu1 %v15376_v13  ;;  %v4480_v56 = vsel %vm14847_vm11, %v15280_v10, %v18304_v52  ;;  %12289 = vmatprep.subr.bf16.mxu0 %v13418_v45 }
 0x195   : > { %6059 = vmatprep.mubr.bf16.mxu1 %v18303_v25  ;;  %18305 = vst [vmem:[#allocation34_spill] sm:$0xff] %v15409_v59  ;;  %v11713_v23 = vpop.f32.mrb[68].mxu0  ;;  %v11825_v44 = vpop.f32.mrb[68].mxu1  ;;  %v15414_v2 = vadd.f32 %v11824_v43, %v3630_v19  ;;  %v15416_v29 = vcombine.low %v4477_v20, %v4480_v56  ;;  %v18308_v43 = vrot.slane %v15251_v60, 5  ;;  %v18309_v20 = vrot.slane %v15324_v26, 9  ;;  %v15439_v60 = vld [vmem:[%s13833_s21 + $0x74] sm:$0xff]  }
 0x196   : > { %v11714_v31 = vpop.f32.mrb[69].mxu0  ;;  %v11826_v48 = vpop.f32.mrb[69].mxu1  ;;  %v4267_v56 = vld [vmem:[%s13833_s21 + $0x108] sm:$0x1]  ;;  %v4269_v26 = vld [vmem:[%s13833_s21 + $0x114] sm:$0xf] }
 0x197   : > { %18306 = vst [vmem:[#allocation24_spill] sm:$0xff] %v15414_v2  ;;  %v11715_v10 = vadd.f32 %v11714_v31, %v11713_v23  ;;  %v11716_v11 = vpop.f32.mrb[70].mxu0  ;;  %v11827_v52 = vadd.f32 %v11826_v48, %v11825_v44  ;;  %v11828_v5 = vpop.f32.mrb[70].mxu1  ;;  %12290 = vmatpush3.bf16.msra.mxu0 %v13419_v54  ;;  %v4484_v19 = vsel %vm14847_vm11, %v18309_v20, %v18308_v43  ;;  %v18310_v23 = vld [vmem:[#allocation35_spill] sm:$0xff]  ;;  %v18311_v54 = vld [vmem:[#allocation25_spill] sm:$0xff] }
 0x198   : > { %v11717_v25 = vpop.f32.mrb[71].mxu0  ;;  %v11829_v49 = vpop.f32.mrb[71].mxu1  ;;  %12411 = vmatprep.subr.bf16.mxu0 %v13422_v39 }
 0x199   : > { %v3635_v55 = vadd.f32 %v11715_v10, %v18307_v51  ;;  %v11718_v59 = vadd.f32 %v11717_v25, %v11716_v11  ;;  %v11830_v45 = vadd.f32 %v11829_v49, %v11828_v5  ;;  %v18312_v5 = vrot.slane %v15329_v30, 5 }
 0x19a   : > { %6157 = vmatmul.mubr.bf16.gmra.mrb[176].mxu0 %v15412_v17 }
 0x19b   : > { %v3638_v44 = vadd.f32 %v11718_v59, %v18310_v23  ;;  %6164 = vmatprep.mubr.bf16.mxu0 %v15242_v36  ;;  %v4487_v25 = vsel %vm14847_vm11, %v15364_v12, %v18312_v5  ;;  %v15436_v39 = vadd.f32 %v11827_v52, %v3635_v55  ;;  %v18315_v12 = vrot.slane %v15341_v28, 5 }
 0x19c   : > { %6060 = vmatmul.mubr.bf16.gmra.mrb[176].mxu1 %v15416_v29  ;;  %v15444_v49 = vcombine.low %v4484_v19, %v4487_v25  ;;  %v4493_v55 = vrot.slane %v4267_v56, 5  ;;  %v18317_v25 = vrot.slane %v15338_v38, 9 }
 0x19d   : > { %6067 = vmatprep.mubr.bf16.mxu1 %v18311_v54  ;;  %18313 = vst [vmem:[#allocation27_spill] sm:$0xff] %v15436_v39  ;;  %v11719_v31 = vpop.f32.mrb[72].mxu0  ;;  %v11831_v48 = vpop.f32.mrb[72].mxu1  ;;  %v15442_v10 = vadd.f32 %v11830_v45, %v3638_v44  ;;  %v4492_v52 = vrot.slane %v18315_v12, 4  ;;  %v4497_v39 = vrot.slane %v4269_v26, 5  ;;  %v18316_v19 = vmov %v18315_v12 }
 0x19e   : > { %v11720_v59 = vpop.f32.mrb[73].mxu0  ;;  %v11832_v11 = vpop.f32.mrb[73].mxu1  ;;  %v4491_v56 = vsel %vm14847_vm11, %v18317_v25, %v18316_v19 }
 0x19f   : > { %18314 = vst [vmem:[#allocation35_spill] sm:$0xff] %v15442_v10  ;;  %v11721_v51 = vadd.f32 %v11720_v59, %v11719_v31  ;;  %v11722_v30 = vpop.f32.mrb[74].mxu0  ;;  %v11833_v43 = vadd.f32 %v11832_v11, %v11831_v48  ;;  %v11834_v20 = vpop.f32.mrb[74].mxu1  ;;  %v4268_v10 = vld [vmem:[%s13833_s21 + $0x110] sm:$0xe]  ;;  %v18318_v59 = vld [vmem:[#allocation28_spill] sm:$0xff] }
 0x1a0   : > { %v11723_v23 = vpop.f32.mrb[75].mxu0  ;;  %v11835_v5 = vpop.f32.mrb[75].mxu1  ;;  %v4270_v31 = vld [vmem:[%s13833_s21 + $0x118] sm:$0x1]  ;;  %v15467_v11 = vld [vmem:[%s13833_s21 + $0x84] sm:$0xff]   ;;  %v10853_v28 = vrot.slane %v4268_v10, 9 }
 0x1a1   : > { %v3643_v2 = vadd.f32 %v11721_v51, %v14701_v16  ;;  %v11724_v45 = vadd.f32 %v11723_v23, %v11722_v30  ;;  %v11836_v44 = vadd.f32 %v11835_v5, %v11834_v20  ;;  %v4494_v16 = vsel %vm14847_vm11, %v4492_v52, %v4493_v55 }
 0x1a2   : > { %6165 = vmatmul.mubr.bf16.gmra.mrb[180].mxu0 %v15439_v60  ;;  %v15471_v23 = vcombine.low %v4491_v56, %v4494_v16  ;;  %v4499_v25 = vrot.slane %v4497_v39, 4 }
 0x1a3   : > { %v3646_v48 = vadd.f32 %v11724_v45, %v14707_v53  ;;  %6172 = vmatprep.mubr.bf16.mxu0 %v15290_v35  ;;  %v15464_v26 = vadd.f32 %v11833_v43, %v3643_v2  ;;  %v4500_v35 = vrot.slane %v4270_v31, 5 }
 0x1a4   : > { %6068 = vmatmul.mubr.bf16.gmra.mrb[180].mxu1 %v15444_v49 }
 0x1a5   : > { %6075 = vmatprep.mubr.bf16.mxu1 %v18318_v59  ;;  %v11725_v51 = vpop.f32.mrb[76].mxu0  ;;  %v11837_v38 = vpop.f32.mrb[76].mxu1  ;;  %v15469_v30 = vadd.f32 %v11836_v44, %v3646_v48  ;;  %v4498_v44 = vsel %vm14847_vm11, %v10853_v28, %v4497_v39  ;;  %v4501_v31 = vsel %vm14847_vm11, %v4499_v25, %v4500_v35  ;;  %v15490_v39 = vld [vmem:[%s13833_s21 + $0x94] sm:$0xff]  }
 0x1a6   : > { %v11726_v20 = vpop.f32.mrb[77].mxu0  ;;  %v11838_v12 = vpop.f32.mrb[77].mxu1 }
 0x1a7   : > { %v11727_v53 = vadd.f32 %v11726_v20, %v11725_v51  ;;  %v11728_v5 = vpop.f32.mrb[78].mxu0  ;;  %v11839_v45 = vadd.f32 %v11838_v12, %v11837_v38  ;;  %v11840_v19 = vpop.f32.mrb[78].mxu1  ;;  %v15487_v12 = vcombine.low %v4498_v44, %v4501_v31  ;;  %v15503_v31 = vld [vmem:[%s13833_s21 + $0xa4] sm:$0xff]  }
 0x1a8   : > { %v11729_v52 = vpop.f32.mrb[79].mxu0  ;;  %v11841_v2 = vpop.f32.mrb[79].mxu1 }
 0x1a9   : > { %v3651_v43 = vadd.f32 %v11727_v53, %v14749_v15  ;;  %v11730_v55 = vadd.f32 %v11729_v52, %v11728_v5  ;;  %v11842_v10 = vadd.f32 %v11841_v2, %v11840_v19 }
 0x1aa   : > { %6173 = vmatmul.mubr.bf16.gmra.mrb[184].mxu0 %v15467_v11 }
 0x1ab   : > { %v3654_v56 = vadd.f32 %v11730_v55, %v14766_v47  ;;  %6180 = vmatprep.mubr.bf16.mxu0 %v15326_v6  ;;  %v15483_v15 = vadd.f32 %v11839_v45, %v3651_v43 }
 0x1ac   : > { %6076 = vmatmul.mubr.bf16.gmra.mrb[184].mxu1 %v15471_v23 }
 0x1ad   : > { %6083 = vmatprep.mubr.bf16.mxu1 %v18208_v27  ;;  %v11731_v48 = vpop.f32.mrb[80].mxu0  ;;  %v11843_v16 = vpop.f32.mrb[80].mxu1  ;;  %v15485_v51 = vadd.f32 %v11842_v10, %v3654_v56 }
 0x1ae   : > { %v11732_v38 = vpop.f32.mrb[81].mxu0  ;;  %v11844_v20 = vpop.f32.mrb[81].mxu1 }
 0x1af   : > { %v11733_v47 = vadd.f32 %v11732_v38, %v11731_v48  ;;  %v11734_v28 = vpop.f32.mrb[82].mxu0  ;;  %v11845_v53 = vadd.f32 %v11844_v20, %v11843_v16  ;;  %v11846_v5 = vpop.f32.mrb[82].mxu1 }
 0x1b0   : > { %v11735_v19 = vpop.f32.mrb[83].mxu0  ;;  %v11847_v52 = vpop.f32.mrb[83].mxu1 }
 0x1b1   : > { %v3659_v35 = vadd.f32 %v11733_v47, %v14817_v21  ;;  %v11736_v45 = vadd.f32 %v11735_v19, %v11734_v28  ;;  %v11848_v25 = vadd.f32 %v11847_v52, %v11846_v5 }
 0x1b2   : > { %6181 = vmatmul.mubr.bf16.gmra.mrb[188].mxu0 %v15490_v39 }
 0x1b3   : > { %v3662_v2 = vadd.f32 %v11736_v45, %v14832_v9  ;;  %6188 = vmatprep.mubr.bf16.mxu0 %v15376_v13  ;;  %v15498_v43 = vadd.f32 %v11845_v53, %v3659_v35  ;;  %v13424_v53 = vld [vmem:[%s18037_s2 + $0x448] sm:$0xff]   ;;  %v13427_v45 = vld [vmem:[%s18037_s2 + $0x450] sm:$0xff]  }
 0x1b4   : > { %6084 = vmatmul.mubr.bf16.gmra.mrb[188].mxu1 %v15487_v12 }
 0x1b5   : > { %6285 = vmatprep.mubr.bf16.mxu1 %v15374_v58  ;;  %v11737_v55 = vpop.f32.mrb[84].mxu0  ;;  %v11849_v10 = vpop.f32.mrb[84].mxu1  ;;  %v15500_v44 = vadd.f32 %v11848_v25, %v3662_v2 }
 0x1b6   : > { %v11738_v56 = vpop.f32.mrb[85].mxu0  ;;  %v11850_v21 = vpop.f32.mrb[85].mxu1 }
 0x1b7   : > { %v11739_v48 = vadd.f32 %v11738_v56, %v11737_v55  ;;  %v11740_v16 = vpop.f32.mrb[86].mxu0  ;;  %v11851_v38 = vadd.f32 %v11850_v21, %v11849_v10  ;;  %v11852_v20 = vpop.f32.mrb[86].mxu1 }
 0x1b8   : > { %v11741_v47 = vpop.f32.mrb[87].mxu0  ;;  %v11853_v9 = vpop.f32.mrb[87].mxu1 }
 0x1b9   : > { %v3667_v28 = vadd.f32 %v11739_v48, %v14873_v57  ;;  %v11742_v5 = vadd.f32 %v11741_v47, %v11740_v16  ;;  %v11854_v58 = vadd.f32 %v11853_v9, %v11852_v20  ;;  %v13431_v47 = vld [vmem:[%s18037_s2 + $0x458] sm:$0xff]  }
 0x1ba   : > { %6189 = vmatmul.mubr.bf16.gmra.mrb[192].mxu0 %v15503_v31 }
 0x1bb   : > { %v3670_v19 = vadd.f32 %v11742_v5, %v14889_v50  ;;  %6196 = vmatprep.mubr.bf16.mxu0 %v15416_v29  ;;  %v15514_v52 = vadd.f32 %v11851_v38, %v3667_v28  ;;  %v15523_v50 = vld [vmem:[%s13833_s21 + $0xb4] sm:$0xff]  }
 0x1bc   : > { %6286 = vmatmul.mubr.bf16.vlgmr.msra.gmra.mrb[192].mxu1 %v18247_v0  ;;  %v18324_v0 = vld [vmem:[#allocation19_spill] sm:$0xff] }
 0x1bd   : > { %6293 = vmatprep.mubr.bf16.mxu1 %v15412_v17  ;;  %13072 = vmatpush3.bf16.msra.mxu1 %v15262_v24  ;;  %v11743_v57 = vpop.f32.mrb[88].mxu0  ;;  %v11855_v35 = vpop.f32.mrb[88].mxu1  ;;  %v15520_v25 = vadd.f32 %v11854_v58, %v3670_v19 }
 0x1be   : > { %13073 = vmatprep.subr.bf16.mxu1 %v13424_v53  ;;  %v11744_v2 = vpop.f32.mrb[89].mxu0  ;;  %v11856_v55 = vpop.f32.mrb[89].mxu1 }
 0x1bf   : > { %v11745_v10 = vadd.f32 %v11744_v2, %v11743_v57  ;;  %v11746_v56 = vpop.f32.mrb[90].mxu0  ;;  %v11857_v17 = vadd.f32 %v11856_v55, %v11855_v35  ;;  %v11858_v21 = vpop.f32.mrb[90].mxu1 }
 0x1c0   : > { %v11747_v48 = vpop.f32.mrb[91].mxu0  ;;  %v11859_v16 = vpop.f32.mrb[91].mxu1 }
 0x1c1   : > { %13074 = vmatpush3.bf16.msra.mxu1 %v13424_v53  ;;  %v3675_v24 = vadd.f32 %v11745_v10, %v14931_v40  ;;  %v11748_v38 = vadd.f32 %v11747_v48, %v11746_v56  ;;  %v11860_v20 = vadd.f32 %v11859_v16, %v11858_v21  ;;  %v13433_v53 = vld [vmem:[%s18037_s2 + $0x460] sm:$0xff]   ;;  %v13436_v16 = vld [vmem:[%s18037_s2 + $0x468] sm:$0xff]  }
 0x1c2   : > { %13075 = vmatprep.subr.bf16.mxu1 %v13427_v45  ;;  %6197 = vmatmul.mubr.bf16.gmra.mrb[196].mxu0 %v15523_v50  ;;  %v4272_v48 = vld [vmem:[%s13833_s21 + $0x124] sm:$0xf] }
 0x1c3   : > { %v3678_v9 = vadd.f32 %v11748_v38, %v14934_v8  ;;  %6204 = vmatprep.mubr.bf16.mxu0 %v15444_v49  ;;  %v15534_v28 = vadd.f32 %v11857_v17, %v3675_v24  ;;  %v15542_v8 = vld [vmem:[%s13833_s21 + $0xc4] sm:$0xff]   ;;  %v4271_v38 = vld [vmem:[%s13833_s21 + $0x120] sm:$0xe] }
 0x1c4   : > { %6294 = vmatmul.mubr.bf16.gmra.mrb[196].mxu1 %v18251_v41 }
 0x1c5   : > { %6301 = vmatprep.mubr.bf16.mxu1 %v15439_v60  ;;  %13076 = vmatpush3.bf16.msra.mxu1 %v13427_v45  ;;  %v11749_v40 = vpop.f32.mrb[92].mxu0  ;;  %v11861_v5 = vpop.f32.mrb[92].mxu1  ;;  %v15536_v58 = vadd.f32 %v11860_v20, %v3678_v9  ;;  %v4504_v20 = vrot.slane %v4272_v48, 5 }
 0x1c6   : > { %13077 = vmatprep.subr.bf16.mxu1 %v13431_v47  ;;  %v11750_v19 = vpop.f32.mrb[93].mxu0  ;;  %v11862_v57 = vpop.f32.mrb[93].mxu1 }
 0x1c7   : > { %v11751_v35 = vadd.f32 %v11750_v19, %v11749_v40  ;;  %v11752_v2 = vpop.f32.mrb[94].mxu0  ;;  %v11863_v60 = vadd.f32 %v11862_v57, %v11861_v5  ;;  %v11864_v55 = vpop.f32.mrb[94].mxu1  ;;  %v4273_v40 = vld [vmem:[%s13833_s21 + $0x128] sm:$0x1]  ;;  %v13438_v19 = vld [vmem:[%s18037_s2 + $0x470] sm:$0xff]  }
 0x1c8   : > { %v11753_v45 = vpop.f32.mrb[95].mxu0  ;;  %v11865_v10 = vpop.f32.mrb[95].mxu1 }
 0x1c9   : > { %13078 = vmatpush3.bf16.msra.mxu1 %v13431_v47  ;;  %v3683_v56 = vadd.f32 %v11751_v35, %v14978_v1  ;;  %v11754_v17 = vadd.f32 %v11753_v45, %v11752_v2  ;;  %v11866_v21 = vadd.f32 %v11865_v10, %v11864_v55  ;;  %v15564_v35 = vld [vmem:[%s13833_s21 + $0xd4] sm:$0xff]   ;;  %v10854_v10 = vrot.slane %v4271_v38, 9 }
 0x1ca   : > { %13079 = vmatprep.subr.bf16.mxu1 %v13433_v53  ;;  %6205 = vmatmul.mubr.bf16.gmra.mrb[200].mxu0 %v15542_v8  ;;  %18319 = vst [vmem:[#allocation48_spill] sm:$0xff] %v15564_v35 }
 0x1cb   : > { %v3686_v24 = vadd.f32 %v11754_v17, %v14986_v22  ;;  %6212 = vmatprep.mubr.bf16.mxu0 %v15471_v23  ;;  %v15554_v1 = vadd.f32 %v11863_v60, %v3683_v56  ;;  %v4506_v56 = vrot.slane %v4504_v20, 4  ;;  %v4507_v17 = vrot.slane %v4273_v40, 5 }
 0x1cc   : > { %6302 = vmatmul.mubr.bf16.gmra.mrb[200].mxu1 %v18259_v62  ;;  %v4275_v62 = vld [vmem:[%s13833_s21 + $0x134] sm:$0xf] }
 0x1cd   : > { %6309 = vmatprep.mubr.bf16.mxu1 %v15467_v11  ;;  %13080 = vmatpush3.bf16.msra.mxu1 %v13433_v53  ;;  %v11755_v47 = vpop.f32.mrb[96].mxu0  ;;  %v11867_v9 = vpop.f32.mrb[96].mxu1  ;;  %v15558_v5 = vadd.f32 %v11866_v21, %v3686_v24  ;;  %v4511_v40 = vrot.slane %v4275_v62, 5 }
 0x1ce   : > { %13081 = vmatprep.subr.bf16.mxu1 %v13436_v16  ;;  %v11756_v22 = vpop.f32.mrb[97].mxu0  ;;  %v11868_v57 = vpop.f32.mrb[97].mxu1 }
 0x1cf   : > { %v11757_v11 = vadd.f32 %v11756_v22, %v11755_v47  ;;  %v11758_v2 = vpop.f32.mrb[98].mxu0  ;;  %v11869_v60 = vadd.f32 %v11868_v57, %v11867_v9  ;;  %v11870_v55 = vpop.f32.mrb[98].mxu1  ;;  %v13439_v47 = vld [vmem:[%s18037_s2 + $0x478] sm:$0xff]   ;;  %v4508_v9 = vsel %vm14847_vm11, %v4506_v56, %v4507_v17  ;;  %v4513_v17 = vrot.slane %v4511_v40, 4 }
 0x1d0   : > { %v11759_v53 = vpop.f32.mrb[99].mxu0  ;;  %v11871_v45 = vpop.f32.mrb[99].mxu1 }
 0x1d1   : > { %13082 = vmatpush3.bf16.msra.mxu1 %v13436_v16  ;;  %v3691_v21 = vadd.f32 %v11757_v11, %v15024_v3  ;;  %v11760_v48 = vadd.f32 %v11759_v53, %v11758_v2  ;;  %v11872_v24 = vadd.f32 %v11871_v45, %v11870_v55  ;;  %v4505_v16 = vsel %vm14847_vm11, %v10854_v10, %v4504_v20  ;;  %v4274_v11 = vld [vmem:[%s13833_s21 + $0x130] sm:$0xe]  ;;  %v4276_v2 = vld [vmem:[%s13833_s21 + $0x138] sm:$0x1] }
 0x1d2   : > { %13083 = vmatprep.subr.bf16.mxu1 %v13438_v19  ;;  %6213 = vmatmul.mubr.bf16.gmra.mrb[204].mxu0 %v15564_v35  ;;  %v10855_v56 = vrot.slane %v4274_v11, 9 }
 0x1d3   : > { %v3694_v38 = vadd.f32 %v11760_v48, %v15034_v18  ;;  %6220 = vmatprep.mubr.bf16.mxu0 %v15487_v12  ;;  %v15576_v3 = vadd.f32 %v11869_v60, %v3691_v21  ;;  %v15589_v21 = vcombine.low %v4505_v16, %v4508_v9  ;;  %v4514_v48 = vrot.slane %v4276_v2, 5 }
 0x1d4   : > { %6310 = vmatmul.mubr.bf16.gmra.mrb[204].mxu1 %v18264_v46 }
 0x1d5   : > { %6317 = vmatprep.mubr.bf16.mxu1 %v15490_v39  ;;  %13084 = vmatpush3.bf16.msra.mxu1 %v13438_v19  ;;  %v11761_v22 = vpop.f32.mrb[100].mxu0  ;;  %v11873_v57 = vpop.f32.mrb[100].mxu1  ;;  %v15584_v18 = vadd.f32 %v11872_v24, %v3694_v38  ;;  %v15587_v39 = vld [vmem:[%s13833_s21 + $0xe4] sm:$0xff]   ;;  %18321 = vst [vmem:[#allocation50_spill] sm:$0xff] %v15589_v21  ;;  %v4515_v9 = vsel %vm14847_vm11, %v4513_v17, %v4514_v48 }
 0x1d6   : > { %13085 = vmatprep.subr.bf16.mxu1 %v13439_v47  ;;  %v11762_v55 = vpop.f32.mrb[101].mxu0  ;;  %v11874_v53 = vpop.f32.mrb[101].mxu1  ;;  %18320 = vst [vmem:[#allocation49_spill] sm:$0xff] %v15587_v39  ;;  %v13445_v24 = vld [vmem:[%s18037_s2 + $0x540] sm:$0xff]  }
 0x1d7   : > { %v11763_v60 = vadd.f32 %v11762_v55, %v11761_v22  ;;  %v11764_v45 = vpop.f32.mrb[102].mxu0  ;;  %v11875_v20 = vadd.f32 %v11874_v53, %v11873_v57  ;;  %v11876_v10 = vpop.f32.mrb[102].mxu1  ;;  %v4278_v57 = vld [vmem:[%s13833_s21 + $0x144] sm:$0xf]  ;;  %v4277_v53 = vld [vmem:[%s13833_s21 + $0x140] sm:$0xe] }
 0x1d8   : > { %v11765_v62 = vpop.f32.mrb[103].mxu0  ;;  %v11877_v19 = vpop.f32.mrb[103].mxu1  ;;  %v4518_v11 = vrot.slane %v4278_v57, 5  ;;  %v10856_v48 = vrot.slane %v4277_v53, 9 }
 0x1d9   : > { %13086 = vmatpush3.bf16.msra.mxu1 %v13439_v47  ;;  %v3699_v38 = vadd.f32 %v11763_v60, %v15070_v33  ;;  %v11766_v41 = vadd.f32 %v11765_v62, %v11764_v45  ;;  %v11878_v22 = vadd.f32 %v11877_v19, %v11876_v10  ;;  %v4512_v33 = vsel %vm14847_vm11, %v10855_v56, %v4511_v40  ;;  %v4279_v60 = vld [vmem:[%s13833_s21 + $0x148] sm:$0x1]  ;;  %v15612_v10 = vld [vmem:[%s13833_s21 + $0xf4] sm:$0xff]  }
 0x1da   : > { %6221 = vmatmul.mubr.bf16.gmra.mrb[208].mxu0 %v15587_v39  ;;  %12523 = vmatprep.subr.bf16.mxu1 %v13445_v24  ;;  %18322 = vst [vmem:[#allocation51_spill] sm:$0xff] %v15612_v10  ;;  %v15614_v40 = vcombine.low %v4512_v33, %v4515_v9  ;;  %v4520_v24 = vrot.slane %v4518_v11, 4  ;;  %v4521_v57 = vrot.slane %v4279_v60, 5  ;;  %v4519_v9 = vsel %vm14847_vm11, %v10856_v48, %v4518_v11  ;;  %v18328_v48 = vld [vmem:[#allocation23_spill] sm:$0xff] }
 0x1db   : > { %v3702_v16 = vadd.f32 %v11766_v41, %v15078_v7  ;;  %6228 = vmatprep.mubr.bf16.mxu0 %v15589_v21  ;;  %v15601_v47 = vadd.f32 %v11875_v20, %v3699_v38 }
 0x1dc   : > { %6318 = vmatmul.mubr.bf16.gmra.mrb[208].mxu1 %v18270_v61  ;;  %18323 = vst [vmem:[#allocation52_spill] sm:$0xff] %v15614_v40 }
 0x1dd   : > { %6325 = vmatprep.mubr.bf16.mxu1 %v15503_v31  ;;  %v11767_v2 = vpop.f32.mrb[104].mxu0  ;;  %v11879_v55 = vpop.f32.mrb[104].mxu1  ;;  %v15609_v45 = vadd.f32 %v11878_v22, %v3702_v16 }
 0x1de   : > { %v11768_v41 = vpop.f32.mrb[105].mxu0  ;;  %v11880_v7 = vpop.f32.mrb[105].mxu1 }
 0x1df   : > { %v11769_v20 = vadd.f32 %v11768_v41, %v11767_v2  ;;  %v11770_v62 = vpop.f32.mrb[106].mxu0  ;;  %v11881_v19 = vadd.f32 %v11880_v7, %v11879_v55  ;;  %v11882_v38 = vpop.f32.mrb[106].mxu1  ;;  %v18325_v2 = vld [vmem:[#allocation21_spill] sm:$0xff] }
 0x1e0   : > { %v11771_v56 = vpop.f32.mrb[107].mxu0  ;;  %v11883_v17 = vpop.f32.mrb[107].mxu1 }
 0x1e1   : > { %v3707_v21 = vadd.f32 %v11769_v20, %v18324_v0  ;;  %v11772_v22 = vadd.f32 %v11771_v56, %v11770_v62  ;;  %v11884_v16 = vadd.f32 %v11883_v17, %v11882_v38  ;;  %v4522_v0 = vsel %vm14847_vm11, %v4520_v24, %v4521_v57  ;;  %v15631_v62 = vld [vmem:[%s13833_s21 + $0x104] sm:$0xff]  }
 0x1e2   : > { %6229 = vmatmul.mubr.bf16.gmra.mrb[212].mxu0 %v15612_v10  ;;  %18326 = vst [vmem:[#allocation19_spill] sm:$0xff] %v15631_v62 }
 0x1e3   : > { %v3710_v41 = vadd.f32 %v11772_v22, %v18325_v2  ;;  %6236 = vmatprep.mubr.bf16.mxu0 %v15614_v40  ;;  %v15622_v33 = vadd.f32 %v11881_v19, %v3707_v21  ;;  %v15633_v21 = vcombine.low %v4519_v9, %v4522_v0 }
 0x1e4   : > { %6326 = vmatmul.mubr.bf16.gmra.mrb[212].mxu1 %v18275_v14 }
 0x1e5   : > { %6333 = vmatprep.mubr.bf16.mxu1 %v15523_v50  ;;  %v11773_v55 = vpop.f32.mrb[108].mxu0  ;;  %v15628_v60 = vadd.f32 %v11884_v16, %v3710_v41  ;;  %18327 = vst [vmem:[#allocation21_spill] sm:$0xff] %v15633_v21  ;;  %v18329_v16 = vld [vmem:[#allocation26_spill] sm:$0xff] }
 0x1e6   : > { %v11774_v7 = vpop.f32.mrb[109].mxu0 }
 0x1e7   : > { %v11885_v53 = vpop.f32.mrb[108].mxu1  ;;  %v11775_v38 = vadd.f32 %v11774_v7, %v11773_v55  ;;  %v11776_v56 = vpop.f32.mrb[110].mxu0 }
 0x1e8   : > { %v11886_v20 = vpop.f32.mrb[109].mxu1  ;;  %v11777_v19 = vpop.f32.mrb[111].mxu0 }
 0x1e9   : > { %v11887_v17 = vadd.f32 %v11886_v20, %v11885_v53  ;;  %v11888_v22 = vpop.f32.mrb[110].mxu1  ;;  %v3715_v2 = vadd.f32 %v11775_v38, %v18328_v48  ;;  %v11778_v24 = vadd.f32 %v11777_v19, %v11776_v56  ;;  %v15646_v38 = vld [vmem:[%s13833_s21 + $0x114] sm:$0xff]  }
 0x1ea   : > { %v11889_v11 = vpop.f32.mrb[111].mxu1  ;;  %6237 = vmatmul.mubr.bf16.gmra.mrb[216].mxu0 %v15631_v62  ;;  %18330 = vst [vmem:[#allocation23_spill] sm:$0xff] %v15646_v38 }
 0x1eb   : > { %v11890_v57 = vadd.f32 %v11889_v11, %v11888_v22  ;;  %v3718_v41 = vadd.f32 %v11778_v24, %v18329_v16  ;;  %6244 = vmatprep.mubr.bf16.mxu0 %v15633_v21  ;;  %v15641_v55 = vadd.f32 %v11887_v17, %v3715_v2  ;;  %v18331_v17 = vld [vmem:[#allocation31_spill] sm:$0xff] }
 0x1ec   : > { %6334 = vmatmul.mubr.bf16.gmra.mrb[216].mxu1 %v18282_v37 }
 0x1ed   : > { %6341 = vmatprep.mubr.bf16.mxu1 %v15542_v8  ;;  %v11779_v9 = vpop.f32.mrb[112].mxu0  ;;  %v15643_v53 = vadd.f32 %v11890_v57, %v3718_v41 }
 0x1ee   : > { %v11780_v7 = vpop.f32.mrb[113].mxu0 }
 0x1ef   : > { %v11891_v0 = vpop.f32.mrb[112].mxu1  ;;  %v11781_v56 = vadd.f32 %v11780_v7, %v11779_v9  ;;  %v11782_v22 = vpop.f32.mrb[114].mxu0 }
 0x1f0   : > { %v11892_v20 = vpop.f32.mrb[113].mxu1  ;;  %v11783_v48 = vpop.f32.mrb[115].mxu0 }
 0x1f1   : > { %v11893_v19 = vadd.f32 %v11892_v20, %v11891_v0  ;;  %v11894_v11 = vpop.f32.mrb[114].mxu1  ;;  %v3723_v16 = vadd.f32 %v11781_v56, %v15217_v63  ;;  %v11784_v21 = vadd.f32 %v11783_v48, %v11782_v22 }
 0x1f2   : > { %v11895_v24 = vpop.f32.mrb[115].mxu1  ;;  %6245 = vmatmul.mubr.bf16.gmra.mrb[220].mxu0 %v15646_v38 }
 0x1f3   : > { %v11896_v34 = vadd.f32 %v11895_v24, %v11894_v11  ;;  %v3726_v2 = vadd.f32 %v11784_v21, %v18331_v17  ;;  %6446 = vmatprep.mubr.bf16.mxu0 %v18264_v46  ;;  %v15654_v57 = vadd.f32 %v11893_v19, %v3723_v16  ;;  %v13423_v21 = vld [vmem:[%s18037_s2 + $0x480] sm:$0xff]   ;;  %v13425_v19 = vld [vmem:[%s18037_s2 + $0x4c8] sm:$0xff]  }
 0x1f4   : > { %6342 = vmatmul.mubr.bf16.gmra.mrb[220].mxu1 %v18288_v32  ;;  %v18332_v16 = vld [vmem:[#allocation41_spill] sm:$0xff] }
 0x1f5   : > { %6349 = vmatprep.mubr.bf16.mxu1 %v15564_v35  ;;  %v11785_v41 = vpop.f32.mrb[116].mxu0  ;;  %v15656_v0 = vadd.f32 %v11896_v34, %v3726_v2 }
 0x1f6   : > { %v11786_v7 = vpop.f32.mrb[117].mxu0 }
 0x1f7   : > { %v11897_v9 = vpop.f32.mrb[116].mxu1  ;;  %v11787_v20 = vadd.f32 %v11786_v7, %v11785_v41  ;;  %v11788_v56 = vpop.f32.mrb[118].mxu0  ;;  %v18333_v41 = vld [vmem:[#allocation42_spill] sm:$0xff] }
 0x1f8   : > { %v11898_v63 = vpop.f32.mrb[117].mxu1  ;;  %v11789_v48 = vpop.f32.mrb[119].mxu0  ;;  %v13426_v7 = vld [vmem:[%s18037_s2 + $0x488] sm:$0xff]  }
 0x1f9   : > { %v11899_v22 = vadd.f32 %v11898_v63, %v11897_v9  ;;  %v11900_v11 = vpop.f32.mrb[118].mxu1  ;;  %v3731_v17 = vadd.f32 %v11787_v20, %v18332_v16  ;;  %v11790_v34 = vadd.f32 %v11789_v48, %v11788_v56  ;;  %v13428_v20 = vld [vmem:[%s18037_s2 + $0x4d0] sm:$0xff]  }
 0x1fa   : > { %v11901_v24 = vpop.f32.mrb[119].mxu1  ;;  %6447 = vmatmul.mubr.bf16.vlgmr.msra.gmra.mrb[224].mxu0 %v15163_v42 }
 0x1fb   : > { %v11902_v2 = vadd.f32 %v11901_v24, %v11900_v11  ;;  %v3734_v9 = vadd.f32 %v11790_v34, %v18333_v41  ;;  %12412 = vmatpush3.bf16.msra.mxu0 %v13423_v21  ;;  %v15672_v63 = vadd.f32 %v11899_v22, %v3731_v17  ;;  %6454 = vmatprep.mubr.bf16.mxu0 %v18270_v61  ;;  %v18334_v61 = vld [vmem:[#allocation44_spill] sm:$0xff] }
 0x1fc   : > { %6350 = vmatmul.mubr.bf16.gmra.mrb[224].mxu1 %v18296_v4  ;;  %12413 = vmatprep.subr.bf16.mxu0 %v13425_v19  ;;  %v13429_v19 = vld [vmem:[%s18037_s2 + $0x490] sm:$0xff]  }
 0x1fd   : > { %6357 = vmatprep.mubr.bf16.mxu1 %v15587_v39  ;;  %v11791_v56 = vpop.f32.mrb[120].mxu0  ;;  %v15678_v11 = vadd.f32 %v11902_v2, %v3734_v9  ;;  %v13434_v2 = vld [vmem:[%s18037_s2 + $0x4d8] sm:$0xff]   ;;  %v18335_v9 = vld [vmem:[#allocation22_spill] sm:$0xff] }
 0x1fe   : > { %v11792_v21 = vpop.f32.mrb[121].mxu0 }
 0x1ff   : > { %v11903_v42 = vpop.f32.mrb[120].mxu1  ;;  %v11793_v24 = vadd.f32 %v11792_v21, %v11791_v56  ;;  %v11794_v16 = vpop.f32.mrb[122].mxu0  ;;  %12414 = vmatpush3.bf16.msra.mxu0 %v13426_v7  ;;  %v18336_v56 = vld [vmem:[#allocation29_spill] sm:$0xff] }
 0x200   : > { %v11904_v48 = vpop.f32.mrb[121].mxu1  ;;  %v11795_v22 = vpop.f32.mrb[123].mxu0  ;;  %12415 = vmatprep.subr.bf16.mxu0 %v13428_v20  ;;  %v18337_v7 = vld [vmem:[#allocation45_spill] sm:$0xff] }
 0x201   : > { %v11905_v34 = vadd.f32 %v11904_v48, %v11903_v42  ;;  %v11906_v41 = vpop.f32.mrb[122].mxu1  ;;  %v3739_v46 = vadd.f32 %v11793_v24, %v18334_v61  ;;  %v11796_v40 = vadd.f32 %v11795_v22, %v11794_v16  ;;  %v13435_v61 = vld [vmem:[%s18037_s2 + $0x498] sm:$0xff]   ;;  %v13440_v24 = vld [vmem:[%s18037_s2 + $0x4e0] sm:$0xff]  }
 0x202   : > { %v11907_v17 = vpop.f32.mrb[123].mxu1  ;;  %6455 = vmatmul.mubr.bf16.gmra.mrb[228].mxu0 %v18336_v56 }
 0x203   : > { %v11908_v39 = vadd.f32 %v11907_v17, %v11906_v41  ;;  %v3742_v42 = vadd.f32 %v11796_v40, %v18337_v7  ;;  %6462 = vmatprep.mubr.bf16.mxu0 %v18275_v14  ;;  %v15692_v20 = vadd.f32 %v11905_v34, %v3739_v46  ;;  %12416 = vmatpush3.bf16.msra.mxu0 %v13429_v19  ;;  %v13441_v7 = vld [vmem:[%s18037_s2 + $0x4a0] sm:$0xff]  }
 0x204   : > { %6358 = vmatmul.mubr.bf16.gmra.mrb[228].mxu1 %v18335_v9  ;;  %12417 = vmatprep.subr.bf16.mxu0 %v13434_v2  ;;  %v18339_v2 = vld [vmem:[#allocation46_spill] sm:$0xff] }
 0x205   : > { %6365 = vmatprep.mubr.bf16.mxu1 %v15612_v10  ;;  %v11797_v21 = vpop.f32.mrb[124].mxu0  ;;  %v15700_v16 = vadd.f32 %v11908_v39, %v3742_v42  ;;  %v13442_v39 = vld [vmem:[%s18037_s2 + $0x4e8] sm:$0xff]   ;;  %v18340_v42 = vld [vmem:[#allocation47_spill] sm:$0xff] }
 0x206   : > { %v11798_v40 = vpop.f32.mrb[125].mxu0 }
 0x207   : > { %v11909_v48 = vpop.f32.mrb[124].mxu1  ;;  %18338 = vst [vmem:[#allocation26_spill] sm:$0xff] %v15700_v16  ;;  %v11799_v22 = vadd.f32 %v11798_v40, %v11797_v21  ;;  %v11800_v17 = vpop.f32.mrb[126].mxu0  ;;  %12418 = vmatpush3.bf16.msra.mxu0 %v13435_v61  ;;  %v15722_v40 = vld [vmem:[%s18038_s3] ss:$0 sm:$0xff]  ;;  %v18346_v16 = vld [vmem:[#allocation24_spill] sm:$0xff] }
 0x208   : > { %v11910_v41 = vpop.f32.mrb[125].mxu1  ;;  %v11801_v19 = vpop.f32.mrb[127].mxu0  ;;  %12419 = vmatprep.subr.bf16.mxu0 %v13440_v24 }
 0x209   : > { %v11911_v46 = vadd.f32 %v11910_v41, %v11909_v48  ;;  %v11912_v34 = vpop.f32.mrb[126].mxu1  ;;  %v3747_v14 = vadd.f32 %v11799_v22, %v18339_v2  ;;  %v11802_v10 = vadd.f32 %v11801_v19, %v11800_v17  ;;  %v13443_v48 = vld [vmem:[%s18037_s2 + $0x4a8] sm:$0xff]   ;;  %v18342_v41 = vld [vmem:[#allocation27_spill] sm:$0xff] }
 0x20a   : > { %v11913_v56 = vpop.f32.mrb[127].mxu1  ;;  %6463 = vmatmul.mubr.bf16.gmra.mrb[232].mxu0 %v15242_v36  ;;  %v18343_v19 = vld [vmem:[#allocation34_spill] sm:$0xff] }
 0x20b   : > { %v11914_v35 = vadd.f32 %v11913_v56, %v11912_v34  ;;  %v3750_v21 = vadd.f32 %v11802_v10, %v18340_v42  ;;  %6470 = vmatprep.mubr.bf16.mxu0 %v18282_v37  ;;  %v15714_v61 = vadd.f32 %v11911_v46, %v3747_v14  ;;  %12420 = vmatpush3.bf16.msra.mxu0 %v13441_v7  ;;  %v13444_v14 = vld [vmem:[%s18037_s2 + $0x4f0] sm:$0xff]   ;;  %v15733_v34 = vld [vmem:[%s18039_s4] ss:$0 sm:$0xff] }
 0x20c   : > { %6366 = vmatmul.mubr.bf16.gmra.mrb[232].mxu1 %v18311_v54  ;;  %12421 = vmatprep.subr.bf16.mxu0 %v13442_v39  ;;  %v18345_v42 = vld [vmem:[#allocation35_spill] sm:$0xff] }
 0x20d   : > { %6373 = vmatprep.mubr.bf16.mxu1 %v15631_v62  ;;  %v13041_v24 = vpop.f32.mrb[128].mxu0  ;;  %v15724_v36 = vadd.f32 %v11914_v35, %v3750_v21 }
 0x20e   : > { %v3957_v22 = vadd.f32 %v13041_v24, %v18342_v41  ;;  %v3948_v17 = vpop.f32.mrb[129].mxu0  ;;  %v13446_v24 = vld [vmem:[%s18037_s2 + $0x4b0] sm:$0xff]  }
 0x20f   : > { %18341 = vst [vmem:[#allocation31_spill] sm:$0xff] %v15724_v36  ;;  %v11955_v10 = vpop.f32.mrb[128].mxu1  ;;  %v3949_v56 = vadd.f32 %v3948_v17, %v18343_v19  ;;  %v13042_v7 = vpop.f32.mrb[130].mxu0  ;;  %12422 = vmatpush3.bf16.msra.mxu0 %v13443_v48  ;;  %v18348_v48 = vld [vmem:[#allocation43_spill] sm:$0xff] }
 0x210   : > { %v11956_v46 = vpop.f32.mrb[129].mxu1  ;;  %v4084_v39 = vmul.f32 %v15722_v40, %v3957_v22  ;;  %v3960_v21 = vadd.f32 %v13042_v7, %v18345_v42  ;;  %v3951_v37 = vpop.f32.mrb[131].mxu0  ;;  %12423 = vmatprep.subr.bf16.mxu0 %v13444_v14 }
 0x211   : > { %v15736_v35 = vadd.f32 %v11956_v46, %v11955_v10  ;;  %v11958_v2 = vpop.f32.mrb[130].mxu1  ;;  %v4082_v41 = vmul.f32 %v15722_v40, %v3949_v56  ;;  %v3952_v36 = vadd.f32 %v3951_v37, %v18346_v16  ;;  %v13455_v10 = vld [vmem:[%s18037_s2 + $0x4f8] sm:$0xff]  }
 0x212   : > { %v11959_v62 = vpop.f32.mrb[131].mxu1  ;;  %v4123_v22 = vadd.f32 %v15733_v34, %v4084_v39  ;;  %v4085_v46 = vmul.f32 %v15722_v40, %v3960_v21  ;;  %6471 = vmatmul.mubr.bf16.gmra.mrb[236].mxu0 %v18348_v48 }
 0x213   : > { %18344 = vst [vmem:[#allocation41_spill] sm:$0xff] %v15736_v35  ;;  %v15745_v17 = vadd.f32 %v11959_v62, %v11958_v2  ;;  %v4121_v19 = vadd.f32 %v15733_v34, %v4082_v41  ;;  %v4083_v56 = vmul.f32 %v15722_v40, %v3952_v36  ;;  %6478 = vmatprep.mubr.bf16.mxu0 %v18288_v32  ;;  %v13457_v62 = vld [vmem:[%s18037_s2 + $0x4b8] sm:$0xff]   ;;  %v13469_v36 = vld [vmem:[%s18037_s2 + $0x5c0] sm:$0xff]  }
 0x214   : > { %6374 = vmatmul.mubr.bf16.gmra.mrb[236].mxu1 %v18318_v59  ;;  %v4124_v37 = vadd.f32 %v15733_v34, %v4085_v46  ;;  %12424 = vmatpush3.bf16.msra.mxu0 %v13446_v24  ;;  %v4155_v2 = vmax.f32 %v4123_v22, 0.0 }
 0x215   : > { %18347 = vst [vmem:[#allocation42_spill] sm:$0xff] %v15745_v17  ;;  %6381 = vmatprep.mubr.bf16.mxu1 %v15646_v38  ;;  %v4122_v16 = vadd.f32 %v15733_v34, %v4083_v56  ;;  %v13045_v14 = vpop.f32.mrb[132].mxu0  ;;  %12425 = vmatprep.subr.bf16.mxu0 %v13455_v10  ;;  %v4153_v41 = vmax.f32 %v4121_v19, 0.0  ;;  %v15769_v38 = vld [vmem:[%s13833_s21 + $0x124] sm:$0xff]  }
 0x216   : > { %v4156_v39 = vmax.f32 %v4124_v37, 0.0  ;;  %v3973_v42 = vadd.f32 %v13045_v14, %v15483_v15  ;;  %v3964_v21 = vpop.f32.mrb[133].mxu0 }
 0x217   : > { %v11961_v7 = vpop.f32.mrb[132].mxu1  ;;  %v4154_v46 = vmax.f32 %v4122_v16, 0.0  ;;  %v3965_v48 = vadd.f32 %v3964_v21, %v15464_v26  ;;  %v13046_v32 = vpop.f32.mrb[134].mxu0 }
 0x218   : > { %v11962_v24 = vpop.f32.mrb[133].mxu1  ;;  %v15773_v17 = vpack.c.bf16 %v4156_v39, %v4155_v2  ;;  %v4088_v35 = vmul.f32 %v15722_v40, %v3973_v42  ;;  %v3976_v22 = vadd.f32 %v13046_v32, %v15485_v51  ;;  %v3967_v37 = vpop.f32.mrb[135].mxu0  ;;  %12426 = vmatpush3.bf16.msra.mxu0 %v13457_v62 }
 0x219   : > { %v15771_v56 = vadd.f32 %v11962_v24, %v11961_v7  ;;  %v11964_v10 = vpop.f32.mrb[134].mxu1  ;;  %v15777_v14 = vpack.c.bf16 %v4154_v46, %v4153_v41  ;;  %v4086_v19 = vmul.f32 %v15722_v40, %v3965_v48  ;;  %v3968_v26 = vadd.f32 %v3967_v37, %v15469_v30  ;;  %12635 = vmatprep.subr.bf16.mxu0 %v13469_v36 }
 0x21a   : > { %18349 = vst [vmem:[#allocation44_spill] sm:$0xff] %v15773_v17  ;;  %v11965_v15 = vpop.f32.mrb[135].mxu1  ;;  %v4127_v7 = vadd.f32 %v15733_v34, %v4088_v35  ;;  %v4089_v2 = vmul.f32 %v15722_v40, %v3976_v22  ;;  %6479 = vmatmul.mubr.bf16.gmra.mrb[240].mxu0 %v15326_v6  ;;  %v15796_v22 = vld [vmem:[%s13833_s21 + $0x134] sm:$0xff]  }
 0x21b   : > { %18350 = vst [vmem:[#allocation29_spill] sm:$0xff] %v15777_v14  ;;  %v15781_v16 = vadd.f32 %v11965_v15, %v11964_v10  ;;  %v4125_v32 = vadd.f32 %v15733_v34, %v4086_v19  ;;  %v4087_v51 = vmul.f32 %v15722_v40, %v3968_v26  ;;  %6486 = vmatprep.mubr.bf16.mxu0 %v18296_v4  ;;  %v13504_v4 = vld [vmem:[%s18037_s2 + $0x5b0] sm:$0xff]  }
 0x21c   : > { %6382 = vmatmul.mubr.bf16.gmra.mrb[240].mxu1 %v18208_v27  ;;  %v4128_v30 = vadd.f32 %v15733_v34, %v4089_v2  ;;  %v4159_v39 = vmax.f32 %v4127_v7, 0.0 }
 0x21d   : > { %6389 = vmatprep.mubr.bf16.mxu1 %v15769_v38  ;;  %v4126_v62 = vadd.f32 %v15733_v34, %v4087_v51  ;;  %v13049_v35 = vpop.f32.mrb[136].mxu0  ;;  %v4157_v41 = vmax.f32 %v4125_v32, 0.0 }
 0x21e   : > { %v4160_v42 = vmax.f32 %v4128_v30, 0.0  ;;  %v3989_v21 = vadd.f32 %v13049_v35, %v15514_v52  ;;  %v3980_v6 = vpop.f32.mrb[137].mxu0 }
 0x21f   : > { %v11967_v36 = vpop.f32.mrb[136].mxu1  ;;  %v4158_v46 = vmax.f32 %v4126_v62, 0.0  ;;  %v3981_v48 = vadd.f32 %v3980_v6, %v15498_v43  ;;  %v13050_v10 = vpop.f32.mrb[138].mxu0 }
 0x220   : > { %v11968_v24 = vpop.f32.mrb[137].mxu1  ;;  %v15800_v19 = vpack.c.bf16 %v4160_v42, %v4159_v39  ;;  %v4092_v26 = vmul.f32 %v15722_v40, %v3989_v21  ;;  %v3992_v7 = vadd.f32 %v13050_v10, %v15520_v25  ;;  %v3983_v2 = vpop.f32.mrb[139].mxu0 }
 0x221   : > { %v15798_v37 = vadd.f32 %v11968_v24, %v11967_v36  ;;  %v11970_v15 = vpop.f32.mrb[138].mxu1  ;;  %v15804_v51 = vpack.c.bf16 %v4158_v46, %v4157_v41  ;;  %v4090_v32 = vmul.f32 %v15722_v40, %v3981_v48  ;;  %v3984_v43 = vadd.f32 %v3983_v2, %v15500_v44  ;;  %v18353_v36 = vld [vmem:[#allocation32_spill] sm:$0xff]  ;;  %v15823_v2 = vld [vmem:[%s13833_s21 + $0x144] sm:$0xff]  }
 0x222   : > { %18351 = vst [vmem:[#allocation45_spill] sm:$0xff] %v15800_v19  ;;  %v11971_v52 = vpop.f32.mrb[139].mxu1  ;;  %v4131_v62 = vadd.f32 %v15733_v34, %v4092_v26  ;;  %v4093_v35 = vmul.f32 %v15722_v40, %v3992_v7  ;;  %6487 = vmatmul.mubr.bf16.gmra.mrb[244].mxu0 %v15376_v13  ;;  %v380_v19 = vld [vmem:[%s13833_s21 + $0x4] sm:$0xf] }
 0x223   : > { %18352 = vst [vmem:[#allocation46_spill] sm:$0xff] %v15804_v51  ;;  %v15808_v30 = vadd.f32 %v11971_v52, %v11970_v15  ;;  %v4129_v25 = vadd.f32 %v15733_v34, %v4090_v32  ;;  %v4091_v39 = vmul.f32 %v15722_v40, %v3984_v43  ;;  %6494 = vmatprep.mubr.bf16.mxu0 %v18335_v9  ;;  %v7130_v9 = vld [vmem:[%s13833_s21 + $0x58] sm:$0xf] }
 0x224   : > { %6390 = vmatmul.mubr.bf16.gmra.mrb[244].mxu1 %v18353_v36  ;;  %v4132_v44 = vadd.f32 %v15733_v34, %v4093_v35  ;;  %v4163_v24 = vmax.f32 %v4131_v62, 0.0 }
 0x225   : > { %6397 = vmatprep.mubr.bf16.mxu1 %v15796_v22  ;;  %v4130_v42 = vadd.f32 %v15733_v34, %v4091_v39  ;;  %v13053_v21 = vpop.f32.mrb[140].mxu0  ;;  %v4161_v10 = vmax.f32 %v4129_v25, 0.0 }
 0x226   : > { %v4164_v41 = vmax.f32 %v4132_v44, 0.0  ;;  %v4005_v46 = vadd.f32 %v13053_v21, %v15554_v1  ;;  %v3996_v13 = vpop.f32.mrb[141].mxu0 }
 0x227   : > { %v11973_v6 = vpop.f32.mrb[140].mxu1  ;;  %v4162_v15 = vmax.f32 %v4130_v42, 0.0  ;;  %v3997_v26 = vadd.f32 %v3996_v13, %v15534_v28  ;;  %v13054_v7 = vpop.f32.mrb[142].mxu0 }
 0x228   : > { %v11974_v48 = vpop.f32.mrb[141].mxu1  ;;  %v15827_v43 = vpack.c.bf16 %v4164_v41, %v4163_v24  ;;  %v4096_v35 = vmul.f32 %v15722_v40, %v4005_v46  ;;  %v4008_v62 = vadd.f32 %v13054_v7, %v15558_v5  ;;  %v3999_v39 = vpop.f32.mrb[143].mxu0  ;;  %v18356_v24 = vld [vmem:[#allocation33_spill] sm:$0xff] }
 0x229   : > { %v15825_v52 = vadd.f32 %v11974_v48, %v11973_v6  ;;  %v11976_v32 = vpop.f32.mrb[142].mxu1  ;;  %v15831_v44 = vpack.c.bf16 %v4162_v15, %v4161_v10  ;;  %v4094_v25 = vmul.f32 %v15722_v40, %v3997_v26  ;;  %v4000_v28 = vadd.f32 %v3999_v39, %v15536_v58 }
 0x22a   : > { %18354 = vst [vmem:[#allocation47_spill] sm:$0xff] %v15827_v43  ;;  %v11977_v1 = vpop.f32.mrb[143].mxu1  ;;  %v4135_v21 = vadd.f32 %v15733_v34, %v4096_v35  ;;  %v4097_v6 = vmul.f32 %v15722_v40, %v4008_v62  ;;  %6495 = vmatmul.mubr.bf16.gmra.mrb[248].mxu0 %v15416_v29 }
 0x22b   : > { %18355 = vst [vmem:[#allocation27_spill] sm:$0xff] %v15831_v44  ;;  %v15835_v42 = vadd.f32 %v11977_v1, %v11976_v32  ;;  %v4133_v5 = vadd.f32 %v15733_v34, %v4094_v25  ;;  %v4095_v41 = vmul.f32 %v15722_v40, %v4000_v28  ;;  %6502 = vmatprep.mubr.bf16.mxu0 %v18311_v54 }
 0x22c   : > { %6398 = vmatmul.mubr.bf16.gmra.mrb[248].mxu1 %v18356_v24  ;;  %v4136_v58 = vadd.f32 %v15733_v34, %v4097_v6  ;;  %v4167_v10 = vmax.f32 %v4135_v21, 0.0 }
 0x22d   : > { %6405 = vmatprep.mubr.bf16.mxu1 %v15823_v2  ;;  %v4134_v46 = vadd.f32 %v15733_v34, %v4095_v41  ;;  %v13057_v13 = vpop.f32.mrb[144].mxu0  ;;  %v4165_v32 = vmax.f32 %v4133_v5, 0.0 }
 0x22e   : > { %v4168_v15 = vmax.f32 %v4136_v58, 0.0  ;;  %v4021_v26 = vadd.f32 %v13057_v13, %v15601_v47  ;;  %v4012_v7 = vpop.f32.mrb[145].mxu0 }
 0x22f   : > { %v11979_v48 = vpop.f32.mrb[144].mxu1  ;;  %v4166_v35 = vmax.f32 %v4134_v46, 0.0  ;;  %v4013_v62 = vadd.f32 %v4012_v7, %v15576_v3  ;;  %v13058_v39 = vpop.f32.mrb[146].mxu0 }
 0x230   : > { %v11980_v29 = vpop.f32.mrb[145].mxu1  ;;  %v15851_v28 = vpack.c.bf16 %v4168_v15, %v4167_v10  ;;  %v4100_v6 = vmul.f32 %v15722_v40, %v4021_v26  ;;  %v4024_v21 = vadd.f32 %v13058_v39, %v15609_v45  ;;  %v4015_v41 = vpop.f32.mrb[147].mxu0  ;;  %v18359_v10 = vld [vmem:[#allocation36_spill] sm:$0xff]  ;;  %v13561_v26 = vld [vmem:[%s13833_s21 + $0x84] sm:$0xff]  }
 0x231   : > { %v15849_v1 = vadd.f32 %v11980_v29, %v11979_v48  ;;  %v11982_v25 = vpop.f32.mrb[146].mxu1  ;;  %v15855_v47 = vpack.c.bf16 %v4166_v35, %v4165_v32  ;;  %v4098_v5 = vmul.f32 %v15722_v40, %v4013_v62  ;;  %v4016_v46 = vadd.f32 %v4015_v41, %v15584_v18 }
 0x232   : > { %18357 = vst [vmem:[#allocation34_spill] sm:$0xff] %v15851_v28  ;;  %v11983_v58 = vpop.f32.mrb[147].mxu1  ;;  %v4139_v13 = vadd.f32 %v15733_v34, %v4100_v6  ;;  %v4101_v48 = vmul.f32 %v15722_v40, %v4024_v21  ;;  %6503 = vmatmul.mubr.bf16.gmra.mrb[252].mxu0 %v15444_v49 }
 0x233   : > { %18358 = vst [vmem:[#allocation35_spill] sm:$0xff] %v15855_v47  ;;  %v15859_v3 = vadd.f32 %v11983_v58, %v11982_v25  ;;  %v4137_v45 = vadd.f32 %v15733_v34, %v4098_v5  ;;  %v4099_v15 = vmul.f32 %v15722_v40, %v4016_v46  ;;  %6510 = vmatprep.mubr.bf16.mxu0 %v18318_v59 }
 0x234   : > { %6406 = vmatmul.mubr.bf16.gmra.mrb[252].mxu1 %v18359_v10  ;;  %v4140_v18 = vadd.f32 %v15733_v34, %v4101_v48  ;;  %v4171_v35 = vmax.f32 %v4139_v13, 0.0 }
 0x235   : > { %13087 = vmatprep.mubr.bf16.mxu1 %v13561_v26  ;;  %v4138_v7 = vadd.f32 %v15733_v34, %v4099_v15  ;;  %v13061_v29 = vpop.f32.mrb[148].mxu0  ;;  %v4169_v6 = vmax.f32 %v4137_v45, 0.0 }
 0x236   : > { %v4172_v62 = vmax.f32 %v4140_v18, 0.0  ;;  %v4037_v39 = vadd.f32 %v13061_v29, %v15641_v55  ;;  %v4028_v25 = vpop.f32.mrb[149].mxu0  ;;  %v13447_v55 = vld [vmem:[%s18037_s2 + $0x500] sm:$0xff]   ;;  %v13448_v29 = vld [vmem:[%s18037_s2 + $0x548] sm:$0xff]  }
 0x237   : > { %v11985_v32 = vpop.f32.mrb[148].mxu1  ;;  %v4170_v21 = vmax.f32 %v4138_v7, 0.0  ;;  %v4029_v41 = vadd.f32 %v4028_v25, %v15622_v33  ;;  %v13062_v58 = vpop.f32.mrb[150].mxu0 }
 0x238   : > { %v11986_v49 = vpop.f32.mrb[149].mxu1  ;;  %v15875_v48 = vpack.c.bf16 %v4172_v62, %v4171_v35  ;;  %v4104_v15 = vmul.f32 %v15722_v40, %v4037_v39  ;;  %v4040_v13 = vadd.f32 %v13062_v58, %v15643_v53  ;;  %v4031_v26 = vpop.f32.mrb[151].mxu0  ;;  %v13562_v62 = vld [vmem:[%s13833_s21 + $0x94] sm:$0xff]  }
 0x239   : > { %v15873_v5 = vadd.f32 %v11986_v49, %v11985_v32  ;;  %v11988_v46 = vpop.f32.mrb[150].mxu1  ;;  %v15882_v18 = vpack.c.bf16 %v4170_v21, %v4169_v6  ;;  %v4102_v33 = vmul.f32 %v15722_v40, %v4029_v41  ;;  %v4032_v7 = vadd.f32 %v4031_v26, %v15628_v60  ;;  %v13449_v49 = vld [vmem:[%s18037_s2 + $0x508] sm:$0xff]   ;;  %v13450_v21 = vld [vmem:[%s18037_s2 + $0x550] sm:$0xff]  }
 0x23a   : > { %18360 = vst [vmem:[#allocation24_spill] sm:$0xff] %v15875_v48  ;;  %v11989_v45 = vpop.f32.mrb[151].mxu1  ;;  %v4143_v53 = vadd.f32 %v15733_v34, %v4104_v15  ;;  %v4105_v35 = vmul.f32 %v15722_v40, %v4040_v13  ;;  %6511 = vmatmul.mubr.bf16.gmra.mrb[0].mxu0 %v15471_v23 }
 0x23b   : > { %18361 = vst [vmem:[#allocation43_spill] sm:$0xff] %v15882_v18  ;;  %v15889_v32 = vadd.f32 %v11989_v45, %v11988_v46  ;;  %v4141_v39 = vadd.f32 %v15733_v34, %v4102_v33  ;;  %v4103_v25 = vmul.f32 %v15722_v40, %v4032_v7  ;;  %6518 = vmatprep.mubr.bf16.mxu0 %v18208_v27 }
 0x23c   : > { %13088 = vmatmul.mubr.bf16.vlgmr.msra.gmra.mrb[0].mxu1 %v13562_v62  ;;  %v4144_v60 = vadd.f32 %v15733_v34, %v4105_v35  ;;  %v4175_v58 = vmax.f32 %v4143_v53, 0.0 }
 0x23d   : > { %13091 = vmatprep.mubr.bf16.mxu1 %v15503_v31  ;;  %12524 = vmatpush3.bf16.msra.mxu1 %v13447_v55  ;;  %v4142_v6 = vadd.f32 %v15733_v34, %v4103_v25  ;;  %v13065_v23 = vpop.f32.mrb[152].mxu0  ;;  %v4173_v26 = vmax.f32 %v4141_v39, 0.0 }
 0x23e   : > { %12525 = vmatprep.subr.bf16.mxu1 %v13448_v29  ;;  %v4176_v46 = vmax.f32 %v4144_v60, 0.0  ;;  %v4053_v31 = vadd.f32 %v13065_v23, %v15672_v63  ;;  %v4044_v15 = vpop.f32.mrb[153].mxu0  ;;  %v13451_v63 = vld [vmem:[%s18037_s2 + $0x510] sm:$0xff]   ;;  %v13452_v23 = vld [vmem:[%s18037_s2 + $0x558] sm:$0xff]  }
 0x23f   : > { %v11991_v41 = vpop.f32.mrb[152].mxu1  ;;  %v4174_v55 = vmax.f32 %v4142_v6, 0.0  ;;  %v4045_v45 = vadd.f32 %v4044_v15, %v15654_v57  ;;  %v13066_v33 = vpop.f32.mrb[154].mxu0  ;;  %v13453_v15 = vld [vmem:[%s18037_s2 + $0x518] sm:$0xff]  }
 0x240   : > { %v11992_v13 = vpop.f32.mrb[153].mxu1  ;;  %v15911_v29 = vpack.c.bf16 %v4176_v46, %v4175_v58  ;;  %v4108_v62 = vmul.f32 %v15722_v40, %v4053_v31  ;;  %v4056_v53 = vadd.f32 %v13066_v33, %v15678_v11  ;;  %v4047_v25 = vpop.f32.mrb[155].mxu0  ;;  %v445_v58 = vld [vmem:[%s13833_s21 + $0x160] sm:$0xc] }
 0x241   : > { %v15909_v7 = vadd.f32 %v11992_v13, %v11991_v41  ;;  %v11994_v35 = vpop.f32.mrb[154].mxu1  ;;  %12526 = vmatpush3.bf16.msra.mxu1 %v13449_v49  ;;  %v15918_v57 = vpack.c.bf16 %v4174_v55, %v4173_v26  ;;  %v4106_v60 = vmul.f32 %v15722_v40, %v4045_v45  ;;  %v4048_v6 = vadd.f32 %v4047_v25, %v15656_v0  ;;  %v13456_v45 = vld [vmem:[%s18037_s2 + $0x560] sm:$0xff]  }
 0x242   : > { %18362 = vst [vmem:[#allocation53_spill] sm:$0xff] %v15911_v29  ;;  %v11995_v39 = vpop.f32.mrb[155].mxu1  ;;  %12527 = vmatprep.subr.bf16.mxu1 %v13450_v21  ;;  %v4147_v49 = vadd.f32 %v15733_v34, %v4108_v62  ;;  %v4109_v41 = vmul.f32 %v15722_v40, %v4056_v53  ;;  %6519 = vmatmul.mubr.bf16.gmra.mrb[4].mxu0 %v15487_v12  ;;  %v446_v21 = vld [vmem:[%s13833_s21 + $0x164] sm:$0xf]  ;;  %v1077_v26 = vshrl.u32 %v445_v58, 16  ;;  %v1080_v55 = vshll.u32 %v445_v58, 16 }
 0x243   : > { %18363 = vst [vmem:[#allocation54_spill] sm:$0xff] %v15918_v57  ;;  %v15925_v11 = vadd.f32 %v11995_v39, %v11994_v35  ;;  %v4145_v46 = vadd.f32 %v15733_v34, %v4106_v60  ;;  %v4107_v0 = vmul.f32 %v15722_v40, %v4048_v6  ;;  %6526 = vmatprep.mubr.bf16.mxu0 %v18353_v36  ;;  %v1086_v53 = vshrl.u32 %v446_v21, 16 }
 0x244   : > { %13092 = vmatmul.mubr.bf16.gmra.mrb[4].mxu1 %v15523_v50  ;;  %v4148_v31 = vadd.f32 %v15733_v34, %v4109_v41 }
 0x245   : > { %13095 = vmatprep.mubr.bf16.mxu1 %v15542_v8  ;;  %12528 = vmatpush3.bf16.msra.mxu1 %v13451_v63  ;;  %v4146_v12 = vadd.f32 %v15733_v34, %v4107_v0  ;;  %v13069_v50 = vpop.f32.mrb[156].mxu0  ;;  %v4179_v8 = vmax.f32 %v4147_v49, 0.0  ;;  %v4177_v63 = vmax.f32 %v4145_v46, 0.0  ;;  %v18365_v0 = vld [vmem:[#allocation31_spill] sm:$0xff]  ;;  %v1089_v46 = vshll.u32 %v446_v21, 16  ;;  %v13459_v21 = vld [vmem:[%s18037_s2 + $0x568] sm:$0xff]  }
 0x246   : > { %12529 = vmatprep.subr.bf16.mxu1 %v13452_v23  ;;  %v4180_v33 = vmax.f32 %v4148_v31, 0.0  ;;  %v4069_v35 = vadd.f32 %v13069_v50, %v15714_v61  ;;  %v4060_v62 = vpop.f32.mrb[157].mxu0  ;;  %v15954_v61 = vld [vmem:[%s13833_s21 + $0x154] sm:$0xf] }
 0x247   : > { %v11997_v13 = vpop.f32.mrb[156].mxu1  ;;  %v4178_v39 = vmax.f32 %v4146_v12, 0.0  ;;  %v4061_v60 = vadd.f32 %v4060_v62, %v15692_v20  ;;  %v13070_v6 = vpop.f32.mrb[158].mxu0  ;;  %v13458_v20 = vld [vmem:[%s18037_s2 + $0x520] sm:$0xff]  }
 0x248   : > { %v11998_v25 = vpop.f32.mrb[157].mxu1  ;;  %v15949_v58 = vpack.c.bf16 %v4180_v33, %v4179_v8  ;;  %v4112_v49 = vmul.f32 %v15722_v40, %v4069_v35  ;;  %v4072_v31 = vadd.f32 %v13070_v6, %v18365_v0  ;;  %v4063_v29 = vpop.f32.mrb[159].mxu0  ;;  %v18367_v8 = vld [vmem:[#allocation26_spill] sm:$0xff]  ;;  %v15964_v35 = vld [vmem:[%s13833_s21 + $0x150] sm:$0xe] }
 0x249   : > { %v15947_v23 = vadd.f32 %v11998_v25, %v11997_v13  ;;  %v12000_v41 = vpop.f32.mrb[158].mxu1  ;;  %12530 = vmatpush3.bf16.msra.mxu1 %v13453_v15  ;;  %v15959_v50 = vpack.c.bf16 %v4178_v39, %v4177_v63  ;;  %v4110_v13 = vmul.f32 %v15722_v40, %v4061_v60  ;;  %v4064_v33 = vadd.f32 %v4063_v29, %v18367_v8  ;;  %v18368_v63 = vld [vmem:[#allocation50_spill] sm:$0xff]  ;;  %v18369_v39 = vld [vmem:[#allocation48_spill] sm:$0xff]  ;;  %v448_v0 = vld [vmem:[%s13833_s21 + $0x170] sm:$0xc] }
 0x24a   : > { %18364 = vst [vmem:[#allocation55_spill] sm:$0xff] %v15949_v58  ;;  %v12001_v12 = vpop.f32.mrb[159].mxu1  ;;  %12531 = vmatprep.subr.bf16.mxu1 %v13456_v45  ;;  %v4151_v15 = vadd.f32 %v15733_v34, %v4112_v49  ;;  %v4113_v25 = vmul.f32 %v15722_v40, %v4072_v31  ;;  %6527 = vmatmul.mubr.bf16.gmra.mrb[8].mxu0 %v18368_v63  ;;  %v447_v60 = vld [vmem:[%s13833_s21 + $0x168] sm:$0x7]  ;;  %v18370_v45 = vld [vmem:[#allocation49_spill] sm:$0xff]  ;;  %v10857_v31 = vrot.slane %v15964_v35, 9 }
 0x24b   : > { %18366 = vst [vmem:[#allocation31_spill] sm:$0xff] %v15959_v50  ;;  %v15966_v62 = vadd.f32 %v12001_v12, %v12000_v41  ;;  %v4149_v29 = vadd.f32 %v15733_v34, %v4110_v13  ;;  %v4111_v6 = vmul.f32 %v15722_v40, %v4064_v33  ;;  %6534 = vmatprep.mubr.bf16.mxu0 %v18356_v24  ;;  %v1079_v12 = vrot.slane %v1077_v26, 6  ;;  %v13460_v13 = vld [vmem:[%s18037_s2 + $0x528] sm:$0xff]  }
 0x24c   : > { %13096 = vmatmul.mubr.bf16.gmra.mrb[8].mxu1 %v18369_v39  ;;  %v4152_v49 = vadd.f32 %v15733_v34, %v4113_v25  ;;  %v1082_v8 = vrot.slane %v1080_v55, 7  ;;  %v1088_v63 = vrot.slane %v1086_v53, 6  ;;  %v1091_v39 = vrot.slane %v1089_v46, 7  ;;  %v13463_v25 = vld [vmem:[%s18037_s2 + $0x570] sm:$0xff]  }
 0x24d   : > { %13099 = vmatprep.mubr.bf16.mxu1 %v18370_v45  ;;  %12532 = vmatpush3.bf16.msra.mxu1 %v13458_v20  ;;  %v4150_v40 = vadd.f32 %v15733_v34, %v4111_v6  ;;  %v12067_v33 = vpop.f32.mrb[160].mxu0  ;;  %v1096_v45 = vshrl.u32 %v447_v60, 16  ;;  %v4183_v35 = vmax.f32 %v4151_v15, 0.0  ;;  %v1099_v20 = vshll.u32 %v447_v60, 16  ;;  %v13464_v60 = vld [vmem:[%s18037_s2 + $0x530] sm:$0xff]  }
 0x24e   : > { %12533 = vmatprep.subr.bf16.mxu1 %v13459_v21  ;;  %v4184_v26 = vmax.f32 %v4152_v49, 0.0  ;;  %v12068_v55 = vpop.f32.mrb[161].mxu0  ;;  %v1105_v50 = vshrl.u32 %v448_v0, 16  ;;  %v4181_v57 = vmax.f32 %v4149_v29, 0.0  ;;  %v1083_v28 = vor.u32 %v1082_v8, %v1079_v12  ;;  %v449_v49 = vld [vmem:[%s13833_s21 + $0x174] sm:$0xf] }
 0x24f   : > { %v12003_v58 = vpop.f32.mrb[160].mxu1  ;;  %v4182_v48 = vmax.f32 %v4150_v40, 0.0  ;;  %v12069_v34 = vadd.f32 %v12068_v55, %v12067_v33  ;;  %v12070_v53 = vpop.f32.mrb[162].mxu0  ;;  %v1108_v47 = vshll.u32 %v448_v0, 16  ;;  %v18373_v40 = vld [vmem:[#allocation41_spill] sm:$0xff]  ;;  %v13465_v0 = vld [vmem:[%s18037_s2 + $0x578] sm:$0xff]  }
 0x250   : > { %v12004_v41 = vpop.f32.mrb[161].mxu1  ;;  %v15993_v21 = vpack.c.bf16 %v4184_v26, %v4183_v35  ;;  %v12071_v18 = vpop.f32.mrb[163].mxu0  ;;  %v18374_v12 = vld [vmem:[#allocation52_spill] sm:$0xff]  ;;  %v18375_v8 = vld [vmem:[#allocation51_spill] sm:$0xff]  ;;  %v18376_v26 = vld [vmem:[#allocation42_spill] sm:$0xff] }
 0x251   : > { %v15991_v46 = vadd.f32 %v12004_v41, %v12003_v58  ;;  %v12006_v6 = vpop.f32.mrb[162].mxu1  ;;  %12534 = vmatpush3.bf16.msra.mxu1 %v13460_v13  ;;  %v15999_v29 = vpack.c.bf16 %v4182_v48, %v4181_v57  ;;  %v16002_v33 = vadd.f32 %v12069_v34, %v18373_v40  ;;  %v12072_v58 = vadd.f32 %v12071_v18, %v12070_v53  ;;  %v4282_v41 = vld [vmem:[%s13833_s21 + $0x158] sm:$0x1]  ;;  %v18377_v18 = vld [vmem:[#allocation19_spill] sm:$0xff] }
 0x252   : > { %18371 = vst [vmem:[#allocation26_spill] sm:$0xff] %v15993_v21  ;;  %v12007_v15 = vpop.f32.mrb[163].mxu1  ;;  %12535 = vmatprep.subr.bf16.mxu1 %v13463_v25  ;;  %6535 = vmatmul.mubr.bf16.gmra.mrb[12].mxu0 %v18374_v12  ;;  %v16012_v48 = vor.u32 %v1091_v39, %v1088_v63  ;;  %v1098_v57 = vrot.slane %v1096_v45, 6  ;;  %v1101_v13 = vrot.slane %v1099_v20, 7  ;;  %v18378_v25 = vrot.slane %v15954_v61, 5  ;;  %v13466_v45 = vld [vmem:[%s18037_s2 + $0x538] sm:$0xff]  }
 0x253   : > { %18372 = vst [vmem:[#allocation50_spill] sm:$0xff] %v15999_v29  ;;  %v16005_v35 = vadd.f32 %v12007_v15, %v12006_v6  ;;  %v16015_v55 = vadd.f32 %v12072_v58, %v18376_v26  ;;  %6542 = vmatprep.mubr.bf16.mxu0 %v18359_v10  ;;  %v450_v53 = vld [vmem:[%s13833_s21 + $0x178] sm:$0x7]  ;;  %v1114_v6 = vshrl.u32 %v449_v49, 16  ;;  %v1117_v15 = vshll.u32 %v449_v49, 16  ;;  %v18381_v10 = vld [vmem:[#allocation21_spill] sm:$0xff] }
 0x254   : > { %13100 = vmatmul.mubr.bf16.gmra.mrb[12].mxu1 %v18375_v8  ;;  %v4527_v34 = vrot.slane %v18378_v25, 4  ;;  %v4528_v40 = vrot.slane %v4282_v41, 5  ;;  %v16023_v12 = vld [vmem:[%s13833_s21 + $0x164] sm:$0xf]  ;;  %v1107_v63 = vrot.slane %v1105_v50, 6  ;;  %v1110_v39 = vrot.slane %v1108_v47, 7 }
 0x255   : > { %13103 = vmatprep.mubr.bf16.mxu1 %v18377_v18  ;;  %12536 = vmatpush3.bf16.msra.mxu1 %v13464_v60  ;;  %v12073_v20 = vpop.f32.mrb[164].mxu0  ;;  %v18379_v58 = vmov %v18378_v25  ;;  %v1084_v18 = vrot.slane %v1083_v28, 4  ;;  %v379_v49 = vld [vmem:[%s13833_s21] sm:$0xc]  ;;  %v1094_v60 = vrot.slane %v16012_v48, 4  ;;  %v1102_v41 = vor.u32 %v1101_v13, %v1098_v57 }
 0x256   : > { %v16032_v26 = vsel %vm14847_vm11, %v10857_v31, %v18379_v58  ;;  %12537 = vmatprep.subr.bf16.mxu1 %v13465_v0  ;;  %v13488_v47 = vld [vmem:[%s18037_s2 + $0x640] sm:$0xff]   ;;  %v12074_v50 = vpop.f32.mrb[165].mxu0  ;;  %v1124_v21 = vshrl.u32 %v450_v53, 16  ;;  %v1127_v29 = vshll.u32 %v450_v53, 16  ;;  %v1116_v28 = vrot.slane %v1114_v6, 6 }
 0x257   : > { %v12009_v25 = vpop.f32.mrb[164].mxu1  ;;  %v12075_v43 = vadd.f32 %v12074_v50, %v12073_v20  ;;  %v12076_v31 = vpop.f32.mrb[166].mxu0  ;;  %v1119_v58 = vrot.slane %v1117_v15, 7  ;;  %v4529_v17 = vsel %vm14847_vm11, %v4527_v34, %v4528_v40  ;;  %v4532_v14 = vrot.slane %v16023_v12, 5  ;;  %v4283_v6 = vld [vmem:[%s13833_s21 + $0x160] sm:$0xe] }
 0x258   : > { %v12010_v61 = vpop.f32.mrb[165].mxu1  ;;  %v12077_v51 = vpop.f32.mrb[167].mxu0  ;;  %v1111_v57 = vor.u32 %v1110_v39, %v1107_v63  ;;  %v461_v53 = vshrl.u32 %v379_v49, 16  ;;  %v4285_v15 = vld [vmem:[%s13833_s21 + $0x168] sm:$0x1]  ;;  %v18382_v34 = vld [vmem:[#allocation23_spill] sm:$0xff]  ;;  %v1093_v12 = vsel %vm13860_vm7, %v1084_v18, %v16012_v48 }
 0x259   : > { %v16039_v44 = vadd.f32 %v12010_v61, %v12009_v25  ;;  %v12012_v0 = vpop.f32.mrb[166].mxu1  ;;  %12538 = vmatpush3.bf16.msra.mxu1 %v13466_v45  ;;  %v16046_v20 = vadd.f32 %v12075_v43, %v15771_v56  ;;  %v12078_v50 = vadd.f32 %v12077_v51, %v12076_v31  ;;  %v464_v61 = vshll.u32 %v379_v49, 16  ;;  %v18384_v39 = vld [vmem:[#allocation37_spill] sm:$0xff]  ;;  %v7127_v40 = vld [vmem:[%s13833_s21 + $0x48] sm:$0xf] }
 0x25a   : > { %v12013_v13 = vpop.f32.mrb[167].mxu1  ;;  %12747 = vmatprep.subr.bf16.mxu1 %v13488_v47  ;;  %6543 = vmatmul.mubr.bf16.gmra.mrb[16].mxu0 %v18381_v10  ;;  %v1103_v56 = vsel %vm13860_vm7, %v1094_v60, %v1102_v41  ;;  %v470_v51 = vshrl.u32 %v380_v19, 16  ;;  %v473_v43 = vshll.u32 %v380_v19, 16  ;;  %v16064_v10 = vor.u32 %v1119_v58, %v1116_v28  ;;  %v381_v47 = vld [vmem:[%s13833_s21 + $0x8] sm:$0x7] }
 0x25b   : > { %v16050_v25 = vadd.f32 %v12013_v13, %v12012_v0  ;;  %v16060_v63 = vadd.f32 %v12078_v50, %v15781_v16  ;;  %6550 = vmatprep.mubr.bf16.mxu0 %v18384_v39  ;;  %v1126_v45 = vrot.slane %v1124_v21, 6  ;;  %v1129_v49 = vrot.slane %v1127_v29, 7  ;;  %v16069_v60 = vld [vmem:[%s13833_s21 + $0x174] sm:$0xf] }
 0x25c   : > { %13104 = vmatmul.mubr.bf16.gmra.mrb[16].mxu1 %v18382_v34  ;;  %v10883_v31 = vcombine.low %v16032_v26, %v4529_v17  ;;  %v10858_v48 = vrot.slane %v4283_v6, 9  ;;  %v4534_v18 = vrot.slane %v4532_v14, 4  ;;  %v4535_v0 = vrot.slane %v4285_v15, 5 }
 0x25d   : > { %13107 = vmatprep.mubr.bf16.mxu1 %v15769_v38  ;;  %v12079_v19 = vpop.f32.mrb[168].mxu0  ;;  %v16071_v41 = vcombine.low %v1093_v12, %v1103_v56  ;;  %v1112_v16 = vrot.slane %v1111_v57, 4  ;;  %v463_v50 = vrot.slane %v461_v53, 6  ;;  %v466_v34 = vrot.slane %v464_v61, 7 }
 0x25e   : > { %v12080_v38 = vpop.f32.mrb[169].mxu0  ;;  %v472_v21 = vrot.slane %v470_v51, 6  ;;  %v475_v29 = vrot.slane %v473_v43, 7  ;;  %v480_v58 = vshrl.u32 %v381_v47, 16  ;;  %v483_v39 = vshll.u32 %v381_v47, 16 }
 0x25f   : > { %18385 = vst [vmem:[#allocation48_spill] sm:$0xff] %v16071_v41  ;;  %v12015_v13 = vpop.f32.mrb[168].mxu1  ;;  %v12081_v17 = vadd.f32 %v12080_v38, %v12079_v19  ;;  %v12082_v26 = vpop.f32.mrb[170].mxu0  ;;  %v1122_v6 = vrot.slane %v16064_v10, 4  ;;  %v1130_v15 = vor.u32 %v1129_v49, %v1126_v45  ;;  %v4533_v61 = vsel %vm14847_vm11, %v10858_v48, %v4532_v14  ;;  %v382_v47 = vld [vmem:[%s13833_s21 + $0x10] sm:$0xc] }
 0x260   : > { %v12016_v28 = vpop.f32.mrb[169].mxu1  ;;  %v12083_v53 = vpop.f32.mrb[171].mxu0  ;;  %v4536_v56 = vsel %vm14847_vm11, %v4534_v18, %v4535_v0  ;;  %v4539_v51 = vrot.slane %v16069_v60, 5  ;;  %v1121_v45 = vsel %vm13860_vm7, %v1112_v16, %v16064_v10  ;;  %v4286_v49 = vld [vmem:[%s13833_s21 + $0x170] sm:$0xe]  ;;  %v467_v48 = vor.u32 %v466_v34, %v463_v50 }
 0x261   : > { %v16074_v12 = vadd.f32 %v12016_v28, %v12015_v13  ;;  %v12018_v57 = vpop.f32.mrb[170].mxu1  ;;  %v16083_v19 = vadd.f32 %v12081_v17, %v15798_v37  ;;  %v12084_v38 = vadd.f32 %v12083_v53, %v12082_v26  ;;  %v383_v28 = vld [vmem:[%s13833_s21 + $0x14] sm:$0xf]  ;;  %v4288_v14 = vld [vmem:[%s13833_s21 + $0x178] sm:$0x1]  ;;  %v16094_v18 = vor.u32 %v475_v29, %v472_v21 }
 0x262   : > { %v12019_v43 = vpop.f32.mrb[171].mxu1  ;;  %6551 = vmatmul.mubr.bf16.gmra.mrb[20].mxu0 %v10883_v31  ;;  %v482_v0 = vrot.slane %v480_v58, 6  ;;  %v485_v37 = vrot.slane %v483_v39, 7  ;;  %v1131_v10 = vsel %vm13860_vm7, %v1122_v6, %v1130_v15  ;;  %v492_v31 = vshll.u32 %v382_v47, 16  ;;  %v384_v17 = vld [vmem:[%s13833_s21 + $0x18] sm:$0x7] }
 0x263   : > { %v16089_v13 = vadd.f32 %v12019_v43, %v12018_v57  ;;  %v16097_v60 = vadd.f32 %v12084_v38, %v15808_v30  ;;  %6558 = vmatprep.mubr.bf16.mxu0 %v16071_v41  ;;  %v10859_v16 = vrot.slane %v4286_v49, 9  ;;  %v498_v50 = vshrl.u32 %v383_v28, 16  ;;  %v13454_v57 = vld [vmem:[%s13833_s21 + $0x154] sm:$0xff]  }
 0x264   : > { %13108 = vmatmul.mubr.bf16.gmra.mrb[20].mxu1 %v15796_v22  ;;  %v489_v22 = vshrl.u32 %v382_v47, 16  ;;  %v501_v34 = vshll.u32 %v383_v28, 16  ;;  %v10884_v29 = vcombine.low %v4533_v61, %v4536_v56  ;;  %v4541_v39 = vrot.slane %v4539_v51, 4  ;;  %v7115_v61 = vld [vmem:[%s13833_s21 + $0x8] sm:$0xf] }
 0x265   : > { %13111 = vmatprep.mubr.bf16.mxu1 %v15823_v2  ;;  %v12085_v21 = vpop.f32.mrb[172].mxu0  ;;  %v4542_v30 = vrot.slane %v4288_v14, 5  ;;  %v16105_v53 = vcombine.low %v1121_v45, %v1131_v10  ;;  %v13461_v2 = vld [vmem:[%s13833_s21 + $0x164] sm:$0xff]   ;;  %v468_v43 = vrot.slane %v467_v48, 4  ;;  %v478_v6 = vrot.slane %v16094_v18, 4 }
 0x266   : > { %v12086_v26 = vpop.f32.mrb[173].mxu0  ;;  %v486_v15 = vor.u32 %v485_v37, %v482_v0  ;;  %v491_v41 = vrot.slane %v489_v22, 6  ;;  %v494_v14 = vrot.slane %v492_v31, 7  ;;  %v500_v27 = vrot.slane %v498_v50, 6 }
 0x267   : > { %v12021_v58 = vpop.f32.mrb[172].mxu1  ;;  %18386 = vst [vmem:[#allocation49_spill] sm:$0xff] %v16105_v53  ;;  %v12087_v38 = vadd.f32 %v12086_v26, %v12085_v21  ;;  %v12088_v49 = vpop.f32.mrb[174].mxu0  ;;  %v503_v59 = vrot.slane %v501_v34, 7  ;;  %v508_v45 = vshrl.u32 %v384_v17, 16  ;;  %v511_v48 = vshll.u32 %v384_v17, 16 }
 0x268   : > { %v12022_v47 = vpop.f32.mrb[173].mxu1  ;;  %v12089_v24 = vpop.f32.mrb[175].mxu0  ;;  %v4540_v22 = vsel %vm14847_vm11, %v10859_v16, %v4539_v51  ;;  %v4543_v31 = vsel %vm14847_vm11, %v4541_v39, %v4542_v30  ;;  %v7272_v50 = vrot.slane %v7115_v61, 5  ;;  %v7116_v51 = vld [vmem:[%s13833_s21 + $0xc] sm:$0x1]  ;;  %v495_v16 = vor.u32 %v494_v14, %v491_v41  ;;  %v13462_v26 = vld [vmem:[%s13833_s21 + $0x174] sm:$0xff]  }
 0x269   : > { %v16109_v28 = vadd.f32 %v12022_v47, %v12021_v58  ;;  %v12024_v56 = vpop.f32.mrb[174].mxu1  ;;  %v16113_v10 = vadd.f32 %v12087_v38, %v15825_v52  ;;  %v12090_v0 = vadd.f32 %v12089_v24, %v12088_v49  ;;  %v487_v52 = vsel %vm13860_vm7, %v478_v6, %v486_v15  ;;  %v7114_v24 = vld [vmem:[%s13833_s21 + $0x4] sm:$0xe]  ;;  %v16134_v6 = vld [vmem:[%s13833_s21 + $0x50] sm:$0xff]  }
 0x26a   : > { %v12025_v36 = vpop.f32.mrb[175].mxu1  ;;  %6559 = vmatmul.mubr.bf16.gmra.mrb[24].mxu0 %v10884_v29  ;;  %v504_v21 = vor.u32 %v503_v59, %v500_v27  ;;  %v510_v29 = vrot.slane %v508_v45, 6  ;;  %v513_v39 = vrot.slane %v511_v48, 7  ;;  %v10885_v17 = vcombine.low %v4540_v22, %v4543_v31  ;;  %v7118_v45 = vld [vmem:[%s13833_s21 + $0x18] sm:$0xf] }
 0x26b   : > { %v16115_v37 = vadd.f32 %v12025_v36, %v12024_v56  ;;  %v16122_v34 = vadd.f32 %v12090_v0, %v15835_v42  ;;  %6566 = vmatprep.mubr.bf16.mxu0 %v16105_v53  ;;  %v477_v36 = vsel %vm13860_vm7, %v468_v43, %v16094_v18  ;;  %v7275_v15 = vrot.slane %v7116_v51, 5  ;;  %v13492_v53 = vld [vmem:[%s18037_s2 + $0x5a0] sm:$0xff]  }
 0x26c   : > { %13112 = vmatmul.mubr.bf16.gmra.mrb[24].mxu1 %v13454_v57  ;;  %v11160_v57 = vrot.slane %v7114_v24, 9  ;;  %v10632_v38 = vcombine.low %v477_v36, %v487_v52  ;;  %v496_v61 = vrot.slane %v495_v16, 4  ;;  %v506_v56 = vrot.slane %v504_v21, 4  ;;  %v7119_v24 = vld [vmem:[%s13833_s21 + $0x1c] sm:$0x1] }
 0x26d   : > { %13115 = vmatprep.mubr.bf16.mxu1 %v13461_v2  ;;  %v12091_v30 = vpop.f32.mrb[176].mxu0  ;;  %v7274_v2 = vrot.slane %v7272_v50, 4  ;;  %v514_v14 = vor.u32 %v513_v39, %v510_v29  ;;  %v7279_v51 = vrot.slane %v7118_v45, 5 }
 0x26e   : > { %v12092_v58 = vpop.f32.mrb[177].mxu0  ;;  %v7273_v36 = vsel %vm14847_vm11, %v11160_v57, %v7272_v50  ;;  %v505_v16 = vsel %vm13860_vm7, %v496_v61, %v504_v21  ;;  %v13475_v61 = vld [vmem:[%s18037_s2 + $0x5c8] sm:$0xff]  }
 0x26f   : > { %v12027_v42 = vpop.f32.mrb[176].mxu1  ;;  %v12093_v18 = vadd.f32 %v12092_v58, %v12091_v30  ;;  %v12094_v43 = vpop.f32.mrb[178].mxu0  ;;  %v7276_v52 = vsel %vm14847_vm11, %v7274_v2, %v7275_v15  ;;  %v515_v29 = vsel %vm13860_vm7, %v506_v56, %v514_v14 }
 0x270   : > { %v12028_v47 = vpop.f32.mrb[177].mxu1  ;;  %v12095_v59 = vpop.f32.mrb[179].mxu0  ;;  %v11186_v58 = vcombine.low %v7273_v36, %v7276_v52  ;;  %v10633_v21 = vcombine.low %v505_v16, %v515_v29  ;;  %v13494_v36 = vld [vmem:[%s18037_s2 + $0x648] sm:$0xff]  }
 0x271   : > { %v16136_v49 = vadd.f32 %v12028_v47, %v12027_v42  ;;  %v12030_v27 = vpop.f32.mrb[178].mxu1  ;;  %v16140_v48 = vadd.f32 %v12093_v18, %v15849_v1  ;;  %v12096_v0 = vadd.f32 %v12095_v59, %v12094_v43  ;;  %v7117_v1 = vld [vmem:[%s13833_s21 + $0x14] sm:$0xe]  ;;  %v13468_v42 = vld [vmem:[%s13833_s21] sm:$0xff]   ;;  %v7281_v43 = vrot.slane %v7279_v51, 4  ;;  %v13476_v29 = vld [vmem:[%s18037_s2 + $0x588] sm:$0xff]  }
 0x272   : > { %v12031_v41 = vpop.f32.mrb[179].mxu1  ;;  %6567 = vmatmul.mubr.bf16.gmra.mrb[28].mxu0 %v10885_v17  ;;  %v11161_v17 = vrot.slane %v7117_v1, 9  ;;  %v13470_v47 = vld [vmem:[%s18037_s2 + $0x580] sm:$0xff]  }
 0x273   : > { %v16142_v22 = vadd.f32 %v12031_v41, %v12030_v27  ;;  %v16145_v31 = vadd.f32 %v12096_v0, %v15859_v3  ;;  %8623 = vmatprep.mubr.bf16.mxu0 %v10632_v38  ;;  %v16165_v27 = vld [vmem:[%s13833_s21 + $0x60] sm:$0xff]   ;;  %v7121_v41 = vld [vmem:[%s13833_s21 + $0x28] sm:$0xf] }
 0x274   : > { %13116 = vmatmul.mubr.bf16.gmra.mrb[28].mxu1 %v13462_v26  ;;  %v7282_v26 = vrot.slane %v7119_v24, 5  ;;  %v13489_v0 = vld [vmem:[%s18037_s2 + $0x600] sm:$0xff]   ;;  %v7286_v16 = vrot.slane %v7121_v41, 5 }
 0x275   : > { %8784 = vmatprep.mubr.bf16.mxu1 %v16134_v6  ;;  %v12097_v3 = vpop.f32.mrb[180].mxu0  ;;  %v7120_v24 = vld [vmem:[%s13833_s21 + $0x24] sm:$0xe] }
 0x276   : > { %v12098_v30 = vpop.f32.mrb[181].mxu0  ;;  %v7283_v1 = vsel %vm14847_vm11, %v7281_v43, %v7282_v26  ;;  %v11162_v26 = vrot.slane %v7120_v24, 9  ;;  %v16205_v43 = vld [vmem:[%s13833_s21 + $0x70] sm:$0xff]   ;;  %v13485_v24 = vld [vmem:[%s18037_s2 + $0x5d8] sm:$0xff]  }
 0x277   : > { %v12033_v39 = vpop.f32.mrb[180].mxu1  ;;  %v12099_v57 = vadd.f32 %v12098_v30, %v12097_v3  ;;  %v12100_v2 = vpop.f32.mrb[182].mxu0  ;;  %v7122_v3 = vld [vmem:[%s13833_s21 + $0x2c] sm:$0x1] }
 0x278   : > { %v12034_v50 = vpop.f32.mrb[181].mxu1  ;;  %v12101_v15 = vpop.f32.mrb[183].mxu0  ;;  %v13495_v30 = vld [vmem:[%s18037_s2 + $0x608] sm:$0xff]  }
 0x279   : > { %v16162_v18 = vadd.f32 %v12034_v50, %v12033_v39  ;;  %v12036_v38 = vpop.f32.mrb[182].mxu1  ;;  %v16172_v56 = vadd.f32 %v12099_v57, %v15873_v5  ;;  %v12102_v14 = vadd.f32 %v12101_v15, %v12100_v2  ;;  %v7280_v5 = vsel %vm14847_vm11, %v11161_v17, %v7279_v51 }
 0x27a   : > { %v12037_v59 = vpop.f32.mrb[183].mxu1  ;;  %8624 = vmatmul.mubr.bf16.vlgmr.msra.gmra.mrb[32].mxu0 %v13468_v42  ;;  %v11187_v50 = vcombine.low %v7280_v5, %v7283_v1  ;;  %v7289_v15 = vrot.slane %v7122_v3, 5 }
 0x27b   : > { %v16174_v45 = vadd.f32 %v12037_v59, %v12036_v38  ;;  %v16183_v52 = vadd.f32 %v12102_v14, %v15889_v32  ;;  %12636 = vmatpush3.bf16.msra.mxu0 %v13470_v47  ;;  %8631 = vmatprep.mubr.bf16.mxu0 %v10633_v21  ;;  %v13481_v32 = vld [vmem:[%s18037_s2 + $0x5d0] sm:$0xff]   ;;  %v7288_v38 = vrot.slane %v7286_v16, 4 }
 0x27c   : > { %8785 = vmatmul.mubr.bf16.vlgmr.msra.gmra.mrb[32].mxu1 %v11186_v58  ;;  %12637 = vmatprep.subr.bf16.mxu0 %v13475_v61  ;;  %v13472_v58 = vld [vmem:[%s13833_s21 + $0x10] sm:$0xff]   ;;  %v16208_v61 = vld [vmem:[%s13833_s21 + $0x38] sm:$0xf] }
 0x27d   : > { %8792 = vmatprep.mubr.bf16.mxu1 %v16165_v27  ;;  %v12103_v39 = vpop.f32.mrb[184].mxu0  ;;  %12748 = vmatpush3.bf16.msra.mxu1 %v13489_v0  ;;  %v13482_v14 = vld [vmem:[%s18037_s2 + $0x590] sm:$0xff]  }
 0x27e   : > { %v12104_v42 = vpop.f32.mrb[185].mxu0  ;;  %12749 = vmatprep.subr.bf16.mxu1 %v13494_v36  ;;  %v13500_v0 = vld [vmem:[%s18037_s2 + $0x650] sm:$0xff]  }
 0x27f   : > { %v12039_v51 = vpop.f32.mrb[184].mxu1  ;;  %v12105_v57 = vadd.f32 %v12104_v42, %v12103_v39  ;;  %v12106_v2 = vpop.f32.mrb[186].mxu0  ;;  %12638 = vmatpush3.bf16.msra.mxu0 %v13476_v29  ;;  %v13501_v29 = vld [vmem:[%s18037_s2 + $0x610] sm:$0xff]   ;;  %v7287_v39 = vsel %vm14847_vm11, %v11162_v26, %v7286_v16  ;;  %v7293_v42 = vrot.slane %v16208_v61, 5  ;;  %v13491_v16 = vld [vmem:[%s18037_s2 + $0x5e0] sm:$0xff]   ;;  %v13507_v26 = vld [vmem:[%s18037_s2 + $0x618] sm:$0xff]  }
 0x280   : > { %v12040_v17 = vpop.f32.mrb[185].mxu1  ;;  %v12107_v59 = vpop.f32.mrb[187].mxu0  ;;  %12639 = vmatprep.subr.bf16.mxu0 %v13481_v32  ;;  %v18387_v32 = vld [vmem:[#allocation38_spill] sm:$0xff] }
 0x281   : > { %v16202_v47 = vadd.f32 %v12040_v17, %v12039_v51  ;;  %v12042_v21 = vpop.f32.mrb[186].mxu1  ;;  %v16217_v36 = vadd.f32 %v12105_v57, %v15909_v7  ;;  %v12108_v5 = vadd.f32 %v12107_v59, %v12106_v2  ;;  %12750 = vmatpush3.bf16.msra.mxu1 %v13495_v30  ;;  %v13506_v7 = vld [vmem:[%s18037_s2 + $0x658] sm:$0xff]   ;;  %v7290_v51 = vsel %vm14847_vm11, %v7288_v38, %v7289_v15  ;;  %v7123_v30 = vld [vmem:[%s13833_s21 + $0x34] sm:$0xe] }
 0x282   : > { %v12043_v41 = vpop.f32.mrb[187].mxu1  ;;  %8632 = vmatmul.mubr.bf16.gmra.mrb[36].mxu0 %v13472_v58  ;;  %v7125_v58 = vld [vmem:[%s13833_s21 + $0x3c] sm:$0x1]  ;;  %12751 = vmatprep.subr.bf16.mxu1 %v13500_v0  ;;  %v11188_v38 = vcombine.low %v7287_v39, %v7290_v51  ;;  %v11163_v15 = vrot.slane %v7123_v30, 9  ;;  %v16255_v0 = vld [vmem:[%s13833_s21 + $0x80] sm:$0xff]  }
 0x283   : > { %v16219_v1 = vadd.f32 %v12043_v41, %v12042_v21  ;;  %v16231_v3 = vadd.f32 %v12108_v5, %v15925_v11  ;;  %8639 = vmatprep.mubr.bf16.mxu0 %v18387_v32  ;;  %12640 = vmatpush3.bf16.msra.mxu0 %v13482_v14  ;;  %v13486_v11 = vld [vmem:[%s18037_s2 + $0x598] sm:$0xff]   ;;  %v13474_v21 = vld [vmem:[%s13833_s21 + $0x20] sm:$0xff]   ;;  %v7295_v5 = vrot.slane %v7293_v42, 4 }
 0x284   : > { %8793 = vmatmul.mubr.bf16.gmra.mrb[36].mxu1 %v11187_v50  ;;  %12641 = vmatprep.subr.bf16.mxu0 %v13485_v24  ;;  %v7296_v24 = vrot.slane %v7125_v58, 5  ;;  %v13497_v58 = vld [vmem:[%s18037_s2 + $0x5e8] sm:$0xff]  }
 0x285   : > { %8800 = vmatprep.mubr.bf16.mxu1 %v16205_v43  ;;  %v12109_v50 = vpop.f32.mrb[188].mxu0  ;;  %12752 = vmatpush3.bf16.msra.mxu1 %v13501_v29 }
 0x286   : > { %v12110_v57 = vpop.f32.mrb[189].mxu0  ;;  %12753 = vmatprep.subr.bf16.mxu1 %v13506_v7  ;;  %v13510_v7 = vld [vmem:[%s18037_s2 + $0x660] sm:$0xff]  }
 0x287   : > { %v12045_v17 = vpop.f32.mrb[188].mxu1  ;;  %v12111_v59 = vadd.f32 %v12110_v57, %v12109_v50  ;;  %v12112_v41 = vpop.f32.mrb[190].mxu0  ;;  %12642 = vmatpush3.bf16.msra.mxu0 %v13486_v11  ;;  %v13512_v11 = vld [vmem:[%s18037_s2 + $0x620] sm:$0xff]  }
 0x288   : > { %v12046_v2 = vpop.f32.mrb[189].mxu1  ;;  %v12113_v29 = vpop.f32.mrb[191].mxu0  ;;  %12643 = vmatprep.subr.bf16.mxu0 %v13491_v16  ;;  %v7294_v16 = vsel %vm14847_vm11, %v11163_v15, %v7293_v42  ;;  %v7126_v57 = vld [vmem:[%s13833_s21 + $0x44] sm:$0xe]  ;;  %v13503_v42 = vld [vmem:[%s18037_s2 + $0x5f0] sm:$0xff]  }
 0x289   : > { %v16252_v61 = vadd.f32 %v12046_v2, %v12045_v17  ;;  %v12048_v14 = vpop.f32.mrb[190].mxu1  ;;  %v16265_v39 = vadd.f32 %v12111_v59, %v15947_v23  ;;  %v12114_v51 = vadd.f32 %v12113_v29, %v12112_v41  ;;  %12754 = vmatpush3.bf16.msra.mxu1 %v13507_v26  ;;  %v13513_v23 = vld [vmem:[%s18037_s2 + $0x668] sm:$0xff]   ;;  %v18388_v17 = vld [vmem:[#allocation40_spill] sm:$0xff]  ;;  %v7297_v26 = vsel %vm14847_vm11, %v7295_v5, %v7296_v24  ;;  %v13478_v41 = vld [vmem:[%s13833_s21 + $0x30] sm:$0xff]  }
 0x28a   : > { %v12049_v32 = vpop.f32.mrb[191].mxu1  ;;  %8640 = vmatmul.mubr.bf16.gmra.mrb[40].mxu0 %v13474_v21  ;;  %v7300_v2 = vrot.slane %v7127_v40, 5  ;;  %v7128_v21 = vld [vmem:[%s13833_s21 + $0x4c] sm:$0x1]  ;;  %12755 = vmatprep.subr.bf16.mxu1 %v13510_v7  ;;  %v11164_v5 = vrot.slane %v7126_v57, 9 }
 0x28b   : > { %v16267_v30 = vadd.f32 %v12049_v32, %v12048_v14  ;;  %v16279_v50 = vadd.f32 %v12114_v51, %v15966_v62  ;;  %8647 = vmatprep.mubr.bf16.mxu0 %v18388_v17  ;;  %12644 = vmatpush3.bf16.msra.mxu0 %v13492_v53  ;;  %v13498_v62 = vld [vmem:[%s18037_s2 + $0x5a8] sm:$0xff]   ;;  %v11189_v14 = vcombine.low %v7294_v16, %v7297_v26  ;;  %v16300_v51 = vld [vmem:[%s13833_s21 + $0x90] sm:$0xff]   ;;  %v7303_v17 = vrot.slane %v7128_v21, 5  ;;  %v13509_v21 = vld [vmem:[%s18037_s2 + $0x5f8] sm:$0xff]  }
 0x28c   : > { %8801 = vmatmul.mubr.bf16.gmra.mrb[40].mxu1 %v11188_v38  ;;  %12645 = vmatprep.subr.bf16.mxu0 %v13497_v58  ;;  %v13514_v40 = vld [vmem:[%s18037_s2 + $0x628] sm:$0xff]   ;;  %v7302_v58 = vrot.slane %v7300_v2, 4 }
 0x28d   : > { %8808 = vmatprep.mubr.bf16.mxu1 %v16255_v0  ;;  %v12115_v38 = vpop.f32.mrb[192].mxu0  ;;  %12756 = vmatpush3.bf16.msra.mxu1 %v13512_v11 }
 0x28e   : > { %v12116_v53 = vpop.f32.mrb[193].mxu0  ;;  %12757 = vmatprep.subr.bf16.mxu1 %v13513_v23  ;;  %v13516_v23 = vld [vmem:[%s18037_s2 + $0x670] sm:$0xff]  }
 0x28f   : > { %v12179_v59 = vpop.f32.mrb[192].mxu1  ;;  %v12117_v24 = vadd.f32 %v12116_v53, %v12115_v38  ;;  %v12118_v32 = vpop.f32.mrb[194].mxu0  ;;  %12646 = vmatpush3.bf16.msra.mxu0 %v13498_v62  ;;  %v13517_v62 = vld [vmem:[%s18037_s2 + $0x630] sm:$0xff]   ;;  %v7301_v38 = vsel %vm14847_vm11, %v11164_v5, %v7300_v2  ;;  %v7307_v53 = vrot.slane %v7130_v9, 5  ;;  %v13519_v9 = vld [vmem:[%s18037_s2 + $0x638] sm:$0xff]  }
 0x290   : > { %v12180_v15 = vpop.f32.mrb[193].mxu1  ;;  %v12119_v11 = vpop.f32.mrb[195].mxu0  ;;  %12647 = vmatprep.subr.bf16.mxu0 %v13503_v42  ;;  %v7304_v42 = vsel %vm14847_vm11, %v7302_v58, %v7303_v17 }
 0x291   : > { %v12181_v29 = vadd.f32 %v12180_v15, %v12179_v59  ;;  %v12182_v7 = vpop.f32.mrb[194].mxu1  ;;  %v16310_v16 = vadd.f32 %v12117_v24, %v15991_v46  ;;  %v12120_v26 = vadd.f32 %v12119_v11, %v12118_v32  ;;  %12758 = vmatpush3.bf16.msra.mxu1 %v13514_v40  ;;  %v18389_v59 = vld [vmem:[#allocation10_spill] sm:$0xff]  ;;  %v7129_v40 = vld [vmem:[%s13833_s21 + $0x54] sm:$0xe]  ;;  %v13480_v24 = vld [vmem:[%s13833_s21 + $0x40] sm:$0xff]  }
 0x292   : > { %v12183_v54 = vpop.f32.mrb[195].mxu1  ;;  %8648 = vmatmul.mubr.bf16.gmra.mrb[44].mxu0 %v13478_v41  ;;  %v7131_v41 = vld [vmem:[%s13833_s21 + $0x5c] sm:$0x1]  ;;  %12759 = vmatprep.subr.bf16.mxu1 %v13516_v23  ;;  %v11165_v32 = vrot.slane %v7129_v40, 9  ;;  %v16351_v23 = vld [vmem:[%s13833_s21 + $0xa0] sm:$0xff]   ;;  %v18392_v40 = vld [vmem:[#allocation11_spill] sm:$0xff] }
 0x293   : > { %v12184_v57 = vadd.f32 %v12183_v54, %v12182_v7  ;;  %v13518_v54 = vld [vmem:[%s18037_s2 + $0x678] sm:$0xff]   ;;  %v16324_v46 = vadd.f32 %v12181_v29, %v16002_v33  ;;  %8655 = vmatprep.mubr.bf16.mxu0 %v18389_v59  ;;  %v16332_v15 = vadd.f32 %v12120_v26, %v16005_v35  ;;  %12648 = vmatpush3.bf16.msra.mxu0 %v13504_v4  ;;  %v16347_v35 = vld [vmem:[%s18037_s2 + $0x680] sm:$0xff]   ;;  %v7309_v26 = vrot.slane %v7307_v53, 4  ;;  %v7133_v59 = vld [vmem:[%s13833_s21 + $0x68] sm:$0xf] }
 0x294   : > { %8809 = vmatmul.mubr.bf16.gmra.mrb[44].mxu1 %v11189_v14  ;;  %v13511_v33 = vld [vmem:[%s18037_s2 + $0x5b8] sm:$0xff]   ;;  %12649 = vmatprep.subr.bf16.mxu0 %v13509_v21  ;;  %v11190_v29 = vcombine.low %v7301_v38, %v7304_v42 }
 0x295   : > { %8816 = vmatprep.mubr.bf16.mxu1 %v16300_v51  ;;  %18390 = vst [vmem:[#allocation41_spill] sm:$0xff] %v16332_v15  ;;  %v16335_v2 = vadd.f32 %v12184_v57, %v16015_v55  ;;  %v12121_v14 = vpop.f32.mrb[196].mxu0  ;;  %12760 = vmatpush3.bf16.msra.mxu1 %v13517_v62  ;;  %v7310_v57 = vrot.slane %v7131_v41, 5 }
 0x296   : > { %v12122_v4 = vpop.f32.mrb[197].mxu0  ;;  %12761 = vmatprep.subr.bf16.mxu1 %v13518_v54  ;;  %v7308_v54 = vsel %vm14847_vm11, %v11165_v32, %v7307_v53  ;;  %v7134_v53 = vld [vmem:[%s13833_s21 + $0x6c] sm:$0x1] }
 0x297   : > { %18391 = vst [vmem:[#allocation52_spill] sm:$0xff] %v16335_v2  ;;  %v12185_v5 = vpop.f32.mrb[196].mxu1  ;;  %v12123_v7 = vadd.f32 %v12122_v4, %v12121_v14  ;;  %v12124_v17 = vpop.f32.mrb[198].mxu0  ;;  %12650 = vmatpush3.bf16.msra.mxu0 %v13511_v33  ;;  %v7311_v41 = vsel %vm14847_vm11, %v7309_v26, %v7310_v57  ;;  %v7314_v33 = vrot.slane %v7133_v59, 5  ;;  %v7136_v26 = vld [vmem:[%s13833_s21 + $0x78] sm:$0xf] }
 0x298   : > { %v12186_v55 = vpop.f32.mrb[197].mxu1  ;;  %v12125_v21 = vpop.f32.mrb[199].mxu0  ;;  %13119 = vmatprep.subr.bf16.mxu0 %v16347_v35 }
 0x299   : > { %v12187_v58 = vadd.f32 %v12186_v55, %v12185_v5  ;;  %v12188_v11 = vpop.f32.mrb[198].mxu1  ;;  %v12126_v2 = vadd.f32 %v12125_v21, %v12124_v17  ;;  %v16355_v38 = vadd.f32 %v12123_v7, %v16039_v44  ;;  %12762 = vmatpush3.bf16.msra.mxu1 %v13519_v9  ;;  %v7132_v44 = vld [vmem:[%s13833_s21 + $0x64] sm:$0xe] }
 0x29a   : > { %v12189_v62 = vpop.f32.mrb[199].mxu1  ;;  %8656 = vmatmul.mubr.bf16.gmra.mrb[48].mxu0 %v13480_v24  ;;  %v16375_v24 = vcombine.low %v7308_v54, %v7311_v41  ;;  %v18393_v41 = vld [vmem:[#allocation12_spill] sm:$0xff] }
 0x29b   : > { %v12190_v15 = vadd.f32 %v12189_v62, %v12188_v11  ;;  %v16361_v42 = vadd.f32 %v12187_v58, %v16046_v20  ;;  %8663 = vmatprep.mubr.bf16.mxu0 %v18392_v40  ;;  %v16369_v14 = vadd.f32 %v12126_v2, %v16050_v25  ;;  %v16378_v11 = vld [vmem:[%s13833_s21 + $0xb0] sm:$0xff]   ;;  %v7316_v25 = vrot.slane %v7314_v33, 4 }
 0x29c   : > { %8817 = vmatmul.mubr.bf16.gmra.mrb[48].mxu1 %v11190_v29  ;;  %v11166_v29 = vrot.slane %v7132_v44, 9  ;;  %v7317_v2 = vrot.slane %v7134_v53, 5  ;;  %v7321_v53 = vrot.slane %v7136_v26, 5  ;;  %v7139_v26 = vld [vmem:[%s13833_s21 + $0x88] sm:$0xf] }
 0x29d   : > { %8824 = vmatprep.mubr.bf16.mxu1 %v16351_v23  ;;  %v16372_v5 = vadd.f32 %v12190_v15, %v16060_v63  ;;  %v12127_v20 = vpop.f32.mrb[200].mxu0 }
 0x29e   : > { %v12128_v4 = vpop.f32.mrb[201].mxu0  ;;  %v7315_v54 = vsel %vm14847_vm11, %v11166_v29, %v7314_v33  ;;  %v7318_v44 = vsel %vm14847_vm11, %v7316_v25, %v7317_v2  ;;  %v16406_v2 = vld [vmem:[%s13833_s21 + $0xc0] sm:$0xff]  }
 0x29f   : > { %v12191_v9 = vpop.f32.mrb[200].mxu1  ;;  %v12129_v32 = vadd.f32 %v12128_v4, %v12127_v20  ;;  %v12130_v58 = vpop.f32.mrb[202].mxu0  ;;  %v7137_v20 = vld [vmem:[%s13833_s21 + $0x7c] sm:$0x1]  ;;  %v16403_v29 = vcombine.low %v7315_v54, %v7318_v44 }
 0x2a0   : > { %v12192_v55 = vpop.f32.mrb[201].mxu1  ;;  %v12131_v63 = vpop.f32.mrb[203].mxu0 }
 0x2a1   : > { %v12193_v7 = vadd.f32 %v12192_v55, %v12191_v9  ;;  %v12194_v17 = vpop.f32.mrb[202].mxu1  ;;  %v12132_v57 = vadd.f32 %v12131_v63, %v12130_v58  ;;  %v16382_v62 = vadd.f32 %v12129_v32, %v16074_v12  ;;  %v7135_v12 = vld [vmem:[%s13833_s21 + $0x74] sm:$0xe]  ;;  %18394 = vst [vmem:[#allocation51_spill] sm:$0xff] %v16403_v29  ;;  %v7324_v63 = vrot.slane %v7137_v20, 5 }
 0x2a2   : > { %v12195_v15 = vpop.f32.mrb[203].mxu1  ;;  %8664 = vmatmul.mubr.bf16.gmra.mrb[52].mxu0 %v16134_v6  ;;  %v11167_v32 = vrot.slane %v7135_v12, 9  ;;  %v18395_v12 = vld [vmem:[#allocation13_spill] sm:$0xff] }
 0x2a3   : > { %v12196_v21 = vadd.f32 %v12195_v15, %v12194_v17  ;;  %v16385_v59 = vadd.f32 %v12193_v7, %v16083_v19  ;;  %8671 = vmatprep.mubr.bf16.mxu0 %v18393_v41  ;;  %v16397_v19 = vadd.f32 %v12132_v57, %v16089_v13  ;;  %v7323_v13 = vrot.slane %v7321_v53, 4 }
 0x2a4   : > { %8825 = vmatmul.mubr.bf16.gmra.mrb[52].mxu1 %v16375_v24  ;;  %v7322_v44 = vsel %vm14847_vm11, %v11167_v32, %v7321_v53 }
 0x2a5   : > { %8832 = vmatprep.mubr.bf16.mxu1 %v16378_v11  ;;  %v16400_v6 = vadd.f32 %v12196_v21, %v16097_v60  ;;  %v12133_v9 = vpop.f32.mrb[204].mxu0  ;;  %v7325_v20 = vsel %vm14847_vm11, %v7323_v13, %v7324_v63 }
 0x2a6   : > { %v12134_v4 = vpop.f32.mrb[205].mxu0 }
 0x2a7   : > { %v12197_v33 = vpop.f32.mrb[204].mxu1  ;;  %v12135_v7 = vadd.f32 %v12134_v4, %v12133_v9  ;;  %v12136_v17 = vpop.f32.mrb[206].mxu0  ;;  %v7328_v9 = vrot.slane %v7139_v26, 5 }
 0x2a8   : > { %v12198_v55 = vpop.f32.mrb[205].mxu1  ;;  %v12137_v60 = vpop.f32.mrb[207].mxu0 }
 0x2a9   : > { %v12199_v58 = vadd.f32 %v12198_v55, %v12197_v33  ;;  %v12200_v25 = vpop.f32.mrb[206].mxu1  ;;  %v12138_v57 = vadd.f32 %v12137_v60, %v12136_v17  ;;  %v16410_v41 = vadd.f32 %v12135_v7, %v16109_v28  ;;  %v7138_v28 = vld [vmem:[%s13833_s21 + $0x84] sm:$0xe]  ;;  %v7140_v33 = vld [vmem:[%s13833_s21 + $0x8c] sm:$0x1]  ;;  %v16431_v7 = vcombine.low %v7322_v44, %v7325_v20  ;;  %v16434_v60 = vld [vmem:[%s13833_s21 + $0xd0] sm:$0xff]  }
 0x2aa   : > { %v12201_v15 = vpop.f32.mrb[207].mxu1  ;;  %8672 = vmatmul.mubr.bf16.gmra.mrb[56].mxu0 %v16165_v27 }
 0x2ab   : > { %v12202_v21 = vadd.f32 %v12201_v15, %v12200_v25  ;;  %v16413_v54 = vadd.f32 %v12199_v58, %v16113_v10  ;;  %8679 = vmatprep.mubr.bf16.mxu0 %v18395_v12  ;;  %v16425_v10 = vadd.f32 %v12138_v57, %v16115_v37  ;;  %18396 = vst [vmem:[#allocation42_spill] sm:$0xff] %v16431_v7  ;;  %v11168_v58 = vrot.slane %v7138_v28, 9  ;;  %v7142_v57 = vld [vmem:[%s13833_s21 + $0x98] sm:$0xf]  ;;  %v18397_v28 = vld [vmem:[#allocation14_spill] sm:$0xff] }
 0x2ac   : > { %8833 = vmatmul.mubr.bf16.gmra.mrb[56].mxu1 %v16403_v29  ;;  %v7330_v37 = vrot.slane %v7328_v9, 4  ;;  %v7331_v15 = vrot.slane %v7140_v33, 5 }
 0x2ad   : > { %8840 = vmatprep.mubr.bf16.mxu1 %v16406_v2  ;;  %v16428_v27 = vadd.f32 %v12202_v21, %v16122_v34  ;;  %v12139_v4 = vpop.f32.mrb[208].mxu0  ;;  %v7329_v20 = vsel %vm14847_vm11, %v11168_v58, %v7328_v9 }
 0x2ae   : > { %v12140_v55 = vpop.f32.mrb[209].mxu0  ;;  %v7332_v33 = vsel %vm14847_vm11, %v7330_v37, %v7331_v15 }
 0x2af   : > { %v12203_v53 = vpop.f32.mrb[208].mxu1  ;;  %v12141_v17 = vadd.f32 %v12140_v55, %v12139_v4  ;;  %v12142_v13 = vpop.f32.mrb[210].mxu0  ;;  %v7335_v4 = vrot.slane %v7142_v57, 5  ;;  %v7145_v57 = vld [vmem:[%s13833_s21 + $0xa8] sm:$0xf] }
 0x2b0   : > { %v12204_v32 = vpop.f32.mrb[209].mxu1  ;;  %v12143_v34 = vpop.f32.mrb[211].mxu0 }
 0x2b1   : > { %v12205_v25 = vadd.f32 %v12204_v32, %v12203_v53  ;;  %v12206_v63 = vpop.f32.mrb[210].mxu1  ;;  %v12144_v21 = vadd.f32 %v12143_v34, %v12142_v13  ;;  %v16438_v29 = vadd.f32 %v12141_v17, %v16136_v49  ;;  %v7141_v49 = vld [vmem:[%s13833_s21 + $0x94] sm:$0xe]  ;;  %v7143_v53 = vld [vmem:[%s13833_s21 + $0x9c] sm:$0x1]  ;;  %v16459_v17 = vcombine.low %v7329_v20, %v7332_v33  ;;  %v16462_v34 = vld [vmem:[%s13833_s21 + $0xe0] sm:$0xff]  }
 0x2b2   : > { %v12207_v26 = vpop.f32.mrb[211].mxu1  ;;  %8680 = vmatmul.mubr.bf16.gmra.mrb[60].mxu0 %v16205_v43 }
 0x2b3   : > { %v12208_v12 = vadd.f32 %v12207_v26, %v12206_v63  ;;  %v16441_v44 = vadd.f32 %v12205_v25, %v16140_v48  ;;  %8687 = vmatprep.mubr.bf16.mxu0 %v18397_v28  ;;  %v16453_v48 = vadd.f32 %v12144_v21, %v16142_v22  ;;  %18398 = vst [vmem:[#allocation19_spill] sm:$0xff] %v16459_v17  ;;  %v11169_v25 = vrot.slane %v7141_v49, 9  ;;  %v18399_v49 = vld [vmem:[#allocation15_spill] sm:$0xff] }
 0x2b4   : > { %8841 = vmatmul.mubr.bf16.gmra.mrb[60].mxu1 %v16431_v7  ;;  %v7337_v22 = vrot.slane %v7335_v4, 4  ;;  %v7338_v26 = vrot.slane %v7143_v53, 5 }
 0x2b5   : > { %8848 = vmatprep.mubr.bf16.mxu1 %v16434_v60  ;;  %v16456_v43 = vadd.f32 %v12208_v12, %v16145_v31  ;;  %v12145_v55 = vpop.f32.mrb[212].mxu0  ;;  %v7336_v33 = vsel %vm14847_vm11, %v11169_v25, %v7335_v4 }
 0x2b6   : > { %v12146_v32 = vpop.f32.mrb[213].mxu0  ;;  %v7339_v53 = vsel %vm14847_vm11, %v7337_v22, %v7338_v26 }
 0x2b7   : > { %v12209_v9 = vpop.f32.mrb[212].mxu1  ;;  %v12147_v13 = vadd.f32 %v12146_v32, %v12145_v55  ;;  %v12148_v37 = vpop.f32.mrb[214].mxu0  ;;  %v7342_v55 = vrot.slane %v7145_v57, 5  ;;  %v7148_v57 = vld [vmem:[%s13833_s21 + $0xb8] sm:$0xf] }
 0x2b8   : > { %v12210_v58 = vpop.f32.mrb[213].mxu1  ;;  %v12149_v31 = vpop.f32.mrb[215].mxu0 }
 0x2b9   : > { %v12211_v63 = vadd.f32 %v12210_v58, %v12209_v9  ;;  %v12212_v15 = vpop.f32.mrb[214].mxu1  ;;  %v12150_v21 = vadd.f32 %v12149_v31, %v12148_v37  ;;  %v16466_v7 = vadd.f32 %v12147_v13, %v16162_v18  ;;  %v7144_v18 = vld [vmem:[%s13833_s21 + $0xa4] sm:$0xe]  ;;  %v7146_v9 = vld [vmem:[%s13833_s21 + $0xac] sm:$0x1]  ;;  %v16487_v13 = vcombine.low %v7336_v33, %v7339_v53  ;;  %v16490_v31 = vld [vmem:[%s13833_s21 + $0xf0] sm:$0xff]  }
 0x2ba   : > { %v12213_v12 = vpop.f32.mrb[215].mxu1  ;;  %8688 = vmatmul.mubr.bf16.gmra.mrb[64].mxu0 %v16255_v0 }
 0x2bb   : > { %v12214_v28 = vadd.f32 %v12213_v12, %v12212_v15  ;;  %v16469_v20 = vadd.f32 %v12211_v63, %v16172_v56  ;;  %8695 = vmatprep.mubr.bf16.mxu0 %v18399_v49  ;;  %v16481_v56 = vadd.f32 %v12150_v21, %v16174_v45  ;;  %18400 = vst [vmem:[#allocation39_spill] sm:$0xff] %v16487_v13  ;;  %v11170_v63 = vrot.slane %v7144_v18, 9  ;;  %v18401_v18 = vld [vmem:[#allocation16_spill] sm:$0xff] }
 0x2bc   : > { %8849 = vmatmul.mubr.bf16.gmra.mrb[64].mxu1 %v16459_v17  ;;  %v7344_v45 = vrot.slane %v7342_v55, 4  ;;  %v7345_v12 = vrot.slane %v7146_v9, 5 }
 0x2bd   : > { %8856 = vmatprep.mubr.bf16.mxu1 %v16462_v34  ;;  %v16484_v0 = vadd.f32 %v12214_v28, %v16183_v52  ;;  %v12151_v32 = vpop.f32.mrb[216].mxu0  ;;  %v7343_v53 = vsel %vm14847_vm11, %v11170_v63, %v7342_v55 }
 0x2be   : > { %v12152_v58 = vpop.f32.mrb[217].mxu0  ;;  %v7346_v9 = vsel %vm14847_vm11, %v7344_v45, %v7345_v12 }
 0x2bf   : > { %v12215_v4 = vpop.f32.mrb[216].mxu1  ;;  %v12153_v37 = vadd.f32 %v12152_v58, %v12151_v32  ;;  %v12154_v22 = vpop.f32.mrb[218].mxu0  ;;  %v7349_v32 = vrot.slane %v7148_v57, 5  ;;  %v7151_v57 = vld [vmem:[%s13833_s21 + $0xc8] sm:$0xf] }
 0x2c0   : > { %v12216_v25 = vpop.f32.mrb[217].mxu1  ;;  %v12155_v52 = vpop.f32.mrb[219].mxu0 }
 0x2c1   : > { %v12217_v15 = vadd.f32 %v12216_v25, %v12215_v4  ;;  %v12218_v26 = vpop.f32.mrb[218].mxu1  ;;  %v12156_v21 = vadd.f32 %v12155_v52, %v12154_v22  ;;  %v16494_v17 = vadd.f32 %v12153_v37, %v16202_v47  ;;  %v7147_v47 = vld [vmem:[%s13833_s21 + $0xb4] sm:$0xe]  ;;  %v7149_v4 = vld [vmem:[%s13833_s21 + $0xbc] sm:$0x1]  ;;  %v16515_v37 = vcombine.low %v7343_v53, %v7346_v9  ;;  %v16518_v52 = vld [vmem:[%s13833_s21 + $0x100] sm:$0xff]  }
 0x2c2   : > { %v12219_v28 = vpop.f32.mrb[219].mxu1  ;;  %8696 = vmatmul.mubr.bf16.gmra.mrb[68].mxu0 %v16300_v51  ;;  %18404 = vst [vmem:[#allocation38_spill] sm:$0xff] %v16518_v52 }
 0x2c3   : > { %v12220_v49 = vadd.f32 %v12219_v28, %v12218_v26  ;;  %v16497_v33 = vadd.f32 %v12217_v15, %v16217_v36  ;;  %8703 = vmatprep.mubr.bf16.mxu0 %v18401_v18  ;;  %v16509_v36 = vadd.f32 %v12156_v21, %v16219_v1  ;;  %18403 = vst [vmem:[#allocation23_spill] sm:$0xff] %v16515_v37  ;;  %v11171_v15 = vrot.slane %v7147_v47, 9  ;;  %v18405_v47 = vld [vmem:[#allocation17_spill] sm:$0xff] }
 0x2c4   : > { %8857 = vmatmul.mubr.bf16.gmra.mrb[68].mxu1 %v16487_v13  ;;  %v7351_v1 = vrot.slane %v7349_v32, 4  ;;  %v7352_v28 = vrot.slane %v7149_v4, 5 }
 0x2c5   : > { %8864 = vmatprep.mubr.bf16.mxu1 %v16490_v31  ;;  %v16512_v51 = vadd.f32 %v12220_v49, %v16231_v3  ;;  %v12157_v58 = vpop.f32.mrb[220].mxu0  ;;  %v7350_v9 = vsel %vm14847_vm11, %v11171_v15, %v7349_v32 }
 0x2c6   : > { %v12158_v25 = vpop.f32.mrb[221].mxu0  ;;  %v7353_v4 = vsel %vm14847_vm11, %v7351_v1, %v7352_v28 }
 0x2c7   : > { %18402 = vst [vmem:[#allocation21_spill] sm:$0xff] %v16512_v51  ;;  %v12221_v55 = vpop.f32.mrb[220].mxu1  ;;  %v12159_v22 = vadd.f32 %v12158_v25, %v12157_v58  ;;  %v12160_v45 = vpop.f32.mrb[222].mxu0  ;;  %v7356_v58 = vrot.slane %v7151_v57, 5  ;;  %v7152_v25 = vld [vmem:[%s13833_s21 + $0xcc] sm:$0x1] }
 0x2c8   : > { %v12222_v63 = vpop.f32.mrb[221].mxu1  ;;  %v12161_v3 = vpop.f32.mrb[223].mxu0  ;;  %v7359_v57 = vrot.slane %v7152_v25, 5 }
 0x2c9   : > { %v12223_v26 = vadd.f32 %v12222_v63, %v12221_v55  ;;  %v12224_v12 = vpop.f32.mrb[222].mxu1  ;;  %v12162_v21 = vadd.f32 %v12161_v3, %v12160_v45  ;;  %v16522_v51 = vadd.f32 %v12159_v22, %v16252_v61  ;;  %v7150_v61 = vld [vmem:[%s13833_s21 + $0xc4] sm:$0xe] }
 0x2ca   : > { %v12225_v49 = vpop.f32.mrb[223].mxu1  ;;  %8704 = vmatmul.mubr.bf16.gmra.mrb[72].mxu0 %v16351_v23  ;;  %v11172_v45 = vrot.slane %v7150_v61, 9  ;;  %v18410_v61 = vld [vmem:[#allocation41_spill] sm:$0xff] }
 0x2cb   : > { %v12226_v13 = vadd.f32 %v12225_v49, %v12224_v12  ;;  %v16525_v53 = vadd.f32 %v12223_v26, %v16265_v39  ;;  %8711 = vmatprep.mubr.bf16.mxu0 %v18405_v47  ;;  %v16537_v39 = vadd.f32 %v12162_v21, %v16267_v30  ;;  %v16543_v26 = vcombine.low %v7350_v9, %v7353_v4  ;;  %v16546_v49 = vld [vmem:[%s13833_s21 + $0x110] sm:$0xff]   ;;  %v7154_v21 = vld [vmem:[%s13833_s21 + $0xd8] sm:$0xf] }
 0x2cc   : > { %8865 = vmatmul.mubr.bf16.gmra.mrb[72].mxu1 %v16515_v37  ;;  %18408 = vst [vmem:[#allocation11_spill] sm:$0xff] %v16546_v49  ;;  %v7358_v30 = vrot.slane %v7356_v58, 4  ;;  %v7357_v4 = vsel %vm14847_vm11, %v11172_v45, %v7356_v58 }
 0x2cd   : > { %8872 = vmatprep.mubr.bf16.mxu1 %v16518_v52  ;;  %v16540_v55 = vadd.f32 %v12226_v13, %v16279_v50  ;;  %v12291_v32 = vpop.f32.mrb[224].mxu0  ;;  %18407 = vst [vmem:[#allocation10_spill] sm:$0xff] %v16543_v26 }
 0x2ce   : > { %v12292_v22 = vpop.f32.mrb[225].mxu0 }
 0x2cf   : > { %18406 = vst [vmem:[#allocation40_spill] sm:$0xff] %v16540_v55  ;;  %v12227_v63 = vpop.f32.mrb[224].mxu1  ;;  %v12293_v1 = vadd.f32 %v12292_v22, %v12291_v32  ;;  %v12294_v3 = vpop.f32.mrb[226].mxu0  ;;  %v7363_v32 = vrot.slane %v7154_v21, 5 }
 0x2d0   : > { %v12228_v15 = vpop.f32.mrb[225].mxu1  ;;  %v12295_v13 = vpop.f32.mrb[227].mxu0 }
 0x2d1   : > { %v12229_v12 = vadd.f32 %v12228_v15, %v12227_v63  ;;  %v12230_v28 = vpop.f32.mrb[226].mxu1  ;;  %v12296_v37 = vadd.f32 %v12295_v13, %v12294_v3  ;;  %v16550_v55 = vadd.f32 %v12293_v1, %v16324_v46  ;;  %v18412_v63 = vld [vmem:[#allocation18_spill] sm:$0xff]  ;;  %v7360_v46 = vsel %vm14847_vm11, %v7358_v30, %v7359_v57  ;;  %v18413_v15 = vld [vmem:[#allocation52_spill] sm:$0xff] }
 0x2d2   : > { %v12231_v50 = vpop.f32.mrb[227].mxu1  ;;  %8712 = vmatmul.mubr.bf16.gmra.mrb[76].mxu0 %v16378_v11  ;;  %v7365_v30 = vrot.slane %v7363_v32, 4 }
 0x2d3   : > { %v12232_v52 = vadd.f32 %v12231_v50, %v12230_v28  ;;  %v16553_v9 = vadd.f32 %v12229_v12, %v16310_v16  ;;  %8719 = vmatprep.mubr.bf16.mxu0 %v18412_v63  ;;  %v7153_v16 = vld [vmem:[%s13833_s21 + $0xd4] sm:$0xe]  ;;  %v16568_v22 = vadd.f32 %v12296_v37, %v18413_v15  ;;  %v7155_v12 = vld [vmem:[%s13833_s21 + $0xdc] sm:$0x1]  ;;  %v16571_v28 = vcombine.low %v7357_v4, %v7360_v46  ;;  %v7157_v15 = vld [vmem:[%s13833_s21 + $0xe8] sm:$0xf] }
 0x2d4   : > { %8873 = vmatmul.mubr.bf16.gmra.mrb[76].mxu1 %v16543_v26  ;;  %v11173_v3 = vrot.slane %v7153_v16, 9  ;;  %v16574_v26 = vld [vmem:[%s13833_s21 + $0x120] sm:$0xff]   ;;  %v7366_v57 = vrot.slane %v7155_v12, 5 }
 0x2d5   : > { %18409 = vst [vmem:[#allocation16_spill] sm:$0xff] %v16553_v9  ;;  %v16560_v25 = vadd.f32 %v12232_v52, %v18410_v61  ;;  %8880 = vmatprep.mubr.bf16.mxu1 %v16546_v49  ;;  %v12297_v58 = vpop.f32.mrb[228].mxu0  ;;  %18414 = vst [vmem:[#allocation41_spill] sm:$0xff] %v16571_v28  ;;  %v13529_v16 = vld [vmem:[%s18040_s5 + $0x40] sm:$0xff]  }
 0x2d6   : > { %v12298_v52 = vpop.f32.mrb[229].mxu0  ;;  %18415 = vst [vmem:[#allocation18_spill] sm:$0xff] %v16574_v26  ;;  %v7364_v12 = vsel %vm14847_vm11, %v11173_v3, %v7363_v32  ;;  %12883 = vmatprep.subr.bf16.mxu1 %v13529_v16  ;;  %v7160_v16 = vld [vmem:[%s13833_s21 + $0xf8] sm:$0xf] }
 0x2d7   : > { %18411 = vst [vmem:[#allocation17_spill] sm:$0xff] %v16560_v25  ;;  %v12233_v1 = vpop.f32.mrb[228].mxu1  ;;  %v12299_v13 = vadd.f32 %v12298_v52, %v12297_v58  ;;  %v12300_v49 = vpop.f32.mrb[230].mxu0  ;;  %v7370_v58 = vrot.slane %v7157_v15, 5  ;;  %v7158_v52 = vld [vmem:[%s13833_s21 + $0xec] sm:$0x1] }
 0x2d8   : > { %v12234_v45 = vpop.f32.mrb[229].mxu1  ;;  %v12301_v21 = vpop.f32.mrb[231].mxu0 }
 0x2d9   : > { %v12235_v50 = vadd.f32 %v12234_v45, %v12233_v1  ;;  %v12236_v61 = vpop.f32.mrb[230].mxu1  ;;  %v12302_v4 = vadd.f32 %v12301_v21, %v12300_v49  ;;  %v16581_v46 = vadd.f32 %v12299_v13, %v16361_v42  ;;  %v7367_v42 = vsel %vm14847_vm11, %v7365_v30, %v7366_v57  ;;  %v7156_v49 = vld [vmem:[%s13833_s21 + $0xe4] sm:$0xe]  ;;  %v16605_v57 = vld [vmem:[%s13833_s21 + $0x130] sm:$0xff]  }
 0x2da   : > { %v12237_v37 = vpop.f32.mrb[231].mxu1  ;;  %8720 = vmatmul.mubr.bf16.gmra.mrb[80].mxu0 %v16406_v2  ;;  %v11174_v13 = vrot.slane %v7156_v49, 9  ;;  %18419 = vst [vmem:[#allocation56_spill] sm:$0xff] %v16605_v57  ;;  %v7372_v15 = vrot.slane %v7370_v58, 4 }
 0x2db   : > { %v16578_v25 = vadd.f32 %v12235_v50, %v16355_v38  ;;  %v12238_v9 = vadd.f32 %v12237_v37, %v12236_v61  ;;  %v18417_v38 = vld [vmem:[#allocation20_spill] sm:$0xff]  ;;  %v16599_v45 = vadd.f32 %v12302_v4, %v16372_v5  ;;  %v16602_v50 = vcombine.low %v7364_v12, %v7367_v42 }
 0x2dc   : > { %8881 = vmatmul.mubr.bf16.gmra.mrb[80].mxu1 %v16571_v28  ;;  %8727 = vmatprep.mubr.bf16.mxu0 %v18417_v38  ;;  %v7373_v5 = vrot.slane %v7158_v52, 5  ;;  %v7371_v49 = vsel %vm14847_vm11, %v11174_v13, %v7370_v58 }
 0x2dd   : > { %v16591_v1 = vadd.f32 %v12238_v9, %v16369_v14  ;;  %8888 = vmatprep.mubr.bf16.mxu1 %v16574_v26  ;;  %v12303_v3 = vpop.f32.mrb[232].mxu0  ;;  %18418 = vst [vmem:[#allocation20_spill] sm:$0xff] %v16602_v50 }
 0x2de   : > { %v12304_v9 = vpop.f32.mrb[233].mxu0 }
 0x2df   : > { %18416 = vst [vmem:[#allocation52_spill] sm:$0xff] %v16591_v1  ;;  %v12239_v32 = vpop.f32.mrb[232].mxu1  ;;  %v12305_v37 = vadd.f32 %v12304_v9, %v12303_v3  ;;  %v12306_v30 = vpop.f32.mrb[234].mxu0 }
 0x2e0   : > { %v12240_v14 = vpop.f32.mrb[233].mxu1  ;;  %v12307_v26 = vpop.f32.mrb[235].mxu0 }
 0x2e1   : > { %v12241_v61 = vadd.f32 %v12240_v14, %v12239_v32  ;;  %v12242_v21 = vpop.f32.mrb[234].mxu1  ;;  %v12308_v12 = vadd.f32 %v12307_v26, %v12306_v30  ;;  %v16612_v42 = vadd.f32 %v12305_v37, %v16385_v59  ;;  %v18422_v32 = vld [vmem:[#allocation22_spill] sm:$0xff]  ;;  %v7159_v59 = vld [vmem:[%s13833_s21 + $0xf4] sm:$0xe]  ;;  %v7377_v26 = vrot.slane %v7160_v16, 5 }
 0x2e2   : > { %v12243_v4 = vpop.f32.mrb[235].mxu1  ;;  %8728 = vmatmul.mubr.bf16.gmra.mrb[84].mxu0 %v16434_v60  ;;  %v7161_v14 = vld [vmem:[%s13833_s21 + $0xfc] sm:$0x1] }
 0x2e3   : > { %v16609_v28 = vadd.f32 %v12241_v61, %v16382_v62  ;;  %v12244_v1 = vadd.f32 %v12243_v4, %v12242_v21  ;;  %8735 = vmatprep.mubr.bf16.mxu0 %v18422_v32  ;;  %v7374_v62 = vsel %vm14847_vm11, %v7372_v15, %v7373_v5  ;;  %v16627_v3 = vadd.f32 %v12308_v12, %v16400_v6 }
 0x2e4   : > { %8889 = vmatmul.mubr.bf16.gmra.mrb[84].mxu1 %v16602_v50  ;;  %v7379_v15 = vrot.slane %v7377_v26, 4  ;;  %v7380_v5 = vrot.slane %v7161_v14, 5 }
 0x2e5   : > { %18420 = vst [vmem:[#allocation57_spill] sm:$0xff] %v16609_v28  ;;  %v16619_v52 = vadd.f32 %v12244_v1, %v16397_v19  ;;  %8896 = vmatprep.mubr.bf16.mxu1 %v16605_v57  ;;  %v12309_v61 = vpop.f32.mrb[236].mxu0  ;;  %v16630_v19 = vcombine.low %v7371_v49, %v7374_v62  ;;  %v11175_v1 = vrot.slane %v7159_v59, 9  ;;  %v16633_v57 = vld [vmem:[%s13833_s21 + $0x140] sm:$0xff]  }
 0x2e6   : > { %v12310_v13 = vpop.f32.mrb[237].mxu0  ;;  %v18423_v59 = vld [vmem:[#allocation25_spill] sm:$0xff] }
 0x2e7   : > { %18421 = vst [vmem:[#allocation58_spill] sm:$0xff] %v16619_v52  ;;  %v12245_v9 = vpop.f32.mrb[236].mxu1  ;;  %v12311_v21 = vadd.f32 %v12310_v13, %v12309_v61  ;;  %v12312_v4 = vpop.f32.mrb[238].mxu0  ;;  %v7378_v49 = vsel %vm14847_vm11, %v11175_v1, %v7377_v26 }
 0x2e8   : > { %v12246_v58 = vpop.f32.mrb[237].mxu1  ;;  %v12313_v50 = vpop.f32.mrb[239].mxu0 }
 0x2e9   : > { %v12247_v37 = vadd.f32 %v12246_v58, %v12245_v9  ;;  %v12248_v30 = vpop.f32.mrb[238].mxu1  ;;  %v12314_v52 = vadd.f32 %v12313_v50, %v12312_v4  ;;  %v16639_v28 = vadd.f32 %v12311_v21, %v16413_v54 }
 0x2ea   : > { %v12249_v16 = vpop.f32.mrb[239].mxu1  ;;  %8736 = vmatmul.mubr.bf16.gmra.mrb[88].mxu0 %v16462_v34 }
 0x2eb   : > { %v16636_v6 = vadd.f32 %v12247_v37, %v16410_v41  ;;  %v12250_v12 = vadd.f32 %v12249_v16, %v12248_v30  ;;  %8743 = vmatprep.mubr.bf16.mxu0 %v18423_v59  ;;  %v7381_v41 = vsel %vm14847_vm11, %v7379_v15, %v7380_v5  ;;  %v16653_v54 = vadd.f32 %v12314_v52, %v16428_v27 }
 0x2ec   : > { %8897 = vmatmul.mubr.bf16.gmra.mrb[88].mxu1 %v16630_v19  ;;  %v16655_v58 = vcombine.low %v7378_v49, %v7381_v41 }
 0x2ed   : > { %v16646_v62 = vadd.f32 %v12250_v12, %v16425_v10  ;;  %8904 = vmatprep.mubr.bf16.mxu1 %v16633_v57  ;;  %v12315_v14 = vpop.f32.mrb[240].mxu0 }
 0x2ee   : > { %v12316_v61 = vpop.f32.mrb[241].mxu0 }
 0x2ef   : > { %v12251_v50 = vpop.f32.mrb[240].mxu1  ;;  %v12317_v13 = vadd.f32 %v12316_v61, %v12315_v14  ;;  %v12318_v1 = vpop.f32.mrb[242].mxu0 }
 0x2f0   : > { %v12252_v9 = vpop.f32.mrb[241].mxu1  ;;  %v12319_v21 = vpop.f32.mrb[243].mxu0 }
 0x2f1   : > { %v12253_v26 = vadd.f32 %v12252_v9, %v12251_v50  ;;  %v12254_v10 = vpop.f32.mrb[242].mxu1  ;;  %v12320_v15 = vadd.f32 %v12319_v21, %v12318_v1  ;;  %v16661_v27 = vadd.f32 %v12317_v13, %v16441_v44  ;;  %v13531_v1 = vld [vmem:[%s18040_s5 + $0x48] sm:$0xff]  }
 0x2f2   : > { %v12255_v37 = vpop.f32.mrb[243].mxu1  ;;  %8744 = vmatmul.mubr.bf16.gmra.mrb[92].mxu0 %v16490_v31 }
 0x2f3   : > { %v16658_v30 = vadd.f32 %v12253_v26, %v16438_v29  ;;  %v12256_v4 = vadd.f32 %v12255_v37, %v12254_v10  ;;  %8945 = vmatprep.mubr.bf16.mxu0 %v16375_v24  ;;  %v16671_v5 = vadd.f32 %v12320_v15, %v16456_v43  ;;  %v13530_v10 = vld [vmem:[%s18040_s5] sm:$0xff]   ;;  %v18424_v37 = vld [vmem:[#allocation51_spill] sm:$0xff] }
 0x2f4   : > { %8905 = vmatmul.mubr.bf16.gmra.mrb[92].mxu1 %v16655_v58 }
 0x2f5   : > { %v16666_v52 = vadd.f32 %v12256_v4, %v16453_v48  ;;  %9106 = vmatprep.mubr.bf16.mxu1 %v18401_v18  ;;  %v12321_v16 = vpop.f32.mrb[244].mxu0  ;;  %v13521_v48 = vld [vmem:[%s18037_s2 + $0x688] sm:$0xff]  }
 0x2f6   : > { %v12322_v49 = vpop.f32.mrb[245].mxu0 }
 0x2f7   : > { %v12257_v29 = vpop.f32.mrb[244].mxu1  ;;  %v12323_v41 = vadd.f32 %v12322_v49, %v12321_v16  ;;  %v12324_v14 = vpop.f32.mrb[246].mxu0 }
 0x2f8   : > { %v12258_v12 = vpop.f32.mrb[245].mxu1  ;;  %v12325_v61 = vpop.f32.mrb[247].mxu0 }
 0x2f9   : > { %v12259_v44 = vadd.f32 %v12258_v12, %v12257_v29  ;;  %v12260_v50 = vpop.f32.mrb[246].mxu1  ;;  %v12326_v43 = vadd.f32 %v12325_v61, %v12324_v14  ;;  %v16680_v13 = vadd.f32 %v12323_v41, %v16469_v20  ;;  %v13523_v61 = vld [vmem:[%s18037_s2 + $0x698] sm:$0xff]  }
 0x2fa   : > { %v12261_v9 = vpop.f32.mrb[247].mxu1  ;;  %8946 = vmatmul.mubr.bf16.vlgmr.msra.gmra.mrb[96].mxu0 %v18392_v40 }
 0x2fb   : > { %v16677_v24 = vadd.f32 %v12259_v44, %v16466_v7  ;;  %v12262_v26 = vadd.f32 %v12261_v9, %v12260_v50  ;;  %13120 = vmatpush3.bf16.msra.mxu0 %v16347_v35  ;;  %8953 = vmatprep.mubr.bf16.mxu0 %v18424_v37  ;;  %v16696_v20 = vadd.f32 %v12326_v43, %v16484_v0  ;;  %v13534_v44 = vld [vmem:[%s18040_s5 + $0x50] sm:$0xff]   ;;  %v18426_v43 = vld [vmem:[#allocation42_spill] sm:$0xff] }
 0x2fc   : > { %9107 = vmatmul.mubr.bf16.vlgmr.msra.gmra.mrb[96].mxu1 %v16351_v23  ;;  %13121 = vmatprep.subr.bf16.mxu0 %v13521_v48  ;;  %v13522_v23 = vld [vmem:[%s18037_s2 + $0x690] sm:$0xff]  }
 0x2fd   : > { %v16691_v7 = vadd.f32 %v12262_v26, %v16481_v56  ;;  %9114 = vmatprep.mubr.bf16.mxu1 %v18405_v47  ;;  %v12327_v21 = vpop.f32.mrb[248].mxu0  ;;  %12884 = vmatpush3.bf16.msra.mxu1 %v13530_v10  ;;  %v13532_v56 = vld [vmem:[%s18040_s5 + $0x8] sm:$0xff]   ;;  %v18425_v26 = vld [vmem:[#allocation12_spill] sm:$0xff]  ;;  %v18427_v10 = vld [vmem:[#allocation21_spill] sm:$0xff] }
 0x2fe   : > { %v12328_v4 = vpop.f32.mrb[249].mxu0  ;;  %12885 = vmatprep.subr.bf16.mxu1 %v13531_v1 }
 0x2ff   : > { %v12263_v40 = vpop.f32.mrb[248].mxu1  ;;  %v12329_v0 = vadd.f32 %v12328_v4, %v12327_v21  ;;  %v12330_v16 = vpop.f32.mrb[250].mxu0  ;;  %13122 = vmatpush3.bf16.msra.mxu0 %v13521_v48  ;;  %v13535_v48 = vld [vmem:[%s18040_s5 + $0x10] sm:$0xff]  }
 0x300   : > { %v12264_v35 = vpop.f32.mrb[249].mxu1  ;;  %v12331_v49 = vpop.f32.mrb[251].mxu0  ;;  %13123 = vmatprep.subr.bf16.mxu0 %v13522_v23 }
 0x301   : > { %v12265_v15 = vadd.f32 %v12264_v35, %v12263_v40  ;;  %v12266_v29 = vpop.f32.mrb[250].mxu1  ;;  %v12332_v14 = vadd.f32 %v12331_v49, %v12330_v16  ;;  %v16712_v9 = vadd.f32 %v12329_v0, %v16497_v33  ;;  %12886 = vmatpush3.bf16.msra.mxu1 %v13532_v56 }
 0x302   : > { %v12267_v12 = vpop.f32.mrb[251].mxu1  ;;  %8954 = vmatmul.mubr.bf16.gmra.mrb[100].mxu0 %v18425_v26  ;;  %12887 = vmatprep.subr.bf16.mxu1 %v13534_v44 }
 0x303   : > { %v16709_v41 = vadd.f32 %v12265_v15, %v16494_v17  ;;  %v12268_v50 = vadd.f32 %v12267_v12, %v12266_v29  ;;  %v13536_v17 = vld [vmem:[%s18040_s5 + $0x58] sm:$0xff]   ;;  %8961 = vmatprep.mubr.bf16.mxu0 %v18426_v43  ;;  %v16731_v1 = vadd.f32 %v12332_v14, %v18427_v10  ;;  %13124 = vmatpush3.bf16.msra.mxu0 %v13522_v23  ;;  %v13540_v14 = vld [vmem:[%s18040_s5 + $0x60] sm:$0xff]  }
 0x304   : > { %9115 = vmatmul.mubr.bf16.gmra.mrb[100].mxu1 %v16378_v11  ;;  %13125 = vmatprep.subr.bf16.mxu0 %v13523_v61  ;;  %v13524_v11 = vld [vmem:[%s18037_s2 + $0x6a0] sm:$0xff]   ;;  %v13537_v23 = vld [vmem:[%s18040_s5 + $0x18] sm:$0xff]  }
 0x305   : > { %v16726_v33 = vadd.f32 %v12268_v50, %v16509_v36  ;;  %9122 = vmatprep.mubr.bf16.mxu1 %v18412_v63  ;;  %v12333_v40 = vpop.f32.mrb[252].mxu0  ;;  %12888 = vmatpush3.bf16.msra.mxu1 %v13535_v48  ;;  %v13525_v50 = vld [vmem:[%s18037_s2 + $0x6a8] sm:$0xff]   ;;  %v18429_v48 = vld [vmem:[#allocation19_spill] sm:$0xff] }
 0x306   : > { %v12334_v36 = vpop.f32.mrb[253].mxu0  ;;  %12889 = vmatprep.subr.bf16.mxu1 %v13536_v17  ;;  %v13541_v17 = vld [vmem:[%s18040_s5 + $0x20] sm:$0xff]  }
 0x307   : > { %v12269_v37 = vpop.f32.mrb[252].mxu1  ;;  %v12335_v35 = vadd.f32 %v12334_v36, %v12333_v40  ;;  %v12336_v15 = vpop.f32.mrb[254].mxu0  ;;  %13126 = vmatpush3.bf16.msra.mxu0 %v13523_v61  ;;  %v18428_v61 = vld [vmem:[#allocation13_spill] sm:$0xff] }
 0x308   : > { %v12270_v21 = vpop.f32.mrb[253].mxu1  ;;  %v12337_v29 = vpop.f32.mrb[255].mxu0  ;;  %13127 = vmatprep.subr.bf16.mxu0 %v13524_v11 }
 0x309   : > { %v12271_v56 = vadd.f32 %v12270_v21, %v12269_v37  ;;  %v12272_v4 = vpop.f32.mrb[254].mxu1  ;;  %v12338_v49 = vadd.f32 %v12337_v29, %v12336_v15  ;;  %v16743_v44 = vadd.f32 %v12335_v35, %v16525_v53  ;;  %v18430_v53 = vld [vmem:[#allocation40_spill] sm:$0xff]  ;;  %12890 = vmatpush3.bf16.msra.mxu1 %v13537_v23  ;;  %v16776_v21 = vld [vmem:[%s18039_s4 + $0x1] ss:$0 sm:$0xff] }
 0x30a   : > { %v12273_v0 = vpop.f32.mrb[255].mxu1  ;;  %8962 = vmatmul.mubr.bf16.gmra.mrb[104].mxu0 %v18428_v61  ;;  %12891 = vmatprep.subr.bf16.mxu1 %v13540_v14 }
 0x30b   : > { %v16740_v16 = vadd.f32 %v12271_v56, %v16522_v51  ;;  %v12274_v12 = vadd.f32 %v12273_v0, %v12272_v4  ;;  %8969 = vmatprep.mubr.bf16.mxu0 %v18429_v48  ;;  %v16759_v26 = vadd.f32 %v12338_v49, %v18430_v53  ;;  %13128 = vmatpush3.bf16.msra.mxu0 %v13524_v11 }
 0x30c   : > { %9123 = vmatmul.mubr.bf16.gmra.mrb[104].mxu1 %v16406_v2  ;;  %v16767_v2 = vld [vmem:[%s18038_s3 + $0x1] ss:$0 sm:$0xff]  ;;  %13129 = vmatprep.subr.bf16.mxu0 %v13525_v50 }
 0x30d   : > { %v16754_v51 = vadd.f32 %v12274_v12, %v16537_v39  ;;  %9130 = vmatprep.mubr.bf16.mxu1 %v18417_v38  ;;  %v12339_v43 = vpop.f32.mrb[0].mxu0  ;;  %v13528_v39 = vld [vmem:[%s18037_s2 + $0x6b0] sm:$0xff]   ;;  %12892 = vmatpush3.bf16.msra.mxu1 %v13541_v17  ;;  %v18432_v17 = vld [vmem:[#allocation14_spill] sm:$0xff] }
 0x30e   : > { %v12340_v40 = vpop.f32.mrb[1].mxu0 }
 0x30f   : > { %v13089_v10 = vpop.f32.mrb[0].mxu1  ;;  %v12341_v36 = vadd.f32 %v12340_v40, %v12339_v43  ;;  %v12342_v35 = vpop.f32.mrb[2].mxu0  ;;  %13130 = vmatpush3.bf16.msra.mxu0 %v13525_v50  ;;  %v13543_v50 = vld [vmem:[%s18040_s5 + $0x28] sm:$0xff]  }
 0x310   : > { %v6618_v37 = vadd.f32 %v13089_v10, %v16581_v46  ;;  %v6609_v11 = vpop.f32.mrb[1].mxu1  ;;  %v12343_v29 = vpop.f32.mrb[3].mxu0  ;;  %v13542_v46 = vld [vmem:[%s18040_s5 + $0x68] sm:$0xff]   ;;  %13131 = vmatprep.subr.bf16.mxu0 %v13528_v39  ;;  %v18433_v10 = vld [vmem:[#allocation39_spill] sm:$0xff] }
 0x311   : > { %v6610_v56 = vadd.f32 %v6609_v11, %v16550_v55  ;;  %v13090_v4 = vpop.f32.mrb[2].mxu1  ;;  %v12344_v49 = vadd.f32 %v12343_v29, %v12342_v35  ;;  %v18431_v55 = vld [vmem:[#allocation16_spill] sm:$0xff]  ;;  %12893 = vmatprep.subr.bf16.mxu1 %v13542_v46 }
 0x312   : > { %v6746_v15 = vmul.f32 %v16767_v2, %v6618_v37  ;;  %v6621_v0 = vadd.f32 %v13090_v4, %v16599_v45  ;;  %v6612_v23 = vpop.f32.mrb[3].mxu1  ;;  %v16787_v61 = vadd.f32 %v12341_v36, %v18431_v55  ;;  %v13539_v45 = vld [vmem:[%s18037_s2 + $0x6b8] sm:$0xff]   ;;  %8970 = vmatmul.mubr.bf16.gmra.mrb[108].mxu0 %v18432_v17  ;;  %v18434_v37 = vld [vmem:[#allocation17_spill] sm:$0xff]  ;;  %12894 = vmatpush3.bf16.msra.mxu1 %v13543_v50  ;;  %v13546_v4 = vld [vmem:[%s18040_s5 + $0x30] sm:$0xff]  }
 0x313   : > { %v6744_v12 = vmul.f32 %v16767_v2, %v6610_v56  ;;  %v6613_v14 = vadd.f32 %v6612_v23, %v16568_v22  ;;  %v13545_v22 = vld [vmem:[%s18040_s5 + $0x70] sm:$0xff]   ;;  %8977 = vmatprep.mubr.bf16.mxu0 %v18433_v10  ;;  %v16806_v40 = vadd.f32 %v12344_v49, %v18434_v37  ;;  %13132 = vmatpush3.bf16.msra.mxu0 %v13528_v39 }
 0x314   : > { %v6786_v48 = vadd.f32 %v16776_v21, %v6746_v15  ;;  %v6747_v53 = vmul.f32 %v16767_v2, %v6621_v0  ;;  %9131 = vmatmul.mubr.bf16.gmra.mrb[108].mxu1 %v16434_v60  ;;  %13133 = vmatprep.subr.bf16.mxu0 %v13539_v45 }
 0x315   : > { %v6745_v43 = vmul.f32 %v16767_v2, %v6613_v14  ;;  %9138 = vmatprep.mubr.bf16.mxu1 %v18422_v32  ;;  %v6784_v11 = vadd.f32 %v16776_v21, %v6744_v12  ;;  %v12345_v56 = vpop.f32.mrb[4].mxu0  ;;  %12895 = vmatprep.subr.bf16.mxu1 %v13545_v22 }
 0x316   : > { %v6787_v36 = vadd.f32 %v16776_v21, %v6747_v53  ;;  %v6818_v15 = vmax.f32 %v6786_v48, 0.0  ;;  %v12346_v23 = vpop.f32.mrb[5].mxu0  ;;  %12896 = vmatpush3.bf16.msra.mxu1 %v13546_v4 }
 0x317   : > { %v6785_v60 = vadd.f32 %v16776_v21, %v6745_v43  ;;  %v13093_v35 = vpop.f32.mrb[4].mxu1  ;;  %v12347_v39 = vadd.f32 %v12346_v23, %v12345_v56  ;;  %v12348_v14 = vpop.f32.mrb[6].mxu0  ;;  %v6816_v53 = vmax.f32 %v6784_v11, 0.0  ;;  %13134 = vmatpush3.bf16.msra.mxu0 %v13539_v45 }
 0x318   : > { %v6819_v0 = vmax.f32 %v6787_v36, 0.0  ;;  %v6634_v29 = vadd.f32 %v13093_v35, %v16639_v28  ;;  %v6625_v12 = vpop.f32.mrb[5].mxu1  ;;  %v12349_v43 = vpop.f32.mrb[7].mxu0  ;;  %v13547_v28 = vld [vmem:[%s18040_s5 + $0x78] sm:$0xff]   ;;  %v18436_v35 = vld [vmem:[#allocation23_spill] sm:$0xff] }
 0x319   : > { %v6817_v49 = vmax.f32 %v6785_v60, 0.0  ;;  %v6626_v46 = vadd.f32 %v6625_v12, %v16612_v42  ;;  %v13094_v55 = vpop.f32.mrb[6].mxu1  ;;  %v12350_v37 = vadd.f32 %v12349_v43, %v12348_v14  ;;  %v16826_v11 = vadd.f32 %v12347_v39, %v16578_v25  ;;  %v18435_v60 = vld [vmem:[#allocation15_spill] sm:$0xff]  ;;  %v18437_v25 = vld [vmem:[#allocation52_spill] sm:$0xff]  ;;  %12897 = vmatprep.subr.bf16.mxu1 %v13547_v28 }
 0x31a   : > { %v6750_v50 = vmul.f32 %v16767_v2, %v6634_v29  ;;  %v6637_v17 = vadd.f32 %v13094_v55, %v16653_v54  ;;  %v6628_v10 = vpop.f32.mrb[7].mxu1  ;;  %v16821_v48 = vpack.c.bf16 %v6819_v0, %v6818_v15  ;;  %v13548_v54 = vld [vmem:[%s18040_s5 + $0x38] sm:$0xff]   ;;  %8978 = vmatmul.mubr.bf16.gmra.mrb[112].mxu0 %v18435_v60  ;;  %v18438_v60 = vld [vmem:[#allocation57_spill] sm:$0xff] }
 0x31b   : > { %v6748_v22 = vmul.f32 %v16767_v2, %v6626_v46  ;;  %v6629_v42 = vadd.f32 %v6628_v10, %v16627_v3  ;;  %v16835_v56 = vpack.c.bf16 %v6817_v49, %v6816_v53  ;;  %8985 = vmatprep.mubr.bf16.mxu0 %v18436_v35  ;;  %v16841_v4 = vadd.f32 %v12350_v37, %v18437_v25 }
 0x31c   : > { %v6790_v45 = vadd.f32 %v16776_v21, %v6750_v50  ;;  %v6751_v36 = vmul.f32 %v16767_v2, %v6637_v17  ;;  %9139 = vmatmul.mubr.bf16.gmra.mrb[112].mxu1 %v16462_v34 }
 0x31d   : > { %v6749_v3 = vmul.f32 %v16767_v2, %v6629_v42  ;;  %9146 = vmatprep.mubr.bf16.mxu1 %v18423_v59  ;;  %v6788_v15 = vadd.f32 %v16776_v21, %v6748_v22  ;;  %v12351_v23 = vpop.f32.mrb[8].mxu0  ;;  %12898 = vmatpush3.bf16.msra.mxu1 %v13548_v54 }
 0x31e   : > { %v6791_v0 = vadd.f32 %v16776_v21, %v6751_v36  ;;  %v6822_v12 = vmax.f32 %v6790_v45, 0.0  ;;  %v12352_v46 = vpop.f32.mrb[9].mxu0 }
 0x31f   : > { %v6789_v29 = vadd.f32 %v16776_v21, %v6749_v3  ;;  %v13097_v34 = vpop.f32.mrb[8].mxu1  ;;  %v12353_v53 = vadd.f32 %v12352_v46, %v12351_v23  ;;  %v12354_v17 = vpop.f32.mrb[10].mxu0  ;;  %v6820_v10 = vmax.f32 %v6788_v15, 0.0 }
 0x320   : > { %v6823_v49 = vmax.f32 %v6791_v0, 0.0  ;;  %v6650_v39 = vadd.f32 %v13097_v34, %v16680_v13  ;;  %v6641_v14 = vpop.f32.mrb[9].mxu1  ;;  %v12355_v37 = vpop.f32.mrb[11].mxu0  ;;  %v18439_v0 = vld [vmem:[#allocation10_spill] sm:$0xff] }
 0x321   : > { %v6821_v55 = vmax.f32 %v6789_v29, 0.0  ;;  %v6642_v50 = vadd.f32 %v6641_v14, %v16661_v27  ;;  %v13098_v43 = vpop.f32.mrb[10].mxu1  ;;  %v12356_v13 = vadd.f32 %v12355_v37, %v12354_v17  ;;  %v16855_v3 = vadd.f32 %v12353_v53, %v18438_v60  ;;  %v18440_v29 = vld [vmem:[#allocation28_spill] sm:$0xff] }
 0x322   : > { %v6754_v28 = vmul.f32 %v16767_v2, %v6650_v39  ;;  %v6653_v22 = vadd.f32 %v13098_v43, %v16696_v20  ;;  %v6644_v42 = vpop.f32.mrb[11].mxu1  ;;  %v16850_v54 = vpack.c.bf16 %v6823_v49, %v6822_v12  ;;  %8986 = vmatmul.mubr.bf16.gmra.mrb[116].mxu0 %v18401_v18 }
 0x323   : > { %v6752_v45 = vmul.f32 %v16767_v2, %v6642_v50  ;;  %v6645_v36 = vadd.f32 %v6644_v42, %v16671_v5  ;;  %v16861_v20 = vpack.c.bf16 %v6821_v55, %v6820_v10  ;;  %8993 = vmatprep.mubr.bf16.mxu0 %v18439_v0  ;;  %v18441_v5 = vld [vmem:[#allocation58_spill] sm:$0xff] }
 0x324   : > { %v6794_v27 = vadd.f32 %v16776_v21, %v6754_v28  ;;  %v6755_v25 = vmul.f32 %v16767_v2, %v6653_v22  ;;  %9147 = vmatmul.mubr.bf16.gmra.mrb[116].mxu1 %v16490_v31  ;;  %v16867_v23 = vadd.f32 %v12356_v13, %v18441_v5  ;;  %v18442_v5 = vld [vmem:[#allocation38_spill] sm:$0xff] }
 0x325   : > { %v6753_v15 = vmul.f32 %v16767_v2, %v6645_v36  ;;  %9154 = vmatprep.mubr.bf16.mxu1 %v18440_v29  ;;  %v6792_v34 = vadd.f32 %v16776_v21, %v6752_v45  ;;  %v12357_v18 = vpop.f32.mrb[12].mxu0 }
 0x326   : > { %v6795_v12 = vadd.f32 %v16776_v21, %v6755_v25  ;;  %v6826_v31 = vmax.f32 %v6794_v27, 0.0  ;;  %v12358_v55 = vpop.f32.mrb[13].mxu0 }
 0x327   : > { %v6793_v49 = vadd.f32 %v16776_v21, %v6753_v15  ;;  %v13101_v39 = vpop.f32.mrb[12].mxu1  ;;  %v12359_v17 = vadd.f32 %v12358_v55, %v12357_v18  ;;  %v12360_v10 = vpop.f32.mrb[14].mxu0  ;;  %v6824_v22 = vmax.f32 %v6792_v34, 0.0 }
 0x328   : > { %v6827_v46 = vmax.f32 %v6795_v12, 0.0  ;;  %v6666_v14 = vadd.f32 %v13101_v39, %v16743_v44  ;;  %v6657_v53 = vpop.f32.mrb[13].mxu1  ;;  %v12361_v45 = vpop.f32.mrb[15].mxu0  ;;  %v18443_v12 = vld [vmem:[#allocation41_spill] sm:$0xff] }
 0x329   : > { %v6825_v50 = vmax.f32 %v6793_v49, 0.0  ;;  %v6658_v43 = vadd.f32 %v6657_v53, %v16712_v9  ;;  %v13102_v28 = vpop.f32.mrb[14].mxu1  ;;  %v12362_v44 = vadd.f32 %v12361_v45, %v12360_v10  ;;  %v6537_v25 = vadd.f32 %v12359_v17, %v16636_v6  ;;  %v18444_v49 = vld [vmem:[#allocation30_spill] sm:$0xff] }
 0x32a   : > { %v6758_v37 = vmul.f32 %v16767_v2, %v6666_v14  ;;  %v6669_v42 = vadd.f32 %v13102_v28, %v16759_v26  ;;  %v6660_v13 = vpop.f32.mrb[15].mxu1  ;;  %v16876_v36 = vpack.c.bf16 %v6827_v46, %v6826_v31  ;;  %8994 = vmatmul.mubr.bf16.gmra.mrb[120].mxu0 %v18405_v47 }
 0x32b   : > { %v6756_v60 = vmul.f32 %v16767_v2, %v6658_v43  ;;  %v6661_v27 = vadd.f32 %v6660_v13, %v16731_v1  ;;  %v16885_v26 = vpack.c.bf16 %v6825_v50, %v6824_v22  ;;  %9001 = vmatprep.mubr.bf16.mxu0 %v18443_v12  ;;  %v6540_v1 = vadd.f32 %v12362_v44, %v16646_v62 }
 0x32c   : > { %v6798_v9 = vadd.f32 %v16776_v21, %v6758_v37  ;;  %v6759_v15 = vmul.f32 %v16767_v2, %v6669_v42  ;;  %9155 = vmatmul.mubr.bf16.gmra.mrb[120].mxu1 %v18442_v5  ;;  %v18445_v5 = vld [vmem:[#allocation11_spill] sm:$0xff] }
 0x32d   : > { %v6757_v34 = vmul.f32 %v16767_v2, %v6661_v27  ;;  %9162 = vmatprep.mubr.bf16.mxu1 %v18444_v49  ;;  %v6796_v6 = vadd.f32 %v16776_v21, %v6756_v60  ;;  %v12363_v31 = vpop.f32.mrb[16].mxu0  ;;  %v16899_v60 = vld [vmem:[%s13833_s21 + $0x108] sm:$0xf] }
 0x32e   : > { %v6799_v18 = vadd.f32 %v16776_v21, %v6759_v15  ;;  %v6830_v46 = vmax.f32 %v6798_v9, 0.0  ;;  %v12364_v53 = vpop.f32.mrb[17].mxu0 }
 0x32f   : > { %v6797_v39 = vadd.f32 %v16776_v21, %v6757_v34  ;;  %v13105_v47 = vpop.f32.mrb[16].mxu1  ;;  %v12365_v43 = vadd.f32 %v12364_v53, %v12363_v31  ;;  %v12366_v62 = vpop.f32.mrb[18].mxu0  ;;  %v6828_v22 = vmax.f32 %v6796_v6, 0.0  ;;  %v7162_v31 = vld [vmem:[%s13833_s21 + $0x104] sm:$0xe] }
 0x330   : > { %v6831_v14 = vmax.f32 %v6799_v18, 0.0  ;;  %v6682_v55 = vadd.f32 %v13105_v47, %v16826_v11  ;;  %v6673_v50 = vpop.f32.mrb[17].mxu1  ;;  %v12367_v45 = vpop.f32.mrb[19].mxu0  ;;  %v7384_v47 = vrot.slane %v16899_v60, 5  ;;  %v16928_v60 = vld [vmem:[%s13833_s21 + $0x118] sm:$0xf] }
 0x331   : > { %v6829_v17 = vmax.f32 %v6797_v39, 0.0  ;;  %v6674_v10 = vadd.f32 %v6673_v50, %v16787_v61  ;;  %v13106_v28 = vpop.f32.mrb[18].mxu1  ;;  %v12368_v27 = vadd.f32 %v12367_v45, %v12366_v62  ;;  %v16906_v9 = vadd.f32 %v12365_v43, %v16658_v30  ;;  %v18446_v39 = vld [vmem:[#allocation20_spill] sm:$0xff] }
 0x332   : > { %v6762_v37 = vmul.f32 %v16767_v2, %v6682_v55  ;;  %v6685_v42 = vadd.f32 %v13106_v28, %v16841_v4  ;;  %v6676_v13 = vpop.f32.mrb[19].mxu1  ;;  %v16901_v44 = vpack.c.bf16 %v6831_v14, %v6830_v46  ;;  %9002 = vmatmul.mubr.bf16.gmra.mrb[124].mxu0 %v18412_v63  ;;  %v7164_v46 = vld [vmem:[%s13833_s21 + $0x10c] sm:$0x1]  ;;  %v11176_v28 = vrot.slane %v7162_v31, 9 }
 0x333   : > { %v6760_v11 = vmul.f32 %v16767_v2, %v6674_v10  ;;  %v6677_v61 = vadd.f32 %v6676_v13, %v16806_v40  ;;  %v16912_v34 = vpack.c.bf16 %v6829_v17, %v6828_v22  ;;  %9009 = vmatprep.mubr.bf16.mxu0 %v18446_v39  ;;  %v18447_v40 = vld [vmem:[#allocation32_spill] sm:$0xff]  ;;  %v16919_v30 = vadd.f32 %v12368_v27, %v16666_v52 }
 0x334   : > { %v6802_v15 = vadd.f32 %v16776_v21, %v6762_v37  ;;  %v6763_v4 = vmul.f32 %v16767_v2, %v6685_v42  ;;  %9163 = vmatmul.mubr.bf16.gmra.mrb[124].mxu1 %v18445_v5  ;;  %v7386_v45 = vrot.slane %v7384_v47, 4  ;;  %v7387_v13 = vrot.slane %v7164_v46, 5 }
 0x335   : > { %v6800_v6 = vadd.f32 %v16776_v21, %v6760_v11  ;;  %v6761_v18 = vmul.f32 %v16767_v2, %v6677_v61  ;;  %9170 = vmatprep.mubr.bf16.mxu1 %v18447_v40  ;;  %v12369_v55 = vpop.f32.mrb[20].mxu0 }
 0x336   : > { %v6803_v63 = vadd.f32 %v16776_v21, %v6763_v4  ;;  %v6834_v50 = vmax.f32 %v6802_v15, 0.0  ;;  %v12370_v10 = vpop.f32.mrb[21].mxu0 }
 0x337   : > { %v6801_v14 = vadd.f32 %v16776_v21, %v6761_v18  ;;  %v13109_v53 = vpop.f32.mrb[20].mxu1  ;;  %v12371_v22 = vadd.f32 %v12370_v10, %v12369_v55  ;;  %v12372_v37 = vpop.f32.mrb[22].mxu0  ;;  %v7165_v55 = vld [vmem:[%s13833_s21 + $0x114] sm:$0xe] }
 0x338   : > { %v6835_v17 = vmax.f32 %v6803_v63, 0.0  ;;  %v6698_v43 = vadd.f32 %v13109_v53, %v6537_v25  ;;  %v6689_v62 = vpop.f32.mrb[21].mxu1  ;;  %v12373_v15 = vpop.f32.mrb[23].mxu0  ;;  %v6832_v63 = vmax.f32 %v6800_v6, 0.0  ;;  %v7391_v53 = vrot.slane %v16928_v60, 5 }
 0x339   : > { %v6690_v52 = vadd.f32 %v6689_v62, %v16855_v3  ;;  %v13110_v42 = vpop.f32.mrb[22].mxu1  ;;  %v6833_v11 = vmax.f32 %v6801_v14, 0.0  ;;  %v12374_v18 = vadd.f32 %v12373_v15, %v12372_v37  ;;  %v6553_v31 = vadd.f32 %v12371_v22, %v16677_v24  ;;  %v18449_v24 = vld [vmem:[#allocation33_spill] sm:$0xff] }
 0x33a   : > { %v6766_v27 = vmul.f32 %v16767_v2, %v6698_v43  ;;  %v6701_v61 = vadd.f32 %v13110_v42, %v6540_v1  ;;  %v6692_v4 = vpop.f32.mrb[23].mxu1  ;;  %v16931_v25 = vpack.c.bf16 %v6835_v17, %v6834_v50  ;;  %9010 = vmatmul.mubr.bf16.gmra.mrb[128].mxu0 %v18417_v38  ;;  %v18448_v1 = vld [vmem:[#allocation18_spill] sm:$0xff]  ;;  %v7167_v43 = vld [vmem:[%s13833_s21 + $0x11c] sm:$0x1]  ;;  %v7388_v37 = vsel %vm14847_vm11, %v7386_v45, %v7387_v13 }
 0x33b   : > { %v6764_v5 = vmul.f32 %v16767_v2, %v6690_v52  ;;  %v6693_v3 = vadd.f32 %v6692_v4, %v16867_v23  ;;  %v6556_v23 = vadd.f32 %v12374_v18, %v16691_v7  ;;  %9017 = vmatprep.mubr.bf16.mxu0 %v16630_v19  ;;  %v16949_v10 = vpack.c.bf16 %v6833_v11, %v6832_v63 }
 0x33c   : > { %v6806_v46 = vadd.f32 %v16776_v21, %v6766_v27  ;;  %v6767_v14 = vmul.f32 %v16767_v2, %v6701_v61  ;;  %9171 = vmatmul.mubr.bf16.gmra.mrb[128].mxu1 %v18448_v1  ;;  %v7385_v52 = vsel %vm14847_vm11, %v11176_v28, %v7384_v47  ;;  %v11177_v7 = vrot.slane %v7165_v55, 9 }
 0x33d   : > { %v6804_v50 = vadd.f32 %v16776_v21, %v6764_v5  ;;  %v6765_v17 = vmul.f32 %v16767_v2, %v6693_v3  ;;  %9178 = vmatprep.mubr.bf16.mxu1 %v18449_v24  ;;  %v12375_v62 = vpop.f32.mrb[24].mxu0  ;;  %v7393_v4 = vrot.slane %v7391_v53, 4 }
 0x33e   : > { %v6807_v6 = vadd.f32 %v16776_v21, %v6767_v14  ;;  %v6838_v42 = vmax.f32 %v6806_v46, 0.0  ;;  %v12376_v61 = vpop.f32.mrb[25].mxu0  ;;  %v7394_v14 = vrot.slane %v7167_v43, 5 }
 0x33f   : > { %v6805_v38 = vadd.f32 %v16776_v21, %v6765_v17  ;;  %v13113_v22 = vpop.f32.mrb[24].mxu1  ;;  %v12377_v11 = vadd.f32 %v12376_v61, %v12375_v62  ;;  %v12378_v3 = vpop.f32.mrb[26].mxu0  ;;  %v6836_v1 = vmax.f32 %v6804_v50, 0.0 }
 0x340   : > { %v6839_v60 = vmax.f32 %v6807_v6, 0.0  ;;  %v6714_v27 = vadd.f32 %v13113_v22, %v6553_v31  ;;  %v6705_v15 = vpop.f32.mrb[25].mxu1  ;;  %v12379_v17 = vpop.f32.mrb[27].mxu0 }
 0x341   : > { %v6837_v5 = vmax.f32 %v6805_v38, 0.0  ;;  %v6706_v18 = vadd.f32 %v6705_v15, %v16906_v9  ;;  %v13114_v63 = vpop.f32.mrb[26].mxu1  ;;  %v12380_v46 = vadd.f32 %v12379_v17, %v12378_v3  ;;  %v6561_v9 = vadd.f32 %v12377_v11, %v16709_v41  ;;  %v18451_v41 = vld [vmem:[#allocation36_spill] sm:$0xff] }
 0x342   : > { %v6770_v47 = vmul.f32 %v16767_v2, %v6714_v27  ;;  %v6717_v28 = vadd.f32 %v13114_v63, %v6556_v23  ;;  %v6708_v45 = vpop.f32.mrb[27].mxu1  ;;  %v16958_v13 = vpack.c.bf16 %v6839_v60, %v6838_v42  ;;  %9018 = vmatmul.mubr.bf16.gmra.mrb[132].mxu0 %v18422_v32  ;;  %v18450_v23 = vld [vmem:[#allocation56_spill] sm:$0xff]  ;;  %v7169_v42 = vld [vmem:[%s13833_s21 + $0x128] sm:$0xf]  ;;  %v451_v32 = vld [vmem:[%s13833_s21 + $0x180] sm:$0xc]  ;;  %v7392_v11 = vsel %vm14847_vm11, %v11177_v7, %v7391_v53 }
 0x343   : > { %v6768_v31 = vmul.f32 %v16767_v2, %v6706_v18  ;;  %v6709_v55 = vadd.f32 %v6708_v45, %v16919_v30  ;;  %v16967_v43 = vpack.c.bf16 %v6837_v5, %v6836_v1  ;;  %v6564_v22 = vadd.f32 %v12380_v46, %v16726_v33  ;;  %9025 = vmatprep.mubr.bf16.mxu0 %v16655_v58  ;;  %v7168_v30 = vld [vmem:[%s13833_s21 + $0x124] sm:$0xe] }
 0x344   : > { %v6810_v6 = vadd.f32 %v16776_v21, %v6770_v47  ;;  %v6771_v50 = vmul.f32 %v16767_v2, %v6717_v28  ;;  %9179 = vmatmul.mubr.bf16.gmra.mrb[132].mxu1 %v18450_v23  ;;  %v16979_v5 = vcombine.low %v7385_v52, %v7388_v37  ;;  %v7395_v33 = vsel %vm14847_vm11, %v7393_v4, %v7394_v14  ;;  %v452_v18 = vld [vmem:[%s13833_s21 + $0x184] sm:$0xf] }
 0x345   : > { %v6808_v38 = vadd.f32 %v16776_v21, %v6768_v31  ;;  %v6769_v62 = vmul.f32 %v16767_v2, %v6709_v55  ;;  %9186 = vmatprep.mubr.bf16.mxu1 %v18451_v41  ;;  %v12381_v61 = vpop.f32.mrb[28].mxu0  ;;  %v11178_v28 = vrot.slane %v7168_v30, 9  ;;  %v7398_v17 = vrot.slane %v7169_v42, 5 }
 0x346   : > { %v6811_v60 = vadd.f32 %v16776_v21, %v6771_v50  ;;  %v6842_v3 = vmax.f32 %v6810_v6, 0.0  ;;  %v12382_v1 = vpop.f32.mrb[29].mxu0  ;;  %v1133_v37 = vshrl.u32 %v451_v32, 16  ;;  %v1136_v7 = vshll.u32 %v451_v32, 16 }
 0x347   : > { %v6809_v27 = vadd.f32 %v16776_v21, %v6769_v62  ;;  %v13117_v15 = vpop.f32.mrb[28].mxu1  ;;  %v12383_v31 = vadd.f32 %v12382_v1, %v12381_v61  ;;  %v12384_v55 = vpop.f32.mrb[30].mxu0  ;;  %v6840_v50 = vmax.f32 %v6808_v38, 0.0  ;;  %v1142_v62 = vshrl.u32 %v452_v18, 16 }
 0x348   : > { %v6843_v63 = vmax.f32 %v6811_v60, 0.0  ;;  %v6721_v47 = vpop.f32.mrb[29].mxu1  ;;  %v12385_v23 = vpop.f32.mrb[31].mxu0  ;;  %v7170_v60 = vld [vmem:[%s13833_s21 + $0x12c] sm:$0x1]  ;;  %v7400_v38 = vrot.slane %v7398_v17, 4 }
 0x349   : > { %v6841_v45 = vmax.f32 %v6809_v27, 0.0  ;;  %v6722_v46 = vadd.f32 %v6721_v47, %v6561_v9  ;;  %v13118_v52 = vpop.f32.mrb[30].mxu1  ;;  %v6569_v14 = vadd.f32 %v12383_v31, %v16740_v16  ;;  %v12386_v30 = vadd.f32 %v12385_v23, %v12384_v55  ;;  %v17012_v55 = vld [vmem:[%s13833_s21 + $0x134] sm:$0xe] }
 0x34a   : > { %v6724_v53 = vpop.f32.mrb[31].mxu1  ;;  %v16986_v4 = vpack.c.bf16 %v6843_v63, %v6842_v3  ;;  %9026 = vmatmul.mubr.bf16.gmra.mrb[136].mxu0 %v18423_v59  ;;  %v16993_v9 = vcombine.low %v7392_v11, %v7395_v33  ;;  %v1145_v32 = vshll.u32 %v452_v18, 16  ;;  %v453_v59 = vld [vmem:[%s13833_s21 + $0x188] sm:$0x7]  ;;  %v18454_v63 = vld [vmem:[#allocation37_spill] sm:$0xff]  ;;  %v7401_v11 = vrot.slane %v7170_v60, 5 }
 0x34b   : > { %v6772_v6 = vmul.f32 %v16767_v2, %v6722_v46  ;;  %v6725_v42 = vadd.f32 %v6724_v53, %v6564_v22  ;;  %v16995_v27 = vpack.c.bf16 %v6841_v45, %v6840_v50  ;;  %v6730_v61 = vadd.f32 %v13117_v15, %v6569_v14  ;;  %9033 = vmatprep.mubr.bf16.mxu0 %v16979_v5  ;;  %v17006_v33 = vld [vmem:[%s13833_s21 + $0x138] sm:$0xf]  ;;  %v13526_v46 = vld [vmem:[%s13833_s21 + $0x150] sm:$0xff]  }
 0x34c   : > { %18452 = vst [vmem:[#allocation22_spill] sm:$0xff] %v16986_v4  ;;  %9187 = vmatmul.mubr.bf16.gmra.mrb[136].mxu1 %v16633_v57  ;;  %v6572_v3 = vadd.f32 %v12386_v30, %v16754_v51  ;;  %v7399_v57 = vsel %vm14847_vm11, %v11178_v28, %v7398_v17  ;;  %v1135_v15 = vrot.slane %v1133_v37, 6  ;;  %v1138_v18 = vrot.slane %v1136_v7, 7 }
 0x34d   : > { %18453 = vst [vmem:[#allocation25_spill] sm:$0xff] %v16995_v27  ;;  %v6812_v16 = vadd.f32 %v16776_v21, %v6772_v6  ;;  %v6773_v22 = vmul.f32 %v16767_v2, %v6725_v42  ;;  %9194 = vmatprep.mubr.bf16.mxu1 %v18454_v63  ;;  %v6774_v1 = vmul.f32 %v16767_v2, %v6730_v61  ;;  %v12427_v45 = vpop.f32.mrb[32].mxu0  ;;  %v1144_v50 = vrot.slane %v1142_v62, 6  ;;  %v454_v61 = vld [vmem:[%s13833_s21 + $0x190] sm:$0xc] }
 0x34e   : > { %v6733_v47 = vadd.f32 %v13118_v52, %v6572_v3  ;;  %v12428_v53 = vpop.f32.mrb[33].mxu0  ;;  %v1147_v17 = vrot.slane %v1145_v32, 7  ;;  %v1152_v14 = vshrl.u32 %v453_v59, 16  ;;  %v1155_v6 = vshll.u32 %v453_v59, 16 }
 0x34f   : > { %v6813_v51 = vadd.f32 %v16776_v21, %v6773_v22  ;;  %v12539_v31 = vpop.f32.mrb[32].mxu1  ;;  %v6844_v23 = vmax.f32 %v6812_v16, 0.0  ;;  %v12429_v52 = vadd.f32 %v12428_v53, %v12427_v45  ;;  %v12430_v42 = vpop.f32.mrb[34].mxu0  ;;  %v7402_v62 = vsel %vm14847_vm11, %v7400_v38, %v7401_v11 }
 0x350   : > { %v12540_v28 = vpop.f32.mrb[33].mxu1  ;;  %v6775_v37 = vmul.f32 %v16767_v2, %v6733_v47  ;;  %v12431_v3 = vpop.f32.mrb[35].mxu0  ;;  %v7405_v16 = vrot.slane %v17006_v33, 5  ;;  %v1139_v32 = vor.u32 %v1138_v18, %v1135_v15  ;;  %v6814_v59 = vadd.f32 %v16776_v21, %v6774_v1  ;;  %v18458_v15 = vld [vmem:[#allocation48_spill] sm:$0xff] }
 0x351   : > { %v6845_v7 = vmax.f32 %v6813_v51, 0.0  ;;  %v12541_v30 = vadd.f32 %v12540_v28, %v12539_v31  ;;  %v12542_v60 = vpop.f32.mrb[34].mxu1  ;;  %v12432_v2 = vadd.f32 %v12431_v3, %v12430_v42  ;;  %v455_v51 = vld [vmem:[%s13833_s21 + $0x194] sm:$0xf]  ;;  %v7173_v31 = vld [vmem:[%s13833_s21 + $0x13c] sm:$0x1]  ;;  %v17028_v28 = vor.u32 %v1147_v17, %v1144_v50 }
 0x352   : > { %v12543_v22 = vpop.f32.mrb[35].mxu1  ;;  %9034 = vmatmul.mubr.bf16.gmra.mrb[140].mxu0 %v18440_v29  ;;  %v11179_v53 = vrot.slane %v17012_v55, 9  ;;  %v1161_v38 = vshrl.u32 %v454_v61, 16  ;;  %v6815_v11 = vadd.f32 %v16776_v21, %v6775_v37  ;;  %v1154_v18 = vrot.slane %v1152_v14, 6  ;;  %v13527_v3 = vld [vmem:[%s13833_s21 + $0x160] sm:$0xff]  }
 0x353   : > { %v17020_v63 = vadd.f32 %v12541_v30, %v12429_v52  ;;  %v12544_v47 = vadd.f32 %v12543_v22, %v12542_v60  ;;  %v17023_v45 = vpack.c.bf16 %v6845_v7, %v6844_v23  ;;  %9041 = vmatprep.mubr.bf16.mxu0 %v16993_v9  ;;  %v1157_v1 = vrot.slane %v1155_v6, 7  ;;  %v456_v30 = vld [vmem:[%s13833_s21 + $0x198] sm:$0x7] }
 0x354   : > { %9195 = vmatmul.mubr.bf16.gmra.mrb[140].mxu1 %v13526_v46  ;;  %v1164_v29 = vshll.u32 %v454_v61, 16  ;;  %v1170_v46 = vshrl.u32 %v455_v51, 16  ;;  %v1173_v23 = vshll.u32 %v455_v51, 16  ;;  %v6846_v7 = vmax.f32 %v6814_v59, 0.0 }
 0x355   : > { %18455 = vst [vmem:[#allocation51_spill] sm:$0xff] %v17020_v63  ;;  %18456 = vst [vmem:[#allocation12_spill] sm:$0xff] %v17023_v45  ;;  %v17031_v33 = vadd.f32 %v12544_v47, %v12432_v2  ;;  %9202 = vmatprep.mubr.bf16.mxu1 %v18458_v15  ;;  %v6847_v55 = vmax.f32 %v6815_v11, 0.0  ;;  %v12433_v50 = vpop.f32.mrb[36].mxu0  ;;  %v17035_v52 = vcombine.low %v7399_v57, %v7402_v62  ;;  %v7407_v21 = vrot.slane %v7405_v16, 4 }
 0x356   : > { %v7408_v37 = vrot.slane %v7173_v31, 5  ;;  %v12434_v42 = vpop.f32.mrb[37].mxu0  ;;  %v1140_v22 = vrot.slane %v1139_v32, 4  ;;  %v1150_v14 = vrot.slane %v17028_v28, 4  ;;  %v1163_v6 = vrot.slane %v1161_v38, 6 }
 0x357   : > { %18457 = vst [vmem:[#allocation42_spill] sm:$0xff] %v17031_v33  ;;  %v12545_v17 = vpop.f32.mrb[36].mxu1  ;;  %v17040_v61 = vpack.c.bf16 %v6847_v55, %v6846_v7  ;;  %v12435_v2 = vadd.f32 %v12434_v42, %v12433_v50  ;;  %v12436_v47 = vpop.f32.mrb[38].mxu0  ;;  %v1158_v11 = vor.u32 %v1157_v1, %v1154_v18  ;;  %v7175_v57 = vld [vmem:[%s13833_s21 + $0x148] sm:$0xf]  ;;  %v1166_v62 = vrot.slane %v1164_v29, 7 }
 0x358   : > { %v12546_v60 = vpop.f32.mrb[37].mxu1  ;;  %v12437_v15 = vpop.f32.mrb[39].mxu0  ;;  %v1172_v31 = vrot.slane %v1170_v46, 6  ;;  %v1175_v4 = vrot.slane %v1173_v23, 7  ;;  %v1180_v27 = vshrl.u32 %v456_v30, 16  ;;  %v1183_v33 = vshll.u32 %v456_v30, 16 }
 0x359   : > { %v12547_v59 = vadd.f32 %v12546_v60, %v12545_v17  ;;  %v12548_v51 = vpop.f32.mrb[38].mxu1  ;;  %v12438_v63 = vadd.f32 %v12437_v15, %v12436_v47  ;;  %v7406_v18 = vsel %vm14847_vm11, %v11179_v53, %v7405_v16  ;;  %v7409_v1 = vsel %vm14847_vm11, %v7407_v21, %v7408_v37  ;;  %v18459_v46 = vld [vmem:[#allocation49_spill] sm:$0xff]  ;;  %v7176_v37 = vld [vmem:[%s13833_s21 + $0x14c] sm:$0x1]  ;;  %v13533_v60 = vld [vmem:[%s13833_s21 + $0x170] sm:$0xff]  }
 0x35a   : > { %v12549_v45 = vpop.f32.mrb[39].mxu1  ;;  %9042 = vmatmul.mubr.bf16.gmra.mrb[144].mxu0 %v18444_v49  ;;  %v1159_v49 = vsel %vm13860_vm7, %v1150_v14, %v1158_v11  ;;  %v7174_v7 = vld [vmem:[%s13833_s21 + $0x144] sm:$0xe]  ;;  %v7412_v55 = vrot.slane %v7175_v57, 5  ;;  %v1167_v16 = vor.u32 %v1166_v62, %v1163_v6  ;;  %v1176_v53 = vor.u32 %v1175_v4, %v1172_v31 }
 0x35b   : > { %v17043_v32 = vadd.f32 %v12547_v59, %v12435_v2  ;;  %v12550_v38 = vadd.f32 %v12549_v45, %v12548_v51  ;;  %9049 = vmatprep.mubr.bf16.mxu0 %v17035_v52  ;;  %v1149_v45 = vsel %vm13860_vm7, %v1140_v22, %v17028_v28  ;;  %v1182_v50 = vrot.slane %v1180_v27, 6 }
 0x35c   : > { %9203 = vmatmul.mubr.bf16.gmra.mrb[144].mxu1 %v13527_v3  ;;  %v1185_v17 = vrot.slane %v1183_v33, 7  ;;  %v17062_v3 = vcombine.low %v7406_v18, %v7409_v1  ;;  %v11180_v2 = vrot.slane %v7174_v7, 9  ;;  %v10656_v14 = vcombine.low %v1149_v45, %v1159_v49 }
 0x35d   : > { %v17050_v29 = vadd.f32 %v12550_v38, %v12438_v63  ;;  %9210 = vmatprep.mubr.bf16.mxu1 %v18459_v46  ;;  %v12439_v63 = vpop.f32.mrb[40].mxu0  ;;  %v7414_v51 = vrot.slane %v7412_v55, 4  ;;  %v7415_v4 = vrot.slane %v7176_v37, 5  ;;  %v1168_v27 = vrot.slane %v1167_v16, 4 }
 0x35e   : > { %v12440_v30 = vpop.f32.mrb[41].mxu0  ;;  %v1178_v33 = vrot.slane %v1176_v53, 4  ;;  %v1186_v57 = vor.u32 %v1185_v17, %v1182_v50  ;;  %v7413_v18 = vsel %vm14847_vm11, %v11180_v2, %v7412_v55  ;;  %v13538_v50 = vld [vmem:[%s13833_s21 + $0x180] sm:$0xff]  }
 0x35f   : > { %v12551_v21 = vpop.f32.mrb[40].mxu1  ;;  %v12441_v59 = vadd.f32 %v12440_v30, %v12439_v63  ;;  %v12442_v22 = vpop.f32.mrb[42].mxu0  ;;  %v7416_v1 = vsel %vm14847_vm11, %v7414_v51, %v7415_v4  ;;  %v1177_v46 = vsel %vm13860_vm7, %v1168_v27, %v1176_v53  ;;  %v13544_v51 = vld [vmem:[%s13833_s21 + $0x190] sm:$0xff]  }
 0x360   : > { %v12552_v42 = vpop.f32.mrb[41].mxu1  ;;  %v12443_v11 = vpop.f32.mrb[43].mxu0  ;;  %v1187_v45 = vsel %vm13860_vm7, %v1178_v33, %v1186_v57  ;;  %v17079_v30 = vcombine.low %v7413_v18, %v7416_v1 }
 0x361   : > { %v12553_v28 = vadd.f32 %v12552_v42, %v12551_v21  ;;  %v12554_v47 = vpop.f32.mrb[42].mxu1  ;;  %v12444_v15 = vadd.f32 %v12443_v11, %v12442_v22  ;;  %v10657_v55 = vcombine.low %v1177_v46, %v1187_v45 }
 0x362   : > { %v12555_v6 = vpop.f32.mrb[43].mxu1  ;;  %9050 = vmatmul.mubr.bf16.gmra.mrb[148].mxu0 %v18447_v40 }
 0x363   : > { %v17064_v62 = vadd.f32 %v12553_v28, %v12441_v59  ;;  %v12556_v31 = vadd.f32 %v12555_v6, %v12554_v47  ;;  %9057 = vmatprep.mubr.bf16.mxu0 %v17062_v3 }
 0x364   : > { %9211 = vmatmul.mubr.bf16.gmra.mrb[148].mxu1 %v13533_v60 }
 0x365   : > { %v17067_v38 = vadd.f32 %v12556_v31, %v12444_v15  ;;  %9218 = vmatprep.mubr.bf16.mxu1 %v10656_v14  ;;  %v12445_v49 = vpop.f32.mrb[44].mxu0 }
 0x366   : > { %v12446_v7 = vpop.f32.mrb[45].mxu0 }
 0x367   : > { %v12557_v40 = vpop.f32.mrb[44].mxu1  ;;  %v12447_v17 = vadd.f32 %v12446_v7, %v12445_v49  ;;  %v12448_v21 = vpop.f32.mrb[46].mxu0 }
 0x368   : > { %v12558_v16 = vpop.f32.mrb[45].mxu1  ;;  %v12449_v42 = vpop.f32.mrb[47].mxu0 }
 0x369   : > { %v12559_v63 = vadd.f32 %v12558_v16, %v12557_v40  ;;  %v12560_v37 = vpop.f32.mrb[46].mxu1  ;;  %v12450_v53 = vadd.f32 %v12449_v42, %v12448_v21 }
 0x36a   : > { %v12561_v60 = vpop.f32.mrb[47].mxu1  ;;  %9058 = vmatmul.mubr.bf16.gmra.mrb[152].mxu0 %v18449_v24 }
 0x36b   : > { %v17081_v2 = vadd.f32 %v12559_v63, %v12447_v17  ;;  %v12562_v23 = vadd.f32 %v12561_v60, %v12560_v37  ;;  %9065 = vmatprep.mubr.bf16.mxu0 %v17079_v30 }
 0x36c   : > { %9219 = vmatmul.mubr.bf16.gmra.mrb[152].mxu1 %v13538_v50 }
 0x36d   : > { %v17084_v59 = vadd.f32 %v12562_v23, %v12450_v53  ;;  %9226 = vmatprep.mubr.bf16.mxu1 %v10657_v55  ;;  %v12451_v28 = vpop.f32.mrb[48].mxu0  ;;  %v18461_v55 = vld [vmem:[#allocation29_spill] sm:$0xff] }
 0x36e   : > { %v12452_v47 = vpop.f32.mrb[49].mxu0 }
 0x36f   : > { %v12563_v22 = vpop.f32.mrb[48].mxu1  ;;  %v12453_v11 = vadd.f32 %v12452_v47, %v12451_v28  ;;  %v12454_v4 = vpop.f32.mrb[50].mxu0 }
 0x370   : > { %v12564_v14 = vpop.f32.mrb[49].mxu1  ;;  %v12455_v33 = vpop.f32.mrb[51].mxu0 }
 0x371   : > { %v12565_v6 = vadd.f32 %v12564_v14, %v12563_v22  ;;  %v12566_v27 = vpop.f32.mrb[50].mxu1  ;;  %v12456_v24 = vadd.f32 %v12455_v33, %v12454_v4  ;;  %v18462_v4 = vld [vmem:[#allocation44_spill] sm:$0xff] }
 0x372   : > { %v12567_v57 = vpop.f32.mrb[51].mxu1  ;;  %9066 = vmatmul.mubr.bf16.gmra.mrb[156].mxu0 %v18451_v41 }
 0x373   : > { %v17088_v15 = vadd.f32 %v12565_v6, %v12453_v11  ;;  %v12568_v31 = vadd.f32 %v12567_v57, %v12566_v27  ;;  %13135 = vmatprep.mubr.bf16.mxu0 %v18436_v35 }
 0x374   : > { %9227 = vmatmul.mubr.bf16.gmra.mrb[156].mxu1 %v13544_v51 }
 0x375   : > { %v17091_v18 = vadd.f32 %v12568_v31, %v12456_v24  ;;  %9812 = vmatprep.mubr.bf16.mxu1 %v16835_v56  ;;  %v12457_v1 = vpop.f32.mrb[52].mxu0 }
 0x376   : > { %v12458_v45 = vpop.f32.mrb[53].mxu0 }
 0x377   : > { %v12569_v46 = vpop.f32.mrb[52].mxu1  ;;  %v12459_v40 = vadd.f32 %v12458_v45, %v12457_v1  ;;  %v12460_v16 = vpop.f32.mrb[54].mxu0 }
 0x378   : > { %v12570_v49 = vpop.f32.mrb[53].mxu1  ;;  %v12461_v17 = vpop.f32.mrb[55].mxu0 }
 0x379   : > { %v12571_v7 = vadd.f32 %v12570_v49, %v12569_v46  ;;  %v12572_v50 = vpop.f32.mrb[54].mxu1  ;;  %v12462_v41 = vadd.f32 %v12461_v17, %v12460_v16 }
 0x37a   : > { %v12573_v63 = vpop.f32.mrb[55].mxu1  ;;  %13136 = vmatmul.mubr.bf16.vlgmr.msra.gmra.mrb[160].mxu0 %v18439_v0 }
 0x37b   : > { %v17095_v21 = vadd.f32 %v12571_v7, %v12459_v40  ;;  %v12574_v37 = vadd.f32 %v12573_v63, %v12572_v50  ;;  %13139 = vmatprep.mubr.bf16.mxu0 %v18443_v12 }
 0x37c   : > { %9813 = vmatmul.mubr.bf16.vlgmr.msra.gmra.mrb[160].mxu1 %v18461_v55 }
 0x37d   : > { %v17099_v56 = vadd.f32 %v12574_v37, %v12462_v41  ;;  %9820 = vmatprep.mubr.bf16.mxu1 %v16821_v48  ;;  %v12463_v35 = vpop.f32.mrb[56].mxu0 }
 0x37e   : > { %v12464_v60 = vpop.f32.mrb[57].mxu0 }
 0x37f   : > { %v12575_v42 = vpop.f32.mrb[56].mxu1  ;;  %v12465_v23 = vadd.f32 %v12464_v60, %v12463_v35  ;;  %v12466_v22 = vpop.f32.mrb[58].mxu0 }
 0x380   : > { %v12576_v53 = vpop.f32.mrb[57].mxu1  ;;  %v12467_v14 = vpop.f32.mrb[59].mxu0 }
 0x381   : > { %v12577_v28 = vadd.f32 %v12576_v53, %v12575_v42  ;;  %v12578_v47 = vpop.f32.mrb[58].mxu1  ;;  %v12468_v0 = vadd.f32 %v12467_v14, %v12466_v22  ;;  %v7181_v53 = vld [vmem:[%s13833_s21 + $0x168] sm:$0xf]  ;;  %v7177_v22 = vld [vmem:[%s13833_s21 + $0x154] sm:$0xe] }
 0x382   : > { %v12579_v51 = vpop.f32.mrb[59].mxu1  ;;  %13140 = vmatmul.mubr.bf16.gmra.mrb[164].mxu0 %v18446_v39 }
 0x383   : > { %v17103_v11 = vadd.f32 %v12577_v28, %v12465_v23  ;;  %v12580_v6 = vadd.f32 %v12579_v51, %v12578_v47  ;;  %13143 = vmatprep.mubr.bf16.mxu0 %v16630_v19  ;;  %v18464_v28 = vld [vmem:[#allocation45_spill] sm:$0xff]  ;;  %v7179_v51 = vld [vmem:[%s13833_s21 + $0x15c] sm:$0x1] }
 0x384   : > { %9821 = vmatmul.mubr.bf16.gmra.mrb[164].mxu1 %v18462_v4  ;;  %v7182_v4 = vld [vmem:[%s13833_s21 + $0x16c] sm:$0x1] }
 0x385   : > { %v17107_v48 = vadd.f32 %v12580_v6, %v12468_v0  ;;  %9828 = vmatprep.mubr.bf16.mxu1 %v16861_v20  ;;  %v12469_v12 = vpop.f32.mrb[60].mxu0  ;;  %v18463_v20 = vld [vmem:[#allocation46_spill] sm:$0xff]  ;;  %v7180_v0 = vld [vmem:[%s13833_s21 + $0x164] sm:$0xe]  ;;  %v7426_v6 = vrot.slane %v7181_v53, 5 }
 0x386   : > { %v12470_v33 = vpop.f32.mrb[61].mxu0 }
 0x387   : > { %v12581_v27 = vpop.f32.mrb[60].mxu1  ;;  %v12471_v24 = vadd.f32 %v12470_v33, %v12469_v12  ;;  %v12472_v1 = vpop.f32.mrb[62].mxu0 }
 0x388   : > { %v12582_v57 = vpop.f32.mrb[61].mxu1  ;;  %v12473_v45 = vpop.f32.mrb[63].mxu0 }
 0x389   : > { %v12583_v31 = vadd.f32 %v12582_v57, %v12581_v27  ;;  %v12584_v46 = vpop.f32.mrb[62].mxu1  ;;  %v12474_v39 = vadd.f32 %v12473_v45, %v12472_v1  ;;  %v11181_v57 = vrot.slane %v7177_v22, 9  ;;  %v11182_v1 = vrot.slane %v7180_v0, 9  ;;  %v13549_v22 = vld [vmem:[%s18040_s5 + $0x80] sm:$0xff]  }
 0x38a   : > { %v12585_v49 = vpop.f32.mrb[63].mxu1  ;;  %13144 = vmatmul.mubr.bf16.gmra.mrb[168].mxu0 %v16655_v58  ;;  %v7178_v58 = vld [vmem:[%s13833_s21 + $0x158] sm:$0xf]  ;;  %13167 = vmatprep.subr.bf16.mxu0 %v13549_v22 }
 0x38b   : > { %v17111_v40 = vadd.f32 %v12583_v31, %v12471_v24  ;;  %v12586_v7 = vadd.f32 %v12585_v49, %v12584_v46  ;;  %13147 = vmatprep.mubr.bf16.mxu0 %v16979_v5  ;;  %v7419_v47 = vrot.slane %v7178_v58, 5  ;;  %v7422_v31 = vrot.slane %v7179_v51, 5  ;;  %v7183_v58 = vld [vmem:[%s13833_s21 + $0x174] sm:$0xe]  ;;  %13168 = vmatpush3.bf16.msra.mxu0 %v13549_v22 }
 0x38c   : > { %9829 = vmatmul.mubr.bf16.gmra.mrb[168].mxu1 %v18463_v20  ;;  %v7427_v53 = vsel %vm14847_vm11, %v11182_v1, %v7426_v6 }
 0x38d   : > { %v17115_v19 = vadd.f32 %v12586_v7, %v12474_v39  ;;  %9836 = vmatprep.mubr.bf16.mxu1 %v16850_v54  ;;  %v12475_v16 = vpop.f32.mrb[64].mxu0  ;;  %v7421_v24 = vrot.slane %v7419_v47, 4  ;;  %v7429_v39 = vrot.slane %v7182_v4, 5  ;;  %v7184_v7 = vld [vmem:[%s13833_s21 + $0x178] sm:$0xf] }
 0x38e   : > { %v12476_v17 = vpop.f32.mrb[65].mxu0 }
 0x38f   : > { %v12587_v50 = vpop.f32.mrb[64].mxu1  ;;  %v12477_v41 = vadd.f32 %v12476_v17, %v12475_v16  ;;  %v12478_v55 = vpop.f32.mrb[66].mxu0 }
 0x390   : > { %v12588_v63 = vpop.f32.mrb[65].mxu1  ;;  %v12479_v42 = vpop.f32.mrb[67].mxu0 }
 0x391   : > { %v12589_v37 = vadd.f32 %v12588_v63, %v12587_v50  ;;  %v12590_v35 = vpop.f32.mrb[66].mxu1  ;;  %v12480_v54 = vadd.f32 %v12479_v42, %v12478_v55  ;;  %v7187_v50 = vld [vmem:[%s13833_s21 + $0x188] sm:$0xf]  ;;  %v7420_v55 = vsel %vm14847_vm11, %v11181_v57, %v7419_v47  ;;  %v7433_v42 = vrot.slane %v7184_v7, 5  ;;  %v7188_v47 = vld [vmem:[%s13833_s21 + $0x18c] sm:$0x1] }
 0x392   : > { %v12591_v60 = vpop.f32.mrb[67].mxu1  ;;  %13148 = vmatmul.mubr.bf16.gmra.mrb[172].mxu0 %v16993_v9 }
 0x393   : > { %v17121_v23 = vadd.f32 %v12589_v37, %v12477_v41  ;;  %v12592_v5 = vadd.f32 %v12591_v60, %v12590_v35  ;;  %13151 = vmatprep.mubr.bf16.mxu0 %v17035_v52  ;;  %v7428_v52 = vrot.slane %v7426_v6, 4  ;;  %v18465_v37 = vld [vmem:[#allocation27_spill] sm:$0xff]  ;;  %v7423_v35 = vsel %vm14847_vm11, %v7421_v24, %v7422_v31 }
 0x394   : > { %9837 = vmatmul.mubr.bf16.gmra.mrb[172].mxu1 %v18464_v28  ;;  %v7440_v28 = vrot.slane %v7187_v50, 5  ;;  %v11207_v4 = vcombine.low %v7420_v55, %v7423_v35  ;;  %v7189_v35 = vld [vmem:[%s13833_s21 + $0x194] sm:$0xe] }
 0x395   : > { %v17126_v14 = vadd.f32 %v12592_v5, %v12480_v54  ;;  %9844 = vmatprep.mubr.bf16.mxu1 %v16885_v26  ;;  %v12481_v12 = vpop.f32.mrb[68].mxu0  ;;  %v7185_v54 = vld [vmem:[%s13833_s21 + $0x17c] sm:$0x1]  ;;  %v7186_v5 = vld [vmem:[%s13833_s21 + $0x184] sm:$0xe] }
 0x396   : > { %v12482_v33 = vpop.f32.mrb[69].mxu0 }
 0x397   : > { %v12593_v27 = vpop.f32.mrb[68].mxu1  ;;  %v12483_v46 = vadd.f32 %v12482_v33, %v12481_v12  ;;  %v12484_v26 = vpop.f32.mrb[70].mxu0  ;;  %v7436_v33 = vrot.slane %v7185_v54, 5 }
 0x398   : > { %v12594_v9 = vpop.f32.mrb[69].mxu1  ;;  %v12485_v20 = vpop.f32.mrb[71].mxu0 }
 0x399   : > { %v12595_v45 = vadd.f32 %v12594_v9, %v12593_v27  ;;  %v12596_v49 = vpop.f32.mrb[70].mxu1  ;;  %v12486_v63 = vadd.f32 %v12485_v20, %v12484_v26  ;;  %v7435_v27 = vrot.slane %v7433_v42, 4  ;;  %v11184_v9 = vrot.slane %v7186_v5, 9 }
 0x39a   : > { %v12597_v16 = vpop.f32.mrb[71].mxu1  ;;  %13152 = vmatmul.mubr.bf16.gmra.mrb[176].mxu0 %v17062_v3  ;;  %v7430_v3 = vsel %vm14847_vm11, %v7428_v52, %v7429_v39  ;;  %v7190_v52 = vld [vmem:[%s13833_s21 + $0x198] sm:$0xf] }
 0x39b   : > { %v17135_v17 = vadd.f32 %v12595_v45, %v12483_v46  ;;  %v12598_v41 = vadd.f32 %v12597_v16, %v12596_v49  ;;  %13155 = vmatprep.mubr.bf16.mxu0 %v17079_v30  ;;  %v11208_v6 = vcombine.low %v7427_v53, %v7430_v3  ;;  %v7442_v46 = vrot.slane %v7440_v28, 4  ;;  %v18466_v16 = vld [vmem:[#allocation47_spill] sm:$0xff]  ;;  %v7191_v53 = vld [vmem:[%s13833_s21 + $0x19c] sm:$0x1] }
 0x39c   : > { %9845 = vmatmul.mubr.bf16.gmra.mrb[176].mxu1 %v18465_v37  ;;  %v7443_v45 = vrot.slane %v7188_v47, 5  ;;  %v7441_v37 = vsel %vm14847_vm11, %v11184_v9, %v7440_v28 }
 0x39d   : > { %v17144_v60 = vadd.f32 %v12598_v41, %v12486_v63  ;;  %9852 = vmatprep.mubr.bf16.mxu1 %v16876_v36  ;;  %v12487_v51 = vpop.f32.mrb[72].mxu0  ;;  %v11183_v36 = vrot.slane %v7183_v58, 9  ;;  %v7437_v63 = vsel %vm14847_vm11, %v7435_v27, %v7436_v33  ;;  %v7447_v58 = vrot.slane %v7190_v52, 5 }
 0x39e   : > { %v12488_v30 = vpop.f32.mrb[73].mxu0  ;;  %v7444_v55 = vsel %vm14847_vm11, %v7442_v46, %v7443_v45  ;;  %v13551_v45 = vld [vmem:[%s18040_s5 + $0x90] sm:$0xff]  }
 0x39f   : > { %v12599_v0 = vpop.f32.mrb[72].mxu1  ;;  %v12489_v57 = vadd.f32 %v12488_v30, %v12487_v51  ;;  %v12490_v31 = vpop.f32.mrb[74].mxu0  ;;  %v7434_v50 = vsel %vm14847_vm11, %v11183_v36, %v7433_v42  ;;  %v13550_v42 = vld [vmem:[%s18040_s5 + $0x88] sm:$0xff]   ;;  %v11210_v47 = vcombine.low %v7441_v37, %v7444_v55  ;;  %v11185_v51 = vrot.slane %v7189_v35, 9 }
 0x3a0   : > { %v12600_v12 = vpop.f32.mrb[73].mxu1  ;;  %v12491_v26 = vpop.f32.mrb[75].mxu0  ;;  %13169 = vmatprep.subr.bf16.mxu0 %v13550_v42  ;;  %v7449_v30 = vrot.slane %v7447_v58, 4 }
 0x3a1   : > { %v12601_v24 = vadd.f32 %v12600_v12, %v12599_v0  ;;  %v12602_v1 = vpop.f32.mrb[74].mxu1  ;;  %v12492_v7 = vadd.f32 %v12491_v26, %v12490_v31  ;;  %13170 = vmatpush3.bf16.msra.mxu0 %v13550_v42  ;;  %v7450_v12 = vrot.slane %v7191_v53, 5  ;;  %v18468_v42 = vld [vmem:[#allocation34_spill] sm:$0xff] }
 0x3a2   : > { %v12603_v49 = vpop.f32.mrb[75].mxu1  ;;  %13156 = vmatmul.mubr.bf16.gmra.mrb[180].mxu0 %v11207_v4  ;;  %13171 = vmatprep.subr.bf16.mxu0 %v13551_v45 }
 0x3a3   : > { %v17159_v39 = vadd.f32 %v12601_v24, %v12489_v57  ;;  %v12604_v20 = vadd.f32 %v12603_v49, %v12602_v1  ;;  %13159 = vmatprep.mubr.bf16.mxu0 %v11208_v6  ;;  %v18467_v24 = vld [vmem:[#allocation35_spill] sm:$0xff]  ;;  %v7448_v1 = vsel %vm14847_vm11, %v11185_v51, %v7447_v58  ;;  %v7451_v46 = vsel %vm14847_vm11, %v7449_v30, %v7450_v12 }
 0x3a4   : > { %9853 = vmatmul.mubr.bf16.gmra.mrb[180].mxu1 %v18466_v16 }
 0x3a5   : > { %v17166_v41 = vadd.f32 %v12604_v20, %v12492_v7  ;;  %9860 = vmatprep.mubr.bf16.mxu1 %v16912_v34  ;;  %v12493_v3 = vpop.f32.mrb[76].mxu0  ;;  %v11209_v34 = vcombine.low %v7434_v50, %v7437_v63  ;;  %v11211_v20 = vcombine.low %v7448_v1, %v7451_v46  ;;  %13172 = vmatpush3.bf16.msra.mxu0 %v13551_v45 }
 0x3a6   : > { %v12494_v5 = vpop.f32.mrb[77].mxu0 }
 0x3a7   : > { %v12605_v54 = vpop.f32.mrb[76].mxu1  ;;  %v12495_v28 = vadd.f32 %v12494_v5, %v12493_v3  ;;  %v12496_v4 = vpop.f32.mrb[78].mxu0  ;;  %v13552_v3 = vld [vmem:[%s18040_s5 + $0x98] sm:$0xff]  }
 0x3a8   : > { %v12606_v22 = vpop.f32.mrb[77].mxu1  ;;  %v12497_v6 = vpop.f32.mrb[79].mxu0  ;;  %13173 = vmatprep.subr.bf16.mxu0 %v13552_v3 }
 0x3a9   : > { %v12607_v0 = vadd.f32 %v12606_v22, %v12605_v54  ;;  %v12608_v36 = vpop.f32.mrb[78].mxu1  ;;  %v12498_v9 = vadd.f32 %v12497_v6, %v12496_v4  ;;  %13174 = vmatpush3.bf16.msra.mxu0 %v13552_v3  ;;  %v18469_v6 = vld [vmem:[#allocation43_spill] sm:$0xff] }
 0x3aa   : > { %v12609_v27 = vpop.f32.mrb[79].mxu1  ;;  %13160 = vmatmul.mubr.bf16.gmra.mrb[184].mxu0 %v11209_v34 }
 0x3ab   : > { %v17178_v33 = vadd.f32 %v12607_v0, %v12495_v28  ;;  %v12610_v57 = vadd.f32 %v12609_v27, %v12608_v36  ;;  %13163 = vmatprep.mubr.bf16.mxu0 %v11210_v47 }
 0x3ac   : > { %9861 = vmatmul.mubr.bf16.gmra.mrb[184].mxu1 %v18467_v24 }
 0x3ad   : > { %v17181_v31 = vadd.f32 %v12610_v57, %v12498_v9  ;;  %9868 = vmatprep.mubr.bf16.mxu1 %v16901_v44  ;;  %v12499_v26 = vpop.f32.mrb[80].mxu0  ;;  %v13553_v9 = vld [vmem:[%s18040_s5 + $0xa0] sm:$0xff]  }
 0x3ae   : > { %v12500_v52 = vpop.f32.mrb[81].mxu0  ;;  %13175 = vmatprep.subr.bf16.mxu0 %v13553_v9 }
 0x3af   : > { %v12611_v49 = vpop.f32.mrb[80].mxu1  ;;  %v12501_v16 = vadd.f32 %v12500_v52, %v12499_v26  ;;  %v12502_v50 = vpop.f32.mrb[82].mxu0  ;;  %13176 = vmatpush3.bf16.msra.mxu0 %v13553_v9 }
 0x3b0   : > { %v12612_v7 = vpop.f32.mrb[81].mxu1  ;;  %v12503_v37 = vpop.f32.mrb[83].mxu0 }
 0x3b1   : > { %v12613_v44 = vadd.f32 %v12612_v7, %v12611_v49  ;;  %v12614_v63 = vpop.f32.mrb[82].mxu1  ;;  %v12504_v8 = vadd.f32 %v12503_v37, %v12502_v50  ;;  %v18470_v50 = vld [vmem:[#allocation24_spill] sm:$0xff]  ;;  %v13554_v37 = vld [vmem:[%s18040_s5 + $0xa8] sm:$0xff]  }
 0x3b2   : > { %v12615_v55 = vpop.f32.mrb[83].mxu1  ;;  %13164 = vmatmul.mubr.bf16.gmra.mrb[188].mxu0 %v11211_v20  ;;  %13177 = vmatprep.subr.bf16.mxu0 %v13554_v37 }
 0x3b3   : > { %v17191_v35 = vadd.f32 %v12613_v44, %v12501_v16  ;;  %v12616_v58 = vadd.f32 %v12615_v55, %v12614_v63  ;;  %13178 = vmatpush3.bf16.msra.mxu0 %v13554_v37 }
 0x3b4   : > { %9869 = vmatmul.mubr.bf16.gmra.mrb[188].mxu1 %v18468_v42 }
 0x3b5   : > { %v17194_v53 = vadd.f32 %v12616_v58, %v12504_v8  ;;  %9876 = vmatprep.mubr.bf16.mxu1 %v16949_v10  ;;  %v12505_v54 = vpop.f32.mrb[84].mxu0 }
 0x3b6   : > { %v12506_v22 = vpop.f32.mrb[85].mxu0 }
 0x3b7   : > { %v12617_v5 = vpop.f32.mrb[84].mxu1  ;;  %v12507_v47 = vadd.f32 %v12506_v22, %v12505_v54  ;;  %v12508_v28 = vpop.f32.mrb[86].mxu0 }
 0x3b8   : > { %v12618_v34 = vpop.f32.mrb[85].mxu1  ;;  %v12509_v4 = vpop.f32.mrb[87].mxu0 }
 0x3b9   : > { %v12619_v51 = vadd.f32 %v12618_v34, %v12617_v5  ;;  %v12620_v0 = vpop.f32.mrb[86].mxu1  ;;  %v12510_v12 = vadd.f32 %v12509_v4, %v12508_v28 }
 0x3ba   : > { %v12621_v36 = vpop.f32.mrb[87].mxu1 }
 0x3bb   : > { %v17200_v30 = vadd.f32 %v12619_v51, %v12507_v47  ;;  %v12622_v10 = vadd.f32 %v12621_v36, %v12620_v0  ;;  %v18471_v0 = vld [vmem:[#allocation54_spill] sm:$0xff]  ;;  %v13555_v36 = vld [vmem:[%s18040_s5 + $0xb0] sm:$0xff]  }
 0x3bc   : > { %9877 = vmatmul.mubr.bf16.gmra.mrb[192].mxu1 %v18469_v6  ;;  %13179 = vmatprep.subr.bf16.mxu0 %v13555_v36 }
 0x3bd   : > { %v17203_v27 = vadd.f32 %v12622_v10, %v12510_v12  ;;  %9884 = vmatprep.mubr.bf16.mxu1 %v16931_v25  ;;  %v12511_v57 = vpop.f32.mrb[88].mxu0  ;;  %13180 = vmatpush3.bf16.msra.mxu0 %v13555_v36 }
 0x3be   : > { %v12512_v1 = vpop.f32.mrb[89].mxu0 }
 0x3bf   : > { %v12623_v24 = vpop.f32.mrb[88].mxu1  ;;  %v12513_v45 = vadd.f32 %v12512_v1, %v12511_v57  ;;  %v12514_v49 = vpop.f32.mrb[90].mxu0 }
 0x3c0   : > { %v12624_v46 = vpop.f32.mrb[89].mxu1  ;;  %v12515_v7 = vpop.f32.mrb[91].mxu0 }
 0x3c1   : > { %v12625_v26 = vadd.f32 %v12624_v46, %v12623_v24  ;;  %v12626_v52 = vpop.f32.mrb[90].mxu1  ;;  %v12516_v44 = vadd.f32 %v12515_v7, %v12514_v49  ;;  %v18472_v49 = vld [vmem:[#allocation51_spill] sm:$0xff] }
 0x3c2   : > { %v12627_v20 = vpop.f32.mrb[91].mxu1 }
 0x3c3   : > { %v17209_v16 = vadd.f32 %v12625_v26, %v12513_v45  ;;  %v12628_v25 = vadd.f32 %v12627_v20, %v12626_v52  ;;  %v18473_v20 = vld [vmem:[#allocation53_spill] sm:$0xff] }
 0x3c4   : > { %9885 = vmatmul.mubr.bf16.gmra.mrb[196].mxu1 %v18470_v50  ;;  %v18475_v50 = vld [vmem:[#allocation25_spill] sm:$0xff] }
 0x3c5   : > { %v17212_v63 = vadd.f32 %v12628_v25, %v12516_v44  ;;  %9892 = vmatprep.mubr.bf16.mxu1 %v16967_v43  ;;  %v12517_v55 = vpop.f32.mrb[92].mxu0  ;;  %v18474_v44 = vld [vmem:[#allocation42_spill] sm:$0xff] }
 0x3c6   : > { %v12518_v58 = vpop.f32.mrb[93].mxu0 }
 0x3c7   : > { %v12629_v8 = vpop.f32.mrb[92].mxu1  ;;  %v12519_v3 = vadd.f32 %v12518_v58, %v12517_v55  ;;  %v12520_v5 = vpop.f32.mrb[94].mxu0 }
 0x3c8   : > { %v12630_v42 = vpop.f32.mrb[93].mxu1  ;;  %v12521_v34 = vpop.f32.mrb[95].mxu0 }
 0x3c9   : > { %v12631_v54 = vadd.f32 %v12630_v42, %v12629_v8  ;;  %v12632_v22 = vpop.f32.mrb[94].mxu1  ;;  %v12522_v28 = vadd.f32 %v12521_v34, %v12520_v5 }
 0x3ca   : > { %v12633_v47 = vpop.f32.mrb[95].mxu1 }
 0x3cb   : > { %v17218_v51 = vadd.f32 %v12631_v54, %v12519_v3  ;;  %v12634_v43 = vadd.f32 %v12633_v47, %v12632_v22 }
 0x3cc   : > { %9893 = vmatmul.mubr.bf16.gmra.mrb[200].mxu1 %v18471_v0 }
 0x3cd   : > { %v17221_v4 = vadd.f32 %v12634_v43, %v12522_v28  ;;  %9900 = vmatprep.mubr.bf16.mxu1 %v16958_v13  ;;  %v12651_v12 = vpop.f32.mrb[96].mxu0  ;;  %v13556_v43 = vld [vmem:[%s18040_s5 + $0xb8] sm:$0xff]  }
 0x3ce   : > { %v12652_v6 = vpop.f32.mrb[97].mxu0  ;;  %13181 = vmatprep.subr.bf16.mxu0 %v13556_v43 }
 0x3cf   : > { %v12763_v10 = vpop.f32.mrb[96].mxu1  ;;  %v12653_v57 = vadd.f32 %v12652_v6, %v12651_v12  ;;  %v12654_v24 = vpop.f32.mrb[98].mxu0  ;;  %13182 = vmatpush3.bf16.msra.mxu0 %v13556_v43 }
 0x3d0   : > { %v12764_v9 = vpop.f32.mrb[97].mxu1  ;;  %v12655_v45 = vpop.f32.mrb[99].mxu0 }
 0x3d1   : > { %v12765_v1 = vadd.f32 %v12764_v9, %v12763_v10  ;;  %v12766_v46 = vpop.f32.mrb[98].mxu1  ;;  %v8948_v52 = vadd.f32 %v12653_v57, %v18472_v49  ;;  %v12656_v7 = vadd.f32 %v12655_v45, %v12654_v24  ;;  %v18476_v10 = vld [vmem:[#allocation31_spill] sm:$0xff]  ;;  %v18477_v9 = vld [vmem:[#allocation22_spill] sm:$0xff] }
 0x3d2   : > { %v12767_v26 = vpop.f32.mrb[99].mxu1 }
 0x3d3   : > { %v12768_v13 = vadd.f32 %v12767_v26, %v12766_v46  ;;  %v8951_v25 = vadd.f32 %v12656_v7, %v18474_v44  ;;  %v17231_v37 = vadd.f32 %v12765_v1, %v8948_v52 }
 0x3d4   : > { %9901 = vmatmul.mubr.bf16.gmra.mrb[204].mxu1 %v18473_v20 }
 0x3d5   : > { %9908 = vmatprep.mubr.bf16.mxu1 %v18475_v50  ;;  %v12657_v55 = vpop.f32.mrb[100].mxu0  ;;  %v17233_v58 = vadd.f32 %v12768_v13, %v8951_v25  ;;  %v18478_v50 = vld [vmem:[#allocation55_spill] sm:$0xff] }
 0x3d6   : > { %v12658_v42 = vpop.f32.mrb[101].mxu0 }
 0x3d7   : > { %v12769_v8 = vpop.f32.mrb[100].mxu1  ;;  %v12659_v54 = vadd.f32 %v12658_v42, %v12657_v55  ;;  %v12660_v5 = vpop.f32.mrb[102].mxu0 }
 0x3d8   : > { %v12770_v3 = vpop.f32.mrb[101].mxu1  ;;  %v12661_v47 = vpop.f32.mrb[103].mxu0 }
 0x3d9   : > { %v12771_v22 = vadd.f32 %v12770_v3, %v12769_v8  ;;  %v12772_v34 = vpop.f32.mrb[102].mxu1  ;;  %v8956_v0 = vadd.f32 %v12659_v54, %v17043_v32  ;;  %v12662_v36 = vadd.f32 %v12661_v47, %v12660_v5  ;;  %v18479_v8 = vld [vmem:[#allocation12_spill] sm:$0xff] }
 0x3da   : > { %v12773_v28 = vpop.f32.mrb[103].mxu1 }
 0x3db   : > { %v12774_v12 = vadd.f32 %v12773_v28, %v12772_v34  ;;  %v8959_v6 = vadd.f32 %v12662_v36, %v17050_v29  ;;  %v17242_v57 = vadd.f32 %v12771_v22, %v8956_v0 }
 0x3dc   : > { %9909 = vmatmul.mubr.bf16.gmra.mrb[208].mxu1 %v18476_v10 }
 0x3dd   : > { %9916 = vmatprep.mubr.bf16.mxu1 %v18477_v9  ;;  %v12663_v24 = vpop.f32.mrb[104].mxu0  ;;  %v17244_v46 = vadd.f32 %v12774_v12, %v8959_v6  ;;  %v18480_v6 = vld [vmem:[#allocation50_spill] sm:$0xff] }
 0x3de   : > { %v12664_v45 = vpop.f32.mrb[105].mxu0 }
 0x3df   : > { %v12775_v1 = vpop.f32.mrb[104].mxu1  ;;  %v12665_v49 = vadd.f32 %v12664_v45, %v12663_v24  ;;  %v12666_v32 = vpop.f32.mrb[106].mxu0 }
 0x3e0   : > { %v12776_v26 = vpop.f32.mrb[105].mxu1  ;;  %v12667_v13 = vpop.f32.mrb[107].mxu0 }
 0x3e1   : > { %v12777_v52 = vadd.f32 %v12776_v26, %v12775_v1  ;;  %v12778_v7 = vpop.f32.mrb[106].mxu1  ;;  %v8964_v44 = vadd.f32 %v12665_v49, %v17064_v62  ;;  %v12668_v29 = vadd.f32 %v12667_v13, %v12666_v32 }
 0x3e2   : > { %v12779_v20 = vpop.f32.mrb[107].mxu1 }
 0x3e3   : > { %v12780_v25 = vadd.f32 %v12779_v20, %v12778_v7  ;;  %v8967_v55 = vadd.f32 %v12668_v29, %v17067_v38  ;;  %v17250_v42 = vadd.f32 %v12777_v52, %v8964_v44 }
 0x3e4   : > { %9917 = vmatmul.mubr.bf16.gmra.mrb[212].mxu1 %v18478_v50  ;;  %v18481_v50 = vld [vmem:[#allocation26_spill] sm:$0xff] }
 0x3e5   : > { %9924 = vmatprep.mubr.bf16.mxu1 %v18479_v8  ;;  %v12669_v3 = vpop.f32.mrb[108].mxu0  ;;  %v17252_v5 = vadd.f32 %v12780_v25, %v8967_v55 }
 0x3e6   : > { %v12670_v22 = vpop.f32.mrb[109].mxu0 }
 0x3e7   : > { %v12781_v54 = vpop.f32.mrb[108].mxu1  ;;  %v12671_v47 = vadd.f32 %v12670_v22, %v12669_v3  ;;  %v12672_v28 = vpop.f32.mrb[110].mxu0 }
 0x3e8   : > { %v12782_v34 = vpop.f32.mrb[109].mxu1  ;;  %v12673_v0 = vpop.f32.mrb[111].mxu0 }
 0x3e9   : > { %v12783_v43 = vadd.f32 %v12782_v34, %v12781_v54  ;;  %v12784_v62 = vpop.f32.mrb[110].mxu1  ;;  %v8972_v12 = vadd.f32 %v12671_v47, %v17081_v2  ;;  %v12674_v10 = vadd.f32 %v12673_v0, %v12672_v28 }
 0x3ea   : > { %v12785_v36 = vpop.f32.mrb[111].mxu1 }
 0x3eb   : > { %v12786_v38 = vadd.f32 %v12785_v36, %v12784_v62  ;;  %v8975_v9 = vadd.f32 %v12674_v10, %v17084_v59  ;;  %v17258_v24 = vadd.f32 %v12783_v43, %v8972_v12 }
 0x3ec   : > { %9925 = vmatmul.mubr.bf16.gmra.mrb[216].mxu1 %v18480_v6 }
 0x3ed   : > { %9932 = vmatprep.mubr.bf16.mxu1 %v17040_v61  ;;  %v12675_v1 = vpop.f32.mrb[112].mxu0  ;;  %v17260_v26 = vadd.f32 %v12786_v38, %v8975_v9 }
 0x3ee   : > { %v12676_v49 = vpop.f32.mrb[113].mxu0 }
 0x3ef   : > { %v12787_v45 = vpop.f32.mrb[112].mxu1  ;;  %v12677_v52 = vadd.f32 %v12676_v49, %v12675_v1  ;;  %v12678_v7 = vpop.f32.mrb[114].mxu0 }
 0x3f0   : > { %v12788_v32 = vpop.f32.mrb[113].mxu1  ;;  %v12679_v20 = vpop.f32.mrb[115].mxu0 }
 0x3f1   : > { %v12789_v13 = vadd.f32 %v12788_v32, %v12787_v45  ;;  %v12790_v2 = vpop.f32.mrb[114].mxu1  ;;  %v8980_v29 = vadd.f32 %v12677_v52, %v17088_v15  ;;  %v12680_v25 = vadd.f32 %v12679_v20, %v12678_v7 }
 0x3f2   : > { %v12791_v44 = vpop.f32.mrb[115].mxu1 }
 0x3f3   : > { %v12792_v59 = vadd.f32 %v12791_v44, %v12790_v2  ;;  %v8983_v61 = vadd.f32 %v12680_v25, %v17091_v18  ;;  %v17265_v55 = vadd.f32 %v12789_v13, %v8980_v29 }
 0x3f4   : > { %9933 = vmatmul.mubr.bf16.gmra.mrb[220].mxu1 %v18481_v50 }
 0x3f5   : > { %v12681_v8 = vpop.f32.mrb[116].mxu0  ;;  %v17267_v54 = vadd.f32 %v12792_v59, %v8983_v61 }
 0x3f6   : > { %v12682_v22 = vpop.f32.mrb[117].mxu0 }
 0x3f7   : > { %v12793_v3 = vpop.f32.mrb[116].mxu1  ;;  %v12683_v47 = vadd.f32 %v12682_v22, %v12681_v8  ;;  %v12684_v28 = vpop.f32.mrb[118].mxu0 }
 0x3f8   : > { %v12794_v34 = vpop.f32.mrb[117].mxu1  ;;  %v12685_v0 = vpop.f32.mrb[119].mxu0 }
 0x3f9   : > { %v12795_v43 = vadd.f32 %v12794_v34, %v12793_v3  ;;  %v12796_v62 = vpop.f32.mrb[118].mxu1  ;;  %v8988_v36 = vadd.f32 %v12683_v47, %v17095_v21  ;;  %v12686_v12 = vadd.f32 %v12685_v0, %v12684_v28 }
 0x3fa   : > { %v12797_v15 = vpop.f32.mrb[119].mxu1 }
 0x3fb   : > { %v12798_v10 = vadd.f32 %v12797_v15, %v12796_v62  ;;  %v8991_v18 = vadd.f32 %v12686_v12, %v17099_v56  ;;  %v17271_v38 = vadd.f32 %v12795_v43, %v8988_v36 }
 0x3fd   : > { %v12687_v6 = vpop.f32.mrb[120].mxu0  ;;  %v17273_v1 = vadd.f32 %v12798_v10, %v8991_v18 }
 0x3fe   : > { %v12688_v45 = vpop.f32.mrb[121].mxu0 }
 0x3ff   : > { %v12799_v9 = vpop.f32.mrb[120].mxu1  ;;  %v12689_v32 = vadd.f32 %v12688_v45, %v12687_v6  ;;  %v12690_v52 = vpop.f32.mrb[122].mxu0 }
 0x400   : > { %v12800_v49 = vpop.f32.mrb[121].mxu1  ;;  %v12691_v2 = vpop.f32.mrb[123].mxu0 }
 0x401   : > { %v12801_v7 = vadd.f32 %v12800_v49, %v12799_v9  ;;  %v12802_v13 = vpop.f32.mrb[122].mxu1  ;;  %v8996_v21 = vadd.f32 %v12689_v32, %v17103_v11  ;;  %v12692_v44 = vadd.f32 %v12691_v2, %v12690_v52 }
 0x402   : > { %v12803_v20 = vpop.f32.mrb[123].mxu1 }
 0x403   : > { %v12804_v29 = vadd.f32 %v12803_v20, %v12802_v13  ;;  %v8999_v56 = vadd.f32 %v12692_v44, %v17107_v48  ;;  %v17277_v25 = vadd.f32 %v12801_v7, %v8996_v21 }
 0x405   : > { %v12693_v59 = vpop.f32.mrb[124].mxu0  ;;  %v17279_v61 = vadd.f32 %v12804_v29, %v8999_v56 }
 0x406   : > { %v12694_v8 = vpop.f32.mrb[125].mxu0 }
 0x407   : > { %v12805_v50 = vpop.f32.mrb[124].mxu1  ;;  %v12695_v22 = vadd.f32 %v12694_v8, %v12693_v59  ;;  %v12696_v34 = vpop.f32.mrb[126].mxu0 }
 0x408   : > { %v12806_v3 = vpop.f32.mrb[125].mxu1  ;;  %v12697_v43 = vpop.f32.mrb[127].mxu0 }
 0x409   : > { %v12807_v47 = vadd.f32 %v12806_v3, %v12805_v50  ;;  %v12808_v28 = vpop.f32.mrb[126].mxu1  ;;  %v9004_v11 = vadd.f32 %v12695_v22, %v17111_v40  ;;  %v12698_v0 = vadd.f32 %v12697_v43, %v12696_v34 }
 0x40a   : > { %v12809_v62 = vpop.f32.mrb[127].mxu1 }
 0x40b   : > { %v12810_v15 = vadd.f32 %v12809_v62, %v12808_v28  ;;  %v9007_v48 = vadd.f32 %v12698_v0, %v17115_v19  ;;  %v17283_v36 = vadd.f32 %v12807_v47, %v9004_v11 }
 0x40d   : > { %v12699_v12 = vpop.f32.mrb[128].mxu0  ;;  %v17285_v18 = vadd.f32 %v12810_v15, %v9007_v48 }
 0x40e   : > { %v12700_v6 = vpop.f32.mrb[129].mxu0 }
 0x40f   : > { %v12811_v10 = vpop.f32.mrb[128].mxu1  ;;  %v12701_v45 = vadd.f32 %v12700_v6, %v12699_v12  ;;  %v12702_v49 = vpop.f32.mrb[130].mxu0 }
 0x410   : > { %v12812_v9 = vpop.f32.mrb[129].mxu1  ;;  %v12703_v7 = vpop.f32.mrb[131].mxu0 }
 0x411   : > { %v12813_v32 = vadd.f32 %v12812_v9, %v12811_v10  ;;  %v12814_v52 = vpop.f32.mrb[130].mxu1  ;;  %v9012_v40 = vadd.f32 %v12701_v45, %v17121_v23  ;;  %v12704_v2 = vadd.f32 %v12703_v7, %v12702_v49 }
 0x412   : > { %v12815_v13 = vpop.f32.mrb[131].mxu1 }
 0x413   : > { %v12816_v20 = vadd.f32 %v12815_v13, %v12814_v52  ;;  %v9015_v19 = vadd.f32 %v12704_v2, %v17126_v14  ;;  %v17289_v21 = vadd.f32 %v12813_v32, %v9012_v40 }
 0x415   : > { %v12705_v44 = vpop.f32.mrb[132].mxu0  ;;  %v17291_v56 = vadd.f32 %v12816_v20, %v9015_v19 }
 0x416   : > { %v12706_v59 = vpop.f32.mrb[133].mxu0 }
 0x417   : > { %v12817_v29 = vpop.f32.mrb[132].mxu1  ;;  %v12707_v8 = vadd.f32 %v12706_v59, %v12705_v44  ;;  %v12708_v3 = vpop.f32.mrb[134].mxu0 }
 0x418   : > { %v12818_v50 = vpop.f32.mrb[133].mxu1  ;;  %v12709_v47 = vpop.f32.mrb[135].mxu0 }
 0x419   : > { %v12819_v22 = vadd.f32 %v12818_v50, %v12817_v29  ;;  %v12820_v34 = vpop.f32.mrb[134].mxu1  ;;  %v9020_v23 = vadd.f32 %v12707_v8, %v17135_v17  ;;  %v12710_v43 = vadd.f32 %v12709_v47, %v12708_v3 }
 0x41a   : > { %v12821_v28 = vpop.f32.mrb[135].mxu1 }
 0x41b   : > { %v12822_v62 = vadd.f32 %v12821_v28, %v12820_v34  ;;  %v9023_v14 = vadd.f32 %v12710_v43, %v17144_v60  ;;  %v17295_v11 = vadd.f32 %v12819_v22, %v9020_v23 }
 0x41d   : > { %v12711_v0 = vpop.f32.mrb[136].mxu0  ;;  %v17297_v48 = vadd.f32 %v12822_v62, %v9023_v14 }
 0x41e   : > { %v12712_v12 = vpop.f32.mrb[137].mxu0 }
 0x41f   : > { %v12823_v15 = vpop.f32.mrb[136].mxu1  ;;  %v12713_v6 = vadd.f32 %v12712_v12, %v12711_v0  ;;  %v12714_v9 = vpop.f32.mrb[138].mxu0 }
 0x420   : > { %v12824_v10 = vpop.f32.mrb[137].mxu1  ;;  %v12715_v32 = vpop.f32.mrb[139].mxu0 }
 0x421   : > { %v12825_v45 = vadd.f32 %v12824_v10, %v12823_v15  ;;  %v12826_v49 = vpop.f32.mrb[138].mxu1  ;;  %v9028_v17 = vadd.f32 %v12713_v6, %v17159_v39  ;;  %v12716_v7 = vadd.f32 %v12715_v32, %v12714_v9 }
 0x422   : > { %v12827_v52 = vpop.f32.mrb[139].mxu1 }
 0x423   : > { %v12828_v13 = vadd.f32 %v12827_v52, %v12826_v49  ;;  %v9031_v60 = vadd.f32 %v12716_v7, %v17166_v41  ;;  %v17301_v40 = vadd.f32 %v12825_v45, %v9028_v17 }
 0x425   : > { %v12717_v2 = vpop.f32.mrb[140].mxu0  ;;  %v17303_v19 = vadd.f32 %v12828_v13, %v9031_v60 }
 0x426   : > { %v12718_v44 = vpop.f32.mrb[141].mxu0 }
 0x427   : > { %v12829_v20 = vpop.f32.mrb[140].mxu1  ;;  %v12719_v59 = vadd.f32 %v12718_v44, %v12717_v2  ;;  %v12720_v50 = vpop.f32.mrb[142].mxu0 }
 0x428   : > { %v12830_v29 = vpop.f32.mrb[141].mxu1  ;;  %v12721_v22 = vpop.f32.mrb[143].mxu0 }
 0x429   : > { %v12831_v8 = vadd.f32 %v12830_v29, %v12829_v20  ;;  %v12832_v3 = vpop.f32.mrb[142].mxu1  ;;  %v9036_v39 = vadd.f32 %v12719_v59, %v17178_v33  ;;  %v12722_v47 = vadd.f32 %v12721_v22, %v12720_v50 }
 0x42a   : > { %v12833_v34 = vpop.f32.mrb[143].mxu1 }
 0x42b   : > { %v12834_v28 = vadd.f32 %v12833_v34, %v12832_v3  ;;  %v9039_v41 = vadd.f32 %v12722_v47, %v17181_v31  ;;  %v17307_v23 = vadd.f32 %v12831_v8, %v9036_v39 }
 0x42d   : > { %v12723_v43 = vpop.f32.mrb[144].mxu0  ;;  %v17309_v14 = vadd.f32 %v12834_v28, %v9039_v41 }
 0x42e   : > { %v12724_v0 = vpop.f32.mrb[145].mxu0 }
 0x42f   : > { %v12835_v62 = vpop.f32.mrb[144].mxu1  ;;  %v12725_v12 = vadd.f32 %v12724_v0, %v12723_v43  ;;  %v12726_v10 = vpop.f32.mrb[146].mxu0 }
 0x430   : > { %v12836_v15 = vpop.f32.mrb[145].mxu1  ;;  %v12727_v45 = vpop.f32.mrb[147].mxu0 }
 0x431   : > { %v12837_v6 = vadd.f32 %v12836_v15, %v12835_v62  ;;  %v12838_v9 = vpop.f32.mrb[146].mxu1  ;;  %v9044_v33 = vadd.f32 %v12725_v12, %v17191_v35  ;;  %v12728_v32 = vadd.f32 %v12727_v45, %v12726_v10 }
 0x432   : > { %v12839_v49 = vpop.f32.mrb[147].mxu1 }
 0x433   : > { %v12840_v52 = vadd.f32 %v12839_v49, %v12838_v9  ;;  %v9047_v31 = vadd.f32 %v12728_v32, %v17194_v53  ;;  %v17313_v17 = vadd.f32 %v12837_v6, %v9044_v33 }
 0x435   : > { %v12729_v7 = vpop.f32.mrb[148].mxu0  ;;  %v17315_v60 = vadd.f32 %v12840_v52, %v9047_v31 }
 0x436   : > { %v12730_v2 = vpop.f32.mrb[149].mxu0 }
 0x437   : > { %v12841_v13 = vpop.f32.mrb[148].mxu1  ;;  %v12731_v44 = vadd.f32 %v12730_v2, %v12729_v7  ;;  %v12732_v29 = vpop.f32.mrb[150].mxu0 }
 0x438   : > { %v12842_v20 = vpop.f32.mrb[149].mxu1  ;;  %v12733_v8 = vpop.f32.mrb[151].mxu0 }
 0x439   : > { %v12843_v59 = vadd.f32 %v12842_v20, %v12841_v13  ;;  %v12844_v50 = vpop.f32.mrb[150].mxu1  ;;  %v9052_v35 = vadd.f32 %v12731_v44, %v17200_v30  ;;  %v12734_v22 = vadd.f32 %v12733_v8, %v12732_v29 }
 0x43a   : > { %v12845_v3 = vpop.f32.mrb[151].mxu1 }
 0x43b   : > { %v12846_v34 = vadd.f32 %v12845_v3, %v12844_v50  ;;  %v9055_v53 = vadd.f32 %v12734_v22, %v17203_v27  ;;  %v17319_v39 = vadd.f32 %v12843_v59, %v9052_v35 }
 0x43d   : > { %v12735_v47 = vpop.f32.mrb[152].mxu0  ;;  %v17321_v41 = vadd.f32 %v12846_v34, %v9055_v53  ;;  %v17336_v34 = vld [vmem:[%s18038_s3 + $0x2] ss:$0 sm:$0xff] }
 0x43e   : > { %v12736_v43 = vpop.f32.mrb[153].mxu0 }
 0x43f   : > { %v12847_v28 = vpop.f32.mrb[152].mxu1  ;;  %v12737_v0 = vadd.f32 %v12736_v43, %v12735_v47  ;;  %v12738_v15 = vpop.f32.mrb[154].mxu0 }
 0x440   : > { %v12848_v62 = vpop.f32.mrb[153].mxu1  ;;  %v12739_v6 = vpop.f32.mrb[155].mxu0 }
 0x441   : > { %v12849_v12 = vadd.f32 %v12848_v62, %v12847_v28  ;;  %v12850_v10 = vpop.f32.mrb[154].mxu1  ;;  %v9060_v30 = vadd.f32 %v12737_v0, %v17209_v16  ;;  %v12740_v45 = vadd.f32 %v12739_v6, %v12738_v15 }
 0x442   : > { %v12851_v9 = vpop.f32.mrb[155].mxu1 }
 0x443   : > { %v12852_v49 = vadd.f32 %v12851_v9, %v12850_v10  ;;  %v9063_v27 = vadd.f32 %v12740_v45, %v17212_v63  ;;  %v17325_v33 = vadd.f32 %v12849_v12, %v9060_v30 }
 0x445   : > { %v12741_v32 = vpop.f32.mrb[156].mxu0  ;;  %v17327_v31 = vadd.f32 %v12852_v49, %v9063_v27 }
 0x446   : > { %v12742_v7 = vpop.f32.mrb[157].mxu0 }
 0x447   : > { %v12853_v52 = vpop.f32.mrb[156].mxu1  ;;  %v12743_v2 = vadd.f32 %v12742_v7, %v12741_v32  ;;  %v12744_v20 = vpop.f32.mrb[158].mxu0 }
 0x448   : > { %v12854_v13 = vpop.f32.mrb[157].mxu1  ;;  %v12745_v59 = vpop.f32.mrb[159].mxu0 }
 0x449   : > { %v12855_v44 = vadd.f32 %v12854_v13, %v12853_v52  ;;  %v12856_v29 = vpop.f32.mrb[158].mxu1  ;;  %v9068_v16 = vadd.f32 %v12743_v2, %v17218_v51  ;;  %v12746_v8 = vadd.f32 %v12745_v59, %v12744_v20  ;;  %v17344_v51 = vld [vmem:[%s18039_s4 + $0x2] ss:$0 sm:$0xff] }
 0x44a   : > { %v12857_v50 = vpop.f32.mrb[159].mxu1 }
 0x44b   : > { %v12858_v3 = vadd.f32 %v12857_v50, %v12856_v29  ;;  %v9071_v63 = vadd.f32 %v12746_v8, %v17221_v4  ;;  %v17331_v35 = vadd.f32 %v12855_v44, %v9068_v16 }
 0x44d   : > { %v13137_v22 = vpop.f32.mrb[160].mxu0  ;;  %v17338_v47 = vadd.f32 %v12858_v3, %v9071_v63 }
 0x44e   : > { %v9278_v28 = vadd.f32 %v13137_v22, %v17242_v57  ;;  %v9269_v43 = vpop.f32.mrb[161].mxu0 }
 0x44f   : > { %v12899_v53 = vpop.f32.mrb[160].mxu1  ;;  %v9270_v4 = vadd.f32 %v9269_v43, %v17231_v37  ;;  %v13138_v15 = vpop.f32.mrb[162].mxu0 }
 0x450   : > { %v12900_v62 = vpop.f32.mrb[161].mxu1  ;;  %v9406_v10 = vmul.f32 %v17336_v34, %v9278_v28  ;;  %v9281_v6 = vadd.f32 %v13138_v15, %v17244_v46  ;;  %v9272_v9 = vpop.f32.mrb[163].mxu0 }
 0x451   : > { %v17347_v0 = vadd.f32 %v12900_v62, %v12899_v53  ;;  %v12902_v12 = vpop.f32.mrb[162].mxu1  ;;  %v9404_v57 = vmul.f32 %v17336_v34, %v9270_v4  ;;  %v9273_v45 = vadd.f32 %v9272_v9, %v17233_v58 }
 0x452   : > { %v12903_v30 = vpop.f32.mrb[163].mxu1  ;;  %v9446_v27 = vadd.f32 %v17344_v51, %v9406_v10  ;;  %v9407_v37 = vmul.f32 %v17336_v34, %v9281_v6 }
 0x453   : > { %v17353_v49 = vadd.f32 %v12903_v30, %v12902_v12  ;;  %v9444_v32 = vadd.f32 %v17344_v51, %v9404_v57  ;;  %v9405_v52 = vmul.f32 %v17336_v34, %v9273_v45 }
 0x454   : > { %v9447_v7 = vadd.f32 %v17344_v51, %v9407_v37  ;;  %v9478_v20 = vmax.f32 %v9446_v27, 0.0 }
 0x455   : > { %v9445_v46 = vadd.f32 %v17344_v51, %v9405_v52  ;;  %v13141_v13 = vpop.f32.mrb[164].mxu0  ;;  %v9476_v50 = vmax.f32 %v9444_v32, 0.0 }
 0x456   : > { %v9479_v44 = vmax.f32 %v9447_v7, 0.0  ;;  %v9294_v58 = vadd.f32 %v13141_v13, %v17258_v24  ;;  %v9285_v29 = vpop.f32.mrb[165].mxu0 }
 0x457   : > { %v12905_v2 = vpop.f32.mrb[164].mxu1  ;;  %v9477_v16 = vmax.f32 %v9445_v46, 0.0  ;;  %v9286_v8 = vadd.f32 %v9285_v29, %v17250_v42  ;;  %v13142_v63 = vpop.f32.mrb[166].mxu0 }
 0x458   : > { %v12906_v59 = vpop.f32.mrb[165].mxu1  ;;  %v9509_v53 = vpack.c.bf16 %v9479_v44, %v9478_v20  ;;  %v9410_v28 = vmul.f32 %v17336_v34, %v9294_v58  ;;  %v9297_v43 = vadd.f32 %v13142_v63, %v17260_v26  ;;  %v9288_v62 = vpop.f32.mrb[167].mxu0 }
 0x459   : > { %v17363_v3 = vadd.f32 %v12906_v59, %v12905_v2  ;;  %v12908_v22 = vpop.f32.mrb[166].mxu1  ;;  %v9408_v15 = vmul.f32 %v17336_v34, %v9286_v8  ;;  %v9289_v24 = vadd.f32 %v9288_v62, %v17252_v5  ;;  %v9508_v10 = vpack.c.bf16 %v9477_v16, %v9476_v50 }
 0x45a   : > { %v12909_v4 = vpop.f32.mrb[167].mxu1  ;;  %v9450_v42 = vadd.f32 %v17344_v51, %v9410_v28  ;;  %v9411_v6 = vmul.f32 %v17336_v34, %v9297_v43 }
 0x45b   : > { %v17369_v12 = vadd.f32 %v12909_v4, %v12908_v22  ;;  %v9448_v9 = vadd.f32 %v17344_v51, %v9408_v15  ;;  %v9409_v30 = vmul.f32 %v17336_v34, %v9289_v24  ;;  %13183 = vmatprep.mubr.bf16.mxu0 %v9508_v10 }
 0x45c   : > { %v9451_v26 = vadd.f32 %v17344_v51, %v9411_v6  ;;  %13184 = vmatmul.mubr.bf16.vlgmr.msra.gmra.mrb[192].mxu0 %v9509_v53  ;;  %v9482_v5 = vmax.f32 %v9450_v42, 0.0 }
 0x45d   : > { %v9449_v57 = vadd.f32 %v17344_v51, %v9409_v30  ;;  %v13145_v45 = vpop.f32.mrb[168].mxu0  ;;  %v9480_v46 = vmax.f32 %v9448_v9, 0.0 }
 0x45e   : > { %v9483_v37 = vmax.f32 %v9451_v26, 0.0  ;;  %v9310_v32 = vadd.f32 %v13145_v45, %v17271_v38  ;;  %v9301_v52 = vpop.f32.mrb[169].mxu0 }
 0x45f   : > { %v12911_v27 = vpop.f32.mrb[168].mxu1  ;;  %v9481_v13 = vmax.f32 %v9449_v57, 0.0  ;;  %v9302_v2 = vadd.f32 %v9301_v52, %v17265_v55  ;;  %v13146_v44 = vpop.f32.mrb[170].mxu0 }
 0x460   : > { %v12912_v7 = vpop.f32.mrb[169].mxu1  ;;  %v9511_v29 = vpack.c.bf16 %v9483_v37, %v9482_v5  ;;  %v9414_v59 = vmul.f32 %v17336_v34, %v9310_v32  ;;  %v9313_v50 = vadd.f32 %v13146_v44, %v17273_v1  ;;  %v9304_v16 = vpop.f32.mrb[171].mxu0 }
 0x461   : > { %v17379_v20 = vadd.f32 %v12912_v7, %v12911_v27  ;;  %v12914_v58 = vpop.f32.mrb[170].mxu1  ;;  %v9412_v63 = vmul.f32 %v17336_v34, %v9302_v2  ;;  %v9305_v38 = vadd.f32 %v9304_v16, %v17267_v54  ;;  %v9510_v53 = vpack.c.bf16 %v9481_v13, %v9480_v46 }
 0x462   : > { %v12915_v8 = vpop.f32.mrb[171].mxu1  ;;  %v9454_v55 = vadd.f32 %v17344_v51, %v9414_v59  ;;  %v9415_v28 = vmul.f32 %v17336_v34, %v9313_v50 }
 0x463   : > { %v17385_v22 = vadd.f32 %v12915_v8, %v12914_v58  ;;  %v9452_v43 = vadd.f32 %v17344_v51, %v9412_v63  ;;  %v9413_v62 = vmul.f32 %v17336_v34, %v9305_v38  ;;  %13187 = vmatprep.mubr.bf16.mxu0 %v9510_v53 }
 0x464   : > { %v9455_v1 = vadd.f32 %v17344_v51, %v9415_v28  ;;  %13188 = vmatmul.mubr.bf16.gmra.mrb[196].mxu0 %v9511_v29  ;;  %v9486_v54 = vmax.f32 %v9454_v55, 0.0 }
 0x465   : > { %v9453_v4 = vadd.f32 %v17344_v51, %v9413_v62  ;;  %v13149_v15 = vpop.f32.mrb[172].mxu0  ;;  %v9484_v30 = vmax.f32 %v9452_v43, 0.0 }
 0x466   : > { %v9487_v10 = vmax.f32 %v9455_v1, 0.0  ;;  %v9326_v42 = vadd.f32 %v13149_v15, %v17283_v36  ;;  %v9317_v6 = vpop.f32.mrb[173].mxu0 }
 0x467   : > { %v12917_v24 = vpop.f32.mrb[172].mxu1  ;;  %v9485_v26 = vmax.f32 %v9453_v4, 0.0  ;;  %v9318_v57 = vadd.f32 %v9317_v6, %v17277_v25  ;;  %v13150_v27 = vpop.f32.mrb[174].mxu0 }
 0x468   : > { %v12918_v9 = vpop.f32.mrb[173].mxu1  ;;  %v9513_v37 = vpack.c.bf16 %v9487_v10, %v9486_v54  ;;  %v9418_v32 = vmul.f32 %v17336_v34, %v9326_v42  ;;  %v9329_v52 = vadd.f32 %v13150_v27, %v17285_v18  ;;  %v9320_v7 = vpop.f32.mrb[175].mxu0 }
 0x469   : > { %v17395_v45 = vadd.f32 %v12918_v9, %v12917_v24  ;;  %v12920_v5 = vpop.f32.mrb[174].mxu1  ;;  %v9416_v13 = vmul.f32 %v17336_v34, %v9318_v57  ;;  %v9321_v36 = vadd.f32 %v9320_v7, %v17279_v61  ;;  %v9512_v44 = vpack.c.bf16 %v9485_v26, %v9484_v30 }
 0x46a   : > { %v12921_v46 = vpop.f32.mrb[175].mxu1  ;;  %v9458_v25 = vadd.f32 %v17344_v51, %v9418_v32  ;;  %v9419_v58 = vmul.f32 %v17336_v34, %v9329_v52 }
 0x46b   : > { %v17401_v2 = vadd.f32 %v12921_v46, %v12920_v5  ;;  %v9456_v29 = vadd.f32 %v17344_v51, %v9416_v13  ;;  %v9417_v59 = vmul.f32 %v17336_v34, %v9321_v36  ;;  %13191 = vmatprep.mubr.bf16.mxu0 %v9512_v44 }
 0x46c   : > { %v9459_v18 = vadd.f32 %v17344_v51, %v9419_v58  ;;  %13192 = vmatmul.mubr.bf16.gmra.mrb[200].mxu0 %v9513_v37  ;;  %v9490_v61 = vmax.f32 %v9458_v25, 0.0 }
 0x46d   : > { %v9457_v50 = vadd.f32 %v17344_v51, %v9417_v59  ;;  %v13153_v16 = vpop.f32.mrb[176].mxu0  ;;  %v9488_v28 = vmax.f32 %v9456_v29, 0.0 }
 0x46e   : > { %v9491_v63 = vmax.f32 %v9459_v18, 0.0  ;;  %v9342_v38 = vadd.f32 %v13153_v16, %v17295_v11  ;;  %v9333_v53 = vpop.f32.mrb[177].mxu0 }
 0x46f   : > { %v12923_v8 = vpop.f32.mrb[176].mxu1  ;;  %v9489_v43 = vmax.f32 %v9457_v50, 0.0  ;;  %v9334_v62 = vadd.f32 %v9333_v53, %v17289_v21  ;;  %v13154_v4 = vpop.f32.mrb[178].mxu0 }
 0x470   : > { %v12924_v55 = vpop.f32.mrb[177].mxu1  ;;  %v9515_v24 = vpack.c.bf16 %v9491_v63, %v9490_v61  ;;  %v9422_v54 = vmul.f32 %v17336_v34, %v9342_v38  ;;  %v9345_v10 = vadd.f32 %v13154_v4, %v17297_v48  ;;  %v9336_v42 = vpop.f32.mrb[179].mxu0 }
 0x471   : > { %v17411_v1 = vadd.f32 %v12924_v55, %v12923_v8  ;;  %v12926_v15 = vpop.f32.mrb[178].mxu1  ;;  %v9420_v9 = vmul.f32 %v17336_v34, %v9334_v62  ;;  %v9337_v11 = vadd.f32 %v9336_v42, %v17291_v56  ;;  %v9514_v26 = vpack.c.bf16 %v9489_v43, %v9488_v28 }
 0x472   : > { %v12927_v6 = vpop.f32.mrb[179].mxu1  ;;  %v9462_v21 = vadd.f32 %v17344_v51, %v9422_v54  ;;  %v9423_v57 = vmul.f32 %v17336_v34, %v9345_v10 }
 0x473   : > { %v17417_v30 = vadd.f32 %v12927_v6, %v12926_v15  ;;  %v9460_v27 = vadd.f32 %v17344_v51, %v9420_v9  ;;  %v9421_v5 = vmul.f32 %v17336_v34, %v9337_v11  ;;  %13195 = vmatprep.mubr.bf16.mxu0 %v9514_v26 }
 0x474   : > { %v9463_v48 = vadd.f32 %v17344_v51, %v9423_v57  ;;  %13196 = vmatmul.mubr.bf16.gmra.mrb[204].mxu0 %v9515_v24  ;;  %v9494_v56 = vmax.f32 %v9462_v21, 0.0 }
 0x475   : > { %v9461_v37 = vadd.f32 %v17344_v51, %v9421_v5  ;;  %v13157_v32 = vpop.f32.mrb[180].mxu0  ;;  %v9492_v44 = vmax.f32 %v9460_v27, 0.0 }
 0x476   : > { %v9495_v7 = vmax.f32 %v9463_v48, 0.0  ;;  %v9358_v46 = vadd.f32 %v13157_v32, %v17307_v23  ;;  %v9349_v13 = vpop.f32.mrb[181].mxu0 }
 0x477   : > { %v12929_v52 = vpop.f32.mrb[180].mxu1  ;;  %v9493_v25 = vmax.f32 %v9461_v37, 0.0  ;;  %v9350_v58 = vadd.f32 %v9349_v13, %v17301_v40  ;;  %v13158_v59 = vpop.f32.mrb[182].mxu0 }
 0x478   : > { %v12930_v36 = vpop.f32.mrb[181].mxu1  ;;  %v9517_v50 = vpack.c.bf16 %v9495_v7, %v9494_v56  ;;  %v9426_v16 = vmul.f32 %v17336_v34, %v9358_v46  ;;  %v9361_v8 = vadd.f32 %v13158_v59, %v17309_v14  ;;  %v9352_v61 = vpop.f32.mrb[183].mxu0 }
 0x479   : > { %v17427_v29 = vadd.f32 %v12930_v36, %v12929_v52  ;;  %v12932_v18 = vpop.f32.mrb[182].mxu1  ;;  %v9424_v38 = vmul.f32 %v17336_v34, %v9350_v58  ;;  %v9353_v23 = vadd.f32 %v9352_v61, %v17303_v19  ;;  %v9516_v55 = vpack.c.bf16 %v9493_v25, %v9492_v44 }
 0x47a   : > { %v12933_v63 = vpop.f32.mrb[183].mxu1  ;;  %v9466_v40 = vadd.f32 %v17344_v51, %v9426_v16  ;;  %v9427_v28 = vmul.f32 %v17336_v34, %v9361_v8 }
 0x47b   : > { %v17433_v53 = vadd.f32 %v12933_v63, %v12932_v18  ;;  %v9464_v43 = vadd.f32 %v17344_v51, %v9424_v38  ;;  %v9425_v62 = vmul.f32 %v17336_v34, %v9353_v23  ;;  %13199 = vmatprep.mubr.bf16.mxu0 %v9516_v55 }
 0x47c   : > { %v9467_v14 = vadd.f32 %v17344_v51, %v9427_v28  ;;  %13200 = vmatmul.mubr.bf16.gmra.mrb[208].mxu0 %v9517_v50  ;;  %v9498_v19 = vmax.f32 %v9466_v40, 0.0 }
 0x47d   : > { %v9465_v4 = vadd.f32 %v17344_v51, %v9425_v62  ;;  %v13161_v15 = vpop.f32.mrb[184].mxu0  ;;  %v9496_v9 = vmax.f32 %v9464_v43, 0.0 }
 0x47e   : > { %v9499_v54 = vmax.f32 %v9467_v14, 0.0  ;;  %v9374_v10 = vadd.f32 %v13161_v15, %v17319_v39  ;;  %v9365_v42 = vpop.f32.mrb[185].mxu0 }
 0x47f   : > { %v12935_v24 = vpop.f32.mrb[184].mxu1  ;;  %v9497_v11 = vmax.f32 %v9465_v4, 0.0  ;;  %v9366_v26 = vadd.f32 %v9365_v42, %v17313_v17  ;;  %v13162_v57 = vpop.f32.mrb[186].mxu0 }
 0x480   : > { %v12936_v6 = vpop.f32.mrb[185].mxu1  ;;  %v9519_v5 = vpack.c.bf16 %v9499_v54, %v9498_v19  ;;  %v9430_v48 = vmul.f32 %v17336_v34, %v9374_v10  ;;  %v9377_v37 = vadd.f32 %v13162_v57, %v17321_v41  ;;  %v9368_v32 = vpop.f32.mrb[187].mxu0 }
 0x481   : > { %v17443_v21 = vadd.f32 %v12936_v6, %v12935_v24  ;;  %v12938_v27 = vpop.f32.mrb[186].mxu1  ;;  %v9428_v56 = vmul.f32 %v17336_v34, %v9366_v26  ;;  %v9369_v39 = vadd.f32 %v9368_v32, %v17315_v60  ;;  %v9518_v46 = vpack.c.bf16 %v9497_v11, %v9496_v9 }
 0x482   : > { %v12939_v52 = vpop.f32.mrb[187].mxu1  ;;  %v9470_v17 = vadd.f32 %v17344_v51, %v9430_v48  ;;  %v9431_v13 = vmul.f32 %v17336_v34, %v9377_v37 }
 0x483   : > { %v17449_v7 = vadd.f32 %v12939_v52, %v12938_v27  ;;  %v9468_v36 = vadd.f32 %v17344_v51, %v9428_v56  ;;  %v9429_v44 = vmul.f32 %v17336_v34, %v9369_v39  ;;  %13203 = vmatprep.mubr.bf16.mxu0 %v9518_v46 }
 0x484   : > { %v9471_v41 = vadd.f32 %v17344_v51, %v9431_v13  ;;  %13204 = vmatmul.mubr.bf16.gmra.mrb[212].mxu0 %v9519_v5  ;;  %v9502_v60 = vmax.f32 %v9470_v17, 0.0 }
 0x485   : > { %v9469_v25 = vadd.f32 %v17344_v51, %v9429_v44  ;;  %v13165_v58 = vpop.f32.mrb[188].mxu0  ;;  %v9500_v61 = vmax.f32 %v9468_v36, 0.0 }
 0x486   : > { %v9503_v18 = vmax.f32 %v9471_v41, 0.0  ;;  %v9390_v50 = vadd.f32 %v13165_v58, %v17331_v35  ;;  %v9381_v16 = vpop.f32.mrb[189].mxu0 }
 0x487   : > { %v12941_v59 = vpop.f32.mrb[188].mxu1  ;;  %v9501_v63 = vmax.f32 %v9469_v25, 0.0  ;;  %v9382_v38 = vadd.f32 %v9381_v16, %v17325_v33  ;;  %v13166_v55 = vpop.f32.mrb[190].mxu0 }
 0x488   : > { %v12942_v8 = vpop.f32.mrb[189].mxu1  ;;  %v9521_v28 = vpack.c.bf16 %v9503_v18, %v9502_v60  ;;  %v9434_v43 = vmul.f32 %v17336_v34, %v9390_v50  ;;  %v9393_v62 = vadd.f32 %v13166_v55, %v17338_v47  ;;  %v9384_v14 = vpop.f32.mrb[191].mxu0 }
 0x489   : > { %v17459_v23 = vadd.f32 %v12942_v8, %v12941_v59  ;;  %v12944_v40 = vpop.f32.mrb[190].mxu1  ;;  %v9432_v15 = vmul.f32 %v17336_v34, %v9382_v38  ;;  %v9385_v35 = vadd.f32 %v9384_v14, %v17327_v31  ;;  %v9520_v19 = vpack.c.bf16 %v9501_v63, %v9500_v61 }
 0x48a   : > { %v12945_v4 = vpop.f32.mrb[191].mxu1  ;;  %v9474_v33 = vadd.f32 %v17344_v51, %v9434_v43  ;;  %v9435_v54 = vmul.f32 %v17336_v34, %v9393_v62 }
 0x48b   : > { %v17465_v24 = vadd.f32 %v12945_v4, %v12944_v40  ;;  %v9472_v10 = vadd.f32 %v17344_v51, %v9432_v15  ;;  %v9433_v42 = vmul.f32 %v17336_v34, %v9385_v35  ;;  %13207 = vmatprep.mubr.bf16.mxu0 %v9520_v19 }
 0x48c   : > { %v9475_v47 = vadd.f32 %v17344_v51, %v9435_v54  ;;  %13208 = vmatmul.mubr.bf16.gmra.mrb[216].mxu0 %v9521_v28  ;;  %v9506_v11 = vmax.f32 %v9474_v33, 0.0 }
 0x48d   : > { %v9473_v6 = vadd.f32 %v17344_v51, %v9433_v42  ;;  %v9504_v57 = vmax.f32 %v9472_v10, 0.0 }
 0x48e   : > { %v9507_v31 = vmax.f32 %v9475_v47, 0.0 }
 0x48f   : > { %v12947_v9 = vpop.f32.mrb[192].mxu1  ;;  %v9505_v27 = vmax.f32 %v9473_v6, 0.0 }
 0x490   : > { %v12948_v26 = vpop.f32.mrb[193].mxu1  ;;  %v9523_v37 = vpack.c.bf16 %v9507_v31, %v9506_v11 }
 0x491   : > { %v17473_v5 = vadd.f32 %v12948_v26, %v12947_v9  ;;  %v12950_v48 = vpop.f32.mrb[194].mxu1  ;;  %v9522_v34 = vpack.c.bf16 %v9505_v27, %v9504_v57 }
 0x492   : > { %v12951_v32 = vpop.f32.mrb[195].mxu1 }
 0x493   : > { %v17475_v52 = vadd.f32 %v12951_v32, %v12950_v48  ;;  %13211 = vmatprep.mubr.bf16.mxu0 %v9522_v34  ;;  %v13627_v48 = vmov 0.0   ;;  %v10323_v32 = vld [vmem:[%s18044_s9] sm:$0xff] }
 0x494   : > { %13212 = vmatmul.mubr.bf16.gmra.mrb[220].mxu0 %v9523_v37  ;;  %13215 = vmatprep.subr.mxu0 %v13627_v48  ;;  %v10251_v37 = vld [vmem:[%s18043_s8] sm:$0xff] }
 0x495   : > { %13220 = vmatprep.subr.mxu1 %v13627_v48  ;;  %13216 = vmatpush3.xpose.msra.mxu0 %v10251_v37 }
 0x496   : > { %13217 = vmatprep.mubr.msk.f32.mxu0 %vm13628_vm12, %v13627_v48  ;;  %13222 = vmatprep.mubr.msk.f32.mxu1 %vm13628_vm12, %v13627_v48 }
 0x497   : > { %v12953_v56 = vpop.f32.mrb[196].mxu1  ;;  %13221 = vmatpush3.msra.mxu1 %v10323_v32 }
 0x498   : > { %v12954_v39 = vpop.f32.mrb[197].mxu1 }
 0x499   : > { %v17477_v46 = vadd.f32 %v12954_v39, %v12953_v56  ;;  %v12956_v51 = vpop.f32.mrb[198].mxu1  ;;  %v17514_v56 = vld [vmem:[%s18041_s6] ss:$0 sm:$0xff] }
 0x49a   : > { %v12957_v17 = vpop.f32.mrb[199].mxu1 }
 0x49b   : > { %v17479_v13 = vadd.f32 %v12957_v17, %v12956_v51 }
 0x49f   : > { %v12959_v36 = vpop.f32.mrb[200].mxu1 }
 0x4a0   : > { %v12960_v44 = vpop.f32.mrb[201].mxu1 }
 0x4a1   : > { %v17481_v41 = vadd.f32 %v12960_v44, %v12959_v36  ;;  %v12962_v25 = vpop.f32.mrb[202].mxu1 }
 0x4a2   : > { %v12963_v58 = vpop.f32.mrb[203].mxu1 }
 0x4a3   : > { %v17483_v59 = vadd.f32 %v12963_v58, %v12962_v25  ;;  %v17522_v25 = vld [vmem:[%s18042_s7] ss:$0 sm:$0xff] }
 0x4a7   : > { %v12965_v60 = vpop.f32.mrb[204].mxu1 }
 0x4a8   : > { %v12966_v18 = vpop.f32.mrb[205].mxu1 }
 0x4a9   : > { %v17485_v50 = vadd.f32 %v12966_v18, %v12965_v60  ;;  %v12968_v16 = vpop.f32.mrb[206].mxu1 }
 0x4aa   : > { %v12969_v8 = vpop.f32.mrb[207].mxu1 }
 0x4ab   : > { %v17487_v61 = vadd.f32 %v12969_v8, %v12968_v16 }
 0x4af   : > { %v12971_v63 = vpop.f32.mrb[208].mxu1 }
 0x4b0   : > { %v12972_v38 = vpop.f32.mrb[209].mxu1 }
 0x4b1   : > { %v17489_v55 = vadd.f32 %v12972_v38, %v12971_v63  ;;  %v12974_v40 = vpop.f32.mrb[210].mxu1 }
 0x4b2   : > { %v12975_v28 = vpop.f32.mrb[211].mxu1 }
 0x4b3   : > { %v17491_v43 = vadd.f32 %v12975_v28, %v12974_v40 }
 0x4b7   : > { %v12977_v62 = vpop.f32.mrb[212].mxu1 }
 0x4b8   : > { %v12978_v14 = vpop.f32.mrb[213].mxu1 }
 0x4b9   : > { %v17493_v4 = vadd.f32 %v12978_v14, %v12977_v62  ;;  %v12980_v15 = vpop.f32.mrb[214].mxu1 }
 0x4ba   : > { %v12981_v35 = vpop.f32.mrb[215].mxu1 }
 0x4bb   : > { %v17495_v19 = vadd.f32 %v12981_v35, %v12980_v15 }
 0x4bf   : > { %v12983_v33 = vpop.f32.mrb[216].mxu1 }
 0x4c0   : > { %v12984_v54 = vpop.f32.mrb[217].mxu1 }
 0x4c1   : > { %v17497_v10 = vadd.f32 %v12984_v54, %v12983_v33  ;;  %v12986_v42 = vpop.f32.mrb[218].mxu1 }
 0x4c2   : > { %v12987_v47 = vpop.f32.mrb[219].mxu1 }
 0x4c3   : > { %v17499_v6 = vadd.f32 %v12987_v47, %v12986_v42 }
 0x4c7   : > { %v12989_v9 = vpop.f32.mrb[220].mxu1 }
 0x4c8   : > { %v12990_v11 = vpop.f32.mrb[221].mxu1 }
 0x4c9   : > { %v17501_v31 = vadd.f32 %v12990_v11, %v12989_v9  ;;  %v12992_v26 = vpop.f32.mrb[222].mxu1 }
 0x4ca   : > { %v12993_v57 = vpop.f32.mrb[223].mxu1 }
 0x4cb   : > { %v17503_v27 = vadd.f32 %v12993_v57, %v12992_v26 }
 0x52f   : > { %v13185_v34 = vpop.f32.mrb[192].mxu0 }
 0x530   : > { %v9984_v39 = vadd.f32 %v13185_v34, %v17363_v3  ;;  %v9975_v51 = vpop.f32.mrb[193].mxu0 }
 0x531   : > { %v9976_v17 = vadd.f32 %v17347_v0, %v9975_v51  ;;  %v13186_v36 = vpop.f32.mrb[194].mxu0 }
 0x532   : > { %v10111_v44 = vmul.f32 %v17514_v56, %v9984_v39  ;;  %v9987_v58 = vadd.f32 %v13186_v36, %v17369_v12  ;;  %v9978_v60 = vpop.f32.mrb[195].mxu0 }
 0x533   : > { %v10109_v18 = vmul.f32 %v17514_v56, %v9976_v17  ;;  %v9979_v16 = vadd.f32 %v17353_v49, %v9978_v60 }
 0x534   : > { %v10112_v3 = vmul.f32 %v17514_v56, %v9987_v58  ;;  %v17533_v63 = vadd.f32 %v17522_v25, %v10111_v44 }
 0x535   : > { %v17529_v8 = vadd.f32 %v17522_v25, %v10109_v18  ;;  %v10110_v0 = vmul.f32 %v17514_v56, %v9979_v16 }
 0x536   : > { %v17539_v12 = vadd.f32 %v17522_v25, %v10112_v3  ;;  %v10182_v33 = vmax.f32 %v17533_v63, 0.0 }
 0x537   : > { %v17536_v38 = vadd.f32 %v17522_v25, %v10110_v0  ;;  %v13189_v40 = vpop.f32.mrb[196].mxu0  ;;  %v10180_v62 = vmax.f32 %v17529_v8, 0.0 }
 0x538   : > { %v10000_v28 = vadd.f32 %v13189_v40, %v17395_v45  ;;  %v9991_v49 = vpop.f32.mrb[197].mxu0  ;;  %v10183_v26 = vmax.f32 %v17539_v12, 0.0 }
 0x539   : > { %v10181_v14 = vmax.f32 %v17536_v38, 0.0  ;;  %v9992_v15 = vadd.f32 %v17379_v20, %v9991_v49  ;;  %v13190_v35 = vpop.f32.mrb[198].mxu0 }
 0x53a   : > { %v10003_v54 = vadd.f32 %v13190_v35, %v17401_v2  ;;  %v9994_v42 = vpop.f32.mrb[199].mxu0  ;;  %v10115_v45 = vmul.f32 %v17514_v56, %v10000_v28 }
 0x53b   : > { %v10212_v47 = vadd.f32 %v10181_v14, %v10180_v62  ;;  %v10113_v9 = vmul.f32 %v17514_v56, %v9992_v15  ;;  %v9995_v11 = vadd.f32 %v17385_v22, %v9994_v42 }
 0x53c   : > { %v10116_v2 = vmul.f32 %v17514_v56, %v10003_v54  ;;  %v17563_v37 = vadd.f32 %v17522_v25, %v10115_v45 }
 0x53d   : > { %v10213_v20 = vadd.f32 %v10212_v47, %v10182_v33  ;;  %v17558_v57 = vadd.f32 %v17522_v25, %v10113_v9  ;;  %v10114_v48 = vmul.f32 %v17514_v56, %v9995_v11 }
 0x53e   : > { %v17575_v44 = vadd.f32 %v17522_v25, %v10116_v2  ;;  %v10186_v40 = vmax.f32 %v17563_v37, 0.0  ;;  %v10407_v37 = vld [vmem:[%s17781_s26 + $0x18] sm:$0xff] }
 0x53f   : > { %v10184_v32 = vmax.f32 %v17558_v57, 0.0  ;;  %v10214_v22 = vadd.f32 %v10213_v20, %v10183_v26  ;;  %v17569_v34 = vadd.f32 %v17522_v25, %v10114_v48  ;;  %v13193_v39 = vpop.f32.mrb[200].mxu0  ;;  %v10404_v57 = vld [vmem:[%s17781_s26] sm:$0xff] }
 0x540   : > { %v10016_v51 = vadd.f32 %v13193_v39, %v17427_v29  ;;  %v10007_v17 = vpop.f32.mrb[201].mxu0  ;;  %v10187_v35 = vmax.f32 %v17575_v44, 0.0 }
 0x541   : > { %v10215_v36 = vadd.f32 %v10214_v22, %v10184_v32  ;;  %v10185_v58 = vmax.f32 %v17569_v34, 0.0  ;;  %v10008_v60 = vadd.f32 %v17411_v1, %v10007_v17  ;;  %v13194_v18 = vpop.f32.mrb[202].mxu0 }
 0x542   : > { %v10119_v16 = vmul.f32 %v17514_v56, %v10016_v51  ;;  %v10019_v3 = vadd.f32 %v13194_v18, %v17433_v53  ;;  %v10010_v0 = vpop.f32.mrb[203].mxu0 }
 0x543   : > { %v10216_v29 = vadd.f32 %v10215_v36, %v10185_v58  ;;  %v10117_v28 = vmul.f32 %v17514_v56, %v10008_v60  ;;  %v10011_v49 = vadd.f32 %v17417_v30, %v10010_v0 }
 0x544   : > { %v10120_v15 = vmul.f32 %v17514_v56, %v10019_v3  ;;  %v17595_v42 = vadd.f32 %v17522_v25, %v10119_v16 }
 0x545   : > { %v10217_v1 = vadd.f32 %v10216_v29, %v10186_v40  ;;  %v17591_v54 = vadd.f32 %v17522_v25, %v10117_v28  ;;  %v10118_v53 = vmul.f32 %v17514_v56, %v10011_v49 }
 0x546   : > { %v17604_v11 = vadd.f32 %v17522_v25, %v10120_v15  ;;  %v10190_v17 = vmax.f32 %v17595_v42, 0.0  ;;  %v10408_v42 = vld [vmem:[%s17781_s26 + $0x20] sm:$0xff] }
 0x547   : > { %v10188_v47 = vmax.f32 %v17591_v54, 0.0  ;;  %v10218_v30 = vadd.f32 %v10217_v1, %v10187_v35  ;;  %v17601_v45 = vadd.f32 %v17522_v25, %v10118_v53  ;;  %v13197_v9 = vpop.f32.mrb[204].mxu0  ;;  %v10410_v54 = vld [vmem:[%s17781_s26 + $0x30] sm:$0xff] }
 0x548   : > { %v10032_v20 = vadd.f32 %v13197_v9, %v17459_v23  ;;  %v10023_v2 = vpop.f32.mrb[205].mxu0  ;;  %v10191_v0 = vmax.f32 %v17604_v11, 0.0 }
 0x549   : > { %v10219_v48 = vadd.f32 %v10218_v30, %v10188_v47  ;;  %v10189_v22 = vmax.f32 %v17601_v45, 0.0  ;;  %v10024_v39 = vadd.f32 %v17443_v21, %v10023_v2  ;;  %v13198_v51 = vpop.f32.mrb[206].mxu0  ;;  %v10409_v45 = vld [vmem:[%s17781_s26 + $0x28] sm:$0xff] }
 0x54a   : > { %v10035_v36 = vadd.f32 %v13198_v51, %v17465_v24  ;;  %v10026_v60 = vpop.f32.mrb[207].mxu0  ;;  %v10123_v16 = vmul.f32 %v17514_v56, %v10032_v20 }
 0x54b   : > { %v10220_v18 = vadd.f32 %v10219_v48, %v10189_v22  ;;  %v10121_v23 = vmul.f32 %v17514_v56, %v10024_v39  ;;  %v10027_v3 = vadd.f32 %v17449_v7, %v10026_v60 }
 0x54c   : > { %v10124_v24 = vmul.f32 %v17514_v56, %v10035_v36  ;;  %v17627_v49 = vadd.f32 %v17522_v25, %v10123_v16 }
 0x54d   : > { %v10221_v21 = vadd.f32 %v10220_v18, %v10190_v17  ;;  %v17622_v29 = vadd.f32 %v17522_v25, %v10121_v23  ;;  %v10122_v28 = vmul.f32 %v17514_v56, %v10027_v3 }
 0x54e   : > { %v17639_v2 = vadd.f32 %v17522_v25, %v10124_v24  ;;  %v10194_v16 = vmax.f32 %v17627_v49, 0.0 }
 0x54f   : > { %v10192_v15 = vmax.f32 %v17622_v29, 0.0  ;;  %v10222_v7 = vadd.f32 %v10221_v21, %v10191_v0  ;;  %v17633_v1 = vadd.f32 %v17522_v25, %v10122_v28  ;;  %v13201_v53 = vpop.f32.mrb[208].mxu0 }
 0x550   : > { %v10048_v30 = vadd.f32 %v13201_v53, %v17477_v46  ;;  %v10039_v9 = vpop.f32.mrb[209].mxu0  ;;  %v18166_v24 = vmax.f32 %v17639_v2, 0.0 }
 0x551   : > { %v10223_v20 = vadd.f32 %v10222_v7, %v10192_v15  ;;  %v10193_v48 = vmax.f32 %v17633_v1, 0.0  ;;  %v10040_v39 = vadd.f32 %v17473_v5, %v10039_v9  ;;  %v13202_v51 = vpop.f32.mrb[210].mxu0 }
 0x552   : > { %v10127_v36 = vmul.f32 %v17514_v56, %v10048_v30  ;;  %v10051_v60 = vadd.f32 %v13202_v51, %v17479_v13  ;;  %v10042_v18 = vpop.f32.mrb[211].mxu0 }
 0x553   : > { %v10224_v46 = vadd.f32 %v10223_v20, %v10193_v48  ;;  %v10125_v23 = vmul.f32 %v17514_v56, %v10040_v39  ;;  %v10043_v3 = vadd.f32 %v17475_v52, %v10042_v18 }
 0x554   : > { %v10128_v21 = vmul.f32 %v17514_v56, %v10051_v60  ;;  %v17659_v7 = vadd.f32 %v17522_v25, %v10127_v36 }
 0x555   : > { %v10225_v5 = vadd.f32 %v10224_v46, %v10194_v16  ;;  %v17655_v28 = vadd.f32 %v17522_v25, %v10125_v23  ;;  %v10126_v13 = vmul.f32 %v17514_v56, %v10043_v3 }
 0x556   : > { %v17668_v20 = vadd.f32 %v17522_v25, %v10128_v21  ;;  %v18152_v23 = vmax.f32 %v17659_v7, 0.0  ;;  %v18485_v29 = vmax.f32 %v17659_v7, 0.0 }
 0x557   : > { %v18155_v53 = vmax.f32 %v17655_v28, 0.0  ;;  %v10226_v52 = vadd.f32 %v10225_v5, %v18166_v24  ;;  %v17665_v30 = vadd.f32 %v17522_v25, %v10126_v13  ;;  %v13205_v9 = vpop.f32.mrb[212].mxu0  ;;  %v18483_v11 = vmax.f32 %v17655_v28, 0.0 }
 0x558   : > { %v10064_v39 = vadd.f32 %v13205_v9, %v17485_v50  ;;  %v10055_v51 = vpop.f32.mrb[213].mxu0 }
 0x559   : > { %v10227_v60 = vadd.f32 %v10226_v52, %v18155_v53  ;;  %v18153_v36 = vmax.f32 %v17665_v30, 0.0  ;;  %v10056_v18 = vadd.f32 %v17481_v41, %v10055_v51  ;;  %v13206_v46 = vpop.f32.mrb[214].mxu0  ;;  %v18154_v52 = vmax.f32 %v17668_v20, 0.0 }
 0x55a   : > { %v10067_v3 = vadd.f32 %v13206_v46, %v17487_v61  ;;  %v10058_v5 = vpop.f32.mrb[215].mxu0  ;;  %v10131_v13 = vmul.f32 %v17514_v56, %v10064_v39 }
 0x55b   : > { %v10228_v21 = vadd.f32 %v10227_v60, %v18153_v36  ;;  %v10129_v50 = vmul.f32 %v17514_v56, %v10056_v18  ;;  %v10059_v9 = vadd.f32 %v17483_v59, %v10058_v5 }
 0x55c   : > { %v10132_v61 = vmul.f32 %v17514_v56, %v10067_v3  ;;  %v17691_v60 = vadd.f32 %v17522_v25, %v10131_v13 }
 0x55d   : > { %v10229_v41 = vadd.f32 %v10228_v21, %v18152_v23  ;;  %v17686_v51 = vadd.f32 %v17522_v25, %v10129_v50  ;;  %v10130_v46 = vmul.f32 %v17514_v56, %v10059_v9 }
 0x55e   : > { %v17703_v9 = vadd.f32 %v17522_v25, %v10132_v61  ;;  %v18157_v53 = vmax.f32 %v17691_v60, 0.0  ;;  %v18489_v7 = vmax.f32 %v17691_v60, 0.0 }
 0x55f   : > { %v18156_v39 = vmax.f32 %v17686_v51, 0.0  ;;  %v10230_v59 = vadd.f32 %v10229_v41, %v18154_v52  ;;  %v17697_v18 = vadd.f32 %v17522_v25, %v10130_v46  ;;  %v13209_v5 = vpop.f32.mrb[216].mxu0  ;;  %v18487_v28 = vmax.f32 %v17686_v51, 0.0  ;;  %v10416_v51 = vld [vmem:[%s17781_s26 + $0x60] sm:$0xff] }
 0x560   : > { %v10080_v21 = vadd.f32 %v13209_v5, %v17493_v4  ;;  %v10071_v50 = vpop.f32.mrb[217].mxu0 }
 0x561   : > { %v10231_v3 = vadd.f32 %v10230_v59, %v18156_v39  ;;  %v18159_v13 = vmax.f32 %v17697_v18, 0.0  ;;  %v10072_v23 = vadd.f32 %v17489_v55, %v10071_v50  ;;  %v13210_v36 = vpop.f32.mrb[218].mxu0  ;;  %v18158_v39 = vmax.f32 %v17703_v9, 0.0 }
 0x562   : > { %v10135_v41 = vmul.f32 %v17514_v56, %v10080_v21  ;;  %v10083_v46 = vadd.f32 %v13210_v36, %v17495_v19  ;;  %v10074_v52 = vpop.f32.mrb[219].mxu0 }
 0x563   : > { %v10232_v4 = vadd.f32 %v10231_v3, %v18159_v13  ;;  %v10133_v59 = vmul.f32 %v17514_v56, %v10072_v23  ;;  %v10075_v61 = vadd.f32 %v17491_v43, %v10074_v52 }
 0x564   : > { %v10136_v5 = vmul.f32 %v17514_v56, %v10083_v46  ;;  %v17723_v36 = vadd.f32 %v17522_v25, %v10135_v41 }
 0x565   : > { %v10233_v55 = vadd.f32 %v10232_v4, %v18157_v53  ;;  %v17719_v21 = vadd.f32 %v17522_v25, %v10133_v59  ;;  %v10134_v19 = vmul.f32 %v17514_v56, %v10075_v61 }
 0x566   : > { %v17732_v3 = vadd.f32 %v17522_v25, %v10136_v5  ;;  %v18493_v60 = vmax.f32 %v17723_v36, 0.0 }
 0x567   : > { %v18165_v50 = vmax.f32 %v17719_v21, 0.0  ;;  %v10234_v43 = vadd.f32 %v10233_v55, %v18158_v39  ;;  %v17729_v23 = vadd.f32 %v17522_v25, %v10134_v19  ;;  %v13213_v52 = vpop.f32.mrb[220].mxu0  ;;  %v18162_v55 = vmax.f32 %v17723_v36, 0.0 }
 0x568   : > { %v10096_v46 = vadd.f32 %v13213_v52, %v17501_v31  ;;  %v10087_v4 = vpop.f32.mrb[221].mxu0 }
 0x569   : > { %v10235_v59 = vadd.f32 %v10234_v43, %v18165_v50  ;;  %v18163_v41 = vmax.f32 %v17729_v23, 0.0  ;;  %v10088_v61 = vadd.f32 %v17497_v10, %v10087_v4  ;;  %v13214_v53 = vpop.f32.mrb[222].mxu0  ;;  %v18161_v43 = vmax.f32 %v17732_v3, 0.0 }
 0x56a   : > { %v10099_v19 = vadd.f32 %v13214_v53, %v17503_v27  ;;  %v10090_v39 = vpop.f32.mrb[223].mxu0  ;;  %v10139_v13 = vmul.f32 %v17514_v56, %v10096_v46 }
 0x56b   : > { %v10236_v5 = vadd.f32 %v10235_v59, %v18163_v41  ;;  %v10137_v31 = vmul.f32 %v17514_v56, %v10088_v61  ;;  %v10091_v52 = vadd.f32 %v17499_v6, %v10090_v39 }
 0x56c   : > { %v10140_v27 = vmul.f32 %v17514_v56, %v10099_v19  ;;  %v17755_v59 = vadd.f32 %v17522_v25, %v10139_v13 }
 0x56d   : > { %v10237_v10 = vadd.f32 %v10236_v5, %v18162_v55  ;;  %v17750_v4 = vadd.f32 %v17522_v25, %v10137_v31  ;;  %v10138_v53 = vmul.f32 %v17514_v56, %v10091_v52 }
 0x56e   : > { %v17766_v5 = vadd.f32 %v17522_v25, %v10140_v27  ;;  %v10210_v56 = vmax.f32 %v17755_v59, 0.0  ;;  %v10427_v59 = vld [vmem:[%s17781_s26 + $0xb8] sm:$0xff] }
 0x56f   : > { %v18160_v46 = vmax.f32 %v17750_v4, 0.0  ;;  %v10238_v6 = vadd.f32 %v10237_v10, %v18161_v43  ;;  %v17761_v39 = vadd.f32 %v17522_v25, %v10138_v53 }
 0x570   : > { %v18167_v31 = vmax.f32 %v17766_v5, 0.0 }
 0x571   : > { %v10239_v61 = vadd.f32 %v10238_v6, %v18160_v46  ;;  %v18164_v19 = vmax.f32 %v17761_v39, 0.0 }
 0x573   : > { %v10240_v13 = vadd.f32 %v10239_v61, %v18164_v19 }
 0x575   : > { %v10241_v52 = vadd.f32 %v10240_v13, %v10210_v56 }
 0x577   : > { %v10242_v10 = vadd.f32 %v10241_v52, %v18167_v31 }
 0x579   : > { %v10243_v53 = vrot.slane %v10242_v10, 4 }
 0x57b   : > { %v10244_v6 = vadd.f32 %v10243_v53, %v10242_v10  ;;  %v10436_v10 = vlaneseq }
 0x57d   : > { %v10245_v46 = vrot.slane %v10244_v6, 2 }
 0x57f   : > { %v10246_v25 = vadd.f32 %v10245_v46, %v10244_v6  ;;  %v10437_v46 = vshrl.u32 %v10436_v10, 7  ;;  %v18491_v10 = vmax.f32 %v17719_v21, 0.0  ;;  %v10422_v21 = vld [vmem:[%s17781_s26 + $0x90] sm:$0xff] }
 0x581   : > { %v10247_v27 = vrot.slane %v10246_v25, 1  ;;  %v10438_v53 = vsub.s32 0, %v10437_v46 }
 0x583   : > { %v10248_v43 = vadd.f32 %v10247_v27, %v10246_v25 }
 0x585   : > { %v10250_v55 = vmul.f32 0.00390625, %v10248_v43 }
 0x587   : > { %13218 = vmatmul.mubr.f32.vlgmr.msra.gmra.mrb[224].mxu0 %v10250_v55 }
 0x65a   : > { %v10318_v41 = vpop.f32.mrb[224].mxu0 }
 0x65b   : > { %v10322_v61 = vmax.f32 %v10318_v41, 0.0  ;;  %v13219_v19 = vpop.f32.mrb[225].mxu0 }
 0x65d   : > { %13223 = vmatmul.mubr.msk.f32.vlgmr.msra.gmra.mrb[224].mxu1 %vm10324_vm13, %v10322_v61 }
 0x730   : > { %v10394_v50 = vpop.f32.mrb[224].mxu1 }
 0x731   : > { %v11459_v24 = vmul.f32 -1.442695, %v10394_v50  ;;  %v13224_v13 = vpop.f32.mrb[225].mxu1 }
 0x732   : > { %v10413_v13 = vld [vmem:[%s17781_s26 + $0x48] sm:$0xff] }
 0x733   : > { %13557 = vpow2.f32 %v11459_v24 }
 0x73d   : > { %v13558_v52 = vpop.eup %13557 }
 0x73e   : > { %v10401_v31 = vadd.f32 1.0, %v13558_v52  ;;  %v10418_v52 = vld [vmem:[%s17781_s26 + $0x70] sm:$0xff] }
 0x740   : > { %13559 = vrcp.f32 %v10401_v31 }
 0x74a   : > { %v13560_v6 = vpop.eup %13559 }
 0x74b   : > { %v10439_v55 = vrot.slane %v13560_v6, %v10438_v53 }
 0x74d   : > { %v10440_v24 = vmul.f32 %v10439_v55, %v10180_v62  ;;  %v10441_v50 = vmul.f32 %v10439_v55, %v10181_v14  ;;  %v10442_v41 = vmul.f32 %v10439_v55, %v10182_v33  ;;  %v10443_v43 = vmul.f32 %v10439_v55, %v10183_v26  ;;  %v10406_v26 = vld [vmem:[%s17781_s26 + $0x10] sm:$0xff] }
 0x74e   : > { %v10444_v19 = vmul.f32 %v10439_v55, %v10184_v32  ;;  %v10445_v8 = vmul.f32 %v10439_v55, %v10185_v58  ;;  %v10446_v38 = vmul.f32 %v10439_v55, %v10186_v40  ;;  %v10447_v63 = vmul.f32 %v10439_v55, %v10187_v35  ;;  %v10405_v32 = vld [vmem:[%s17781_s26 + $0x8] sm:$0xff] }
 0x74f   : > { %v10448_v12 = vmul.f32 %v10439_v55, %v10188_v47  ;;  %v10449_v62 = vmul.f32 %v10439_v55, %v10189_v22  ;;  %v10450_v14 = vmul.f32 %v10439_v55, %v10190_v17  ;;  %v10451_v33 = vmul.f32 %v10439_v55, %v10191_v0  ;;  %v10411_v47 = vld [vmem:[%s17781_s26 + $0x38] sm:$0xff] }
 0x750   : > { %v17814_v34 = vmul.f32 %v10439_v55, %v10192_v15  ;;  %v17818_v44 = vmul.f32 %v10439_v55, %v10193_v48  ;;  %v17822_v58 = vmul.f32 %v10439_v55, %v10194_v16  ;;  %v18482_v40 = vmax.f32 %v17639_v2, 0.0  ;;  %v10414_v2 = vld [vmem:[%s17781_s26 + $0x50] sm:$0xff]  ;;  %v10412_v48 = vld [vmem:[%s17781_s26 + $0x40] sm:$0xff]  ;;  %v10415_v16 = vld [vmem:[%s17781_s26 + $0x58] sm:$0xff] }
 0x751   : > { %v17838_v22 = vmul.f32 %v10439_v55, %v18483_v11  ;;  %v18484_v17 = vmax.f32 %v17665_v30, 0.0  ;;  %v17846_v49 = vmul.f32 %v10439_v55, %v18485_v29  ;;  %v18486_v15 = vmax.f32 %v17668_v20, 0.0  ;;  %v10419_v11 = vld [vmem:[%s17781_s26 + $0x78] sm:$0xff] }
 0x752   : > { %v17826_v35 = vmul.f32 %v10439_v55, %v18482_v40  ;;  %v17857_v31 = vmul.f32 %v10439_v55, %v18487_v28  ;;  %v18488_v30 = vmax.f32 %v17697_v18, 0.0  ;;  %v17865_v27 = vmul.f32 %v10439_v55, %v18489_v7  ;;  %v10420_v7 = vld [vmem:[%s17781_s26 + $0x80] sm:$0xff] }
 0x753   : > { %v17842_v0 = vmul.f32 %v10439_v55, %v18484_v17  ;;  %v17850_v1 = vmul.f32 %v10439_v55, %v18486_v15  ;;  %v18490_v20 = vmax.f32 %v17703_v9, 0.0  ;;  %v17876_v46 = vmul.f32 %v10439_v55, %v18491_v10  ;;  %v10417_v17 = vld [vmem:[%s17781_s26 + $0x68] sm:$0xff] }
 0x754   : > { %v17861_v25 = vmul.f32 %v10439_v55, %v18488_v30  ;;  %v18492_v18 = vmax.f32 %v17729_v23, 0.0  ;;  %v17884_v6 = vmul.f32 %v10439_v55, %v18493_v60  ;;  %v18494_v9 = vmax.f32 %v17732_v3, 0.0 }
 0x755   : > { %v17869_v61 = vmul.f32 %v10439_v55, %v18490_v20  ;;  %v18495_v29 = vmax.f32 %v17750_v4, 0.0  ;;  %v18497_v23 = vmax.f32 %v17761_v39, 0.0  ;;  %v17903_v36 = vmul.f32 %v10439_v55, %v10210_v56  ;;  %v10423_v20 = vld [vmem:[%s17781_s26 + $0x98] sm:$0xff]  ;;  %v10421_v4 = vld [vmem:[%s17781_s26 + $0x88] sm:$0xff] }
 0x756   : > { %v17880_v53 = vmul.f32 %v10439_v55, %v18492_v18  ;;  %v17888_v40 = vmul.f32 %v10439_v55, %v18494_v9  ;;  %v18500_v3 = vmax.f32 %v17766_v5, 0.0  ;;  %v10472_v10 = vadd.f32 %v10440_v24, %v10404_v57  ;;  %v10426_v9 = vld [vmem:[%s17781_s26 + $0xb0] sm:$0xff] }
 0x757   : > { %v17895_v15 = vmul.f32 %v10439_v55, %v18495_v29  ;;  %v17899_v28 = vmul.f32 %v10439_v55, %v18497_v23  ;;  %18499 = vst [vmem:[#allocation19_spill] sm:$0xff] %v17903_v36  ;;  %v10473_v18 = vadd.f32 %v10441_v50, %v10405_v32  ;;  %v10474_v60 = vadd.f32 %v10442_v41, %v10406_v26  ;;  %v10424_v29 = vld [vmem:[%s17781_s26 + $0xa0] sm:$0xff]  ;;  %v10431_v41 = vld [vmem:[%s17781_s26 + $0xd8] sm:$0xff] }
 0x758   : > { %v17907_v30 = vmul.f32 %v10439_v55, %v18500_v3  ;;  %v10475_v39 = vadd.f32 %v10443_v43, %v10407_v37  ;;  %v10476_v56 = vadd.f32 %v10444_v19, %v10408_v42  ;;  %v10477_v23 = vadd.f32 %v10445_v8, %v10409_v45  ;;  %v10425_v3 = vld [vmem:[%s17781_s26 + $0xa8] sm:$0xff]  ;;  %v10428_v36 = vld [vmem:[%s17781_s26 + $0xc0] sm:$0xff]  ;;  %10504 = vst [vmem:[%s17919_s28] sm:$0xff] %v10472_v10  ;;  %v10434_v19 = vld [vmem:[%s17781_s26 + $0xf0] sm:$0xff] }
 0x759   : > { %18496 = vst [vmem:[#allocation21_spill] sm:$0xff] %v17895_v15  ;;  %18498 = vst [vmem:[#allocation13_spill] sm:$0xff] %v17899_v28  ;;  %v10478_v5 = vadd.f32 %v10446_v38, %v10410_v54  ;;  %v10479_v55 = vadd.f32 %v10447_v63, %v10411_v47  ;;  %v10480_v28 = vadd.f32 %v10448_v12, %v10412_v48  ;;  %v10429_v43 = vld [vmem:[%s17781_s26 + $0xc8] sm:$0xff] }
 0x75a   : > { %18501 = vst [vmem:[#allocation40_spill] sm:$0xff] %v17907_v30  ;;  %v10430_v30 = vld [vmem:[%s17781_s26 + $0xd0] sm:$0xff]  ;;  %v10481_v15 = vadd.f32 %v10449_v62, %v10413_v13  ;;  %v10482_v24 = vadd.f32 %v10450_v14, %v10414_v2  ;;  %v10483_v50 = vadd.f32 %v10451_v33, %v10415_v16  ;;  %10505 = vst [vmem:[%s17919_s28 + $0x8] sm:$0xff] %v10473_v18  ;;  %v10432_v62 = vld [vmem:[%s17781_s26 + $0xe0] sm:$0xff] }
 0x75b   : > { %10506 = vst [vmem:[%s17919_s28 + $0x10] sm:$0xff] %v10474_v60  ;;  %10507 = vst [vmem:[%s17919_s28 + $0x18] sm:$0xff] %v10475_v39  ;;  %v10484_v8 = vadd.f32 %v17814_v34, %v10416_v51  ;;  %v10485_v38 = vadd.f32 %v17818_v44, %v10417_v17  ;;  %v10486_v63 = vadd.f32 %v17822_v58, %v10418_v52  ;;  %v10435_v14 = vld [vmem:[%s17781_s26 + $0xf8] sm:$0xff]  ;;  %v10433_v33 = vld [vmem:[%s17781_s26 + $0xe8] sm:$0xff]  ;;  %s13569_s26 = scalar_lea.vmem %s13568_s18, 8192 }
 0x75c   : > { %v10487_v12 = vadd.f32 %v17826_v35, %v10419_v11  ;;  %10508 = vst [vmem:[%s17919_s28 + $0x20] sm:$0xff] %v10476_v56  ;;  %10509 = vst [vmem:[%s17919_s28 + $0x28] sm:$0xff] %v10477_v23  ;;  %v10488_v26 = vadd.f32 %v17838_v22, %v10420_v7  ;;  %v10489_v57 = vadd.f32 %v17842_v0, %v10421_v4  ;;  %p13571_p1 = scmp.lt.s32.totalorder %s13569_s26, %s13563_s11 }
 0x75d   : > { %10510 = vst [vmem:[%s17919_s28 + $0x30] sm:$0xff] %v10478_v5  ;;  %10511 = vst [vmem:[%s17919_s28 + $0x38] sm:$0xff] %v10479_v55  ;;  %v10490_v37 = vadd.f32 %v17846_v49, %v10422_v21  ;;  %v10491_v32 = vadd.f32 %v17850_v1, %v10423_v20  ;;  %v10492_v34 = vadd.f32 %v17857_v31, %v10424_v29 }
 0x75e   : > { %10512 = vst [vmem:[%s17919_s28 + $0x40] sm:$0xff] %v10480_v28  ;;  %10513 = vst [vmem:[%s17919_s28 + $0x48] sm:$0xff] %v10481_v15  ;;  %v10493_v44 = vadd.f32 %v17861_v25, %v10425_v3  ;;  %v10494_v58 = vadd.f32 %v17865_v27, %v10426_v9  ;;  %v10495_v35 = vadd.f32 %v17869_v61, %v10427_v59  ;;  %v18504_v2 = vld [vmem:[#allocation19_spill] sm:$0xff]  ;;  %p13572_p2 = por %p13571_p1, %p13570_p0 }
 0x75f   : > { %10514 = vst [vmem:[%s17919_s28 + $0x50] sm:$0xff] %v10482_v24  ;;  %10515 = vst [vmem:[%s17919_s28 + $0x58] sm:$0xff] %v10483_v50  ;;  %v10496_v54 = vadd.f32 %v17876_v46, %v10428_v36  ;;  %v10497_v42 = vadd.f32 %v17880_v53, %v10429_v43  ;;  %v10498_v47 = vadd.f32 %v17884_v6, %v10430_v30 }
 0x760   : > { %10516 = vst [vmem:[%s17919_s28 + $0x60] sm:$0xff] %v10484_v8  ;;  %10517 = vst [vmem:[%s17919_s28 + $0x68] sm:$0xff] %v10485_v38  ;;  %v10499_v45 = vadd.f32 %v17888_v40, %v10431_v41  ;;  %v18502_v22 = vld [vmem:[#allocation21_spill] sm:$0xff]  ;;  %v10502_v48 = vadd.f32 %v18504_v2, %v10434_v19  ;;  %p13573_p3 = pnand %p13572_p2, %p13566_p13 }
 0x761   : > { %10518 = vst [vmem:[%s17919_s28 + $0x70] sm:$0xff] %v10486_v63  ;;  %10519 = vst [vmem:[%s17919_s28 + $0x78] sm:$0xff] %v10487_v12  ;;  %v10500_v0 = vadd.f32 %v18502_v22, %v10432_v62  ;;  %v18503_v49 = vld [vmem:[#allocation13_spill] sm:$0xff]  ;;  %v18505_v16 = vld [vmem:[#allocation40_spill] sm:$0xff] }
 0x762   : > { %10520 = vst [vmem:[%s17919_s28 + $0x80] sm:$0xff] %v10488_v26  ;;  %10521 = vst [vmem:[%s17919_s28 + $0x88] sm:$0xff] %v10489_v57  ;;  %v10501_v1 = vadd.f32 %v18503_v49, %v10433_v33  ;;  %v10503_v31 = vadd.f32 %v18505_v16, %v10435_v14 }
 0x763   : > { %10522 = vst [vmem:[%s17919_s28 + $0x90] sm:$0xff] %v10490_v37  ;;  %10523 = vst [vmem:[%s17919_s28 + $0x98] sm:$0xff] %v10491_v32 }
 0x764   : > { %10524 = vst [vmem:[%s17919_s28 + $0xa0] sm:$0xff] %v10492_v34  ;;  %10525 = vst [vmem:[%s17919_s28 + $0xa8] sm:$0xff] %v10493_v44 }
 0x765   : > { %10526 = vst [vmem:[%s17919_s28 + $0xb0] sm:$0xff] %v10494_v58  ;;  %10527 = vst [vmem:[%s17919_s28 + $0xb8] sm:$0xff] %v10495_v35 }
 0x766   : > { %10528 = vst [vmem:[%s17919_s28 + $0xc0] sm:$0xff] %v10496_v54  ;;  %10529 = vst [vmem:[%s17919_s28 + $0xc8] sm:$0xff] %v10497_v42 }
 0x767   : > { %10530 = vst [vmem:[%s17919_s28 + $0xd0] sm:$0xff] %v10498_v47  ;;  %10531 = vst [vmem:[%s17919_s28 + $0xd8] sm:$0xff] %v10499_v45 }
 0x768   : > { %10532 = vst [vmem:[%s17919_s28 + $0xe0] sm:$0xff] %v10500_v0  ;;  %10533 = vst [vmem:[%s17919_s28 + $0xe8] sm:$0xff] %v10501_v1 }
 0x769   : > { %10534 = vst [vmem:[%s17919_s28 + $0xf0] sm:$0xff] %v10502_v48  ;;  %10535 = vst [vmem:[%s17919_s28 + $0xf8] sm:$0xff] %v10503_v31 }
 0x76a   : > { %13576 = shalt.err (!%p13573_p3)
}
 0x76b   : > { %s13577_s25 = scalar_lea.hbm %s17970_s30, 4096  ;;  %s13581_s29 = scalar_lea.hbm %s18045_s10, 8192 }
 0x76c   : > { %p13578_p4 = scmp.ne.s32.totalorder %s17970_s30, %s13577_s25  ;;  %p13582_p9 = scmp.lt.u32.totalorder %s17970_s30, %s18045_s10 }
 0x76d   : > { %p13583_p10 = scmp.lt.u32.totalorder %s13581_s29, %s13577_s25  ;;  %p13585_p12 = scmp.lt.u32.totalorder %s13577_s25, %s17970_s30 }
 0x76e   : > { %p13579_p7 = pnand %p13578_p4, %p13725_p5 }
 0x76f   : > { %p13584_p11 = por %p13583_p10, %p13582_p9 }
 0x770   : > { %p13580_p8 = pneg %p13579_p7 }
 0x771   : > { %p13586_p13 = por %p13585_p12, %p13584_p11 }
 0x773   : > { %p13587_p0 = pnand %p13586_p13, %p13580_p8 }
 0x775   : > { %13590 = shalt.err (!%p13587_p0)
}
 0x776   : > { %s13630_s11 = smov 128   ;;  %s13631_s12 = smov 8  }
 0x777   : > { %13226 = dma.vmem_to_hbm [thread:$0]  (%p13725_p5), %s17974_s22, 4096, %s17970_s30, %s17994_s17, %s13630_s11, %s13630_s11, %s13631_s12  }
 0x778 PF: > { %p13232_p1 = scmp.ge.s32.totalorder %s13625_s16, 2  ;;  %s10565_s18 = sand.u32 1, %s13613_s13  }
 0x779   : > { %s10566_s26 = scalar_lea.sflag [#allocation6], %s10565_s18 }
 0x77a   : > { %p13229_p2 = pnand %p13232_p1, %p13729_p6 }
 0x77c   : > { %13608 = dma.done.wait (!%p13229_p2), %s10566_s26, 4096  }
 0x77d   : > { %13610 = vsyncadd (!%p13229_p2), %s10566_s26, 4294963200  ;;  %s18506_s25 = sld [smem:[#allocation8_spill]]  ;;  %p20_p3 = scmp.ge.s32.totalorder %s13712_s19, 4  }
 0x77e   : > { %s18507_s13 = smov %s13617_s14  ;;  %s18508_s14 = smov %s13621_s15 }
 0x77f   : > { %s18510_s16 = smov %s13712_s19  ;;  %22 = sbr.rel (!%p20_p3) target bundleno = 3 (0x3), region = 106 }
 0x783   : > { %s18509_s15 = smov %s18506_s25 }
 0x786   :  { %10571 = vsyncpa [#allocation6], 1 }
 0x787   :  { %10573 = vsyncpa [#allocation6 + $0x1], 1 }

</bundles_post_ra>
